<compile_context>
chip_gen: v7x
topology: tpu7x:2x2x1
jax: 0.10.0
libtpu: 0.0.40
codegen_flags: <defaults>
</compile_context>

<pallas_src>
import functools

import jax
import jax.numpy as jnp
from jax.experimental import pallas as pl
from jax.experimental.pallas import tpu as pltpu


# ----------------------------- tiling helper ------------------------------- #

def _pick_tile(n):
    # Largest (8,128)-friendly row tile that divides n.  Per-grid-step overhead
    # (~0.35 us) dominates at these tiny shapes, so prefer one big tile.
    # TODO(synk): on v7x (2 TensorCores) prefer a grid of >= 2 when n allows.
    for t in (1024, 512, 256, 128):
        if n >= t and n % t == 0:
            return t
    return n


# ----------------------------- Pallas kernels ------------------------------ #

def _ds_block_kernel(p_ref, dww_ref, dwb_ref, pww_ref, pwb_ref, o_ref):
    """Fused depthwise-separable block: dw3x3 + BN + ReLU + pw1x1 + BN + ReLU.

    p_ref:   (9, tn, Cin) bf16  -- 3x3 taps, taps-leading
    dww_ref: (9, 1, Cin)  bf16  -- depthwise weights, BN scale folded in
    dwb_ref: (1, Cin)     f32   -- folded BN bias
    pww_ref: (Cin, Cout)  bf16  -- pointwise weights, BN scale folded in
    pwb_ref: (1, Cout)    f32   -- folded BN bias
    o_ref:   (tn, Cout)   bf16
    """
    # Depthwise 3x3 as a 9-tap MAC on the VPU, f32 accumulation (v5e-safe).
    dww = dww_ref[...].astype(jnp.float32)            # (9, 1, Cin)
    acc = p_ref[0].astype(jnp.float32) * dww[0]
    for k in range(1, 9):                              # static unroll
        acc = acc + p_ref[k].astype(jnp.float32) * dww[k]
    h = jnp.maximum(acc + dwb_ref[...], 0.0)           # (tn, Cin) f32

    # Pointwise 1x1 on the MXU (bf16 x bf16 -> f32 accumulate).
    y = jnp.dot(h.astype(pww_ref.dtype), pww_ref[...],
                preferred_element_type=jnp.float32)
    y = jnp.maximum(y + pwb_ref[...], 0.0)
    o_ref[...] = y.astype(o_ref.dtype)


def ds_block(patches, dw_w, dw_bias, pw_w, pw_bias):
    """patches: (9, N, Cin) -> (N, Cout)."""
    _, N, Cin = patches.shape
    Cout = pw_w.shape[1]
    tn = _pick_tile(N)
    grid = (N // tn,)
    return pl.pallas_call(
        _ds_block_kernel,
        out_shape=jax.ShapeDtypeStruct((N, Cout), jnp.bfloat16),
        grid=grid,
        in_specs=[
            pl.BlockSpec((9, tn, Cin), lambda i: (0, i, 0)),
            pl.BlockSpec((9, 1, Cin), lambda i: (0, 0, 0)),
            pl.BlockSpec((1, Cin), lambda i: (0, 0)),
            pl.BlockSpec((Cin, Cout), lambda i: (0, 0)),
            pl.BlockSpec((1, Cout), lambda i: (0, 0)),
        ],
        out_specs=pl.BlockSpec((tn, Cout), lambda i: (i, 0)),
        compiler_params=pltpu.CompilerParams(dimension_semantics=("parallel",)),
    )(patches, dw_w, dw_bias, pw_w, pw_bias)


def _matmul_bias_kernel(x_ref, w_ref, b_ref, o_ref, *, relu):
    # x: (tn, K), w: (K, M), b: (1, M)  (BN scale already folded into w)
    y = jnp.dot(x_ref[...], w_ref[...], preferred_element_type=jnp.float32)
    y = y + b_ref[...]
    if relu:
        y = jnp.maximum(y, 0.0)
    o_ref[...] = y.astype(o_ref.dtype)


def matmul_bias(x, w, bias, *, relu, out_dtype):
    """(relu)(x @ w + bias). Used by the stem conv (im2col) and the classifier."""
    N, K = x.shape
    M = w.shape[1]
    tn = _pick_tile(N)
    grid = (N // tn,)
    return pl.pallas_call(
        functools.partial(_matmul_bias_kernel, relu=relu),
        out_shape=jax.ShapeDtypeStruct((N, M), out_dtype),
        grid=grid,
        in_specs=[
            pl.BlockSpec((tn, K), lambda i: (i, 0)),
            pl.BlockSpec((K, M), lambda i: (0, 0)),
            pl.BlockSpec((1, M), lambda i: (0, 0)),
        ],
        out_specs=pl.BlockSpec((tn, M), lambda i: (i, 0)),
        compiler_params=pltpu.CompilerParams(dimension_semantics=("parallel",)),
    )(x, w, bias)


def _avgpool_kernel(x_ref, o_ref):
    # x: (B, HW, C) -> (B, C), f32 accumulation.
    o_ref[...] = jnp.mean(x_ref[...].astype(jnp.float32), axis=1)


def global_avgpool(x):
    B, HW, C = x.shape
    return pl.pallas_call(
        _avgpool_kernel,
        out_shape=jax.ShapeDtypeStruct((B, C), jnp.float32),
        grid=(1,),
        in_specs=[pl.BlockSpec((B, HW, C), lambda i: (0, 0, 0))],
        out_specs=pl.BlockSpec((B, C), lambda i: (0, 0)),
    )(x)


# ------------------------------- glue (JAX) -------------------------------- #

def extract_patches_3x3(x, stride):
    """x: (B, H, W, C) NHWC -> (9, B*Ho*Wo, C) taps-leading, padding=1."""
    # TODO(synk): form taps in-kernel from a halo'd activation tile to avoid
    # materializing the 9x patch tensor in HBM for the stride-1 blocks.
    B, H, W, C = x.shape
    xp = jnp.pad(x, ((0, 0), (1, 1), (1, 1), (0, 0)))
    Ho = (H + 2 - 3) // stride + 1
    Wo = (W + 2 - 3) // stride + 1
    taps = []
    for kh in range(3):
        for kw in range(3):
            t = xp[:, kh:kh + stride * (Ho - 1) + 1:stride,
                   kw:kw + stride * (Wo - 1) + 1:stride, :]
            taps.append(t.reshape(B * Ho * Wo, C))
    p = jnp.stack(taps, axis=0)  # (9, N, C)
    return p, Ho, Wo


def _make_divisible(v, divisor=8):
    new_v = max(divisor, int(v + divisor / 2) // divisor * divisor)
    if new_v < 0.9 * v:
        new_v += divisor
    return new_v


def _bn_fold(key, c):
    """Deterministic synthetic BN stats folded to (scale, bias) of shape (1, c)."""
    k1, k2, k3, k4 = jax.random.split(key, 4)
    gamma = jax.random.uniform(k1, (c,), minval=0.5, maxval=1.5)
    beta = 0.1 * jax.random.normal(k2, (c,))
    mean = 0.1 * jax.random.normal(k3, (c,))
    var = jax.random.uniform(k4, (c,), minval=0.5, maxval=1.5)
    scale = gamma / jnp.sqrt(var + 1e-5)
    bias = beta - mean * scale
    return (scale.reshape(1, c).astype(jnp.float32),
            bias.reshape(1, c).astype(jnp.float32))


def block_config(width_multiplier):
    md = lambda v: _make_divisible(v * width_multiplier)
    c0 = md(32)
    cfg = [(c0, md(64), 1), (md(64), md(128), 2), (md(128), md(128), 1),
           (md(128), md(256), 2), (md(256), md(256), 1), (md(256), md(512), 2)]
    cfg += [(md(512), md(512), 1)] * 5
    cfg += [(md(512), md(1024), 2)]
    return c0, cfg, md(1024)


def init_params(key, width_multiplier=0.25, num_classes=16):
    c0, cfg, c_final = block_config(width_multiplier)
    keys = iter(jax.random.split(key, 64))
    params = {}

    # stem conv: 3x3, 3 -> c0, stride 2 (HWIO flattened to (27, c0)), BN folded.
    w = 0.1 * jax.random.normal(next(keys), (3, 3, 3, c0), dtype=jnp.float32)
    s, b = _bn_fold(next(keys), c0)
    params["conv1_w"] = (w.reshape(27, c0) * s).astype(jnp.bfloat16)
    params["conv1_bias"] = b

    blocks = []
    strides = []
    for cin, cout, stride in cfg:
        dw_w = 0.1 * jax.random.normal(next(keys), (3, 3, cin), dtype=jnp.float32)
        dw_scale, dw_bias = _bn_fold(next(keys), cin)
        pw_w = 0.1 * jax.random.normal(next(keys), (cin, cout), dtype=jnp.float32)
        pw_scale, pw_bias = _bn_fold(next(keys), cout)
        blocks.append(dict(
            dw_w=(dw_w.reshape(9, 1, cin) * dw_scale.reshape(1, 1, cin)
                  ).astype(jnp.bfloat16),
            dw_bias=dw_bias,
            pw_w=(pw_w * pw_scale).astype(jnp.bfloat16),
            pw_bias=pw_bias))
        strides.append(stride)
    params["blocks"] = blocks

    params["fc_w"] = 0.1 * jax.random.normal(next(keys), (c_final, num_classes),
                                             dtype=jnp.float32)
    params["fc_b"] = 0.1 * jax.random.normal(next(keys), (1, num_classes),
                                             dtype=jnp.float32)
    return params, tuple(strides)


def mobilenet_forward(params, x_nchw, strides):
    B = x_nchw.shape[0]
    x = jnp.transpose(x_nchw, (0, 2, 3, 1)).astype(jnp.bfloat16)  # NCHW -> NHWC

    # stem: conv3x3 s2 + folded BN + ReLU (im2col + Pallas matmul)
    p, Ho, Wo = extract_patches_3x3(x, stride=2)                  # (9, N, 3)
    N = p.shape[1]
    p_flat = jnp.transpose(p, (1, 0, 2)).reshape(N, 27)           # (kh,kw,cin) order
    y = matmul_bias(p_flat, params["conv1_w"], params["conv1_bias"],
                    relu=True, out_dtype=jnp.bfloat16)
    x = y.reshape(B, Ho, Wo, -1)

    # fused depthwise-separable blocks (one pallas_call each)
    for blk, stride in zip(params["blocks"], strides):
        p, Ho, Wo = extract_patches_3x3(x, stride=stride)         # (9, N, Cin)
        y = ds_block(p, blk["dw_w"], blk["dw_bias"], blk["pw_w"], blk["pw_bias"])
        x = y.reshape(B, Ho, Wo, -1)

    # global average pool + flatten + classifier
    Bf, Hf, Wf, Cf = x.shape
    pooled = global_avgpool(x.reshape(Bf, Hf * Wf, Cf))           # (B, Cf) f32
    logits = matmul_bias(pooled, params["fc_w"], params["fc_b"],
                         relu=False, out_dtype=jnp.float32)
    return logits


if __name__ == "__main__":
    key = jax.random.PRNGKey(0)
    pkey, xkey = jax.random.split(key)

    num_classes = 16
    params, strides = init_params(pkey, width_multiplier=0.25,
                                  num_classes=num_classes)

    # small input consistent with the module: NCHW, 3 input channels
    x = jax.random.normal(xkey, (2, 3, 32, 32), dtype=jnp.float32)

    forward = jax.jit(mobilenet_forward, static_argnums=2)
    out = forward(params, x, strides)
    out = jax.block_until_ready(out)
    assert out.shape == (2, num_classes), out.shape
    assert bool(jnp.all(jnp.isfinite(out)))
    print("KERNEL_OK")
</pallas_src>

<mosaic_0001>
module attributes {stable_mosaic.version = 11 : i64} {
  func.func @_matmul_bias_kernel(%arg0: i32, %arg1: memref<512x27xbf16, #tpu.memory_space<vmem>>, %arg2: memref<27x8xbf16, #tpu.memory_space<vmem>>, %arg3: memref<1x8xf32, #tpu.memory_space<vmem>>, %arg4: memref<512x8xbf16, #tpu.memory_space<vmem>>) attributes {dimension_semantics = [#tpu.dimension_semantics<parallel>], iteration_bounds = array<i64: 1>, scalar_prefetch = 0 : i64, scratch_operands = 0 : i64, tpu.core_type = #tpu.core_type<tc>, window_params = [{transform_indices = @transform_0, window_bounds = array<i64: 512, 27>}, {pipeline_mode = #tpu.pipeline_mode<synchronous>, transform_indices = @transform_1, window_bounds = array<i64: 27, 8>}, {pipeline_mode = #tpu.pipeline_mode<synchronous>, transform_indices = @transform_2, window_bounds = array<i64: 1, 8>}, {transform_indices = @transform_3, window_bounds = array<i64: 512, 8>}]} {
    %c0 = arith.constant 0 : index
    %c0_0 = arith.constant 0 : index
    %0 = vector.load %arg1[%c0, %c0_0] : memref<512x27xbf16, #tpu.memory_space<vmem>>, vector<512x27xbf16>
    %c0_1 = arith.constant 0 : index
    %c0_2 = arith.constant 0 : index
    %1 = vector.load %arg2[%c0_1, %c0_2] : memref<27x8xbf16, #tpu.memory_space<vmem>>, vector<27x8xbf16>
    %cst = arith.constant dense<0.000000e+00> : vector<512x8xf32>
    %2 = tpu.matmul %0, %1, %cst {dimension_numbers = #tpu.dot_dimension_numbers<[1], [0], [0], [1], [0, 0, 1, 1], [], []>} : vector<512x27xbf16>, vector<27x8xbf16>, vector<512x8xf32> -> vector<512x8xf32>
    %c0_3 = arith.constant 0 : index
    %c0_4 = arith.constant 0 : index
    %3 = vector.load %arg3[%c0_3, %c0_4] : memref<1x8xf32, #tpu.memory_space<vmem>>, vector<1x8xf32>
    %4 = vector.broadcast %3 : vector<1x8xf32> to vector<512x8xf32>
    %5 = arith.addf %2, %4 : vector<512x8xf32>
    %cst_5 = arith.constant 0.000000e+00 : f32
    %6 = vector.broadcast %cst_5 : f32 to vector<512x8xf32>
    %7 = arith.maximumf %5, %6 : vector<512x8xf32>
    %8 = arith.truncf %7 : vector<512x8xf32> to vector<512x8xbf16>
    %c0_6 = arith.constant 0 : index
    %c0_7 = arith.constant 0 : index
    %9 = vector.load %arg4[%c0_6, %c0_7] : memref<512x8xbf16, #tpu.memory_space<vmem>>, vector<512x8xbf16>
    tpu.vector_store %arg4[%c0_6, %c0_7], %8 {strides = array<i32>} : memref<512x8xbf16, #tpu.memory_space<vmem>>, vector<512x8xbf16>,
    return
  }
  func.func @transform_0(%arg0: i32) -> (i32, i32) {
    %c0_i32 = arith.constant 0 : i32
    %c0_i32_0 = arith.constant 0 : i32
    return %arg0, %c0_i32 : i32, i32
  }
  func.func @transform_1(%arg0: i32) -> (i32, i32) {
    %c0_i32 = arith.constant 0 : i32
    %c0_i32_0 = arith.constant 0 : i32
    %c0_i32_1 = arith.constant 0 : i32
    return %c0_i32, %c0_i32_0 : i32, i32
  }
  func.func @transform_2(%arg0: i32) -> (i32, i32) {
    %c0_i32 = arith.constant 0 : i32
    %c0_i32_0 = arith.constant 0 : i32
    %c0_i32_1 = arith.constant 0 : i32
    return %c0_i32, %c0_i32_0 : i32, i32
  }
  func.func @transform_3(%arg0: i32) -> (i32, i32) {
    %c0_i32 = arith.constant 0 : i32
    %c0_i32_0 = arith.constant 0 : i32
    return %arg0, %c0_i32 : i32, i32
  }
}

module attributes {stable_mosaic.version = 11 : i64} {
  func.func @_ds_block_kernel(%arg0: i32, %arg1: memref<9x512x8xbf16, #tpu.memory_space<vmem>>, %arg2: memref<9x1x8xbf16, #tpu.memory_space<vmem>>, %arg3: memref<1x8xf32, #tpu.memory_space<vmem>>, %arg4: memref<8x16xbf16, #tpu.memory_space<vmem>>, %arg5: memref<1x16xf32, #tpu.memory_space<vmem>>, %arg6: memref<512x16xbf16, #tpu.memory_space<vmem>>) attributes {dimension_semantics = [#tpu.dimension_semantics<parallel>], iteration_bounds = array<i64: 1>, scalar_prefetch = 0 : i64, scratch_operands = 0 : i64, tpu.core_type = #tpu.core_type<tc>, window_params = [{transform_indices = @transform_0, window_bounds = array<i64: 9, 512, 8>}, {pipeline_mode = #tpu.pipeline_mode<synchronous>, transform_indices = @transform_1, window_bounds = array<i64: 9, 1, 8>}, {pipeline_mode = #tpu.pipeline_mode<synchronous>, transform_indices = @transform_2, window_bounds = array<i64: 1, 8>}, {pipeline_mode = #tpu.pipeline_mode<synchronous>, transform_indices = @transform_3, window_bounds = array<i64: 8, 16>}, {pipeline_mode = #tpu.pipeline_mode<synchronous>, transform_indices = @transform_4, window_bounds = array<i64: 1, 16>}, {transform_indices = @transform_5, window_bounds = array<i64: 512, 16>}]} {
    %c0 = arith.constant 0 : index
    %c0_0 = arith.constant 0 : index
    %c0_1 = arith.constant 0 : index
    %0 = vector.load %arg2[%c0, %c0_0, %c0_1] : memref<9x1x8xbf16, #tpu.memory_space<vmem>>, vector<9x1x8xbf16>
    %1 = arith.extf %0 : vector<9x1x8xbf16> to vector<9x1x8xf32>
    %c0_2 = arith.constant 0 : index
    %c0_3 = arith.constant 0 : index
    %c0_4 = arith.constant 0 : index
    %2 = vector.load %arg1[%c0_2, %c0_3, %c0_4] : memref<9x512x8xbf16, #tpu.memory_space<vmem>>, vector<1x512x8xbf16>
    %3 = vector.shape_cast %2 : vector<1x512x8xbf16> to vector<512x8xbf16>
    %4 = arith.extf %3 : vector<512x8xbf16> to vector<512x8xf32>
    %5 = vector.extract_strided_slice %1 {offsets = [0, 0, 0], sizes = [1, 1, 8], strides = [1, 1, 1]} : vector<9x1x8xf32> to vector<1x1x8xf32>
    %6 = vector.shape_cast %5 : vector<1x1x8xf32> to vector<1x8xf32>
    %7 = vector.broadcast %6 : vector<1x8xf32> to vector<512x8xf32>
    %8 = arith.mulf %4, %7 : vector<512x8xf32>
    %c1 = arith.constant 1 : index
    %c0_5 = arith.constant 0 : index
    %c0_6 = arith.constant 0 : index
    %9 = vector.load %arg1[%c1, %c0_5, %c0_6] : memref<9x512x8xbf16, #tpu.memory_space<vmem>>, vector<1x512x8xbf16>
    %10 = vector.shape_cast %9 : vector<1x512x8xbf16> to vector<512x8xbf16>
    %11 = arith.extf %10 : vector<512x8xbf16> to vector<512x8xf32>
    %12 = vector.extract_strided_slice %1 {offsets = [1, 0, 0], sizes = [1, 1, 8], strides = [1, 1, 1]} : vector<9x1x8xf32> to vector<1x1x8xf32>
    %13 = vector.shape_cast %12 : vector<1x1x8xf32> to vector<1x8xf32>
    %14 = vector.broadcast %13 : vector<1x8xf32> to vector<512x8xf32>
    %15 = arith.mulf %11, %14 : vector<512x8xf32>
    %16 = arith.addf %8, %15 : vector<512x8xf32>
    %c2 = arith.constant 2 : index
    %c0_7 = arith.constant 0 : index
    %c0_8 = arith.constant 0 : index
    %17 = vector.load %arg1[%c2, %c0_7, %c0_8] : memref<9x512x8xbf16, #tpu.memory_space<vmem>>, vector<1x512x8xbf16>
    %18 = vector.shape_cast %17 : vector<1x512x8xbf16> to vector<512x8xbf16>
    %19 = arith.extf %18 : vector<512x8xbf16> to vector<512x8xf32>
    %20 = vector.extract_strided_slice %1 {offsets = [2, 0, 0], sizes = [1, 1, 8], strides = [1, 1, 1]} : vector<9x1x8xf32> to vector<1x1x8xf32>
    %21 = vector.shape_cast %20 : vector<1x1x8xf32> to vector<1x8xf32>
    %22 = vector.broadcast %21 : vector<1x8xf32> to vector<512x8xf32>
    %23 = arith.mulf %19, %22 : vector<512x8xf32>
    %24 = arith.addf %16, %23 : vector<512x8xf32>
    %c3 = arith.constant 3 : index
    %c0_9 = arith.constant 0 : index
    %c0_10 = arith.constant 0 : index
    %25 = vector.load %arg1[%c3, %c0_9, %c0_10] : memref<9x512x8xbf16, #tpu.memory_space<vmem>>, vector<1x512x8xbf16>
    %26 = vector.shape_cast %25 : vector<1x512x8xbf16> to vector<512x8xbf16>
    %27 = arith.extf %26 : vector<512x8xbf16> to vector<512x8xf32>
    %28 = vector.extract_strided_slice %1 {offsets = [3, 0, 0], sizes = [1, 1, 8], strides = [1, 1, 1]} : vector<9x1x8xf32> to vector<1x1x8xf32>
    %29 = vector.shape_cast %28 : vector<1x1x8xf32> to vector<1x8xf32>
    %30 = vector.broadcast %29 : vector<1x8xf32> to vector<512x8xf32>
    %31 = arith.mulf %27, %30 : vector<512x8xf32>
    %32 = arith.addf %24, %31 : vector<512x8xf32>
    %c4 = arith.constant 4 : index
    %c0_11 = arith.constant 0 : index
    %c0_12 = arith.constant 0 : index
    %33 = vector.load %arg1[%c4, %c0_11, %c0_12] : memref<9x512x8xbf16, #tpu.memory_space<vmem>>, vector<1x512x8xbf16>
    %34 = vector.shape_cast %33 : vector<1x512x8xbf16> to vector<512x8xbf16>
    %35 = arith.extf %34 : vector<512x8xbf16> to vector<512x8xf32>
    %36 = vector.extract_strided_slice %1 {offsets = [4, 0, 0], sizes = [1, 1, 8], strides = [1, 1, 1]} : vector<9x1x8xf32> to vector<1x1x8xf32>
    %37 = vector.shape_cast %36 : vector<1x1x8xf32> to vector<1x8xf32>
    %38 = vector.broadcast %37 : vector<1x8xf32> to vector<512x8xf32>
    %39 = arith.mulf %35, %38 : vector<512x8xf32>
    %40 = arith.addf %32, %39 : vector<512x8xf32>
    %c5 = arith.constant 5 : index
    %c0_13 = arith.constant 0 : index
    %c0_14 = arith.constant 0 : index
    %41 = vector.load %arg1[%c5, %c0_13, %c0_14] : memref<9x512x8xbf16, #tpu.memory_space<vmem>>, vector<1x512x8xbf16>
    %42 = vector.shape_cast %41 : vector<1x512x8xbf16> to vector<512x8xbf16>
    %43 = arith.extf %42 : vector<512x8xbf16> to vector<512x8xf32>
    %44 = vector.extract_strided_slice %1 {offsets = [5, 0, 0], sizes = [1, 1, 8], strides = [1, 1, 1]} : vector<9x1x8xf32> to vector<1x1x8xf32>
    %45 = vector.shape_cast %44 : vector<1x1x8xf32> to vector<1x8xf32>
    %46 = vector.broadcast %45 : vector<1x8xf32> to vector<512x8xf32>
    %47 = arith.mulf %43, %46 : vector<512x8xf32>
    %48 = arith.addf %40, %47 : vector<512x8xf32>
    %c6 = arith.constant 6 : index
    %c0_15 = arith.constant 0 : index
    %c0_16 = arith.constant 0 : index
    %49 = vector.load %arg1[%c6, %c0_15, %c0_16] : memref<9x512x8xbf16, #tpu.memory_space<vmem>>, vector<1x512x8xbf16>
    %50 = vector.shape_cast %49 : vector<1x512x8xbf16> to vector<512x8xbf16>
    %51 = arith.extf %50 : vector<512x8xbf16> to vector<512x8xf32>
    %52 = vector.extract_strided_slice %1 {offsets = [6, 0, 0], sizes = [1, 1, 8], strides = [1, 1, 1]} : vector<9x1x8xf32> to vector<1x1x8xf32>
    %53 = vector.shape_cast %52 : vector<1x1x8xf32> to vector<1x8xf32>
    %54 = vector.broadcast %53 : vector<1x8xf32> to vector<512x8xf32>
    %55 = arith.mulf %51, %54 : vector<512x8xf32>
    %56 = arith.addf %48, %55 : vector<512x8xf32>
    %c7 = arith.constant 7 : index
    %c0_17 = arith.constant 0 : index
    %c0_18 = arith.constant 0 : index
    %57 = vector.load %arg1[%c7, %c0_17, %c0_18] : memref<9x512x8xbf16, #tpu.memory_space<vmem>>, vector<1x512x8xbf16>
    %58 = vector.shape_cast %57 : vector<1x512x8xbf16> to vector<512x8xbf16>
    %59 = arith.extf %58 : vector<512x8xbf16> to vector<512x8xf32>
    %60 = vector.extract_strided_slice %1 {offsets = [7, 0, 0], sizes = [1, 1, 8], strides = [1, 1, 1]} : vector<9x1x8xf32> to vector<1x1x8xf32>
    %61 = vector.shape_cast %60 : vector<1x1x8xf32> to vector<1x8xf32>
    %62 = vector.broadcast %61 : vector<1x8xf32> to vector<512x8xf32>
    %63 = arith.mulf %59, %62 : vector<512x8xf32>
    %64 = arith.addf %56, %63 : vector<512x8xf32>
    %c8 = arith.constant 8 : index
    %c0_19 = arith.constant 0 : index
    %c0_20 = arith.constant 0 : index
    %65 = vector.load %arg1[%c8, %c0_19, %c0_20] : memref<9x512x8xbf16, #tpu.memory_space<vmem>>, vector<1x512x8xbf16>
    %66 = vector.shape_cast %65 : vector<1x512x8xbf16> to vector<512x8xbf16>
    %67 = arith.extf %66 : vector<512x8xbf16> to vector<512x8xf32>
    %68 = vector.extract_strided_slice %1 {offsets = [8, 0, 0], sizes = [1, 1, 8], strides = [1, 1, 1]} : vector<9x1x8xf32> to vector<1x1x8xf32>
    %69 = vector.shape_cast %68 : vector<1x1x8xf32> to vector<1x8xf32>
    %70 = vector.broadcast %69 : vector<1x8xf32> to vector<512x8xf32>
    %71 = arith.mulf %67, %70 : vector<512x8xf32>
    %72 = arith.addf %64, %71 : vector<512x8xf32>
    %c0_21 = arith.constant 0 : index
    %c0_22 = arith.constant 0 : index
    %73 = vector.load %arg3[%c0_21, %c0_22] : memref<1x8xf32, #tpu.memory_space<vmem>>, vector<1x8xf32>
    %74 = vector.broadcast %73 : vector<1x8xf32> to vector<512x8xf32>
    %75 = arith.addf %72, %74 : vector<512x8xf32>
    %cst = arith.constant 0.000000e+00 : f32
    %76 = vector.broadcast %cst : f32 to vector<512x8xf32>
    %77 = arith.maximumf %75, %76 : vector<512x8xf32>
    %78 = arith.truncf %77 : vector<512x8xf32> to vector<512x8xbf16>
    %c0_23 = arith.constant 0 : index
    %c0_24 = arith.constant 0 : index
    %79 = vector.load %arg4[%c0_23, %c0_24] : memref<8x16xbf16, #tpu.memory_space<vmem>>, vector<8x16xbf16>
    %cst_25 = arith.constant dense<0.000000e+00> : vector<512x16xf32>
    %80 = tpu.matmul %78, %79, %cst_25 {dimension_numbers = #tpu.dot_dimension_numbers<[1], [0], [0], [1], [0, 0, 1, 1], [], []>} : vector<512x8xbf16>, vector<8x16xbf16>, vector<512x16xf32> -> vector<512x16xf32>
    %c0_26 = arith.constant 0 : index
    %c0_27 = arith.constant 0 : index
    %81 = vector.load %arg5[%c0_26, %c0_27] : memref<1x16xf32, #tpu.memory_space<vmem>>, vector<1x16xf32>
    %82 = vector.broadcast %81 : vector<1x16xf32> to vector<512x16xf32>
    %83 = arith.addf %80, %82 : vector<512x16xf32>
    %cst_28 = arith.constant 0.000000e+00 : f32
    %84 = vector.broadcast %cst_28 : f32 to vector<512x16xf32>
    %85 = arith.maximumf %83, %84 : vector<512x16xf32>
    %86 = arith.truncf %85 : vector<512x16xf32> to vector<512x16xbf16>
    %c0_29 = arith.constant 0 : index
    %c0_30 = arith.constant 0 : index
    %87 = vector.load %arg6[%c0_29, %c0_30] : memref<512x16xbf16, #tpu.memory_space<vmem>>, vector<512x16xbf16>
    tpu.vector_store %arg6[%c0_29, %c0_30], %86 {strides = array<i32>} : memref<512x16xbf16, #tpu.memory_space<vmem>>, vector<512x16xbf16>,
    return
  }
  func.func @transform_0(%arg0: i32) -> (i32, i32, i32) {
    %c0_i32 = arith.constant 0 : i32
    %c0_i32_0 = arith.constant 0 : i32
    %c0_i32_1 = arith.constant 0 : i32
    return %c0_i32, %arg0, %c0_i32_0 : i32, i32, i32
  }
  func.func @transform_1(%arg0: i32) -> (i32, i32, i32) {
    %c0_i32 = arith.constant 0 : i32
    %c0_i32_0 = arith.constant 0 : i32
    %c0_i32_1 = arith.constant 0 : i32
    %c0_i32_2 = arith.constant 0 : i32
    return %c0_i32, %c0_i32_0, %c0_i32_1 : i32, i32, i32
  }
  func.func @transform_2(%arg0: i32) -> (i32, i32) {
    %c0_i32 = arith.constant 0 : i32
    %c0_i32_0 = arith.constant 0 : i32
    %c0_i32_1 = arith.constant 0 : i32
    return %c0_i32, %c0_i32_0 : i32, i32
  }
  func.func @transform_3(%arg0: i32) -> (i32, i32) {
    %c0_i32 = arith.constant 0 : i32
    %c0_i32_0 = arith.constant 0 : i32
    %c0_i32_1 = arith.constant 0 : i32
    return %c0_i32, %c0_i32_0 : i32, i32
  }
  func.func @transform_4(%arg0: i32) -> (i32, i32) {
    %c0_i32 = arith.constant 0 : i32
    %c0_i32_0 = arith.constant 0 : i32
    %c0_i32_1 = arith.constant 0 : i32
    return %c0_i32, %c0_i32_0 : i32, i32
  }
  func.func @transform_5(%arg0: i32) -> (i32, i32) {
    %c0_i32 = arith.constant 0 : i32
    %c0_i32_0 = arith.constant 0 : i32
    return %arg0, %c0_i32 : i32, i32
  }
}

module attributes {stable_mosaic.version = 11 : i64} {
  func.func @_ds_block_kernel(%arg0: i32, %arg1: memref<9x128x16xbf16, #tpu.memory_space<vmem>>, %arg2: memref<9x1x16xbf16, #tpu.memory_space<vmem>>, %arg3: memref<1x16xf32, #tpu.memory_space<vmem>>, %arg4: memref<16x32xbf16, #tpu.memory_space<vmem>>, %arg5: memref<1x32xf32, #tpu.memory_space<vmem>>, %arg6: memref<128x32xbf16, #tpu.memory_space<vmem>>) attributes {dimension_semantics = [#tpu.dimension_semantics<parallel>], iteration_bounds = array<i64: 1>, scalar_prefetch = 0 : i64, scratch_operands = 0 : i64, tpu.core_type = #tpu.core_type<tc>, window_params = [{transform_indices = @transform_0, window_bounds = array<i64: 9, 128, 16>}, {pipeline_mode = #tpu.pipeline_mode<synchronous>, transform_indices = @transform_1, window_bounds = array<i64: 9, 1, 16>}, {pipeline_mode = #tpu.pipeline_mode<synchronous>, transform_indices = @transform_2, window_bounds = array<i64: 1, 16>}, {pipeline_mode = #tpu.pipeline_mode<synchronous>, transform_indices = @transform_3, window_bounds = array<i64: 16, 32>}, {pipeline_mode = #tpu.pipeline_mode<synchronous>, transform_indices = @transform_4, window_bounds = array<i64: 1, 32>}, {transform_indices = @transform_5, window_bounds = array<i64: 128, 32>}]} {
    %c0 = arith.constant 0 : index
    %c0_0 = arith.constant 0 : index
    %c0_1 = arith.constant 0 : index
    %0 = vector.load %arg2[%c0, %c0_0, %c0_1] : memref<9x1x16xbf16, #tpu.memory_space<vmem>>, vector<9x1x16xbf16>
    %1 = arith.extf %0 : vector<9x1x16xbf16> to vector<9x1x16xf32>
    %c0_2 = arith.constant 0 : index
    %c0_3 = arith.constant 0 : index
    %c0_4 = arith.constant 0 : index
    %2 = vector.load %arg1[%c0_2, %c0_3, %c0_4] : memref<9x128x16xbf16, #tpu.memory_space<vmem>>, vector<1x128x16xbf16>
    %3 = vector.shape_cast %2 : vector<1x128x16xbf16> to vector<128x16xbf16>
    %4 = arith.extf %3 : vector<128x16xbf16> to vector<128x16xf32>
    %5 = vector.extract_strided_slice %1 {offsets = [0, 0, 0], sizes = [1, 1, 16], strides = [1, 1, 1]} : vector<9x1x16xf32> to vector<1x1x16xf32>
    %6 = vector.shape_cast %5 : vector<1x1x16xf32> to vector<1x16xf32>
    %7 = vector.broadcast %6 : vector<1x16xf32> to vector<128x16xf32>
    %8 = arith.mulf %4, %7 : vector<128x16xf32>
    %c1 = arith.constant 1 : index
    %c0_5 = arith.constant 0 : index
    %c0_6 = arith.constant 0 : index
    %9 = vector.load %arg1[%c1, %c0_5, %c0_6] : memref<9x128x16xbf16, #tpu.memory_space<vmem>>, vector<1x128x16xbf16>
    %10 = vector.shape_cast %9 : vector<1x128x16xbf16> to vector<128x16xbf16>
    %11 = arith.extf %10 : vector<128x16xbf16> to vector<128x16xf32>
    %12 = vector.extract_strided_slice %1 {offsets = [1, 0, 0], sizes = [1, 1, 16], strides = [1, 1, 1]} : vector<9x1x16xf32> to vector<1x1x16xf32>
    %13 = vector.shape_cast %12 : vector<1x1x16xf32> to vector<1x16xf32>
    %14 = vector.broadcast %13 : vector<1x16xf32> to vector<128x16xf32>
    %15 = arith.mulf %11, %14 : vector<128x16xf32>
    %16 = arith.addf %8, %15 : vector<128x16xf32>
    %c2 = arith.constant 2 : index
    %c0_7 = arith.constant 0 : index
    %c0_8 = arith.constant 0 : index
    %17 = vector.load %arg1[%c2, %c0_7, %c0_8] : memref<9x128x16xbf16, #tpu.memory_space<vmem>>, vector<1x128x16xbf16>
    %18 = vector.shape_cast %17 : vector<1x128x16xbf16> to vector<128x16xbf16>
    %19 = arith.extf %18 : vector<128x16xbf16> to vector<128x16xf32>
    %20 = vector.extract_strided_slice %1 {offsets = [2, 0, 0], sizes = [1, 1, 16], strides = [1, 1, 1]} : vector<9x1x16xf32> to vector<1x1x16xf32>
    %21 = vector.shape_cast %20 : vector<1x1x16xf32> to vector<1x16xf32>
    %22 = vector.broadcast %21 : vector<1x16xf32> to vector<128x16xf32>
    %23 = arith.mulf %19, %22 : vector<128x16xf32>
    %24 = arith.addf %16, %23 : vector<128x16xf32>
    %c3 = arith.constant 3 : index
    %c0_9 = arith.constant 0 : index
    %c0_10 = arith.constant 0 : index
    %25 = vector.load %arg1[%c3, %c0_9, %c0_10] : memref<9x128x16xbf16, #tpu.memory_space<vmem>>, vector<1x128x16xbf16>
    %26 = vector.shape_cast %25 : vector<1x128x16xbf16> to vector<128x16xbf16>
    %27 = arith.extf %26 : vector<128x16xbf16> to vector<128x16xf32>
    %28 = vector.extract_strided_slice %1 {offsets = [3, 0, 0], sizes = [1, 1, 16], strides = [1, 1, 1]} : vector<9x1x16xf32> to vector<1x1x16xf32>
    %29 = vector.shape_cast %28 : vector<1x1x16xf32> to vector<1x16xf32>
    %30 = vector.broadcast %29 : vector<1x16xf32> to vector<128x16xf32>
    %31 = arith.mulf %27, %30 : vector<128x16xf32>
    %32 = arith.addf %24, %31 : vector<128x16xf32>
    %c4 = arith.constant 4 : index
    %c0_11 = arith.constant 0 : index
    %c0_12 = arith.constant 0 : index
    %33 = vector.load %arg1[%c4, %c0_11, %c0_12] : memref<9x128x16xbf16, #tpu.memory_space<vmem>>, vector<1x128x16xbf16>
    %34 = vector.shape_cast %33 : vector<1x128x16xbf16> to vector<128x16xbf16>
    %35 = arith.extf %34 : vector<128x16xbf16> to vector<128x16xf32>
    %36 = vector.extract_strided_slice %1 {offsets = [4, 0, 0], sizes = [1, 1, 16], strides = [1, 1, 1]} : vector<9x1x16xf32> to vector<1x1x16xf32>
    %37 = vector.shape_cast %36 : vector<1x1x16xf32> to vector<1x16xf32>
    %38 = vector.broadcast %37 : vector<1x16xf32> to vector<128x16xf32>
    %39 = arith.mulf %35, %38 : vector<128x16xf32>
    %40 = arith.addf %32, %39 : vector<128x16xf32>
    %c5 = arith.constant 5 : index
    %c0_13 = arith.constant 0 : index
    %c0_14 = arith.constant 0 : index
    %41 = vector.load %arg1[%c5, %c0_13, %c0_14] : memref<9x128x16xbf16, #tpu.memory_space<vmem>>, vector<1x128x16xbf16>
    %42 = vector.shape_cast %41 : vector<1x128x16xbf16> to vector<128x16xbf16>
    %43 = arith.extf %42 : vector<128x16xbf16> to vector<128x16xf32>
    %44 = vector.extract_strided_slice %1 {offsets = [5, 0, 0], sizes = [1, 1, 16], strides = [1, 1, 1]} : vector<9x1x16xf32> to vector<1x1x16xf32>
    %45 = vector.shape_cast %44 : vector<1x1x16xf32> to vector<1x16xf32>
    %46 = vector.broadcast %45 : vector<1x16xf32> to vector<128x16xf32>
    %47 = arith.mulf %43, %46 : vector<128x16xf32>
    %48 = arith.addf %40, %47 : vector<128x16xf32>
    %c6 = arith.constant 6 : index
    %c0_15 = arith.constant 0 : index
    %c0_16 = arith.constant 0 : index
    %49 = vector.load %arg1[%c6, %c0_15, %c0_16] : memref<9x128x16xbf16, #tpu.memory_space<vmem>>, vector<1x128x16xbf16>
    %50 = vector.shape_cast %49 : vector<1x128x16xbf16> to vector<128x16xbf16>
    %51 = arith.extf %50 : vector<128x16xbf16> to vector<128x16xf32>
    %52 = vector.extract_strided_slice %1 {offsets = [6, 0, 0], sizes = [1, 1, 16], strides = [1, 1, 1]} : vector<9x1x16xf32> to vector<1x1x16xf32>
    %53 = vector.shape_cast %52 : vector<1x1x16xf32> to vector<1x16xf32>
    %54 = vector.broadcast %53 : vector<1x16xf32> to vector<128x16xf32>
    %55 = arith.mulf %51, %54 : vector<128x16xf32>
    %56 = arith.addf %48, %55 : vector<128x16xf32>
    %c7 = arith.constant 7 : index
    %c0_17 = arith.constant 0 : index
    %c0_18 = arith.constant 0 : index
    %57 = vector.load %arg1[%c7, %c0_17, %c0_18] : memref<9x128x16xbf16, #tpu.memory_space<vmem>>, vector<1x128x16xbf16>
    %58 = vector.shape_cast %57 : vector<1x128x16xbf16> to vector<128x16xbf16>
    %59 = arith.extf %58 : vector<128x16xbf16> to vector<128x16xf32>
    %60 = vector.extract_strided_slice %1 {offsets = [7, 0, 0], sizes = [1, 1, 16], strides = [1, 1, 1]} : vector<9x1x16xf32> to vector<1x1x16xf32>
    %61 = vector.shape_cast %60 : vector<1x1x16xf32> to vector<1x16xf32>
    %62 = vector.broadcast %61 : vector<1x16xf32> to vector<128x16xf32>
    %63 = arith.mulf %59, %62 : vector<128x16xf32>
    %64 = arith.addf %56, %63 : vector<128x16xf32>
    %c8 = arith.constant 8 : index
    %c0_19 = arith.constant 0 : index
    %c0_20 = arith.constant 0 : index
    %65 = vector.load %arg1[%c8, %c0_19, %c0_20] : memref<9x128x16xbf16, #tpu.memory_space<vmem>>, vector<1x128x16xbf16>
    %66 = vector.shape_cast %65 : vector<1x128x16xbf16> to vector<128x16xbf16>
    %67 = arith.extf %66 : vector<128x16xbf16> to vector<128x16xf32>
    %68 = vector.extract_strided_slice %1 {offsets = [8, 0, 0], sizes = [1, 1, 16], strides = [1, 1, 1]} : vector<9x1x16xf32> to vector<1x1x16xf32>
    %69 = vector.shape_cast %68 : vector<1x1x16xf32> to vector<1x16xf32>
    %70 = vector.broadcast %69 : vector<1x16xf32> to vector<128x16xf32>
    %71 = arith.mulf %67, %70 : vector<128x16xf32>
    %72 = arith.addf %64, %71 : vector<128x16xf32>
    %c0_21 = arith.constant 0 : index
    %c0_22 = arith.constant 0 : index
    %73 = vector.load %arg3[%c0_21, %c0_22] : memref<1x16xf32, #tpu.memory_space<vmem>>, vector<1x16xf32>
    %74 = vector.broadcast %73 : vector<1x16xf32> to vector<128x16xf32>
    %75 = arith.addf %72, %74 : vector<128x16xf32>
    %cst = arith.constant 0.000000e+00 : f32
    %76 = vector.broadcast %cst : f32 to vector<128x16xf32>
    %77 = arith.maximumf %75, %76 : vector<128x16xf32>
    %78 = arith.truncf %77 : vector<128x16xf32> to vector<128x16xbf16>
    %c0_23 = arith.constant 0 : index
    %c0_24 = arith.constant 0 : index
    %79 = vector.load %arg4[%c0_23, %c0_24] : memref<16x32xbf16, #tpu.memory_space<vmem>>, vector<16x32xbf16>
    %cst_25 = arith.constant dense<0.000000e+00> : vector<128x32xf32>
    %80 = tpu.matmul %78, %79, %cst_25 {dimension_numbers = #tpu.dot_dimension_numbers<[1], [0], [0], [1], [0, 0, 1, 1], [], []>} : vector<128x16xbf16>, vector<16x32xbf16>, vector<128x32xf32> -> vector<128x32xf32>
    %c0_26 = arith.constant 0 : index
    %c0_27 = arith.constant 0 : index
    %81 = vector.load %arg5[%c0_26, %c0_27] : memref<1x32xf32, #tpu.memory_space<vmem>>, vector<1x32xf32>
    %82 = vector.broadcast %81 : vector<1x32xf32> to vector<128x32xf32>
    %83 = arith.addf %80, %82 : vector<128x32xf32>
    %cst_28 = arith.constant 0.000000e+00 : f32
    %84 = vector.broadcast %cst_28 : f32 to vector<128x32xf32>
    %85 = arith.maximumf %83, %84 : vector<128x32xf32>
    %86 = arith.truncf %85 : vector<128x32xf32> to vector<128x32xbf16>
    %c0_29 = arith.constant 0 : index
    %c0_30 = arith.constant 0 : index
    %87 = vector.load %arg6[%c0_29, %c0_30] : memref<128x32xbf16, #tpu.memory_space<vmem>>, vector<128x32xbf16>
    tpu.vector_store %arg6[%c0_29, %c0_30], %86 {strides = array<i32>} : memref<128x32xbf16, #tpu.memory_space<vmem>>, vector<128x32xbf16>,
    return
  }
  func.func @transform_0(%arg0: i32) -> (i32, i32, i32) {
    %c0_i32 = arith.constant 0 : i32
    %c0_i32_0 = arith.constant 0 : i32
    %c0_i32_1 = arith.constant 0 : i32
    return %c0_i32, %arg0, %c0_i32_0 : i32, i32, i32
  }
  func.func @transform_1(%arg0: i32) -> (i32, i32, i32) {
    %c0_i32 = arith.constant 0 : i32
    %c0_i32_0 = arith.constant 0 : i32
    %c0_i32_1 = arith.constant 0 : i32
    %c0_i32_2 = arith.constant 0 : i32
    return %c0_i32, %c0_i32_0, %c0_i32_1 : i32, i32, i32
  }
  func.func @transform_2(%arg0: i32) -> (i32, i32) {
    %c0_i32 = arith.constant 0 : i32
    %c0_i32_0 = arith.constant 0 : i32
    %c0_i32_1 = arith.constant 0 : i32
    return %c0_i32, %c0_i32_0 : i32, i32
  }
  func.func @transform_3(%arg0: i32) -> (i32, i32) {
    %c0_i32 = arith.constant 0 : i32
    %c0_i32_0 = arith.constant 0 : i32
    %c0_i32_1 = arith.constant 0 : i32
    return %c0_i32, %c0_i32_0 : i32, i32
  }
  func.func @transform_4(%arg0: i32) -> (i32, i32) {
    %c0_i32 = arith.constant 0 : i32
    %c0_i32_0 = arith.constant 0 : i32
    %c0_i32_1 = arith.constant 0 : i32
    return %c0_i32, %c0_i32_0 : i32, i32
  }
  func.func @transform_5(%arg0: i32) -> (i32, i32) {
    %c0_i32 = arith.constant 0 : i32
    %c0_i32_0 = arith.constant 0 : i32
    return %arg0, %c0_i32 : i32, i32
  }
}

module attributes {stable_mosaic.version = 11 : i64} {
  func.func @_ds_block_kernel(%arg0: i32, %arg1: memref<9x128x32xbf16, #tpu.memory_space<vmem>>, %arg2: memref<9x1x32xbf16, #tpu.memory_space<vmem>>, %arg3: memref<1x32xf32, #tpu.memory_space<vmem>>, %arg4: memref<32x32xbf16, #tpu.memory_space<vmem>>, %arg5: memref<1x32xf32, #tpu.memory_space<vmem>>, %arg6: memref<128x32xbf16, #tpu.memory_space<vmem>>) attributes {dimension_semantics = [#tpu.dimension_semantics<parallel>], iteration_bounds = array<i64: 1>, scalar_prefetch = 0 : i64, scratch_operands = 0 : i64, tpu.core_type = #tpu.core_type<tc>, window_params = [{transform_indices = @transform_0, window_bounds = array<i64: 9, 128, 32>}, {pipeline_mode = #tpu.pipeline_mode<synchronous>, transform_indices = @transform_1, window_bounds = array<i64: 9, 1, 32>}, {pipeline_mode = #tpu.pipeline_mode<synchronous>, transform_indices = @transform_2, window_bounds = array<i64: 1, 32>}, {pipeline_mode = #tpu.pipeline_mode<synchronous>, transform_indices = @transform_3, window_bounds = array<i64: 32, 32>}, {pipeline_mode = #tpu.pipeline_mode<synchronous>, transform_indices = @transform_4, window_bounds = array<i64: 1, 32>}, {transform_indices = @transform_5, window_bounds = array<i64: 128, 32>}]} {
    %c0 = arith.constant 0 : index
    %c0_0 = arith.constant 0 : index
    %c0_1 = arith.constant 0 : index
    %0 = vector.load %arg2[%c0, %c0_0, %c0_1] : memref<9x1x32xbf16, #tpu.memory_space<vmem>>, vector<9x1x32xbf16>
    %1 = arith.extf %0 : vector<9x1x32xbf16> to vector<9x1x32xf32>
    %c0_2 = arith.constant 0 : index
    %c0_3 = arith.constant 0 : index
    %c0_4 = arith.constant 0 : index
    %2 = vector.load %arg1[%c0_2, %c0_3, %c0_4] : memref<9x128x32xbf16, #tpu.memory_space<vmem>>, vector<1x128x32xbf16>
    %3 = vector.shape_cast %2 : vector<1x128x32xbf16> to vector<128x32xbf16>
    %4 = arith.extf %3 : vector<128x32xbf16> to vector<128x32xf32>
    %5 = vector.extract_strided_slice %1 {offsets = [0, 0, 0], sizes = [1, 1, 32], strides = [1, 1, 1]} : vector<9x1x32xf32> to vector<1x1x32xf32>
    %6 = vector.shape_cast %5 : vector<1x1x32xf32> to vector<1x32xf32>
    %7 = vector.broadcast %6 : vector<1x32xf32> to vector<128x32xf32>
    %8 = arith.mulf %4, %7 : vector<128x32xf32>
    %c1 = arith.constant 1 : index
    %c0_5 = arith.constant 0 : index
    %c0_6 = arith.constant 0 : index
    %9 = vector.load %arg1[%c1, %c0_5, %c0_6] : memref<9x128x32xbf16, #tpu.memory_space<vmem>>, vector<1x128x32xbf16>
    %10 = vector.shape_cast %9 : vector<1x128x32xbf16> to vector<128x32xbf16>
    %11 = arith.extf %10 : vector<128x32xbf16> to vector<128x32xf32>
    %12 = vector.extract_strided_slice %1 {offsets = [1, 0, 0], sizes = [1, 1, 32], strides = [1, 1, 1]} : vector<9x1x32xf32> to vector<1x1x32xf32>
    %13 = vector.shape_cast %12 : vector<1x1x32xf32> to vector<1x32xf32>
    %14 = vector.broadcast %13 : vector<1x32xf32> to vector<128x32xf32>
    %15 = arith.mulf %11, %14 : vector<128x32xf32>
    %16 = arith.addf %8, %15 : vector<128x32xf32>
    %c2 = arith.constant 2 : index
    %c0_7 = arith.constant 0 : index
    %c0_8 = arith.constant 0 : index
    %17 = vector.load %arg1[%c2, %c0_7, %c0_8] : memref<9x128x32xbf16, #tpu.memory_space<vmem>>, vector<1x128x32xbf16>
    %18 = vector.shape_cast %17 : vector<1x128x32xbf16> to vector<128x32xbf16>
    %19 = arith.extf %18 : vector<128x32xbf16> to vector<128x32xf32>
    %20 = vector.extract_strided_slice %1 {offsets = [2, 0, 0], sizes = [1, 1, 32], strides = [1, 1, 1]} : vector<9x1x32xf32> to vector<1x1x32xf32>
    %21 = vector.shape_cast %20 : vector<1x1x32xf32> to vector<1x32xf32>
    %22 = vector.broadcast %21 : vector<1x32xf32> to vector<128x32xf32>
    %23 = arith.mulf %19, %22 : vector<128x32xf32>
    %24 = arith.addf %16, %23 : vector<128x32xf32>
    %c3 = arith.constant 3 : index
    %c0_9 = arith.constant 0 : index
    %c0_10 = arith.constant 0 : index
    %25 = vector.load %arg1[%c3, %c0_9, %c0_10] : memref<9x128x32xbf16, #tpu.memory_space<vmem>>, vector<1x128x32xbf16>
    %26 = vector.shape_cast %25 : vector<1x128x32xbf16> to vector<128x32xbf16>
    %27 = arith.extf %26 : vector<128x32xbf16> to vector<128x32xf32>
    %28 = vector.extract_strided_slice %1 {offsets = [3, 0, 0], sizes = [1, 1, 32], strides = [1, 1, 1]} : vector<9x1x32xf32> to vector<1x1x32xf32>
    %29 = vector.shape_cast %28 : vector<1x1x32xf32> to vector<1x32xf32>
    %30 = vector.broadcast %29 : vector<1x32xf32> to vector<128x32xf32>
    %31 = arith.mulf %27, %30 : vector<128x32xf32>
    %32 = arith.addf %24, %31 : vector<128x32xf32>
    %c4 = arith.constant 4 : index
    %c0_11 = arith.constant 0 : index
    %c0_12 = arith.constant 0 : index
    %33 = vector.load %arg1[%c4, %c0_11, %c0_12] : memref<9x128x32xbf16, #tpu.memory_space<vmem>>, vector<1x128x32xbf16>
    %34 = vector.shape_cast %33 : vector<1x128x32xbf16> to vector<128x32xbf16>
    %35 = arith.extf %34 : vector<128x32xbf16> to vector<128x32xf32>
    %36 = vector.extract_strided_slice %1 {offsets = [4, 0, 0], sizes = [1, 1, 32], strides = [1, 1, 1]} : vector<9x1x32xf32> to vector<1x1x32xf32>
    %37 = vector.shape_cast %36 : vector<1x1x32xf32> to vector<1x32xf32>
    %38 = vector.broadcast %37 : vector<1x32xf32> to vector<128x32xf32>
    %39 = arith.mulf %35, %38 : vector<128x32xf32>
    %40 = arith.addf %32, %39 : vector<128x32xf32>
    %c5 = arith.constant 5 : index
    %c0_13 = arith.constant 0 : index
    %c0_14 = arith.constant 0 : index
    %41 = vector.load %arg1[%c5, %c0_13, %c0_14] : memref<9x128x32xbf16, #tpu.memory_space<vmem>>, vector<1x128x32xbf16>
    %42 = vector.shape_cast %41 : vector<1x128x32xbf16> to vector<128x32xbf16>
    %43 = arith.extf %42 : vector<128x32xbf16> to vector<128x32xf32>
    %44 = vector.extract_strided_slice %1 {offsets = [5, 0, 0], sizes = [1, 1, 32], strides = [1, 1, 1]} : vector<9x1x32xf32> to vector<1x1x32xf32>
    %45 = vector.shape_cast %44 : vector<1x1x32xf32> to vector<1x32xf32>
    %46 = vector.broadcast %45 : vector<1x32xf32> to vector<128x32xf32>
    %47 = arith.mulf %43, %46 : vector<128x32xf32>
    %48 = arith.addf %40, %47 : vector<128x32xf32>
    %c6 = arith.constant 6 : index
    %c0_15 = arith.constant 0 : index
    %c0_16 = arith.constant 0 : index
    %49 = vector.load %arg1[%c6, %c0_15, %c0_16] : memref<9x128x32xbf16, #tpu.memory_space<vmem>>, vector<1x128x32xbf16>
    %50 = vector.shape_cast %49 : vector<1x128x32xbf16> to vector<128x32xbf16>
    %51 = arith.extf %50 : vector<128x32xbf16> to vector<128x32xf32>
    %52 = vector.extract_strided_slice %1 {offsets = [6, 0, 0], sizes = [1, 1, 32], strides = [1, 1, 1]} : vector<9x1x32xf32> to vector<1x1x32xf32>
    %53 = vector.shape_cast %52 : vector<1x1x32xf32> to vector<1x32xf32>
    %54 = vector.broadcast %53 : vector<1x32xf32> to vector<128x32xf32>
    %55 = arith.mulf %51, %54 : vector<128x32xf32>
    %56 = arith.addf %48, %55 : vector<128x32xf32>
    %c7 = arith.constant 7 : index
    %c0_17 = arith.constant 0 : index
    %c0_18 = arith.constant 0 : index
    %57 = vector.load %arg1[%c7, %c0_17, %c0_18] : memref<9x128x32xbf16, #tpu.memory_space<vmem>>, vector<1x128x32xbf16>
    %58 = vector.shape_cast %57 : vector<1x128x32xbf16> to vector<128x32xbf16>
    %59 = arith.extf %58 : vector<128x32xbf16> to vector<128x32xf32>
    %60 = vector.extract_strided_slice %1 {offsets = [7, 0, 0], sizes = [1, 1, 32], strides = [1, 1, 1]} : vector<9x1x32xf32> to vector<1x1x32xf32>
    %61 = vector.shape_cast %60 : vector<1x1x32xf32> to vector<1x32xf32>
    %62 = vector.broadcast %61 : vector<1x32xf32> to vector<128x32xf32>
    %63 = arith.mulf %59, %62 : vector<128x32xf32>
    %64 = arith.addf %56, %63 : vector<128x32xf32>
    %c8 = arith.constant 8 : index
    %c0_19 = arith.constant 0 : index
    %c0_20 = arith.constant 0 : index
    %65 = vector.load %arg1[%c8, %c0_19, %c0_20] : memref<9x128x32xbf16, #tpu.memory_space<vmem>>, vector<1x128x32xbf16>
    %66 = vector.shape_cast %65 : vector<1x128x32xbf16> to vector<128x32xbf16>
    %67 = arith.extf %66 : vector<128x32xbf16> to vector<128x32xf32>
    %68 = vector.extract_strided_slice %1 {offsets = [8, 0, 0], sizes = [1, 1, 32], strides = [1, 1, 1]} : vector<9x1x32xf32> to vector<1x1x32xf32>
    %69 = vector.shape_cast %68 : vector<1x1x32xf32> to vector<1x32xf32>
    %70 = vector.broadcast %69 : vector<1x32xf32> to vector<128x32xf32>
    %71 = arith.mulf %67, %70 : vector<128x32xf32>
    %72 = arith.addf %64, %71 : vector<128x32xf32>
    %c0_21 = arith.constant 0 : index
    %c0_22 = arith.constant 0 : index
    %73 = vector.load %arg3[%c0_21, %c0_22] : memref<1x32xf32, #tpu.memory_space<vmem>>, vector<1x32xf32>
    %74 = vector.broadcast %73 : vector<1x32xf32> to vector<128x32xf32>
    %75 = arith.addf %72, %74 : vector<128x32xf32>
    %cst = arith.constant 0.000000e+00 : f32
    %76 = vector.broadcast %cst : f32 to vector<128x32xf32>
    %77 = arith.maximumf %75, %76 : vector<128x32xf32>
    %78 = arith.truncf %77 : vector<128x32xf32> to vector<128x32xbf16>
    %c0_23 = arith.constant 0 : index
    %c0_24 = arith.constant 0 : index
    %79 = vector.load %arg4[%c0_23, %c0_24] : memref<32x32xbf16, #tpu.memory_space<vmem>>, vector<32x32xbf16>
    %cst_25 = arith.constant dense<0.000000e+00> : vector<128x32xf32>
    %80 = tpu.matmul %78, %79, %cst_25 {dimension_numbers = #tpu.dot_dimension_numbers<[1], [0], [0], [1], [0, 0, 1, 1], [], []>} : vector<128x32xbf16>, vector<32x32xbf16>, vector<128x32xf32> -> vector<128x32xf32>
    %c0_26 = arith.constant 0 : index
    %c0_27 = arith.constant 0 : index
    %81 = vector.load %arg5[%c0_26, %c0_27] : memref<1x32xf32, #tpu.memory_space<vmem>>, vector<1x32xf32>
    %82 = vector.broadcast %81 : vector<1x32xf32> to vector<128x32xf32>
    %83 = arith.addf %80, %82 : vector<128x32xf32>
    %cst_28 = arith.constant 0.000000e+00 : f32
    %84 = vector.broadcast %cst_28 : f32 to vector<128x32xf32>
    %85 = arith.maximumf %83, %84 : vector<128x32xf32>
    %86 = arith.truncf %85 : vector<128x32xf32> to vector<128x32xbf16>
    %c0_29 = arith.constant 0 : index
    %c0_30 = arith.constant 0 : index
    %87 = vector.load %arg6[%c0_29, %c0_30] : memref<128x32xbf16, #tpu.memory_space<vmem>>, vector<128x32xbf16>
    tpu.vector_store %arg6[%c0_29, %c0_30], %86 {strides = array<i32>} : memref<128x32xbf16, #tpu.memory_space<vmem>>, vector<128x32xbf16>,
    return
  }
  func.func @transform_0(%arg0: i32) -> (i32, i32, i32) {
    %c0_i32 = arith.constant 0 : i32
    %c0_i32_0 = arith.constant 0 : i32
    %c0_i32_1 = arith.constant 0 : i32
    return %c0_i32, %arg0, %c0_i32_0 : i32, i32, i32
  }
  func.func @transform_1(%arg0: i32) -> (i32, i32, i32) {
    %c0_i32 = arith.constant 0 : i32
    %c0_i32_0 = arith.constant 0 : i32
    %c0_i32_1 = arith.constant 0 : i32
    %c0_i32_2 = arith.constant 0 : i32
    return %c0_i32, %c0_i32_0, %c0_i32_1 : i32, i32, i32
  }
  func.func @transform_2(%arg0: i32) -> (i32, i32) {
    %c0_i32 = arith.constant 0 : i32
    %c0_i32_0 = arith.constant 0 : i32
    %c0_i32_1 = arith.constant 0 : i32
    return %c0_i32, %c0_i32_0 : i32, i32
  }
  func.func @transform_3(%arg0: i32) -> (i32, i32) {
    %c0_i32 = arith.constant 0 : i32
    %c0_i32_0 = arith.constant 0 : i32
    %c0_i32_1 = arith.constant 0 : i32
    return %c0_i32, %c0_i32_0 : i32, i32
  }
  func.func @transform_4(%arg0: i32) -> (i32, i32) {
    %c0_i32 = arith.constant 0 : i32
    %c0_i32_0 = arith.constant 0 : i32
    %c0_i32_1 = arith.constant 0 : i32
    return %c0_i32, %c0_i32_0 : i32, i32
  }
  func.func @transform_5(%arg0: i32) -> (i32, i32) {
    %c0_i32 = arith.constant 0 : i32
    %c0_i32_0 = arith.constant 0 : i32
    return %arg0, %c0_i32 : i32, i32
  }
}

module attributes {stable_mosaic.version = 11 : i64} {
  func.func @_ds_block_kernel(%arg0: i32, %arg1: memref<9x32x32xbf16, #tpu.memory_space<vmem>>, %arg2: memref<9x1x32xbf16, #tpu.memory_space<vmem>>, %arg3: memref<1x32xf32, #tpu.memory_space<vmem>>, %arg4: memref<32x64xbf16, #tpu.memory_space<vmem>>, %arg5: memref<1x64xf32, #tpu.memory_space<vmem>>, %arg6: memref<32x64xbf16, #tpu.memory_space<vmem>>) attributes {dimension_semantics = [#tpu.dimension_semantics<parallel>], iteration_bounds = array<i64: 1>, scalar_prefetch = 0 : i64, scratch_operands = 0 : i64, tpu.core_type = #tpu.core_type<tc>, window_params = [{transform_indices = @transform_0, window_bounds = array<i64: 9, 32, 32>}, {pipeline_mode = #tpu.pipeline_mode<synchronous>, transform_indices = @transform_1, window_bounds = array<i64: 9, 1, 32>}, {pipeline_mode = #tpu.pipeline_mode<synchronous>, transform_indices = @transform_2, window_bounds = array<i64: 1, 32>}, {pipeline_mode = #tpu.pipeline_mode<synchronous>, transform_indices = @transform_3, window_bounds = array<i64: 32, 64>}, {pipeline_mode = #tpu.pipeline_mode<synchronous>, transform_indices = @transform_4, window_bounds = array<i64: 1, 64>}, {transform_indices = @transform_5, window_bounds = array<i64: 32, 64>}]} {
    %c0 = arith.constant 0 : index
    %c0_0 = arith.constant 0 : index
    %c0_1 = arith.constant 0 : index
    %0 = vector.load %arg2[%c0, %c0_0, %c0_1] : memref<9x1x32xbf16, #tpu.memory_space<vmem>>, vector<9x1x32xbf16>
    %1 = arith.extf %0 : vector<9x1x32xbf16> to vector<9x1x32xf32>
    %c0_2 = arith.constant 0 : index
    %c0_3 = arith.constant 0 : index
    %c0_4 = arith.constant 0 : index
    %2 = vector.load %arg1[%c0_2, %c0_3, %c0_4] : memref<9x32x32xbf16, #tpu.memory_space<vmem>>, vector<1x32x32xbf16>
    %3 = vector.shape_cast %2 : vector<1x32x32xbf16> to vector<32x32xbf16>
    %4 = arith.extf %3 : vector<32x32xbf16> to vector<32x32xf32>
    %5 = vector.extract_strided_slice %1 {offsets = [0, 0, 0], sizes = [1, 1, 32], strides = [1, 1, 1]} : vector<9x1x32xf32> to vector<1x1x32xf32>
    %6 = vector.shape_cast %5 : vector<1x1x32xf32> to vector<1x32xf32>
    %7 = vector.broadcast %6 : vector<1x32xf32> to vector<32x32xf32>
    %8 = arith.mulf %4, %7 : vector<32x32xf32>
    %c1 = arith.constant 1 : index
    %c0_5 = arith.constant 0 : index
    %c0_6 = arith.constant 0 : index
    %9 = vector.load %arg1[%c1, %c0_5, %c0_6] : memref<9x32x32xbf16, #tpu.memory_space<vmem>>, vector<1x32x32xbf16>
    %10 = vector.shape_cast %9 : vector<1x32x32xbf16> to vector<32x32xbf16>
    %11 = arith.extf %10 : vector<32x32xbf16> to vector<32x32xf32>
    %12 = vector.extract_strided_slice %1 {offsets = [1, 0, 0], sizes = [1, 1, 32], strides = [1, 1, 1]} : vector<9x1x32xf32> to vector<1x1x32xf32>
    %13 = vector.shape_cast %12 : vector<1x1x32xf32> to vector<1x32xf32>
    %14 = vector.broadcast %13 : vector<1x32xf32> to vector<32x32xf32>
    %15 = arith.mulf %11, %14 : vector<32x32xf32>
    %16 = arith.addf %8, %15 : vector<32x32xf32>
    %c2 = arith.constant 2 : index
    %c0_7 = arith.constant 0 : index
    %c0_8 = arith.constant 0 : index
    %17 = vector.load %arg1[%c2, %c0_7, %c0_8] : memref<9x32x32xbf16, #tpu.memory_space<vmem>>, vector<1x32x32xbf16>
    %18 = vector.shape_cast %17 : vector<1x32x32xbf16> to vector<32x32xbf16>
    %19 = arith.extf %18 : vector<32x32xbf16> to vector<32x32xf32>
    %20 = vector.extract_strided_slice %1 {offsets = [2, 0, 0], sizes = [1, 1, 32], strides = [1, 1, 1]} : vector<9x1x32xf32> to vector<1x1x32xf32>
    %21 = vector.shape_cast %20 : vector<1x1x32xf32> to vector<1x32xf32>
    %22 = vector.broadcast %21 : vector<1x32xf32> to vector<32x32xf32>
    %23 = arith.mulf %19, %22 : vector<32x32xf32>
    %24 = arith.addf %16, %23 : vector<32x32xf32>
    %c3 = arith.constant 3 : index
    %c0_9 = arith.constant 0 : index
    %c0_10 = arith.constant 0 : index
    %25 = vector.load %arg1[%c3, %c0_9, %c0_10] : memref<9x32x32xbf16, #tpu.memory_space<vmem>>, vector<1x32x32xbf16>
    %26 = vector.shape_cast %25 : vector<1x32x32xbf16> to vector<32x32xbf16>
    %27 = arith.extf %26 : vector<32x32xbf16> to vector<32x32xf32>
    %28 = vector.extract_strided_slice %1 {offsets = [3, 0, 0], sizes = [1, 1, 32], strides = [1, 1, 1]} : vector<9x1x32xf32> to vector<1x1x32xf32>
    %29 = vector.shape_cast %28 : vector<1x1x32xf32> to vector<1x32xf32>
    %30 = vector.broadcast %29 : vector<1x32xf32> to vector<32x32xf32>
    %31 = arith.mulf %27, %30 : vector<32x32xf32>
    %32 = arith.addf %24, %31 : vector<32x32xf32>
    %c4 = arith.constant 4 : index
    %c0_11 = arith.constant 0 : index
    %c0_12 = arith.constant 0 : index
    %33 = vector.load %arg1[%c4, %c0_11, %c0_12] : memref<9x32x32xbf16, #tpu.memory_space<vmem>>, vector<1x32x32xbf16>
    %34 = vector.shape_cast %33 : vector<1x32x32xbf16> to vector<32x32xbf16>
    %35 = arith.extf %34 : vector<32x32xbf16> to vector<32x32xf32>
    %36 = vector.extract_strided_slice %1 {offsets = [4, 0, 0], sizes = [1, 1, 32], strides = [1, 1, 1]} : vector<9x1x32xf32> to vector<1x1x32xf32>
    %37 = vector.shape_cast %36 : vector<1x1x32xf32> to vector<1x32xf32>
    %38 = vector.broadcast %37 : vector<1x32xf32> to vector<32x32xf32>
    %39 = arith.mulf %35, %38 : vector<32x32xf32>
    %40 = arith.addf %32, %39 : vector<32x32xf32>
    %c5 = arith.constant 5 : index
    %c0_13 = arith.constant 0 : index
    %c0_14 = arith.constant 0 : index
    %41 = vector.load %arg1[%c5, %c0_13, %c0_14] : memref<9x32x32xbf16, #tpu.memory_space<vmem>>, vector<1x32x32xbf16>
    %42 = vector.shape_cast %41 : vector<1x32x32xbf16> to vector<32x32xbf16>
    %43 = arith.extf %42 : vector<32x32xbf16> to vector<32x32xf32>
    %44 = vector.extract_strided_slice %1 {offsets = [5, 0, 0], sizes = [1, 1, 32], strides = [1, 1, 1]} : vector<9x1x32xf32> to vector<1x1x32xf32>
    %45 = vector.shape_cast %44 : vector<1x1x32xf32> to vector<1x32xf32>
    %46 = vector.broadcast %45 : vector<1x32xf32> to vector<32x32xf32>
    %47 = arith.mulf %43, %46 : vector<32x32xf32>
    %48 = arith.addf %40, %47 : vector<32x32xf32>
    %c6 = arith.constant 6 : index
    %c0_15 = arith.constant 0 : index
    %c0_16 = arith.constant 0 : index
    %49 = vector.load %arg1[%c6, %c0_15, %c0_16] : memref<9x32x32xbf16, #tpu.memory_space<vmem>>, vector<1x32x32xbf16>
    %50 = vector.shape_cast %49 : vector<1x32x32xbf16> to vector<32x32xbf16>
    %51 = arith.extf %50 : vector<32x32xbf16> to vector<32x32xf32>
    %52 = vector.extract_strided_slice %1 {offsets = [6, 0, 0], sizes = [1, 1, 32], strides = [1, 1, 1]} : vector<9x1x32xf32> to vector<1x1x32xf32>
    %53 = vector.shape_cast %52 : vector<1x1x32xf32> to vector<1x32xf32>
    %54 = vector.broadcast %53 : vector<1x32xf32> to vector<32x32xf32>
    %55 = arith.mulf %51, %54 : vector<32x32xf32>
    %56 = arith.addf %48, %55 : vector<32x32xf32>
    %c7 = arith.constant 7 : index
    %c0_17 = arith.constant 0 : index
    %c0_18 = arith.constant 0 : index
    %57 = vector.load %arg1[%c7, %c0_17, %c0_18] : memref<9x32x32xbf16, #tpu.memory_space<vmem>>, vector<1x32x32xbf16>
    %58 = vector.shape_cast %57 : vector<1x32x32xbf16> to vector<32x32xbf16>
    %59 = arith.extf %58 : vector<32x32xbf16> to vector<32x32xf32>
    %60 = vector.extract_strided_slice %1 {offsets = [7, 0, 0], sizes = [1, 1, 32], strides = [1, 1, 1]} : vector<9x1x32xf32> to vector<1x1x32xf32>
    %61 = vector.shape_cast %60 : vector<1x1x32xf32> to vector<1x32xf32>
    %62 = vector.broadcast %61 : vector<1x32xf32> to vector<32x32xf32>
    %63 = arith.mulf %59, %62 : vector<32x32xf32>
    %64 = arith.addf %56, %63 : vector<32x32xf32>
    %c8 = arith.constant 8 : index
    %c0_19 = arith.constant 0 : index
    %c0_20 = arith.constant 0 : index
    %65 = vector.load %arg1[%c8, %c0_19, %c0_20] : memref<9x32x32xbf16, #tpu.memory_space<vmem>>, vector<1x32x32xbf16>
    %66 = vector.shape_cast %65 : vector<1x32x32xbf16> to vector<32x32xbf16>
    %67 = arith.extf %66 : vector<32x32xbf16> to vector<32x32xf32>
    %68 = vector.extract_strided_slice %1 {offsets = [8, 0, 0], sizes = [1, 1, 32], strides = [1, 1, 1]} : vector<9x1x32xf32> to vector<1x1x32xf32>
    %69 = vector.shape_cast %68 : vector<1x1x32xf32> to vector<1x32xf32>
    %70 = vector.broadcast %69 : vector<1x32xf32> to vector<32x32xf32>
    %71 = arith.mulf %67, %70 : vector<32x32xf32>
    %72 = arith.addf %64, %71 : vector<32x32xf32>
    %c0_21 = arith.constant 0 : index
    %c0_22 = arith.constant 0 : index
    %73 = vector.load %arg3[%c0_21, %c0_22] : memref<1x32xf32, #tpu.memory_space<vmem>>, vector<1x32xf32>
    %74 = vector.broadcast %73 : vector<1x32xf32> to vector<32x32xf32>
    %75 = arith.addf %72, %74 : vector<32x32xf32>
    %cst = arith.constant 0.000000e+00 : f32
    %76 = vector.broadcast %cst : f32 to vector<32x32xf32>
    %77 = arith.maximumf %75, %76 : vector<32x32xf32>
    %78 = arith.truncf %77 : vector<32x32xf32> to vector<32x32xbf16>
    %c0_23 = arith.constant 0 : index
    %c0_24 = arith.constant 0 : index
    %79 = vector.load %arg4[%c0_23, %c0_24] : memref<32x64xbf16, #tpu.memory_space<vmem>>, vector<32x64xbf16>
    %cst_25 = arith.constant dense<0.000000e+00> : vector<32x64xf32>
    %80 = tpu.matmul %78, %79, %cst_25 {dimension_numbers = #tpu.dot_dimension_numbers<[1], [0], [0], [1], [0, 0, 1, 1], [], []>} : vector<32x32xbf16>, vector<32x64xbf16>, vector<32x64xf32> -> vector<32x64xf32>
    %c0_26 = arith.constant 0 : index
    %c0_27 = arith.constant 0 : index
    %81 = vector.load %arg5[%c0_26, %c0_27] : memref<1x64xf32, #tpu.memory_space<vmem>>, vector<1x64xf32>
    %82 = vector.broadcast %81 : vector<1x64xf32> to vector<32x64xf32>
    %83 = arith.addf %80, %82 : vector<32x64xf32>
    %cst_28 = arith.constant 0.000000e+00 : f32
    %84 = vector.broadcast %cst_28 : f32 to vector<32x64xf32>
    %85 = arith.maximumf %83, %84 : vector<32x64xf32>
    %86 = arith.truncf %85 : vector<32x64xf32> to vector<32x64xbf16>
    %c0_29 = arith.constant 0 : index
    %c0_30 = arith.constant 0 : index
    %87 = vector.load %arg6[%c0_29, %c0_30] : memref<32x64xbf16, #tpu.memory_space<vmem>>, vector<32x64xbf16>
    tpu.vector_store %arg6[%c0_29, %c0_30], %86 {strides = array<i32>} : memref<32x64xbf16, #tpu.memory_space<vmem>>, vector<32x64xbf16>,
    return
  }
  func.func @transform_0(%arg0: i32) -> (i32, i32, i32) {
    %c0_i32 = arith.constant 0 : i32
    %c0_i32_0 = arith.constant 0 : i32
    %c0_i32_1 = arith.constant 0 : i32
    return %c0_i32, %arg0, %c0_i32_0 : i32, i32, i32
  }
  func.func @transform_1(%arg0: i32) -> (i32, i32, i32) {
    %c0_i32 = arith.constant 0 : i32
    %c0_i32_0 = arith.constant 0 : i32
    %c0_i32_1 = arith.constant 0 : i32
    %c0_i32_2 = arith.constant 0 : i32
    return %c0_i32, %c0_i32_0, %c0_i32_1 : i32, i32, i32
  }
  func.func @transform_2(%arg0: i32) -> (i32, i32) {
    %c0_i32 = arith.constant 0 : i32
    %c0_i32_0 = arith.constant 0 : i32
    %c0_i32_1 = arith.constant 0 : i32
    return %c0_i32, %c0_i32_0 : i32, i32
  }
  func.func @transform_3(%arg0: i32) -> (i32, i32) {
    %c0_i32 = arith.constant 0 : i32
    %c0_i32_0 = arith.constant 0 : i32
    %c0_i32_1 = arith.constant 0 : i32
    return %c0_i32, %c0_i32_0 : i32, i32
  }
  func.func @transform_4(%arg0: i32) -> (i32, i32) {
    %c0_i32 = arith.constant 0 : i32
    %c0_i32_0 = arith.constant 0 : i32
    %c0_i32_1 = arith.constant 0 : i32
    return %c0_i32, %c0_i32_0 : i32, i32
  }
  func.func @transform_5(%arg0: i32) -> (i32, i32) {
    %c0_i32 = arith.constant 0 : i32
    %c0_i32_0 = arith.constant 0 : i32
    return %arg0, %c0_i32 : i32, i32
  }
}

module attributes {stable_mosaic.version = 11 : i64} {
  func.func @_ds_block_kernel(%arg0: i32, %arg1: memref<9x32x64xbf16, #tpu.memory_space<vmem>>, %arg2: memref<9x1x64xbf16, #tpu.memory_space<vmem>>, %arg3: memref<1x64xf32, #tpu.memory_space<vmem>>, %arg4: memref<64x64xbf16, #tpu.memory_space<vmem>>, %arg5: memref<1x64xf32, #tpu.memory_space<vmem>>, %arg6: memref<32x64xbf16, #tpu.memory_space<vmem>>) attributes {dimension_semantics = [#tpu.dimension_semantics<parallel>], iteration_bounds = array<i64: 1>, scalar_prefetch = 0 : i64, scratch_operands = 0 : i64, tpu.core_type = #tpu.core_type<tc>, window_params = [{transform_indices = @transform_0, window_bounds = array<i64: 9, 32, 64>}, {pipeline_mode = #tpu.pipeline_mode<synchronous>, transform_indices = @transform_1, window_bounds = array<i64: 9, 1, 64>}, {pipeline_mode = #tpu.pipeline_mode<synchronous>, transform_indices = @transform_2, window_bounds = array<i64: 1, 64>}, {pipeline_mode = #tpu.pipeline_mode<synchronous>, transform_indices = @transform_3, window_bounds = array<i64: 64, 64>}, {pipeline_mode = #tpu.pipeline_mode<synchronous>, transform_indices = @transform_4, window_bounds = array<i64: 1, 64>}, {transform_indices = @transform_5, window_bounds = array<i64: 32, 64>}]} {
    %c0 = arith.constant 0 : index
    %c0_0 = arith.constant 0 : index
    %c0_1 = arith.constant 0 : index
    %0 = vector.load %arg2[%c0, %c0_0, %c0_1] : memref<9x1x64xbf16, #tpu.memory_space<vmem>>, vector<9x1x64xbf16>
    %1 = arith.extf %0 : vector<9x1x64xbf16> to vector<9x1x64xf32>
    %c0_2 = arith.constant 0 : index
    %c0_3 = arith.constant 0 : index
    %c0_4 = arith.constant 0 : index
    %2 = vector.load %arg1[%c0_2, %c0_3, %c0_4] : memref<9x32x64xbf16, #tpu.memory_space<vmem>>, vector<1x32x64xbf16>
    %3 = vector.shape_cast %2 : vector<1x32x64xbf16> to vector<32x64xbf16>
    %4 = arith.extf %3 : vector<32x64xbf16> to vector<32x64xf32>
    %5 = vector.extract_strided_slice %1 {offsets = [0, 0, 0], sizes = [1, 1, 64], strides = [1, 1, 1]} : vector<9x1x64xf32> to vector<1x1x64xf32>
    %6 = vector.shape_cast %5 : vector<1x1x64xf32> to vector<1x64xf32>
    %7 = vector.broadcast %6 : vector<1x64xf32> to vector<32x64xf32>
    %8 = arith.mulf %4, %7 : vector<32x64xf32>
    %c1 = arith.constant 1 : index
    %c0_5 = arith.constant 0 : index
    %c0_6 = arith.constant 0 : index
    %9 = vector.load %arg1[%c1, %c0_5, %c0_6] : memref<9x32x64xbf16, #tpu.memory_space<vmem>>, vector<1x32x64xbf16>
    %10 = vector.shape_cast %9 : vector<1x32x64xbf16> to vector<32x64xbf16>
    %11 = arith.extf %10 : vector<32x64xbf16> to vector<32x64xf32>
    %12 = vector.extract_strided_slice %1 {offsets = [1, 0, 0], sizes = [1, 1, 64], strides = [1, 1, 1]} : vector<9x1x64xf32> to vector<1x1x64xf32>
    %13 = vector.shape_cast %12 : vector<1x1x64xf32> to vector<1x64xf32>
    %14 = vector.broadcast %13 : vector<1x64xf32> to vector<32x64xf32>
    %15 = arith.mulf %11, %14 : vector<32x64xf32>
    %16 = arith.addf %8, %15 : vector<32x64xf32>
    %c2 = arith.constant 2 : index
    %c0_7 = arith.constant 0 : index
    %c0_8 = arith.constant 0 : index
    %17 = vector.load %arg1[%c2, %c0_7, %c0_8] : memref<9x32x64xbf16, #tpu.memory_space<vmem>>, vector<1x32x64xbf16>
    %18 = vector.shape_cast %17 : vector<1x32x64xbf16> to vector<32x64xbf16>
    %19 = arith.extf %18 : vector<32x64xbf16> to vector<32x64xf32>
    %20 = vector.extract_strided_slice %1 {offsets = [2, 0, 0], sizes = [1, 1, 64], strides = [1, 1, 1]} : vector<9x1x64xf32> to vector<1x1x64xf32>
    %21 = vector.shape_cast %20 : vector<1x1x64xf32> to vector<1x64xf32>
    %22 = vector.broadcast %21 : vector<1x64xf32> to vector<32x64xf32>
    %23 = arith.mulf %19, %22 : vector<32x64xf32>
    %24 = arith.addf %16, %23 : vector<32x64xf32>
    %c3 = arith.constant 3 : index
    %c0_9 = arith.constant 0 : index
    %c0_10 = arith.constant 0 : index
    %25 = vector.load %arg1[%c3, %c0_9, %c0_10] : memref<9x32x64xbf16, #tpu.memory_space<vmem>>, vector<1x32x64xbf16>
    %26 = vector.shape_cast %25 : vector<1x32x64xbf16> to vector<32x64xbf16>
    %27 = arith.extf %26 : vector<32x64xbf16> to vector<32x64xf32>
    %28 = vector.extract_strided_slice %1 {offsets = [3, 0, 0], sizes = [1, 1, 64], strides = [1, 1, 1]} : vector<9x1x64xf32> to vector<1x1x64xf32>
    %29 = vector.shape_cast %28 : vector<1x1x64xf32> to vector<1x64xf32>
    %30 = vector.broadcast %29 : vector<1x64xf32> to vector<32x64xf32>
    %31 = arith.mulf %27, %30 : vector<32x64xf32>
    %32 = arith.addf %24, %31 : vector<32x64xf32>
    %c4 = arith.constant 4 : index
    %c0_11 = arith.constant 0 : index
    %c0_12 = arith.constant 0 : index
    %33 = vector.load %arg1[%c4, %c0_11, %c0_12] : memref<9x32x64xbf16, #tpu.memory_space<vmem>>, vector<1x32x64xbf16>
    %34 = vector.shape_cast %33 : vector<1x32x64xbf16> to vector<32x64xbf16>
    %35 = arith.extf %34 : vector<32x64xbf16> to vector<32x64xf32>
    %36 = vector.extract_strided_slice %1 {offsets = [4, 0, 0], sizes = [1, 1, 64], strides = [1, 1, 1]} : vector<9x1x64xf32> to vector<1x1x64xf32>
    %37 = vector.shape_cast %36 : vector<1x1x64xf32> to vector<1x64xf32>
    %38 = vector.broadcast %37 : vector<1x64xf32> to vector<32x64xf32>
    %39 = arith.mulf %35, %38 : vector<32x64xf32>
    %40 = arith.addf %32, %39 : vector<32x64xf32>
    %c5 = arith.constant 5 : index
    %c0_13 = arith.constant 0 : index
    %c0_14 = arith.constant 0 : index
    %41 = vector.load %arg1[%c5, %c0_13, %c0_14] : memref<9x32x64xbf16, #tpu.memory_space<vmem>>, vector<1x32x64xbf16>
    %42 = vector.shape_cast %41 : vector<1x32x64xbf16> to vector<32x64xbf16>
    %43 = arith.extf %42 : vector<32x64xbf16> to vector<32x64xf32>
    %44 = vector.extract_strided_slice %1 {offsets = [5, 0, 0], sizes = [1, 1, 64], strides = [1, 1, 1]} : vector<9x1x64xf32> to vector<1x1x64xf32>
    %45 = vector.shape_cast %44 : vector<1x1x64xf32> to vector<1x64xf32>
    %46 = vector.broadcast %45 : vector<1x64xf32> to vector<32x64xf32>
    %47 = arith.mulf %43, %46 : vector<32x64xf32>
    %48 = arith.addf %40, %47 : vector<32x64xf32>
    %c6 = arith.constant 6 : index
    %c0_15 = arith.constant 0 : index
    %c0_16 = arith.constant 0 : index
    %49 = vector.load %arg1[%c6, %c0_15, %c0_16] : memref<9x32x64xbf16, #tpu.memory_space<vmem>>, vector<1x32x64xbf16>
    %50 = vector.shape_cast %49 : vector<1x32x64xbf16> to vector<32x64xbf16>
    %51 = arith.extf %50 : vector<32x64xbf16> to vector<32x64xf32>
    %52 = vector.extract_strided_slice %1 {offsets = [6, 0, 0], sizes = [1, 1, 64], strides = [1, 1, 1]} : vector<9x1x64xf32> to vector<1x1x64xf32>
    %53 = vector.shape_cast %52 : vector<1x1x64xf32> to vector<1x64xf32>
    %54 = vector.broadcast %53 : vector<1x64xf32> to vector<32x64xf32>
    %55 = arith.mulf %51, %54 : vector<32x64xf32>
    %56 = arith.addf %48, %55 : vector<32x64xf32>
    %c7 = arith.constant 7 : index
    %c0_17 = arith.constant 0 : index
    %c0_18 = arith.constant 0 : index
    %57 = vector.load %arg1[%c7, %c0_17, %c0_18] : memref<9x32x64xbf16, #tpu.memory_space<vmem>>, vector<1x32x64xbf16>
    %58 = vector.shape_cast %57 : vector<1x32x64xbf16> to vector<32x64xbf16>
    %59 = arith.extf %58 : vector<32x64xbf16> to vector<32x64xf32>
    %60 = vector.extract_strided_slice %1 {offsets = [7, 0, 0], sizes = [1, 1, 64], strides = [1, 1, 1]} : vector<9x1x64xf32> to vector<1x1x64xf32>
    %61 = vector.shape_cast %60 : vector<1x1x64xf32> to vector<1x64xf32>
    %62 = vector.broadcast %61 : vector<1x64xf32> to vector<32x64xf32>
    %63 = arith.mulf %59, %62 : vector<32x64xf32>
    %64 = arith.addf %56, %63 : vector<32x64xf32>
    %c8 = arith.constant 8 : index
    %c0_19 = arith.constant 0 : index
    %c0_20 = arith.constant 0 : index
    %65 = vector.load %arg1[%c8, %c0_19, %c0_20] : memref<9x32x64xbf16, #tpu.memory_space<vmem>>, vector<1x32x64xbf16>
    %66 = vector.shape_cast %65 : vector<1x32x64xbf16> to vector<32x64xbf16>
    %67 = arith.extf %66 : vector<32x64xbf16> to vector<32x64xf32>
    %68 = vector.extract_strided_slice %1 {offsets = [8, 0, 0], sizes = [1, 1, 64], strides = [1, 1, 1]} : vector<9x1x64xf32> to vector<1x1x64xf32>
    %69 = vector.shape_cast %68 : vector<1x1x64xf32> to vector<1x64xf32>
    %70 = vector.broadcast %69 : vector<1x64xf32> to vector<32x64xf32>
    %71 = arith.mulf %67, %70 : vector<32x64xf32>
    %72 = arith.addf %64, %71 : vector<32x64xf32>
    %c0_21 = arith.constant 0 : index
    %c0_22 = arith.constant 0 : index
    %73 = vector.load %arg3[%c0_21, %c0_22] : memref<1x64xf32, #tpu.memory_space<vmem>>, vector<1x64xf32>
    %74 = vector.broadcast %73 : vector<1x64xf32> to vector<32x64xf32>
    %75 = arith.addf %72, %74 : vector<32x64xf32>
    %cst = arith.constant 0.000000e+00 : f32
    %76 = vector.broadcast %cst : f32 to vector<32x64xf32>
    %77 = arith.maximumf %75, %76 : vector<32x64xf32>
    %78 = arith.truncf %77 : vector<32x64xf32> to vector<32x64xbf16>
    %c0_23 = arith.constant 0 : index
    %c0_24 = arith.constant 0 : index
    %79 = vector.load %arg4[%c0_23, %c0_24] : memref<64x64xbf16, #tpu.memory_space<vmem>>, vector<64x64xbf16>
    %cst_25 = arith.constant dense<0.000000e+00> : vector<32x64xf32>
    %80 = tpu.matmul %78, %79, %cst_25 {dimension_numbers = #tpu.dot_dimension_numbers<[1], [0], [0], [1], [0, 0, 1, 1], [], []>} : vector<32x64xbf16>, vector<64x64xbf16>, vector<32x64xf32> -> vector<32x64xf32>
    %c0_26 = arith.constant 0 : index
    %c0_27 = arith.constant 0 : index
    %81 = vector.load %arg5[%c0_26, %c0_27] : memref<1x64xf32, #tpu.memory_space<vmem>>, vector<1x64xf32>
    %82 = vector.broadcast %81 : vector<1x64xf32> to vector<32x64xf32>
    %83 = arith.addf %80, %82 : vector<32x64xf32>
    %cst_28 = arith.constant 0.000000e+00 : f32
    %84 = vector.broadcast %cst_28 : f32 to vector<32x64xf32>
    %85 = arith.maximumf %83, %84 : vector<32x64xf32>
    %86 = arith.truncf %85 : vector<32x64xf32> to vector<32x64xbf16>
    %c0_29 = arith.constant 0 : index
    %c0_30 = arith.constant 0 : index
    %87 = vector.load %arg6[%c0_29, %c0_30] : memref<32x64xbf16, #tpu.memory_space<vmem>>, vector<32x64xbf16>
    tpu.vector_store %arg6[%c0_29, %c0_30], %86 {strides = array<i32>} : memref<32x64xbf16, #tpu.memory_space<vmem>>, vector<32x64xbf16>,
    return
  }
  func.func @transform_0(%arg0: i32) -> (i32, i32, i32) {
    %c0_i32 = arith.constant 0 : i32
    %c0_i32_0 = arith.constant 0 : i32
    %c0_i32_1 = arith.constant 0 : i32
    return %c0_i32, %arg0, %c0_i32_0 : i32, i32, i32
  }
  func.func @transform_1(%arg0: i32) -> (i32, i32, i32) {
    %c0_i32 = arith.constant 0 : i32
    %c0_i32_0 = arith.constant 0 : i32
    %c0_i32_1 = arith.constant 0 : i32
    %c0_i32_2 = arith.constant 0 : i32
    return %c0_i32, %c0_i32_0, %c0_i32_1 : i32, i32, i32
  }
  func.func @transform_2(%arg0: i32) -> (i32, i32) {
    %c0_i32 = arith.constant 0 : i32
    %c0_i32_0 = arith.constant 0 : i32
    %c0_i32_1 = arith.constant 0 : i32
    return %c0_i32, %c0_i32_0 : i32, i32
  }
  func.func @transform_3(%arg0: i32) -> (i32, i32) {
    %c0_i32 = arith.constant 0 : i32
    %c0_i32_0 = arith.constant 0 : i32
    %c0_i32_1 = arith.constant 0 : i32
    return %c0_i32, %c0_i32_0 : i32, i32
  }
  func.func @transform_4(%arg0: i32) -> (i32, i32) {
    %c0_i32 = arith.constant 0 : i32
    %c0_i32_0 = arith.constant 0 : i32
    %c0_i32_1 = arith.constant 0 : i32
    return %c0_i32, %c0_i32_0 : i32, i32
  }
  func.func @transform_5(%arg0: i32) -> (i32, i32) {
    %c0_i32 = arith.constant 0 : i32
    %c0_i32_0 = arith.constant 0 : i32
    return %arg0, %c0_i32 : i32, i32
  }
}

module attributes {stable_mosaic.version = 11 : i64} {
  func.func @_ds_block_kernel(%arg0: i32, %arg1: memref<9x8x64xbf16, #tpu.memory_space<vmem>>, %arg2: memref<9x1x64xbf16, #tpu.memory_space<vmem>>, %arg3: memref<1x64xf32, #tpu.memory_space<vmem>>, %arg4: memref<64x128xbf16, #tpu.memory_space<vmem>>, %arg5: memref<1x128xf32, #tpu.memory_space<vmem>>, %arg6: memref<8x128xbf16, #tpu.memory_space<vmem>>) attributes {dimension_semantics = [#tpu.dimension_semantics<parallel>], iteration_bounds = array<i64: 1>, scalar_prefetch = 0 : i64, scratch_operands = 0 : i64, tpu.core_type = #tpu.core_type<tc>, window_params = [{transform_indices = @transform_0, window_bounds = array<i64: 9, 8, 64>}, {pipeline_mode = #tpu.pipeline_mode<synchronous>, transform_indices = @transform_1, window_bounds = array<i64: 9, 1, 64>}, {pipeline_mode = #tpu.pipeline_mode<synchronous>, transform_indices = @transform_2, window_bounds = array<i64: 1, 64>}, {pipeline_mode = #tpu.pipeline_mode<synchronous>, transform_indices = @transform_3, window_bounds = array<i64: 64, 128>}, {pipeline_mode = #tpu.pipeline_mode<synchronous>, transform_indices = @transform_4, window_bounds = array<i64: 1, 128>}, {transform_indices = @transform_5, window_bounds = array<i64: 8, 128>}]} {
    %c0 = arith.constant 0 : index
    %c0_0 = arith.constant 0 : index
    %c0_1 = arith.constant 0 : index
    %0 = vector.load %arg2[%c0, %c0_0, %c0_1] : memref<9x1x64xbf16, #tpu.memory_space<vmem>>, vector<9x1x64xbf16>
    %1 = arith.extf %0 : vector<9x1x64xbf16> to vector<9x1x64xf32>
    %c0_2 = arith.constant 0 : index
    %c0_3 = arith.constant 0 : index
    %c0_4 = arith.constant 0 : index
    %2 = vector.load %arg1[%c0_2, %c0_3, %c0_4] : memref<9x8x64xbf16, #tpu.memory_space<vmem>>, vector<1x8x64xbf16>
    %3 = vector.shape_cast %2 : vector<1x8x64xbf16> to vector<8x64xbf16>
    %4 = arith.extf %3 : vector<8x64xbf16> to vector<8x64xf32>
    %5 = vector.extract_strided_slice %1 {offsets = [0, 0, 0], sizes = [1, 1, 64], strides = [1, 1, 1]} : vector<9x1x64xf32> to vector<1x1x64xf32>
    %6 = vector.shape_cast %5 : vector<1x1x64xf32> to vector<1x64xf32>
    %7 = vector.broadcast %6 : vector<1x64xf32> to vector<8x64xf32>
    %8 = arith.mulf %4, %7 : vector<8x64xf32>
    %c1 = arith.constant 1 : index
    %c0_5 = arith.constant 0 : index
    %c0_6 = arith.constant 0 : index
    %9 = vector.load %arg1[%c1, %c0_5, %c0_6] : memref<9x8x64xbf16, #tpu.memory_space<vmem>>, vector<1x8x64xbf16>
    %10 = vector.shape_cast %9 : vector<1x8x64xbf16> to vector<8x64xbf16>
    %11 = arith.extf %10 : vector<8x64xbf16> to vector<8x64xf32>
    %12 = vector.extract_strided_slice %1 {offsets = [1, 0, 0], sizes = [1, 1, 64], strides = [1, 1, 1]} : vector<9x1x64xf32> to vector<1x1x64xf32>
    %13 = vector.shape_cast %12 : vector<1x1x64xf32> to vector<1x64xf32>
    %14 = vector.broadcast %13 : vector<1x64xf32> to vector<8x64xf32>
    %15 = arith.mulf %11, %14 : vector<8x64xf32>
    %16 = arith.addf %8, %15 : vector<8x64xf32>
    %c2 = arith.constant 2 : index
    %c0_7 = arith.constant 0 : index
    %c0_8 = arith.constant 0 : index
    %17 = vector.load %arg1[%c2, %c0_7, %c0_8] : memref<9x8x64xbf16, #tpu.memory_space<vmem>>, vector<1x8x64xbf16>
    %18 = vector.shape_cast %17 : vector<1x8x64xbf16> to vector<8x64xbf16>
    %19 = arith.extf %18 : vector<8x64xbf16> to vector<8x64xf32>
    %20 = vector.extract_strided_slice %1 {offsets = [2, 0, 0], sizes = [1, 1, 64], strides = [1, 1, 1]} : vector<9x1x64xf32> to vector<1x1x64xf32>
    %21 = vector.shape_cast %20 : vector<1x1x64xf32> to vector<1x64xf32>
    %22 = vector.broadcast %21 : vector<1x64xf32> to vector<8x64xf32>
    %23 = arith.mulf %19, %22 : vector<8x64xf32>
    %24 = arith.addf %16, %23 : vector<8x64xf32>
    %c3 = arith.constant 3 : index
    %c0_9 = arith.constant 0 : index
    %c0_10 = arith.constant 0 : index
    %25 = vector.load %arg1[%c3, %c0_9, %c0_10] : memref<9x8x64xbf16, #tpu.memory_space<vmem>>, vector<1x8x64xbf16>
    %26 = vector.shape_cast %25 : vector<1x8x64xbf16> to vector<8x64xbf16>
    %27 = arith.extf %26 : vector<8x64xbf16> to vector<8x64xf32>
    %28 = vector.extract_strided_slice %1 {offsets = [3, 0, 0], sizes = [1, 1, 64], strides = [1, 1, 1]} : vector<9x1x64xf32> to vector<1x1x64xf32>
    %29 = vector.shape_cast %28 : vector<1x1x64xf32> to vector<1x64xf32>
    %30 = vector.broadcast %29 : vector<1x64xf32> to vector<8x64xf32>
    %31 = arith.mulf %27, %30 : vector<8x64xf32>
    %32 = arith.addf %24, %31 : vector<8x64xf32>
    %c4 = arith.constant 4 : index
    %c0_11 = arith.constant 0 : index
    %c0_12 = arith.constant 0 : index
    %33 = vector.load %arg1[%c4, %c0_11, %c0_12] : memref<9x8x64xbf16, #tpu.memory_space<vmem>>, vector<1x8x64xbf16>
    %34 = vector.shape_cast %33 : vector<1x8x64xbf16> to vector<8x64xbf16>
    %35 = arith.extf %34 : vector<8x64xbf16> to vector<8x64xf32>
    %36 = vector.extract_strided_slice %1 {offsets = [4, 0, 0], sizes = [1, 1, 64], strides = [1, 1, 1]} : vector<9x1x64xf32> to vector<1x1x64xf32>
    %37 = vector.shape_cast %36 : vector<1x1x64xf32> to vector<1x64xf32>
    %38 = vector.broadcast %37 : vector<1x64xf32> to vector<8x64xf32>
    %39 = arith.mulf %35, %38 : vector<8x64xf32>
    %40 = arith.addf %32, %39 : vector<8x64xf32>
    %c5 = arith.constant 5 : index
    %c0_13 = arith.constant 0 : index
    %c0_14 = arith.constant 0 : index
    %41 = vector.load %arg1[%c5, %c0_13, %c0_14] : memref<9x8x64xbf16, #tpu.memory_space<vmem>>, vector<1x8x64xbf16>
    %42 = vector.shape_cast %41 : vector<1x8x64xbf16> to vector<8x64xbf16>
    %43 = arith.extf %42 : vector<8x64xbf16> to vector<8x64xf32>
    %44 = vector.extract_strided_slice %1 {offsets = [5, 0, 0], sizes = [1, 1, 64], strides = [1, 1, 1]} : vector<9x1x64xf32> to vector<1x1x64xf32>
    %45 = vector.shape_cast %44 : vector<1x1x64xf32> to vector<1x64xf32>
    %46 = vector.broadcast %45 : vector<1x64xf32> to vector<8x64xf32>
    %47 = arith.mulf %43, %46 : vector<8x64xf32>
    %48 = arith.addf %40, %47 : vector<8x64xf32>
    %c6 = arith.constant 6 : index
    %c0_15 = arith.constant 0 : index
    %c0_16 = arith.constant 0 : index
    %49 = vector.load %arg1[%c6, %c0_15, %c0_16] : memref<9x8x64xbf16, #tpu.memory_space<vmem>>, vector<1x8x64xbf16>
    %50 = vector.shape_cast %49 : vector<1x8x64xbf16> to vector<8x64xbf16>
    %51 = arith.extf %50 : vector<8x64xbf16> to vector<8x64xf32>
    %52 = vector.extract_strided_slice %1 {offsets = [6, 0, 0], sizes = [1, 1, 64], strides = [1, 1, 1]} : vector<9x1x64xf32> to vector<1x1x64xf32>
    %53 = vector.shape_cast %52 : vector<1x1x64xf32> to vector<1x64xf32>
    %54 = vector.broadcast %53 : vector<1x64xf32> to vector<8x64xf32>
    %55 = arith.mulf %51, %54 : vector<8x64xf32>
    %56 = arith.addf %48, %55 : vector<8x64xf32>
    %c7 = arith.constant 7 : index
    %c0_17 = arith.constant 0 : index
    %c0_18 = arith.constant 0 : index
    %57 = vector.load %arg1[%c7, %c0_17, %c0_18] : memref<9x8x64xbf16, #tpu.memory_space<vmem>>, vector<1x8x64xbf16>
    %58 = vector.shape_cast %57 : vector<1x8x64xbf16> to vector<8x64xbf16>
    %59 = arith.extf %58 : vector<8x64xbf16> to vector<8x64xf32>
    %60 = vector.extract_strided_slice %1 {offsets = [7, 0, 0], sizes = [1, 1, 64], strides = [1, 1, 1]} : vector<9x1x64xf32> to vector<1x1x64xf32>
    %61 = vector.shape_cast %60 : vector<1x1x64xf32> to vector<1x64xf32>
    %62 = vector.broadcast %61 : vector<1x64xf32> to vector<8x64xf32>
    %63 = arith.mulf %59, %62 : vector<8x64xf32>
    %64 = arith.addf %56, %63 : vector<8x64xf32>
    %c8 = arith.constant 8 : index
    %c0_19 = arith.constant 0 : index
    %c0_20 = arith.constant 0 : index
    %65 = vector.load %arg1[%c8, %c0_19, %c0_20] : memref<9x8x64xbf16, #tpu.memory_space<vmem>>, vector<1x8x64xbf16>
    %66 = vector.shape_cast %65 : vector<1x8x64xbf16> to vector<8x64xbf16>
    %67 = arith.extf %66 : vector<8x64xbf16> to vector<8x64xf32>
    %68 = vector.extract_strided_slice %1 {offsets = [8, 0, 0], sizes = [1, 1, 64], strides = [1, 1, 1]} : vector<9x1x64xf32> to vector<1x1x64xf32>
    %69 = vector.shape_cast %68 : vector<1x1x64xf32> to vector<1x64xf32>
    %70 = vector.broadcast %69 : vector<1x64xf32> to vector<8x64xf32>
    %71 = arith.mulf %67, %70 : vector<8x64xf32>
    %72 = arith.addf %64, %71 : vector<8x64xf32>
    %c0_21 = arith.constant 0 : index
    %c0_22 = arith.constant 0 : index
    %73 = vector.load %arg3[%c0_21, %c0_22] : memref<1x64xf32, #tpu.memory_space<vmem>>, vector<1x64xf32>
    %74 = vector.broadcast %73 : vector<1x64xf32> to vector<8x64xf32>
    %75 = arith.addf %72, %74 : vector<8x64xf32>
    %cst = arith.constant 0.000000e+00 : f32
    %76 = vector.broadcast %cst : f32 to vector<8x64xf32>
    %77 = arith.maximumf %75, %76 : vector<8x64xf32>
    %78 = arith.truncf %77 : vector<8x64xf32> to vector<8x64xbf16>
    %c0_23 = arith.constant 0 : index
    %c0_24 = arith.constant 0 : index
    %79 = vector.load %arg4[%c0_23, %c0_24] : memref<64x128xbf16, #tpu.memory_space<vmem>>, vector<64x128xbf16>
    %cst_25 = arith.constant dense<0.000000e+00> : vector<8x128xf32>
    %80 = tpu.matmul %78, %79, %cst_25 {dimension_numbers = #tpu.dot_dimension_numbers<[1], [0], [0], [1], [0, 0, 1, 1], [], []>} : vector<8x64xbf16>, vector<64x128xbf16>, vector<8x128xf32> -> vector<8x128xf32>
    %c0_26 = arith.constant 0 : index
    %c0_27 = arith.constant 0 : index
    %81 = vector.load %arg5[%c0_26, %c0_27] : memref<1x128xf32, #tpu.memory_space<vmem>>, vector<1x128xf32>
    %82 = vector.broadcast %81 : vector<1x128xf32> to vector<8x128xf32>
    %83 = arith.addf %80, %82 : vector<8x128xf32>
    %cst_28 = arith.constant 0.000000e+00 : f32
    %84 = vector.broadcast %cst_28 : f32 to vector<8x128xf32>
    %85 = arith.maximumf %83, %84 : vector<8x128xf32>
    %86 = arith.truncf %85 : vector<8x128xf32> to vector<8x128xbf16>
    %c0_29 = arith.constant 0 : index
    %c0_30 = arith.constant 0 : index
    %87 = vector.load %arg6[%c0_29, %c0_30] : memref<8x128xbf16, #tpu.memory_space<vmem>>, vector<8x128xbf16>
    tpu.vector_store %arg6[%c0_29, %c0_30], %86 {strides = array<i32>} : memref<8x128xbf16, #tpu.memory_space<vmem>>, vector<8x128xbf16>,
    return
  }
  func.func @transform_0(%arg0: i32) -> (i32, i32, i32) {
    %c0_i32 = arith.constant 0 : i32
    %c0_i32_0 = arith.constant 0 : i32
    %c0_i32_1 = arith.constant 0 : i32
    return %c0_i32, %arg0, %c0_i32_0 : i32, i32, i32
  }
  func.func @transform_1(%arg0: i32) -> (i32, i32, i32) {
    %c0_i32 = arith.constant 0 : i32
    %c0_i32_0 = arith.constant 0 : i32
    %c0_i32_1 = arith.constant 0 : i32
    %c0_i32_2 = arith.constant 0 : i32
    return %c0_i32, %c0_i32_0, %c0_i32_1 : i32, i32, i32
  }
  func.func @transform_2(%arg0: i32) -> (i32, i32) {
    %c0_i32 = arith.constant 0 : i32
    %c0_i32_0 = arith.constant 0 : i32
    %c0_i32_1 = arith.constant 0 : i32
    return %c0_i32, %c0_i32_0 : i32, i32
  }
  func.func @transform_3(%arg0: i32) -> (i32, i32) {
    %c0_i32 = arith.constant 0 : i32
    %c0_i32_0 = arith.constant 0 : i32
    %c0_i32_1 = arith.constant 0 : i32
    return %c0_i32, %c0_i32_0 : i32, i32
  }
  func.func @transform_4(%arg0: i32) -> (i32, i32) {
    %c0_i32 = arith.constant 0 : i32
    %c0_i32_0 = arith.constant 0 : i32
    %c0_i32_1 = arith.constant 0 : i32
    return %c0_i32, %c0_i32_0 : i32, i32
  }
  func.func @transform_5(%arg0: i32) -> (i32, i32) {
    %c0_i32 = arith.constant 0 : i32
    %c0_i32_0 = arith.constant 0 : i32
    return %arg0, %c0_i32 : i32, i32
  }
}

module attributes {stable_mosaic.version = 11 : i64} {
  func.func @_ds_block_kernel(%arg0: i32, %arg1: memref<9x8x128xbf16, #tpu.memory_space<vmem>>, %arg2: memref<9x1x128xbf16, #tpu.memory_space<vmem>>, %arg3: memref<1x128xf32, #tpu.memory_space<vmem>>, %arg4: memref<128x128xbf16, #tpu.memory_space<vmem>>, %arg5: memref<1x128xf32, #tpu.memory_space<vmem>>, %arg6: memref<8x128xbf16, #tpu.memory_space<vmem>>) attributes {dimension_semantics = [#tpu.dimension_semantics<parallel>], iteration_bounds = array<i64: 1>, scalar_prefetch = 0 : i64, scratch_operands = 0 : i64, tpu.core_type = #tpu.core_type<tc>, window_params = [{transform_indices = @transform_0, window_bounds = array<i64: 9, 8, 128>}, {pipeline_mode = #tpu.pipeline_mode<synchronous>, transform_indices = @transform_1, window_bounds = array<i64: 9, 1, 128>}, {pipeline_mode = #tpu.pipeline_mode<synchronous>, transform_indices = @transform_2, window_bounds = array<i64: 1, 128>}, {pipeline_mode = #tpu.pipeline_mode<synchronous>, transform_indices = @transform_3, window_bounds = array<i64: 128, 128>}, {pipeline_mode = #tpu.pipeline_mode<synchronous>, transform_indices = @transform_4, window_bounds = array<i64: 1, 128>}, {transform_indices = @transform_5, window_bounds = array<i64: 8, 128>}]} {
    %c0 = arith.constant 0 : index
    %c0_0 = arith.constant 0 : index
    %c0_1 = arith.constant 0 : index
    %0 = vector.load %arg2[%c0, %c0_0, %c0_1] : memref<9x1x128xbf16, #tpu.memory_space<vmem>>, vector<9x1x128xbf16>
    %1 = arith.extf %0 : vector<9x1x128xbf16> to vector<9x1x128xf32>
    %c0_2 = arith.constant 0 : index
    %c0_3 = arith.constant 0 : index
    %c0_4 = arith.constant 0 : index
    %2 = vector.load %arg1[%c0_2, %c0_3, %c0_4] : memref<9x8x128xbf16, #tpu.memory_space<vmem>>, vector<1x8x128xbf16>
    %3 = vector.shape_cast %2 : vector<1x8x128xbf16> to vector<8x128xbf16>
    %4 = arith.extf %3 : vector<8x128xbf16> to vector<8x128xf32>
    %5 = vector.extract_strided_slice %1 {offsets = [0, 0, 0], sizes = [1, 1, 128], strides = [1, 1, 1]} : vector<9x1x128xf32> to vector<1x1x128xf32>
    %6 = vector.shape_cast %5 : vector<1x1x128xf32> to vector<1x128xf32>
    %7 = vector.broadcast %6 : vector<1x128xf32> to vector<8x128xf32>
    %8 = arith.mulf %4, %7 : vector<8x128xf32>
    %c1 = arith.constant 1 : index
    %c0_5 = arith.constant 0 : index
    %c0_6 = arith.constant 0 : index
    %9 = vector.load %arg1[%c1, %c0_5, %c0_6] : memref<9x8x128xbf16, #tpu.memory_space<vmem>>, vector<1x8x128xbf16>
    %10 = vector.shape_cast %9 : vector<1x8x128xbf16> to vector<8x128xbf16>
    %11 = arith.extf %10 : vector<8x128xbf16> to vector<8x128xf32>
    %12 = vector.extract_strided_slice %1 {offsets = [1, 0, 0], sizes = [1, 1, 128], strides = [1, 1, 1]} : vector<9x1x128xf32> to vector<1x1x128xf32>
    %13 = vector.shape_cast %12 : vector<1x1x128xf32> to vector<1x128xf32>
    %14 = vector.broadcast %13 : vector<1x128xf32> to vector<8x128xf32>
    %15 = arith.mulf %11, %14 : vector<8x128xf32>
    %16 = arith.addf %8, %15 : vector<8x128xf32>
    %c2 = arith.constant 2 : index
    %c0_7 = arith.constant 0 : index
    %c0_8 = arith.constant 0 : index
    %17 = vector.load %arg1[%c2, %c0_7, %c0_8] : memref<9x8x128xbf16, #tpu.memory_space<vmem>>, vector<1x8x128xbf16>
    %18 = vector.shape_cast %17 : vector<1x8x128xbf16> to vector<8x128xbf16>
    %19 = arith.extf %18 : vector<8x128xbf16> to vector<8x128xf32>
    %20 = vector.extract_strided_slice %1 {offsets = [2, 0, 0], sizes = [1, 1, 128], strides = [1, 1, 1]} : vector<9x1x128xf32> to vector<1x1x128xf32>
    %21 = vector.shape_cast %20 : vector<1x1x128xf32> to vector<1x128xf32>
    %22 = vector.broadcast %21 : vector<1x128xf32> to vector<8x128xf32>
    %23 = arith.mulf %19, %22 : vector<8x128xf32>
    %24 = arith.addf %16, %23 : vector<8x128xf32>
    %c3 = arith.constant 3 : index
    %c0_9 = arith.constant 0 : index
    %c0_10 = arith.constant 0 : index
    %25 = vector.load %arg1[%c3, %c0_9, %c0_10] : memref<9x8x128xbf16, #tpu.memory_space<vmem>>, vector<1x8x128xbf16>
    %26 = vector.shape_cast %25 : vector<1x8x128xbf16> to vector<8x128xbf16>
    %27 = arith.extf %26 : vector<8x128xbf16> to vector<8x128xf32>
    %28 = vector.extract_strided_slice %1 {offsets = [3, 0, 0], sizes = [1, 1, 128], strides = [1, 1, 1]} : vector<9x1x128xf32> to vector<1x1x128xf32>
    %29 = vector.shape_cast %28 : vector<1x1x128xf32> to vector<1x128xf32>
    %30 = vector.broadcast %29 : vector<1x128xf32> to vector<8x128xf32>
    %31 = arith.mulf %27, %30 : vector<8x128xf32>
    %32 = arith.addf %24, %31 : vector<8x128xf32>
    %c4 = arith.constant 4 : index
    %c0_11 = arith.constant 0 : index
    %c0_12 = arith.constant 0 : index
    %33 = vector.load %arg1[%c4, %c0_11, %c0_12] : memref<9x8x128xbf16, #tpu.memory_space<vmem>>, vector<1x8x128xbf16>
    %34 = vector.shape_cast %33 : vector<1x8x128xbf16> to vector<8x128xbf16>
    %35 = arith.extf %34 : vector<8x128xbf16> to vector<8x128xf32>
    %36 = vector.extract_strided_slice %1 {offsets = [4, 0, 0], sizes = [1, 1, 128], strides = [1, 1, 1]} : vector<9x1x128xf32> to vector<1x1x128xf32>
    %37 = vector.shape_cast %36 : vector<1x1x128xf32> to vector<1x128xf32>
    %38 = vector.broadcast %37 : vector<1x128xf32> to vector<8x128xf32>
    %39 = arith.mulf %35, %38 : vector<8x128xf32>
    %40 = arith.addf %32, %39 : vector<8x128xf32>
    %c5 = arith.constant 5 : index
    %c0_13 = arith.constant 0 : index
    %c0_14 = arith.constant 0 : index
    %41 = vector.load %arg1[%c5, %c0_13, %c0_14] : memref<9x8x128xbf16, #tpu.memory_space<vmem>>, vector<1x8x128xbf16>
    %42 = vector.shape_cast %41 : vector<1x8x128xbf16> to vector<8x128xbf16>
    %43 = arith.extf %42 : vector<8x128xbf16> to vector<8x128xf32>
    %44 = vector.extract_strided_slice %1 {offsets = [5, 0, 0], sizes = [1, 1, 128], strides = [1, 1, 1]} : vector<9x1x128xf32> to vector<1x1x128xf32>
    %45 = vector.shape_cast %44 : vector<1x1x128xf32> to vector<1x128xf32>
    %46 = vector.broadcast %45 : vector<1x128xf32> to vector<8x128xf32>
    %47 = arith.mulf %43, %46 : vector<8x128xf32>
    %48 = arith.addf %40, %47 : vector<8x128xf32>
    %c6 = arith.constant 6 : index
    %c0_15 = arith.constant 0 : index
    %c0_16 = arith.constant 0 : index
    %49 = vector.load %arg1[%c6, %c0_15, %c0_16] : memref<9x8x128xbf16, #tpu.memory_space<vmem>>, vector<1x8x128xbf16>
    %50 = vector.shape_cast %49 : vector<1x8x128xbf16> to vector<8x128xbf16>
    %51 = arith.extf %50 : vector<8x128xbf16> to vector<8x128xf32>
    %52 = vector.extract_strided_slice %1 {offsets = [6, 0, 0], sizes = [1, 1, 128], strides = [1, 1, 1]} : vector<9x1x128xf32> to vector<1x1x128xf32>
    %53 = vector.shape_cast %52 : vector<1x1x128xf32> to vector<1x128xf32>
    %54 = vector.broadcast %53 : vector<1x128xf32> to vector<8x128xf32>
    %55 = arith.mulf %51, %54 : vector<8x128xf32>
    %56 = arith.addf %48, %55 : vector<8x128xf32>
    %c7 = arith.constant 7 : index
    %c0_17 = arith.constant 0 : index
    %c0_18 = arith.constant 0 : index
    %57 = vector.load %arg1[%c7, %c0_17, %c0_18] : memref<9x8x128xbf16, #tpu.memory_space<vmem>>, vector<1x8x128xbf16>
    %58 = vector.shape_cast %57 : vector<1x8x128xbf16> to vector<8x128xbf16>
    %59 = arith.extf %58 : vector<8x128xbf16> to vector<8x128xf32>
    %60 = vector.extract_strided_slice %1 {offsets = [7, 0, 0], sizes = [1, 1, 128], strides = [1, 1, 1]} : vector<9x1x128xf32> to vector<1x1x128xf32>
    %61 = vector.shape_cast %60 : vector<1x1x128xf32> to vector<1x128xf32>
    %62 = vector.broadcast %61 : vector<1x128xf32> to vector<8x128xf32>
    %63 = arith.mulf %59, %62 : vector<8x128xf32>
    %64 = arith.addf %56, %63 : vector<8x128xf32>
    %c8 = arith.constant 8 : index
    %c0_19 = arith.constant 0 : index
    %c0_20 = arith.constant 0 : index
    %65 = vector.load %arg1[%c8, %c0_19, %c0_20] : memref<9x8x128xbf16, #tpu.memory_space<vmem>>, vector<1x8x128xbf16>
    %66 = vector.shape_cast %65 : vector<1x8x128xbf16> to vector<8x128xbf16>
    %67 = arith.extf %66 : vector<8x128xbf16> to vector<8x128xf32>
    %68 = vector.extract_strided_slice %1 {offsets = [8, 0, 0], sizes = [1, 1, 128], strides = [1, 1, 1]} : vector<9x1x128xf32> to vector<1x1x128xf32>
    %69 = vector.shape_cast %68 : vector<1x1x128xf32> to vector<1x128xf32>
    %70 = vector.broadcast %69 : vector<1x128xf32> to vector<8x128xf32>
    %71 = arith.mulf %67, %70 : vector<8x128xf32>
    %72 = arith.addf %64, %71 : vector<8x128xf32>
    %c0_21 = arith.constant 0 : index
    %c0_22 = arith.constant 0 : index
    %73 = vector.load %arg3[%c0_21, %c0_22] : memref<1x128xf32, #tpu.memory_space<vmem>>, vector<1x128xf32>
    %74 = vector.broadcast %73 : vector<1x128xf32> to vector<8x128xf32>
    %75 = arith.addf %72, %74 : vector<8x128xf32>
    %cst = arith.constant 0.000000e+00 : f32
    %76 = vector.broadcast %cst : f32 to vector<8x128xf32>
    %77 = arith.maximumf %75, %76 : vector<8x128xf32>
    %78 = arith.truncf %77 : vector<8x128xf32> to vector<8x128xbf16>
    %c0_23 = arith.constant 0 : index
    %c0_24 = arith.constant 0 : index
    %79 = vector.load %arg4[%c0_23, %c0_24] : memref<128x128xbf16, #tpu.memory_space<vmem>>, vector<128x128xbf16>
    %cst_25 = arith.constant dense<0.000000e+00> : vector<8x128xf32>
    %80 = tpu.matmul %78, %79, %cst_25 {dimension_numbers = #tpu.dot_dimension_numbers<[1], [0], [0], [1], [0, 0, 1, 1], [], []>} : vector<8x128xbf16>, vector<128x128xbf16>, vector<8x128xf32> -> vector<8x128xf32>
    %c0_26 = arith.constant 0 : index
    %c0_27 = arith.constant 0 : index
    %81 = vector.load %arg5[%c0_26, %c0_27] : memref<1x128xf32, #tpu.memory_space<vmem>>, vector<1x128xf32>
    %82 = vector.broadcast %81 : vector<1x128xf32> to vector<8x128xf32>
    %83 = arith.addf %80, %82 : vector<8x128xf32>
    %cst_28 = arith.constant 0.000000e+00 : f32
    %84 = vector.broadcast %cst_28 : f32 to vector<8x128xf32>
    %85 = arith.maximumf %83, %84 : vector<8x128xf32>
    %86 = arith.truncf %85 : vector<8x128xf32> to vector<8x128xbf16>
    %c0_29 = arith.constant 0 : index
    %c0_30 = arith.constant 0 : index
    %87 = vector.load %arg6[%c0_29, %c0_30] : memref<8x128xbf16, #tpu.memory_space<vmem>>, vector<8x128xbf16>
    tpu.vector_store %arg6[%c0_29, %c0_30], %86 {strides = array<i32>} : memref<8x128xbf16, #tpu.memory_space<vmem>>, vector<8x128xbf16>,
    return
  }
  func.func @transform_0(%arg0: i32) -> (i32, i32, i32) {
    %c0_i32 = arith.constant 0 : i32
    %c0_i32_0 = arith.constant 0 : i32
    %c0_i32_1 = arith.constant 0 : i32
    return %c0_i32, %arg0, %c0_i32_0 : i32, i32, i32
  }
  func.func @transform_1(%arg0: i32) -> (i32, i32, i32) {
    %c0_i32 = arith.constant 0 : i32
    %c0_i32_0 = arith.constant 0 : i32
    %c0_i32_1 = arith.constant 0 : i32
    %c0_i32_2 = arith.constant 0 : i32
    return %c0_i32, %c0_i32_0, %c0_i32_1 : i32, i32, i32
  }
  func.func @transform_2(%arg0: i32) -> (i32, i32) {
    %c0_i32 = arith.constant 0 : i32
    %c0_i32_0 = arith.constant 0 : i32
    %c0_i32_1 = arith.constant 0 : i32
    return %c0_i32, %c0_i32_0 : i32, i32
  }
  func.func @transform_3(%arg0: i32) -> (i32, i32) {
    %c0_i32 = arith.constant 0 : i32
    %c0_i32_0 = arith.constant 0 : i32
    %c0_i32_1 = arith.constant 0 : i32
    return %c0_i32, %c0_i32_0 : i32, i32
  }
  func.func @transform_4(%arg0: i32) -> (i32, i32) {
    %c0_i32 = arith.constant 0 : i32
    %c0_i32_0 = arith.constant 0 : i32
    %c0_i32_1 = arith.constant 0 : i32
    return %c0_i32, %c0_i32_0 : i32, i32
  }
  func.func @transform_5(%arg0: i32) -> (i32, i32) {
    %c0_i32 = arith.constant 0 : i32
    %c0_i32_0 = arith.constant 0 : i32
    return %arg0, %c0_i32 : i32, i32
  }
}

module attributes {stable_mosaic.version = 11 : i64} {
  func.func @_avgpool_kernel(%arg0: i32, %arg1: memref<2x1x256xbf16, #tpu.memory_space<vmem>>, %arg2: memref<2x256xf32, #tpu.memory_space<vmem>>) attributes {dimension_semantics = [#tpu.dimension_semantics<arbitrary>], iteration_bounds = array<i64: 1>, scalar_prefetch = 0 : i64, scratch_operands = 0 : i64, tpu.core_type = #tpu.core_type<tc>, window_params = [{pipeline_mode = #tpu.pipeline_mode<synchronous>, transform_indices = @transform_0, window_bounds = array<i64: 2, 1, 256>}, {pipeline_mode = #tpu.pipeline_mode<synchronous>, transform_indices = @transform_1, window_bounds = array<i64: 2, 256>}]} {
    %c0 = arith.constant 0 : index
    %c0_0 = arith.constant 0 : index
    %c0_1 = arith.constant 0 : index
    %0 = vector.load %arg1[%c0, %c0_0, %c0_1] : memref<2x1x256xbf16, #tpu.memory_space<vmem>>, vector<2x1x256xbf16>
    %1 = arith.extf %0 : vector<2x1x256xbf16> to vector<2x1x256xf32>
    %cst = arith.constant dense<0.000000e+00> : vector<2x256xf32>
    %2 = vector.multi_reduction <add>, %1, %cst [1] : vector<2x1x256xf32> to vector<2x256xf32>
    %cst_2 = arith.constant 1.000000e+00 : f32
    %3 = vector.broadcast %cst_2 : f32 to vector<2x256xf32>
    %4 = arith.divf %2, %3 : vector<2x256xf32>
    %c0_3 = arith.constant 0 : index
    %c0_4 = arith.constant 0 : index
    %5 = vector.load %arg2[%c0_3, %c0_4] : memref<2x256xf32, #tpu.memory_space<vmem>>, vector<2x256xf32>
    tpu.vector_store %arg2[%c0_3, %c0_4], %4 {strides = array<i32>} : memref<2x256xf32, #tpu.memory_space<vmem>>, vector<2x256xf32>,
    return
  }
  func.func @transform_0(%arg0: i32) -> (i32, i32, i32) {
    %c0_i32 = arith.constant 0 : i32
    %c0_i32_0 = arith.constant 0 : i32
    %c0_i32_1 = arith.constant 0 : i32
    %c0_i32_2 = arith.constant 0 : i32
    return %c0_i32, %c0_i32_0, %c0_i32_1 : i32, i32, i32
  }
  func.func @transform_1(%arg0: i32) -> (i32, i32) {
    %c0_i32 = arith.constant 0 : i32
    %c0_i32_0 = arith.constant 0 : i32
    %c0_i32_1 = arith.constant 0 : i32
    return %c0_i32, %c0_i32_0 : i32, i32
  }
}

module attributes {stable_mosaic.version = 11 : i64} {
  func.func @_ds_block_kernel(%arg0: i32, %arg1: memref<9x2x128xbf16, #tpu.memory_space<vmem>>, %arg2: memref<9x1x128xbf16, #tpu.memory_space<vmem>>, %arg3: memref<1x128xf32, #tpu.memory_space<vmem>>, %arg4: memref<128x256xbf16, #tpu.memory_space<vmem>>, %arg5: memref<1x256xf32, #tpu.memory_space<vmem>>, %arg6: memref<2x256xbf16, #tpu.memory_space<vmem>>) attributes {dimension_semantics = [#tpu.dimension_semantics<parallel>], iteration_bounds = array<i64: 1>, scalar_prefetch = 0 : i64, scratch_operands = 0 : i64, tpu.core_type = #tpu.core_type<tc>, window_params = [{transform_indices = @transform_0, window_bounds = array<i64: 9, 2, 128>}, {pipeline_mode = #tpu.pipeline_mode<synchronous>, transform_indices = @transform_1, window_bounds = array<i64: 9, 1, 128>}, {pipeline_mode = #tpu.pipeline_mode<synchronous>, transform_indices = @transform_2, window_bounds = array<i64: 1, 128>}, {pipeline_mode = #tpu.pipeline_mode<synchronous>, transform_indices = @transform_3, window_bounds = array<i64: 128, 256>}, {pipeline_mode = #tpu.pipeline_mode<synchronous>, transform_indices = @transform_4, window_bounds = array<i64: 1, 256>}, {transform_indices = @transform_5, window_bounds = array<i64: 2, 256>}]} {
    %c0 = arith.constant 0 : index
    %c0_0 = arith.constant 0 : index
    %c0_1 = arith.constant 0 : index
    %0 = vector.load %arg2[%c0, %c0_0, %c0_1] : memref<9x1x128xbf16, #tpu.memory_space<vmem>>, vector<9x1x128xbf16>
    %1 = arith.extf %0 : vector<9x1x128xbf16> to vector<9x1x128xf32>
    %c0_2 = arith.constant 0 : index
    %c0_3 = arith.constant 0 : index
    %c0_4 = arith.constant 0 : index
    %2 = vector.load %arg1[%c0_2, %c0_3, %c0_4] : memref<9x2x128xbf16, #tpu.memory_space<vmem>>, vector<1x2x128xbf16>
    %3 = vector.shape_cast %2 : vector<1x2x128xbf16> to vector<2x128xbf16>
    %4 = arith.extf %3 : vector<2x128xbf16> to vector<2x128xf32>
    %5 = vector.extract_strided_slice %1 {offsets = [0, 0, 0], sizes = [1, 1, 128], strides = [1, 1, 1]} : vector<9x1x128xf32> to vector<1x1x128xf32>
    %6 = vector.shape_cast %5 : vector<1x1x128xf32> to vector<1x128xf32>
    %7 = vector.broadcast %6 : vector<1x128xf32> to vector<2x128xf32>
    %8 = arith.mulf %4, %7 : vector<2x128xf32>
    %c1 = arith.constant 1 : index
    %c0_5 = arith.constant 0 : index
    %c0_6 = arith.constant 0 : index
    %9 = vector.load %arg1[%c1, %c0_5, %c0_6] : memref<9x2x128xbf16, #tpu.memory_space<vmem>>, vector<1x2x128xbf16>
    %10 = vector.shape_cast %9 : vector<1x2x128xbf16> to vector<2x128xbf16>
    %11 = arith.extf %10 : vector<2x128xbf16> to vector<2x128xf32>
    %12 = vector.extract_strided_slice %1 {offsets = [1, 0, 0], sizes = [1, 1, 128], strides = [1, 1, 1]} : vector<9x1x128xf32> to vector<1x1x128xf32>
    %13 = vector.shape_cast %12 : vector<1x1x128xf32> to vector<1x128xf32>
    %14 = vector.broadcast %13 : vector<1x128xf32> to vector<2x128xf32>
    %15 = arith.mulf %11, %14 : vector<2x128xf32>
    %16 = arith.addf %8, %15 : vector<2x128xf32>
    %c2 = arith.constant 2 : index
    %c0_7 = arith.constant 0 : index
    %c0_8 = arith.constant 0 : index
    %17 = vector.load %arg1[%c2, %c0_7, %c0_8] : memref<9x2x128xbf16, #tpu.memory_space<vmem>>, vector<1x2x128xbf16>
    %18 = vector.shape_cast %17 : vector<1x2x128xbf16> to vector<2x128xbf16>
    %19 = arith.extf %18 : vector<2x128xbf16> to vector<2x128xf32>
    %20 = vector.extract_strided_slice %1 {offsets = [2, 0, 0], sizes = [1, 1, 128], strides = [1, 1, 1]} : vector<9x1x128xf32> to vector<1x1x128xf32>
    %21 = vector.shape_cast %20 : vector<1x1x128xf32> to vector<1x128xf32>
    %22 = vector.broadcast %21 : vector<1x128xf32> to vector<2x128xf32>
    %23 = arith.mulf %19, %22 : vector<2x128xf32>
    %24 = arith.addf %16, %23 : vector<2x128xf32>
    %c3 = arith.constant 3 : index
    %c0_9 = arith.constant 0 : index
    %c0_10 = arith.constant 0 : index
    %25 = vector.load %arg1[%c3, %c0_9, %c0_10] : memref<9x2x128xbf16, #tpu.memory_space<vmem>>, vector<1x2x128xbf16>
    %26 = vector.shape_cast %25 : vector<1x2x128xbf16> to vector<2x128xbf16>
    %27 = arith.extf %26 : vector<2x128xbf16> to vector<2x128xf32>
    %28 = vector.extract_strided_slice %1 {offsets = [3, 0, 0], sizes = [1, 1, 128], strides = [1, 1, 1]} : vector<9x1x128xf32> to vector<1x1x128xf32>
    %29 = vector.shape_cast %28 : vector<1x1x128xf32> to vector<1x128xf32>
    %30 = vector.broadcast %29 : vector<1x128xf32> to vector<2x128xf32>
    %31 = arith.mulf %27, %30 : vector<2x128xf32>
    %32 = arith.addf %24, %31 : vector<2x128xf32>
    %c4 = arith.constant 4 : index
    %c0_11 = arith.constant 0 : index
    %c0_12 = arith.constant 0 : index
    %33 = vector.load %arg1[%c4, %c0_11, %c0_12] : memref<9x2x128xbf16, #tpu.memory_space<vmem>>, vector<1x2x128xbf16>
    %34 = vector.shape_cast %33 : vector<1x2x128xbf16> to vector<2x128xbf16>
    %35 = arith.extf %34 : vector<2x128xbf16> to vector<2x128xf32>
    %36 = vector.extract_strided_slice %1 {offsets = [4, 0, 0], sizes = [1, 1, 128], strides = [1, 1, 1]} : vector<9x1x128xf32> to vector<1x1x128xf32>
    %37 = vector.shape_cast %36 : vector<1x1x128xf32> to vector<1x128xf32>
    %38 = vector.broadcast %37 : vector<1x128xf32> to vector<2x128xf32>
    %39 = arith.mulf %35, %38 : vector<2x128xf32>
    %40 = arith.addf %32, %39 : vector<2x128xf32>
    %c5 = arith.constant 5 : index
    %c0_13 = arith.constant 0 : index
    %c0_14 = arith.constant 0 : index
    %41 = vector.load %arg1[%c5, %c0_13, %c0_14] : memref<9x2x128xbf16, #tpu.memory_space<vmem>>, vector<1x2x128xbf16>
    %42 = vector.shape_cast %41 : vector<1x2x128xbf16> to vector<2x128xbf16>
    %43 = arith.extf %42 : vector<2x128xbf16> to vector<2x128xf32>
    %44 = vector.extract_strided_slice %1 {offsets = [5, 0, 0], sizes = [1, 1, 128], strides = [1, 1, 1]} : vector<9x1x128xf32> to vector<1x1x128xf32>
    %45 = vector.shape_cast %44 : vector<1x1x128xf32> to vector<1x128xf32>
    %46 = vector.broadcast %45 : vector<1x128xf32> to vector<2x128xf32>
    %47 = arith.mulf %43, %46 : vector<2x128xf32>
    %48 = arith.addf %40, %47 : vector<2x128xf32>
    %c6 = arith.constant 6 : index
    %c0_15 = arith.constant 0 : index
    %c0_16 = arith.constant 0 : index
    %49 = vector.load %arg1[%c6, %c0_15, %c0_16] : memref<9x2x128xbf16, #tpu.memory_space<vmem>>, vector<1x2x128xbf16>
    %50 = vector.shape_cast %49 : vector<1x2x128xbf16> to vector<2x128xbf16>
    %51 = arith.extf %50 : vector<2x128xbf16> to vector<2x128xf32>
    %52 = vector.extract_strided_slice %1 {offsets = [6, 0, 0], sizes = [1, 1, 128], strides = [1, 1, 1]} : vector<9x1x128xf32> to vector<1x1x128xf32>
    %53 = vector.shape_cast %52 : vector<1x1x128xf32> to vector<1x128xf32>
    %54 = vector.broadcast %53 : vector<1x128xf32> to vector<2x128xf32>
    %55 = arith.mulf %51, %54 : vector<2x128xf32>
    %56 = arith.addf %48, %55 : vector<2x128xf32>
    %c7 = arith.constant 7 : index
    %c0_17 = arith.constant 0 : index
    %c0_18 = arith.constant 0 : index
    %57 = vector.load %arg1[%c7, %c0_17, %c0_18] : memref<9x2x128xbf16, #tpu.memory_space<vmem>>, vector<1x2x128xbf16>
    %58 = vector.shape_cast %57 : vector<1x2x128xbf16> to vector<2x128xbf16>
    %59 = arith.extf %58 : vector<2x128xbf16> to vector<2x128xf32>
    %60 = vector.extract_strided_slice %1 {offsets = [7, 0, 0], sizes = [1, 1, 128], strides = [1, 1, 1]} : vector<9x1x128xf32> to vector<1x1x128xf32>
    %61 = vector.shape_cast %60 : vector<1x1x128xf32> to vector<1x128xf32>
    %62 = vector.broadcast %61 : vector<1x128xf32> to vector<2x128xf32>
    %63 = arith.mulf %59, %62 : vector<2x128xf32>
    %64 = arith.addf %56, %63 : vector<2x128xf32>
    %c8 = arith.constant 8 : index
    %c0_19 = arith.constant 0 : index
    %c0_20 = arith.constant 0 : index
    %65 = vector.load %arg1[%c8, %c0_19, %c0_20] : memref<9x2x128xbf16, #tpu.memory_space<vmem>>, vector<1x2x128xbf16>
    %66 = vector.shape_cast %65 : vector<1x2x128xbf16> to vector<2x128xbf16>
    %67 = arith.extf %66 : vector<2x128xbf16> to vector<2x128xf32>
    %68 = vector.extract_strided_slice %1 {offsets = [8, 0, 0], sizes = [1, 1, 128], strides = [1, 1, 1]} : vector<9x1x128xf32> to vector<1x1x128xf32>
    %69 = vector.shape_cast %68 : vector<1x1x128xf32> to vector<1x128xf32>
    %70 = vector.broadcast %69 : vector<1x128xf32> to vector<2x128xf32>
    %71 = arith.mulf %67, %70 : vector<2x128xf32>
    %72 = arith.addf %64, %71 : vector<2x128xf32>
    %c0_21 = arith.constant 0 : index
    %c0_22 = arith.constant 0 : index
    %73 = vector.load %arg3[%c0_21, %c0_22] : memref<1x128xf32, #tpu.memory_space<vmem>>, vector<1x128xf32>
    %74 = vector.broadcast %73 : vector<1x128xf32> to vector<2x128xf32>
    %75 = arith.addf %72, %74 : vector<2x128xf32>
    %cst = arith.constant 0.000000e+00 : f32
    %76 = vector.broadcast %cst : f32 to vector<2x128xf32>
    %77 = arith.maximumf %75, %76 : vector<2x128xf32>
    %78 = arith.truncf %77 : vector<2x128xf32> to vector<2x128xbf16>
    %c0_23 = arith.constant 0 : index
    %c0_24 = arith.constant 0 : index
    %79 = vector.load %arg4[%c0_23, %c0_24] : memref<128x256xbf16, #tpu.memory_space<vmem>>, vector<128x256xbf16>
    %cst_25 = arith.constant dense<0.000000e+00> : vector<2x256xf32>
    %80 = tpu.matmul %78, %79, %cst_25 {dimension_numbers = #tpu.dot_dimension_numbers<[1], [0], [0], [1], [0, 0, 1, 1], [], []>} : vector<2x128xbf16>, vector<128x256xbf16>, vector<2x256xf32> -> vector<2x256xf32>
    %c0_26 = arith.constant 0 : index
    %c0_27 = arith.constant 0 : index
    %81 = vector.load %arg5[%c0_26, %c0_27] : memref<1x256xf32, #tpu.memory_space<vmem>>, vector<1x256xf32>
    %82 = vector.broadcast %81 : vector<1x256xf32> to vector<2x256xf32>
    %83 = arith.addf %80, %82 : vector<2x256xf32>
    %cst_28 = arith.constant 0.000000e+00 : f32
    %84 = vector.broadcast %cst_28 : f32 to vector<2x256xf32>
    %85 = arith.maximumf %83, %84 : vector<2x256xf32>
    %86 = arith.truncf %85 : vector<2x256xf32> to vector<2x256xbf16>
    %c0_29 = arith.constant 0 : index
    %c0_30 = arith.constant 0 : index
    %87 = vector.load %arg6[%c0_29, %c0_30] : memref<2x256xbf16, #tpu.memory_space<vmem>>, vector<2x256xbf16>
    tpu.vector_store %arg6[%c0_29, %c0_30], %86 {strides = array<i32>} : memref<2x256xbf16, #tpu.memory_space<vmem>>, vector<2x256xbf16>,
    return
  }
  func.func @transform_0(%arg0: i32) -> (i32, i32, i32) {
    %c0_i32 = arith.constant 0 : i32
    %c0_i32_0 = arith.constant 0 : i32
    %c0_i32_1 = arith.constant 0 : i32
    return %c0_i32, %arg0, %c0_i32_0 : i32, i32, i32
  }
  func.func @transform_1(%arg0: i32) -> (i32, i32, i32) {
    %c0_i32 = arith.constant 0 : i32
    %c0_i32_0 = arith.constant 0 : i32
    %c0_i32_1 = arith.constant 0 : i32
    %c0_i32_2 = arith.constant 0 : i32
    return %c0_i32, %c0_i32_0, %c0_i32_1 : i32, i32, i32
  }
  func.func @transform_2(%arg0: i32) -> (i32, i32) {
    %c0_i32 = arith.constant 0 : i32
    %c0_i32_0 = arith.constant 0 : i32
    %c0_i32_1 = arith.constant 0 : i32
    return %c0_i32, %c0_i32_0 : i32, i32
  }
  func.func @transform_3(%arg0: i32) -> (i32, i32) {
    %c0_i32 = arith.constant 0 : i32
    %c0_i32_0 = arith.constant 0 : i32
    %c0_i32_1 = arith.constant 0 : i32
    return %c0_i32, %c0_i32_0 : i32, i32
  }
  func.func @transform_4(%arg0: i32) -> (i32, i32) {
    %c0_i32 = arith.constant 0 : i32
    %c0_i32_0 = arith.constant 0 : i32
    %c0_i32_1 = arith.constant 0 : i32
    return %c0_i32, %c0_i32_0 : i32, i32
  }
  func.func @transform_5(%arg0: i32) -> (i32, i32) {
    %c0_i32 = arith.constant 0 : i32
    %c0_i32_0 = arith.constant 0 : i32
    return %arg0, %c0_i32 : i32, i32
  }
}

module attributes {stable_mosaic.version = 11 : i64} {
  func.func @_matmul_bias_kernel(%arg0: i32, %arg1: memref<2x256xf32, #tpu.memory_space<vmem>>, %arg2: memref<256x16xf32, #tpu.memory_space<vmem>>, %arg3: memref<1x16xf32, #tpu.memory_space<vmem>>, %arg4: memref<2x16xf32, #tpu.memory_space<vmem>>) attributes {dimension_semantics = [#tpu.dimension_semantics<parallel>], iteration_bounds = array<i64: 1>, scalar_prefetch = 0 : i64, scratch_operands = 0 : i64, tpu.core_type = #tpu.core_type<tc>, window_params = [{transform_indices = @transform_0, window_bounds = array<i64: 2, 256>}, {pipeline_mode = #tpu.pipeline_mode<synchronous>, transform_indices = @transform_1, window_bounds = array<i64: 256, 16>}, {pipeline_mode = #tpu.pipeline_mode<synchronous>, transform_indices = @transform_2, window_bounds = array<i64: 1, 16>}, {transform_indices = @transform_3, window_bounds = array<i64: 2, 16>}]} {
    %c0 = arith.constant 0 : index
    %c0_0 = arith.constant 0 : index
    %0 = vector.load %arg1[%c0, %c0_0] : memref<2x256xf32, #tpu.memory_space<vmem>>, vector<2x256xf32>
    %c0_1 = arith.constant 0 : index
    %c0_2 = arith.constant 0 : index
    %1 = vector.load %arg2[%c0_1, %c0_2] : memref<256x16xf32, #tpu.memory_space<vmem>>, vector<256x16xf32>
    %cst = arith.constant dense<0.000000e+00> : vector<2x16xf32>
    %2 = tpu.matmul %0, %1, %cst {dimension_numbers = #tpu.dot_dimension_numbers<[1], [0], [0], [1], [0, 0, 1, 1], [], []>} : vector<2x256xf32>, vector<256x16xf32>, vector<2x16xf32> -> vector<2x16xf32>
    %c0_3 = arith.constant 0 : index
    %c0_4 = arith.constant 0 : index
    %3 = vector.load %arg3[%c0_3, %c0_4] : memref<1x16xf32, #tpu.memory_space<vmem>>, vector<1x16xf32>
    %4 = vector.broadcast %3 : vector<1x16xf32> to vector<2x16xf32>
    %5 = arith.addf %2, %4 : vector<2x16xf32>
    %c0_5 = arith.constant 0 : index
    %c0_6 = arith.constant 0 : index
    %6 = vector.load %arg4[%c0_5, %c0_6] : memref<2x16xf32, #tpu.memory_space<vmem>>, vector<2x16xf32>
    tpu.vector_store %arg4[%c0_5, %c0_6], %5 {strides = array<i32>} : memref<2x16xf32, #tpu.memory_space<vmem>>, vector<2x16xf32>,
    return
  }
  func.func @transform_0(%arg0: i32) -> (i32, i32) {
    %c0_i32 = arith.constant 0 : i32
    %c0_i32_0 = arith.constant 0 : i32
    return %arg0, %c0_i32 : i32, i32
  }
  func.func @transform_1(%arg0: i32) -> (i32, i32) {
    %c0_i32 = arith.constant 0 : i32
    %c0_i32_0 = arith.constant 0 : i32
    %c0_i32_1 = arith.constant 0 : i32
    return %c0_i32, %c0_i32_0 : i32, i32
  }
  func.func @transform_2(%arg0: i32) -> (i32, i32) {
    %c0_i32 = arith.constant 0 : i32
    %c0_i32_0 = arith.constant 0 : i32
    %c0_i32_1 = arith.constant 0 : i32
    return %c0_i32, %c0_i32_0 : i32, i32
  }
  func.func @transform_3(%arg0: i32) -> (i32, i32) {
    %c0_i32 = arith.constant 0 : i32
    %c0_i32_0 = arith.constant 0 : i32
    return %arg0, %c0_i32 : i32, i32
  }
}

</mosaic_0001>

<bundles_post_ra>
// kernel: mobilenet_forward.15
= control target key start
LH: loop header
LB: loop body
LE: loop exit
PB: predicated region body
PF: predicated region fallthrough
CT: control target
= control target key end

     0   :  { %vm358_vm0 = vcmask 1044480   ;;  %vm359_vm1 = vcmask 1045504   ;;  %vm261_vm2 = vcmask 220160   ;;  %v1379_v1 = vmov 65535   ;;  %s1859_s1 = inlined_call_operand.vmem [shape: bf16[27,8], index: 1, kind: input, shape index: {}]   ;;  %s1860_s0 = inlined_call_operand.vmem [shape: bf16[512,27], index: 0, kind: input, shape index: {}]   ;;  %s1861_s2 = inlined_call_operand.vmem [shape: f32[1,8], index: 2, kind: input, shape index: {}]   ;;  %s1862_s3 = inlined_call_operand.vmem [shape: bf16[512,8], index: 3, kind: output, shape index: {}]  }
   0x1   :  { %v1345_v0 = vld [vmem:[%s1859_s1] sm:$0xff]   ;;  %v360_v2 = vsel %vm358_vm0, 4294967295, %v1379_v1  ;;  %v1346_v3 = vld [vmem:[%s1859_s1 + $0x8] sm:$0x3f]   ;;  %v1351_v10 = vld [vmem:[%s1860_s0 + $0x10] sm:$0xff]   ;;  %vm974_vm3 = vcmask 60416  }
   0x2   :  { %1272 = vmatprep.subr.bf16.mxu0 %v1345_v0  ;;  %1340 = vmatprep.subr.bf16.mxu1 %v1345_v0  ;;  %v361_v4 = vsel %vm359_vm1, %v360_v2, 0  ;;  %v1347_v5 = vld [vmem:[%s1860_s0] sm:$0xff]   ;;  %v1349_v8 = vld [vmem:[%s1860_s0 + $0x8] sm:$0xff]   ;;  %v1352_v11 = vld [vmem:[%s1860_s0 + $0x90] sm:$0xff]  }
   0x3   :  { %1273 = vmatpush3.bf16.msra.mxu0 %v1345_v0  ;;  %1342 = vmatpush3.bf16.msra.mxu1 %v1345_v0  ;;  %v363_v6 = vand.u32 %v1346_v3, %v361_v4  ;;  %v1348_v7 = vld [vmem:[%s1860_s0 + $0x80] sm:$0xff]   ;;  %v1350_v9 = vld [vmem:[%s1860_s0 + $0x88] sm:$0xff]   ;;  %v1353_v12 = vld [vmem:[%s1860_s0 + $0x18] sm:$0xff]  }
   0x4   :  { %1276 = vmatprep.mubr.msk.bf16.mxu0 %vm261_vm2, %v1347_v5  ;;  %1308 = vmatprep.mubr.msk.bf16.mxu1 %vm261_vm2, %v1348_v7  ;;  %v1354_v13 = vld [vmem:[%s1860_s0 + $0x98] sm:$0xff]   ;;  %v1355_v14 = vld [vmem:[%s1860_s0 + $0x20] sm:$0xff]   ;;  %v1357_v16 = vld [vmem:[%s1860_s0 + $0x28] sm:$0xff]  }
   0x5   :  { %1274 = vmatprep.subr.bf16.mxu0 %v363_v6  ;;  %1341 = vmatprep.subr.bf16.mxu1 %v363_v6  ;;  %v1356_v15 = vld [vmem:[%s1860_s0 + $0xa0] sm:$0xff]   ;;  %v1358_v17 = vld [vmem:[%s1860_s0 + $0xa8] sm:$0xff]   ;;  %v1359_v18 = vld [vmem:[%s1860_s0 + $0x30] sm:$0xff]  }
   0x6   :  { %v1360_v19 = vld [vmem:[%s1860_s0 + $0xb0] sm:$0xff]   ;;  %v1361_v20 = vld [vmem:[%s1860_s0 + $0x38] sm:$0xff]   ;;  %v1363_v22 = vld [vmem:[%s1860_s0 + $0x40] sm:$0xff]  }
   0x7   :  { %1275 = vmatpush3.bf16.msra.mxu0 %v363_v6  ;;  %1343 = vmatpush3.bf16.msra.mxu1 %v363_v6  ;;  %v1362_v21 = vld [vmem:[%s1860_s0 + $0xb8] sm:$0xff]   ;;  %v1364_v23 = vld [vmem:[%s1860_s0 + $0xc0] sm:$0xff]   ;;  %v1365_v24 = vld [vmem:[%s1860_s0 + $0x48] sm:$0xff]  }
   0x8   :  { %v1366_v25 = vld [vmem:[%s1860_s0 + $0xc8] sm:$0xff]   ;;  %v1367_v26 = vld [vmem:[%s1860_s0 + $0x50] sm:$0xff]   ;;  %v1369_v28 = vld [vmem:[%s1860_s0 + $0x58] sm:$0xff]  }
   0x9   :  { %v1368_v27 = vld [vmem:[%s1860_s0 + $0xd0] sm:$0xff]   ;;  %v1370_v29 = vld [vmem:[%s1860_s0 + $0xd8] sm:$0xff]   ;;  %v1371_v30 = vld [vmem:[%s1860_s0 + $0x60] sm:$0xff]  }
   0xa   :  { %1277 = vmatmul.mubr.msk.bf16.vlgmr.msra.gmra.mrb[0].mxu0 %vm261_vm2, %v1349_v8  ;;  %1309 = vmatmul.mubr.msk.bf16.vlgmr.msra.gmra.mrb[0].mxu1 %vm261_vm2, %v1350_v9  ;;  %v1372_v31 = vld [vmem:[%s1860_s0 + $0xe0] sm:$0xff]   ;;  %v1373_v32 = vld [vmem:[%s1860_s0 + $0x68] sm:$0xff]   ;;  %v1375_v34 = vld [vmem:[%s1860_s0 + $0x70] sm:$0xff]  }
   0xb   :  { %1280 = vmatprep.mubr.msk.bf16.mxu0 %vm261_vm2, %v1351_v10  ;;  %1312 = vmatprep.mubr.msk.bf16.mxu1 %vm261_vm2, %v1352_v11  ;;  %v1374_v33 = vld [vmem:[%s1860_s0 + $0xe8] sm:$0xff]   ;;  %v1376_v35 = vld [vmem:[%s1860_s0 + $0xf0] sm:$0xff]   ;;  %v1377_v36 = vld [vmem:[%s1860_s0 + $0x78] sm:$0xff]  }
   0xc   :  { %v1378_v37 = vld [vmem:[%s1860_s0 + $0xf8] sm:$0xff]   ;;  %v1537_v38 = vld [vmem:[%s1861_s2] ss:$0 sm:$0xff] }
  0x12   :  { %1281 = vmatmul.mubr.msk.bf16.gmra.mrb[4].mxu0 %vm261_vm2, %v1353_v12  ;;  %1313 = vmatmul.mubr.msk.bf16.gmra.mrb[4].mxu1 %vm261_vm2, %v1354_v13 }
  0x13   :  { %1284 = vmatprep.mubr.msk.bf16.mxu0 %vm261_vm2, %v1355_v14  ;;  %1316 = vmatprep.mubr.msk.bf16.mxu1 %vm261_vm2, %v1356_v15 }
  0x1a   :  { %1285 = vmatmul.mubr.msk.bf16.gmra.mrb[8].mxu0 %vm261_vm2, %v1357_v16  ;;  %1317 = vmatmul.mubr.msk.bf16.gmra.mrb[8].mxu1 %vm261_vm2, %v1358_v17 }
  0x1b   :  { %1288 = vmatprep.mubr.msk.bf16.mxu0 %vm261_vm2, %v1359_v18  ;;  %1320 = vmatprep.mubr.msk.bf16.mxu1 %vm261_vm2, %v1360_v19 }
  0x22   :  { %1289 = vmatmul.mubr.msk.bf16.gmra.mrb[12].mxu0 %vm261_vm2, %v1361_v20  ;;  %1321 = vmatmul.mubr.msk.bf16.gmra.mrb[12].mxu1 %vm261_vm2, %v1362_v21 }
  0x23   :  { %1292 = vmatprep.mubr.msk.bf16.mxu0 %vm261_vm2, %v1363_v22  ;;  %1324 = vmatprep.mubr.msk.bf16.mxu1 %vm261_vm2, %v1364_v23 }
  0x2a   :  { %1293 = vmatmul.mubr.msk.bf16.gmra.mrb[16].mxu0 %vm261_vm2, %v1365_v24  ;;  %1325 = vmatmul.mubr.msk.bf16.gmra.mrb[16].mxu1 %vm261_vm2, %v1366_v25 }
  0x2b   :  { %1296 = vmatprep.mubr.msk.bf16.mxu0 %vm261_vm2, %v1367_v26  ;;  %1328 = vmatprep.mubr.msk.bf16.mxu1 %vm261_vm2, %v1368_v27 }
  0x32   :  { %1297 = vmatmul.mubr.msk.bf16.gmra.mrb[20].mxu0 %vm261_vm2, %v1369_v28  ;;  %1329 = vmatmul.mubr.msk.bf16.gmra.mrb[20].mxu1 %vm261_vm2, %v1370_v29 }
  0x33   :  { %1300 = vmatprep.mubr.msk.bf16.mxu0 %vm261_vm2, %v1371_v30  ;;  %1332 = vmatprep.mubr.msk.bf16.mxu1 %vm261_vm2, %v1372_v31 }
  0x3a   :  { %1301 = vmatmul.mubr.msk.bf16.gmra.mrb[24].mxu0 %vm261_vm2, %v1373_v32  ;;  %1333 = vmatmul.mubr.msk.bf16.gmra.mrb[24].mxu1 %vm261_vm2, %v1374_v33 }
  0x3b   :  { %1304 = vmatprep.mubr.msk.bf16.mxu0 %vm261_vm2, %v1375_v34  ;;  %1336 = vmatprep.mubr.msk.bf16.mxu1 %vm261_vm2, %v1376_v35 }
  0x42   :  { %1305 = vmatmul.mubr.msk.bf16.gmra.mrb[28].mxu0 %vm261_vm2, %v1377_v36  ;;  %1337 = vmatmul.mubr.msk.bf16.gmra.mrb[28].mxu1 %vm261_vm2, %v1378_v37 }
  0xdd   :  { %v1278_v39 = vpop.f32.mrb[0].mxu0  ;;  %v1310_v40 = vpop.f32.mrb[0].mxu1 }
  0xde   :  { %v408_v41 = vadd.f32 %v1278_v39, %v1537_v38  ;;  %v536_v42 = vadd.f32 %v1310_v40, %v1537_v38  ;;  %v399_v43 = vpop.f32.mrb[1].mxu0  ;;  %v527_v44 = vpop.f32.mrb[1].mxu1 }
  0xdf   :  { %v400_v45 = vadd.f32 %v1537_v38, %v399_v43  ;;  %v528_v46 = vadd.f32 %v1537_v38, %v527_v44  ;;  %v1279_v47 = vpop.f32.mrb[2].mxu0  ;;  %v1311_v48 = vpop.f32.mrb[2].mxu1 }
  0xe0   :  { %v656_v49 = vmax.f32 %v408_v41, 0.0  ;;  %v688_v50 = vmax.f32 %v536_v42, 0.0  ;;  %v411_v51 = vadd.f32 %v1279_v47, %v1537_v38  ;;  %v539_v52 = vadd.f32 %v1311_v48, %v1537_v38  ;;  %v402_v53 = vpop.f32.mrb[3].mxu0  ;;  %v530_v54 = vpop.f32.mrb[3].mxu1 }
  0xe1   :  { %v654_v55 = vmax.f32 %v400_v45, 0.0  ;;  %v686_v56 = vmax.f32 %v528_v46, 0.0  ;;  %v403_v57 = vadd.f32 %v1537_v38, %v402_v53  ;;  %v531_v58 = vadd.f32 %v1537_v38, %v530_v54 }
  0xe2   :  { %v1176_v59 = vpack.c.bf16 %v656_v49, %v656_v49  ;;  %v1208_v60 = vpack.c.bf16 %v688_v50, %v688_v50  ;;  %v657_v61 = vmax.f32 %v411_v51, 0.0  ;;  %v689_v62 = vmax.f32 %v539_v52, 0.0 }
  0xe3   :  { %v1174_v63 = vpack.c.bf16 %v654_v55, %v654_v55  ;;  %v1206_v0 = vpack.c.bf16 %v686_v56, %v686_v56  ;;  %v655_v1 = vmax.f32 %v403_v57, 0.0  ;;  %v687_v2 = vmax.f32 %v531_v58, 0.0 }
  0xe4   :  { %977 = vst.msk [vmem:[%s1862_s3 + $0x8] sm:$0xf] %vm974_vm3, %v1176_v59  ;;  %1009 = vst.msk [vmem:[%s1862_s3 + $0x88] sm:$0xf] %vm974_vm3, %v1208_v60  ;;  %v1177_v3 = vpack.c.bf16 %v657_v61, %v657_v61  ;;  %v1209_v4 = vpack.c.bf16 %v689_v62, %v689_v62 }
  0xe5   :  { %975 = vst.msk [vmem:[%s1862_s3] sm:$0xf] %vm974_vm3, %v1174_v63  ;;  %1007 = vst.msk [vmem:[%s1862_s3 + $0x80] sm:$0xf] %vm974_vm3, %v1206_v0  ;;  %v1175_v5 = vpack.c.bf16 %v655_v1, %v655_v1  ;;  %v1207_v6 = vpack.c.bf16 %v687_v2, %v687_v2  ;;  %v1282_v7 = vpop.f32.mrb[4].mxu0  ;;  %v1314_v8 = vpop.f32.mrb[4].mxu1 }
  0xe6   :  { %978 = vst.msk [vmem:[%s1862_s3 + $0xc] sm:$0xf] %vm974_vm3, %v1177_v3  ;;  %1010 = vst.msk [vmem:[%s1862_s3 + $0x8c] sm:$0xf] %vm974_vm3, %v1209_v4  ;;  %v424_v9 = vadd.f32 %v1282_v7, %v1537_v38  ;;  %v552_v10 = vadd.f32 %v1314_v8, %v1537_v38  ;;  %v415_v11 = vpop.f32.mrb[5].mxu0  ;;  %v543_v12 = vpop.f32.mrb[5].mxu1 }
  0xe7   :  { %976 = vst.msk [vmem:[%s1862_s3 + $0x4] sm:$0xf] %vm974_vm3, %v1175_v5  ;;  %1008 = vst.msk [vmem:[%s1862_s3 + $0x84] sm:$0xf] %vm974_vm3, %v1207_v6  ;;  %v416_v13 = vadd.f32 %v1537_v38, %v415_v11  ;;  %v544_v14 = vadd.f32 %v1537_v38, %v543_v12  ;;  %v1283_v15 = vpop.f32.mrb[6].mxu0  ;;  %v1315_v16 = vpop.f32.mrb[6].mxu1 }
  0xe8   :  { %v660_v17 = vmax.f32 %v424_v9, 0.0  ;;  %v692_v18 = vmax.f32 %v552_v10, 0.0  ;;  %v427_v19 = vadd.f32 %v1283_v15, %v1537_v38  ;;  %v555_v20 = vadd.f32 %v1315_v16, %v1537_v38  ;;  %v418_v21 = vpop.f32.mrb[7].mxu0  ;;  %v546_v22 = vpop.f32.mrb[7].mxu1 }
  0xe9   :  { %v658_v23 = vmax.f32 %v416_v13, 0.0  ;;  %v690_v24 = vmax.f32 %v544_v14, 0.0  ;;  %v419_v25 = vadd.f32 %v1537_v38, %v418_v21  ;;  %v547_v26 = vadd.f32 %v1537_v38, %v546_v22 }
  0xea   :  { %v1180_v27 = vpack.c.bf16 %v660_v17, %v660_v17  ;;  %v1212_v28 = vpack.c.bf16 %v692_v18, %v692_v18  ;;  %v661_v29 = vmax.f32 %v427_v19, 0.0  ;;  %v693_v30 = vmax.f32 %v555_v20, 0.0 }
  0xeb   :  { %v1178_v31 = vpack.c.bf16 %v658_v23, %v658_v23  ;;  %v1210_v32 = vpack.c.bf16 %v690_v24, %v690_v24  ;;  %v659_v33 = vmax.f32 %v419_v25, 0.0  ;;  %v691_v34 = vmax.f32 %v547_v26, 0.0 }
  0xec   :  { %981 = vst.msk [vmem:[%s1862_s3 + $0x18] sm:$0xf] %vm974_vm3, %v1180_v27  ;;  %1013 = vst.msk [vmem:[%s1862_s3 + $0x98] sm:$0xf] %vm974_vm3, %v1212_v28  ;;  %v1181_v35 = vpack.c.bf16 %v661_v29, %v661_v29  ;;  %v1213_v36 = vpack.c.bf16 %v693_v30, %v693_v30 }
  0xed   :  { %979 = vst.msk [vmem:[%s1862_s3 + $0x10] sm:$0xf] %vm974_vm3, %v1178_v31  ;;  %1011 = vst.msk [vmem:[%s1862_s3 + $0x90] sm:$0xf] %vm974_vm3, %v1210_v32  ;;  %v1179_v37 = vpack.c.bf16 %v659_v33, %v659_v33  ;;  %v1211_v39 = vpack.c.bf16 %v691_v34, %v691_v34  ;;  %v1286_v40 = vpop.f32.mrb[8].mxu0  ;;  %v1318_v41 = vpop.f32.mrb[8].mxu1 }
  0xee   :  { %982 = vst.msk [vmem:[%s1862_s3 + $0x1c] sm:$0xf] %vm974_vm3, %v1181_v35  ;;  %1014 = vst.msk [vmem:[%s1862_s3 + $0x9c] sm:$0xf] %vm974_vm3, %v1213_v36  ;;  %v440_v42 = vadd.f32 %v1286_v40, %v1537_v38  ;;  %v568_v43 = vadd.f32 %v1318_v41, %v1537_v38  ;;  %v431_v44 = vpop.f32.mrb[9].mxu0  ;;  %v559_v45 = vpop.f32.mrb[9].mxu1 }
  0xef   :  { %980 = vst.msk [vmem:[%s1862_s3 + $0x14] sm:$0xf] %vm974_vm3, %v1179_v37  ;;  %1012 = vst.msk [vmem:[%s1862_s3 + $0x94] sm:$0xf] %vm974_vm3, %v1211_v39  ;;  %v432_v46 = vadd.f32 %v1537_v38, %v431_v44  ;;  %v560_v47 = vadd.f32 %v1537_v38, %v559_v45  ;;  %v1287_v48 = vpop.f32.mrb[10].mxu0  ;;  %v1319_v49 = vpop.f32.mrb[10].mxu1 }
  0xf0   :  { %v664_v50 = vmax.f32 %v440_v42, 0.0  ;;  %v696_v51 = vmax.f32 %v568_v43, 0.0  ;;  %v443_v52 = vadd.f32 %v1287_v48, %v1537_v38  ;;  %v571_v53 = vadd.f32 %v1319_v49, %v1537_v38  ;;  %v434_v54 = vpop.f32.mrb[11].mxu0  ;;  %v562_v55 = vpop.f32.mrb[11].mxu1 }
  0xf1   :  { %v662_v56 = vmax.f32 %v432_v46, 0.0  ;;  %v694_v57 = vmax.f32 %v560_v47, 0.0  ;;  %v435_v58 = vadd.f32 %v1537_v38, %v434_v54  ;;  %v563_v59 = vadd.f32 %v1537_v38, %v562_v55 }
  0xf2   :  { %v1184_v60 = vpack.c.bf16 %v664_v50, %v664_v50  ;;  %v1216_v61 = vpack.c.bf16 %v696_v51, %v696_v51  ;;  %v665_v62 = vmax.f32 %v443_v52, 0.0  ;;  %v697_v63 = vmax.f32 %v571_v53, 0.0 }
  0xf3   :  { %v1182_v0 = vpack.c.bf16 %v662_v56, %v662_v56  ;;  %v1214_v1 = vpack.c.bf16 %v694_v57, %v694_v57  ;;  %v663_v2 = vmax.f32 %v435_v58, 0.0  ;;  %v695_v3 = vmax.f32 %v563_v59, 0.0 }
  0xf4   :  { %985 = vst.msk [vmem:[%s1862_s3 + $0x28] sm:$0xf] %vm974_vm3, %v1184_v60  ;;  %1017 = vst.msk [vmem:[%s1862_s3 + $0xa8] sm:$0xf] %vm974_vm3, %v1216_v61  ;;  %v1185_v4 = vpack.c.bf16 %v665_v62, %v665_v62  ;;  %v1217_v5 = vpack.c.bf16 %v697_v63, %v697_v63 }
  0xf5   :  { %983 = vst.msk [vmem:[%s1862_s3 + $0x20] sm:$0xf] %vm974_vm3, %v1182_v0  ;;  %1015 = vst.msk [vmem:[%s1862_s3 + $0xa0] sm:$0xf] %vm974_vm3, %v1214_v1  ;;  %v1183_v6 = vpack.c.bf16 %v663_v2, %v663_v2  ;;  %v1215_v7 = vpack.c.bf16 %v695_v3, %v695_v3  ;;  %v1290_v8 = vpop.f32.mrb[12].mxu0  ;;  %v1322_v9 = vpop.f32.mrb[12].mxu1 }
  0xf6   :  { %986 = vst.msk [vmem:[%s1862_s3 + $0x2c] sm:$0xf] %vm974_vm3, %v1185_v4  ;;  %1018 = vst.msk [vmem:[%s1862_s3 + $0xac] sm:$0xf] %vm974_vm3, %v1217_v5  ;;  %v456_v10 = vadd.f32 %v1290_v8, %v1537_v38  ;;  %v584_v11 = vadd.f32 %v1322_v9, %v1537_v38  ;;  %v447_v12 = vpop.f32.mrb[13].mxu0  ;;  %v575_v13 = vpop.f32.mrb[13].mxu1 }
  0xf7   :  { %984 = vst.msk [vmem:[%s1862_s3 + $0x24] sm:$0xf] %vm974_vm3, %v1183_v6  ;;  %1016 = vst.msk [vmem:[%s1862_s3 + $0xa4] sm:$0xf] %vm974_vm3, %v1215_v7  ;;  %v448_v14 = vadd.f32 %v1537_v38, %v447_v12  ;;  %v576_v15 = vadd.f32 %v1537_v38, %v575_v13  ;;  %v1291_v16 = vpop.f32.mrb[14].mxu0  ;;  %v1323_v17 = vpop.f32.mrb[14].mxu1 }
  0xf8   :  { %v668_v18 = vmax.f32 %v456_v10, 0.0  ;;  %v700_v19 = vmax.f32 %v584_v11, 0.0  ;;  %v459_v20 = vadd.f32 %v1291_v16, %v1537_v38  ;;  %v587_v21 = vadd.f32 %v1323_v17, %v1537_v38  ;;  %v450_v22 = vpop.f32.mrb[15].mxu0  ;;  %v578_v23 = vpop.f32.mrb[15].mxu1 }
  0xf9   :  { %v666_v24 = vmax.f32 %v448_v14, 0.0  ;;  %v698_v25 = vmax.f32 %v576_v15, 0.0  ;;  %v451_v26 = vadd.f32 %v1537_v38, %v450_v22  ;;  %v579_v27 = vadd.f32 %v1537_v38, %v578_v23 }
  0xfa   :  { %v1188_v28 = vpack.c.bf16 %v668_v18, %v668_v18  ;;  %v1220_v29 = vpack.c.bf16 %v700_v19, %v700_v19  ;;  %v669_v30 = vmax.f32 %v459_v20, 0.0  ;;  %v701_v31 = vmax.f32 %v587_v21, 0.0 }
  0xfb   :  { %v1186_v32 = vpack.c.bf16 %v666_v24, %v666_v24  ;;  %v1218_v33 = vpack.c.bf16 %v698_v25, %v698_v25  ;;  %v667_v34 = vmax.f32 %v451_v26, 0.0  ;;  %v699_v35 = vmax.f32 %v579_v27, 0.0 }
  0xfc   :  { %989 = vst.msk [vmem:[%s1862_s3 + $0x38] sm:$0xf] %vm974_vm3, %v1188_v28  ;;  %1021 = vst.msk [vmem:[%s1862_s3 + $0xb8] sm:$0xf] %vm974_vm3, %v1220_v29  ;;  %v1189_v36 = vpack.c.bf16 %v669_v30, %v669_v30  ;;  %v1221_v37 = vpack.c.bf16 %v701_v31, %v701_v31 }
  0xfd   :  { %987 = vst.msk [vmem:[%s1862_s3 + $0x30] sm:$0xf] %vm974_vm3, %v1186_v32  ;;  %1019 = vst.msk [vmem:[%s1862_s3 + $0xb0] sm:$0xf] %vm974_vm3, %v1218_v33  ;;  %v1187_v39 = vpack.c.bf16 %v667_v34, %v667_v34  ;;  %v1219_v40 = vpack.c.bf16 %v699_v35, %v699_v35  ;;  %v1294_v41 = vpop.f32.mrb[16].mxu0  ;;  %v1326_v42 = vpop.f32.mrb[16].mxu1 }
  0xfe   :  { %990 = vst.msk [vmem:[%s1862_s3 + $0x3c] sm:$0xf] %vm974_vm3, %v1189_v36  ;;  %1022 = vst.msk [vmem:[%s1862_s3 + $0xbc] sm:$0xf] %vm974_vm3, %v1221_v37  ;;  %v472_v43 = vadd.f32 %v1294_v41, %v1537_v38  ;;  %v600_v44 = vadd.f32 %v1326_v42, %v1537_v38  ;;  %v463_v45 = vpop.f32.mrb[17].mxu0  ;;  %v591_v46 = vpop.f32.mrb[17].mxu1 }
  0xff   :  { %988 = vst.msk [vmem:[%s1862_s3 + $0x34] sm:$0xf] %vm974_vm3, %v1187_v39  ;;  %1020 = vst.msk [vmem:[%s1862_s3 + $0xb4] sm:$0xf] %vm974_vm3, %v1219_v40  ;;  %v464_v47 = vadd.f32 %v1537_v38, %v463_v45  ;;  %v592_v48 = vadd.f32 %v1537_v38, %v591_v46  ;;  %v1295_v49 = vpop.f32.mrb[18].mxu0  ;;  %v1327_v50 = vpop.f32.mrb[18].mxu1 }
 0x100   :  { %v672_v51 = vmax.f32 %v472_v43, 0.0  ;;  %v704_v52 = vmax.f32 %v600_v44, 0.0  ;;  %v475_v53 = vadd.f32 %v1295_v49, %v1537_v38  ;;  %v603_v54 = vadd.f32 %v1327_v50, %v1537_v38  ;;  %v466_v55 = vpop.f32.mrb[19].mxu0  ;;  %v594_v56 = vpop.f32.mrb[19].mxu1 }
 0x101   :  { %v670_v57 = vmax.f32 %v464_v47, 0.0  ;;  %v702_v58 = vmax.f32 %v592_v48, 0.0  ;;  %v467_v59 = vadd.f32 %v1537_v38, %v466_v55  ;;  %v595_v60 = vadd.f32 %v1537_v38, %v594_v56 }
 0x102   :  { %v1192_v61 = vpack.c.bf16 %v672_v51, %v672_v51  ;;  %v1224_v62 = vpack.c.bf16 %v704_v52, %v704_v52  ;;  %v673_v63 = vmax.f32 %v475_v53, 0.0  ;;  %v705_v0 = vmax.f32 %v603_v54, 0.0 }
 0x103   :  { %v1190_v1 = vpack.c.bf16 %v670_v57, %v670_v57  ;;  %v1222_v2 = vpack.c.bf16 %v702_v58, %v702_v58  ;;  %v671_v3 = vmax.f32 %v467_v59, 0.0  ;;  %v703_v4 = vmax.f32 %v595_v60, 0.0 }
 0x104   :  { %993 = vst.msk [vmem:[%s1862_s3 + $0x48] sm:$0xf] %vm974_vm3, %v1192_v61  ;;  %1025 = vst.msk [vmem:[%s1862_s3 + $0xc8] sm:$0xf] %vm974_vm3, %v1224_v62  ;;  %v1193_v5 = vpack.c.bf16 %v673_v63, %v673_v63  ;;  %v1225_v6 = vpack.c.bf16 %v705_v0, %v705_v0 }
 0x105   :  { %991 = vst.msk [vmem:[%s1862_s3 + $0x40] sm:$0xf] %vm974_vm3, %v1190_v1  ;;  %1023 = vst.msk [vmem:[%s1862_s3 + $0xc0] sm:$0xf] %vm974_vm3, %v1222_v2  ;;  %v1191_v7 = vpack.c.bf16 %v671_v3, %v671_v3  ;;  %v1223_v8 = vpack.c.bf16 %v703_v4, %v703_v4  ;;  %v1298_v9 = vpop.f32.mrb[20].mxu0  ;;  %v1330_v10 = vpop.f32.mrb[20].mxu1 }
 0x106   :  { %994 = vst.msk [vmem:[%s1862_s3 + $0x4c] sm:$0xf] %vm974_vm3, %v1193_v5  ;;  %1026 = vst.msk [vmem:[%s1862_s3 + $0xcc] sm:$0xf] %vm974_vm3, %v1225_v6  ;;  %v488_v11 = vadd.f32 %v1298_v9, %v1537_v38  ;;  %v616_v12 = vadd.f32 %v1330_v10, %v1537_v38  ;;  %v479_v13 = vpop.f32.mrb[21].mxu0  ;;  %v607_v14 = vpop.f32.mrb[21].mxu1 }
 0x107   :  { %992 = vst.msk [vmem:[%s1862_s3 + $0x44] sm:$0xf] %vm974_vm3, %v1191_v7  ;;  %1024 = vst.msk [vmem:[%s1862_s3 + $0xc4] sm:$0xf] %vm974_vm3, %v1223_v8  ;;  %v480_v15 = vadd.f32 %v1537_v38, %v479_v13  ;;  %v608_v16 = vadd.f32 %v1537_v38, %v607_v14  ;;  %v1299_v17 = vpop.f32.mrb[22].mxu0  ;;  %v1331_v18 = vpop.f32.mrb[22].mxu1 }
 0x108   :  { %v676_v19 = vmax.f32 %v488_v11, 0.0  ;;  %v708_v20 = vmax.f32 %v616_v12, 0.0  ;;  %v491_v21 = vadd.f32 %v1299_v17, %v1537_v38  ;;  %v619_v22 = vadd.f32 %v1331_v18, %v1537_v38  ;;  %v482_v23 = vpop.f32.mrb[23].mxu0  ;;  %v610_v24 = vpop.f32.mrb[23].mxu1 }
 0x109   :  { %v674_v25 = vmax.f32 %v480_v15, 0.0  ;;  %v706_v26 = vmax.f32 %v608_v16, 0.0  ;;  %v483_v27 = vadd.f32 %v1537_v38, %v482_v23  ;;  %v611_v28 = vadd.f32 %v1537_v38, %v610_v24 }
 0x10a   :  { %v1196_v29 = vpack.c.bf16 %v676_v19, %v676_v19  ;;  %v1228_v30 = vpack.c.bf16 %v708_v20, %v708_v20  ;;  %v677_v31 = vmax.f32 %v491_v21, 0.0  ;;  %v709_v32 = vmax.f32 %v619_v22, 0.0 }
 0x10b   :  { %v1194_v33 = vpack.c.bf16 %v674_v25, %v674_v25  ;;  %v1226_v34 = vpack.c.bf16 %v706_v26, %v706_v26  ;;  %v675_v35 = vmax.f32 %v483_v27, 0.0  ;;  %v707_v36 = vmax.f32 %v611_v28, 0.0 }
 0x10c   :  { %997 = vst.msk [vmem:[%s1862_s3 + $0x58] sm:$0xf] %vm974_vm3, %v1196_v29  ;;  %1029 = vst.msk [vmem:[%s1862_s3 + $0xd8] sm:$0xf] %vm974_vm3, %v1228_v30  ;;  %v1197_v37 = vpack.c.bf16 %v677_v31, %v677_v31  ;;  %v1229_v39 = vpack.c.bf16 %v709_v32, %v709_v32 }
 0x10d   :  { %995 = vst.msk [vmem:[%s1862_s3 + $0x50] sm:$0xf] %vm974_vm3, %v1194_v33  ;;  %1027 = vst.msk [vmem:[%s1862_s3 + $0xd0] sm:$0xf] %vm974_vm3, %v1226_v34  ;;  %v1195_v40 = vpack.c.bf16 %v675_v35, %v675_v35  ;;  %v1227_v41 = vpack.c.bf16 %v707_v36, %v707_v36  ;;  %v1302_v42 = vpop.f32.mrb[24].mxu0  ;;  %v1334_v43 = vpop.f32.mrb[24].mxu1 }
 0x10e   :  { %998 = vst.msk [vmem:[%s1862_s3 + $0x5c] sm:$0xf] %vm974_vm3, %v1197_v37  ;;  %1030 = vst.msk [vmem:[%s1862_s3 + $0xdc] sm:$0xf] %vm974_vm3, %v1229_v39  ;;  %v504_v44 = vadd.f32 %v1302_v42, %v1537_v38  ;;  %v632_v45 = vadd.f32 %v1334_v43, %v1537_v38  ;;  %v495_v46 = vpop.f32.mrb[25].mxu0  ;;  %v623_v47 = vpop.f32.mrb[25].mxu1 }
 0x10f   :  { %996 = vst.msk [vmem:[%s1862_s3 + $0x54] sm:$0xf] %vm974_vm3, %v1195_v40  ;;  %1028 = vst.msk [vmem:[%s1862_s3 + $0xd4] sm:$0xf] %vm974_vm3, %v1227_v41  ;;  %v496_v48 = vadd.f32 %v1537_v38, %v495_v46  ;;  %v624_v49 = vadd.f32 %v1537_v38, %v623_v47  ;;  %v1303_v50 = vpop.f32.mrb[26].mxu0  ;;  %v1335_v51 = vpop.f32.mrb[26].mxu1 }
 0x110   :  { %v680_v52 = vmax.f32 %v504_v44, 0.0  ;;  %v712_v53 = vmax.f32 %v632_v45, 0.0  ;;  %v507_v54 = vadd.f32 %v1303_v50, %v1537_v38  ;;  %v635_v55 = vadd.f32 %v1335_v51, %v1537_v38  ;;  %v498_v56 = vpop.f32.mrb[27].mxu0  ;;  %v626_v57 = vpop.f32.mrb[27].mxu1 }
 0x111   :  { %v678_v58 = vmax.f32 %v496_v48, 0.0  ;;  %v710_v59 = vmax.f32 %v624_v49, 0.0  ;;  %v499_v60 = vadd.f32 %v1537_v38, %v498_v56  ;;  %v627_v61 = vadd.f32 %v1537_v38, %v626_v57 }
 0x112   :  { %v1200_v62 = vpack.c.bf16 %v680_v52, %v680_v52  ;;  %v1232_v63 = vpack.c.bf16 %v712_v53, %v712_v53  ;;  %v681_v0 = vmax.f32 %v507_v54, 0.0  ;;  %v713_v1 = vmax.f32 %v635_v55, 0.0 }
 0x113   :  { %v1198_v2 = vpack.c.bf16 %v678_v58, %v678_v58  ;;  %v1230_v3 = vpack.c.bf16 %v710_v59, %v710_v59  ;;  %v679_v4 = vmax.f32 %v499_v60, 0.0  ;;  %v711_v5 = vmax.f32 %v627_v61, 0.0 }
 0x114   :  { %1001 = vst.msk [vmem:[%s1862_s3 + $0x68] sm:$0xf] %vm974_vm3, %v1200_v62  ;;  %1033 = vst.msk [vmem:[%s1862_s3 + $0xe8] sm:$0xf] %vm974_vm3, %v1232_v63  ;;  %v1201_v6 = vpack.c.bf16 %v681_v0, %v681_v0  ;;  %v1233_v7 = vpack.c.bf16 %v713_v1, %v713_v1 }
 0x115   :  { %999 = vst.msk [vmem:[%s1862_s3 + $0x60] sm:$0xf] %vm974_vm3, %v1198_v2  ;;  %1031 = vst.msk [vmem:[%s1862_s3 + $0xe0] sm:$0xf] %vm974_vm3, %v1230_v3  ;;  %v1199_v8 = vpack.c.bf16 %v679_v4, %v679_v4  ;;  %v1231_v9 = vpack.c.bf16 %v711_v5, %v711_v5  ;;  %v1306_v10 = vpop.f32.mrb[28].mxu0  ;;  %v1338_v11 = vpop.f32.mrb[28].mxu1 }
 0x116   :  { %1002 = vst.msk [vmem:[%s1862_s3 + $0x6c] sm:$0xf] %vm974_vm3, %v1201_v6  ;;  %1034 = vst.msk [vmem:[%s1862_s3 + $0xec] sm:$0xf] %vm974_vm3, %v1233_v7  ;;  %v520_v12 = vadd.f32 %v1306_v10, %v1537_v38  ;;  %v648_v13 = vadd.f32 %v1338_v11, %v1537_v38  ;;  %v511_v14 = vpop.f32.mrb[29].mxu0  ;;  %v639_v15 = vpop.f32.mrb[29].mxu1 }
 0x117   :  { %1000 = vst.msk [vmem:[%s1862_s3 + $0x64] sm:$0xf] %vm974_vm3, %v1199_v8  ;;  %1032 = vst.msk [vmem:[%s1862_s3 + $0xe4] sm:$0xf] %vm974_vm3, %v1231_v9  ;;  %v512_v16 = vadd.f32 %v1537_v38, %v511_v14  ;;  %v640_v17 = vadd.f32 %v1537_v38, %v639_v15  ;;  %v1307_v18 = vpop.f32.mrb[30].mxu0  ;;  %v1339_v19 = vpop.f32.mrb[30].mxu1 }
 0x118   :  { %v684_v20 = vmax.f32 %v520_v12, 0.0  ;;  %v716_v21 = vmax.f32 %v648_v13, 0.0  ;;  %v523_v22 = vadd.f32 %v1307_v18, %v1537_v38  ;;  %v651_v23 = vadd.f32 %v1339_v19, %v1537_v38  ;;  %v514_v24 = vpop.f32.mrb[31].mxu0  ;;  %v642_v25 = vpop.f32.mrb[31].mxu1 }
 0x119   :  { %v682_v26 = vmax.f32 %v512_v16, 0.0  ;;  %v714_v27 = vmax.f32 %v640_v17, 0.0  ;;  %v515_v28 = vadd.f32 %v1537_v38, %v514_v24  ;;  %v643_v29 = vadd.f32 %v1537_v38, %v642_v25 }
 0x11a   :  { %v1204_v30 = vpack.c.bf16 %v684_v20, %v684_v20  ;;  %v1236_v31 = vpack.c.bf16 %v716_v21, %v716_v21  ;;  %v685_v32 = vmax.f32 %v523_v22, 0.0  ;;  %v717_v33 = vmax.f32 %v651_v23, 0.0 }
 0x11b   :  { %v1202_v34 = vpack.c.bf16 %v682_v26, %v682_v26  ;;  %v1234_v35 = vpack.c.bf16 %v714_v27, %v714_v27  ;;  %v683_v36 = vmax.f32 %v515_v28, 0.0  ;;  %v715_v37 = vmax.f32 %v643_v29, 0.0 }
 0x11c   :  { %1005 = vst.msk [vmem:[%s1862_s3 + $0x78] sm:$0xf] %vm974_vm3, %v1204_v30  ;;  %1037 = vst.msk [vmem:[%s1862_s3 + $0xf8] sm:$0xf] %vm974_vm3, %v1236_v31  ;;  %v1205_v39 = vpack.c.bf16 %v685_v32, %v685_v32  ;;  %v1237_v38 = vpack.c.bf16 %v717_v33, %v717_v33 }
 0x11d   :  { %1003 = vst.msk [vmem:[%s1862_s3 + $0x70] sm:$0xf] %vm974_vm3, %v1202_v34  ;;  %1035 = vst.msk [vmem:[%s1862_s3 + $0xf0] sm:$0xf] %vm974_vm3, %v1234_v35  ;;  %v1203_v40 = vpack.c.bf16 %v683_v36, %v683_v36  ;;  %v1235_v41 = vpack.c.bf16 %v715_v37, %v715_v37 }
 0x11e   :  { %1006 = vst.msk [vmem:[%s1862_s3 + $0x7c] sm:$0xf] %vm974_vm3, %v1205_v39  ;;  %1038 = vst.msk [vmem:[%s1862_s3 + $0xfc] sm:$0xf] %vm974_vm3, %v1237_v38 }
 0x11f   :  { %1004 = vst.msk [vmem:[%s1862_s3 + $0x74] sm:$0xf] %vm974_vm3, %v1203_v40  ;;  %1036 = vst.msk [vmem:[%s1862_s3 + $0xf4] sm:$0xf] %vm974_vm3, %v1235_v41 }

// kernel: mobilenet_forward.16
= control target key start
LH: loop header
LB: loop body
LE: loop exit
PB: predicated region body
PF: predicated region fallthrough
CT: control target
= control target key end

     0   :  { %vm2595_vm0 = vcmask 1043456   ;;  %v167_v0 = vlaneseq  ;;  %vm2498_vm1 = vcmask 64512   ;;  %vm3208_vm2 = vcmask 125952   ;;  %s7551_s3 = inlined_call_operand.vmem [shape: bf16[8,16], index: 3, kind: input, shape index: {}]   ;;  %s7552_s0 = inlined_call_operand.vmem [shape: bf16[9,512,8], index: 0, kind: input, shape index: {}]   ;;  %s7553_s1 = inlined_call_operand.vmem [shape: bf16[9,1,8], index: 1, kind: input, shape index: {}]   ;;  %s7554_s2 = inlined_call_operand.vmem [shape: f32[1,8], index: 2, kind: input, shape index: {}]   ;;  %s7555_s4 = inlined_call_operand.vmem [shape: f32[1,16], index: 4, kind: input, shape index: {}]   ;;  %s7556_s5 = inlined_call_operand.vmem [shape: bf16[512,16], index: 5, kind: output, shape index: {}]  }
   0x1   :  { %v2490_v1 = vld [vmem:[%s7551_s3] sm:$0xf]  ;;  %v25_v10 = vld [vmem:[%s7553_s1 + $0x4] sm:$0x1]  ;;  %v26_v11 = vld [vmem:[%s7553_s1 + $0x5] sm:$0x1] }
   0x2   :  { %v21_v2 = vld [vmem:[%s7553_s1] sm:$0x1]  ;;  %v22_v3 = vld [vmem:[%s7553_s1 + $0x1] sm:$0x1]  ;;  %5491 = vmatprep.subr.msk.bf16.mxu0 %vm2595_vm0, %v2490_v1  ;;  %5492 = vmatprep.subr.msk.bf16.mxu1 %vm2595_vm0, %v2490_v1  ;;  %v2597_v4 = vsel %vm2595_vm0, %v2490_v1, 0  ;;  %v34_v19 = vunpack.c.l.bf16 %v25_v10  ;;  %v35_v20 = vunpack.c.l.bf16 %v26_v11  ;;  %v168_v22 = vshrl.u32 %v167_v0, 7 }
   0x3   :  { %v23_v5 = vld [vmem:[%s7553_s1 + $0x2] sm:$0x1]  ;;  %v24_v6 = vld [vmem:[%s7553_s1 + $0x3] sm:$0x1]  ;;  %v30_v7 = vunpack.c.l.bf16 %v21_v2  ;;  %v31_v8 = vunpack.c.l.bf16 %v22_v3  ;;  %5424 = vmatpush3.bf16.msra.mxu0 %v2597_v4  ;;  %5490 = vmatpush3.bf16.msra.mxu1 %v2597_v4  ;;  %v27_v12 = vld [vmem:[%s7553_s1 + $0x6] sm:$0x1] }
   0x4   :  { %v3952_v9 = vld [vmem:[%s7552_s0] sm:$0xff]   ;;  %v32_v13 = vunpack.c.l.bf16 %v23_v5  ;;  %v33_v14 = vunpack.c.l.bf16 %v24_v6  ;;  %v29_v18 = vld [vmem:[%s7553_s1 + $0x8] sm:$0x1]  ;;  %v36_v21 = vunpack.c.l.bf16 %v27_v12  ;;  %v169_v31 = vsub.s32 0, %v168_v22 }
   0x5   :  { %v3953_v15 = vunpack.c.l.bf16 %v3952_v9  ;;  %v3954_v16 = vunpack.c.h.bf16 %v3952_v9  ;;  %v28_v17 = vld [vmem:[%s7553_s1 + $0x7] sm:$0x1]  ;;  %v38_v25 = vunpack.c.l.bf16 %v29_v18 }
   0x6   :  { %v5134_v23 = vld [vmem:[%s7552_s0 + $0x100] sm:$0xff]   ;;  %v37_v24 = vunpack.c.l.bf16 %v28_v17  ;;  %v5577_v41 = vrot.slane %v30_v7, %v169_v31  ;;  %v5579_v42 = vrot.slane %v31_v8, %v169_v31  ;;  %v5581_v43 = vrot.slane %v32_v13, %v169_v31 }
   0x7   :  { %v4081_v26 = vunpack.c.l.bf16 %v5134_v23  ;;  %v4082_v27 = vunpack.c.h.bf16 %v5134_v23  ;;  %v5166_v28 = vld [vmem:[%s7552_s0 + $0x200] sm:$0xff]   ;;  %v5583_v44 = vrot.slane %v33_v14, %v169_v31  ;;  %v5585_v45 = vrot.slane %v34_v19, %v169_v31 }
   0x8   :  { %v5198_v29 = vld [vmem:[%s7552_s0 + $0x300] sm:$0xff]   ;;  %v4209_v32 = vunpack.c.l.bf16 %v5166_v28  ;;  %v4210_v33 = vunpack.c.h.bf16 %v5166_v28  ;;  %v5587_v47 = vrot.slane %v35_v20, %v169_v31  ;;  %v171_v49 = vmul.f32 %v3953_v15, %v5577_v41 }
   0x9   :  { %v5230_v30 = vld [vmem:[%s7552_s0 + $0x400] sm:$0xff]   ;;  %v4337_v34 = vunpack.c.l.bf16 %v5198_v29  ;;  %v4338_v37 = vunpack.c.h.bf16 %v5198_v29  ;;  %v172_v50 = vmul.f32 %v3954_v16, %v5577_v41  ;;  %v368_v51 = vmul.f32 %v4081_v26, %v5579_v42 }
   0xa   :  { %v5262_v35 = vld [vmem:[%s7552_s0 + $0x500] sm:$0xff]   ;;  %v4465_v38 = vunpack.c.l.bf16 %v5230_v30  ;;  %v4466_v39 = vunpack.c.h.bf16 %v5230_v30  ;;  %v369_v52 = vmul.f32 %v4082_v27, %v5579_v42  ;;  %v629_v53 = vmul.f32 %v4209_v32, %v5581_v43 }
   0xb   :  { %v5294_v36 = vld [vmem:[%s7552_s0 + $0x600] sm:$0xff]   ;;  %v4593_v40 = vunpack.c.l.bf16 %v5262_v35  ;;  %v4594_v46 = vunpack.c.h.bf16 %v5262_v35  ;;  %v630_v54 = vmul.f32 %v4210_v33, %v5581_v43  ;;  %v890_v55 = vmul.f32 %v4337_v34, %v5583_v44 }
   0xc   :  { %v4721_v48 = vunpack.c.l.bf16 %v5294_v36  ;;  %v891_v56 = vmul.f32 %v4338_v37, %v5583_v44  ;;  %v5326_v57 = vld [vmem:[%s7552_s0 + $0x700] sm:$0xff]   ;;  %v432_v58 = vadd.f32 %v368_v51, %v171_v49  ;;  %v433_v59 = vadd.f32 %v369_v52, %v172_v50 }
   0xd   :  { %v1151_v60 = vmul.f32 %v4465_v38, %v5585_v45  ;;  %v1152_v61 = vmul.f32 %v4466_v39, %v5585_v45  ;;  %v5358_v62 = vld [vmem:[%s7552_s0 + $0x800] sm:$0xff]   ;;  %v1412_v63 = vmul.f32 %v4593_v40, %v5587_v47  ;;  %v1413_v0 = vmul.f32 %v4594_v46, %v5587_v47 }
   0xe   :  { %v4722_v1 = vunpack.c.h.bf16 %v5294_v36  ;;  %v5607_v2 = vrot.slane %v36_v21, %v169_v31  ;;  %v693_v3 = vadd.f32 %v629_v53, %v432_v58  ;;  %v694_v4 = vadd.f32 %v630_v54, %v433_v59  ;;  %v5118_v7 = vld [vmem:[%s7552_s0 + $0x80] sm:$0xff]  }
   0xf   :  { %v4849_v5 = vunpack.c.l.bf16 %v5326_v57  ;;  %v4850_v6 = vunpack.c.h.bf16 %v5326_v57  ;;  %v5614_v10 = vrot.slane %v37_v24, %v169_v31  ;;  %v4977_v11 = vunpack.c.l.bf16 %v5358_v62  ;;  %v5150_v16 = vld [vmem:[%s7552_s0 + $0x180] sm:$0xff]  }
  0x10   :  { %v1673_v8 = vmul.f32 %v4721_v48, %v5607_v2  ;;  %v1674_v9 = vmul.f32 %v4722_v1, %v5607_v2  ;;  %v954_v12 = vadd.f32 %v890_v55, %v693_v3  ;;  %v955_v13 = vadd.f32 %v891_v56, %v694_v4  ;;  %v5182_v21 = vld [vmem:[%s7552_s0 + $0x280] sm:$0xff]  }
  0x11   :  { %v4978_v14 = vunpack.c.h.bf16 %v5358_v62  ;;  %v5616_v15 = vrot.slane %v38_v25, %v169_v31  ;;  %v1934_v17 = vmul.f32 %v4849_v5, %v5614_v10  ;;  %v1935_v18 = vmul.f32 %v4850_v6, %v5614_v10  ;;  %v5214_v26 = vld [vmem:[%s7552_s0 + $0x380] sm:$0xff]  }
  0x12   :  { %v4017_v19 = vunpack.c.l.bf16 %v5118_v7  ;;  %v4018_v20 = vunpack.c.h.bf16 %v5118_v7  ;;  %v1215_v22 = vadd.f32 %v1151_v60, %v954_v12  ;;  %v1216_v23 = vadd.f32 %v1152_v61, %v955_v13  ;;  %v5246_v39 = vld [vmem:[%s7552_s0 + $0x480] sm:$0xff]  }
  0x13   :  { %v2195_v24 = vmul.f32 %v4977_v11, %v5616_v15  ;;  %v2196_v25 = vmul.f32 %v4978_v14, %v5616_v15  ;;  %v4145_v29 = vunpack.c.l.bf16 %v5150_v16  ;;  %v4146_v30 = vunpack.c.h.bf16 %v5150_v16  ;;  %v5278_v50 = vld [vmem:[%s7552_s0 + $0x580] sm:$0xff]  }
  0x14   :  { %v203_v27 = vmul.f32 %v4017_v19, %v5577_v41  ;;  %v204_v28 = vmul.f32 %v4018_v20, %v5577_v41  ;;  %v1476_v31 = vadd.f32 %v1412_v63, %v1215_v22  ;;  %v1477_v32 = vadd.f32 %v1413_v0, %v1216_v23  ;;  %v5648_v59 = vld [vmem:[%s7554_s2] ss:$0 sm:$0xff]  ;;  %v5103_v22 = vld [vmem:[%s7552_s0 + $0x8] sm:$0xff]  }
  0x15   :  { %v4273_v33 = vunpack.c.l.bf16 %v5182_v21  ;;  %v4274_v34 = vunpack.c.h.bf16 %v5182_v21  ;;  %v400_v35 = vmul.f32 %v4145_v29, %v5579_v42  ;;  %v401_v36 = vmul.f32 %v4146_v30, %v5579_v42  ;;  %v5310_v0 = vld [vmem:[%s7552_s0 + $0x680] sm:$0xff]  }
  0x16   :  { %v4401_v37 = vunpack.c.l.bf16 %v5214_v26  ;;  %v4402_v38 = vunpack.c.h.bf16 %v5214_v26  ;;  %v1737_v40 = vadd.f32 %v1673_v8, %v1476_v31  ;;  %v1738_v46 = vadd.f32 %v1674_v9, %v1477_v32  ;;  %v5342_v6 = vld [vmem:[%s7552_s0 + $0x780] sm:$0xff]  }
  0x17   :  { %v661_v48 = vmul.f32 %v4273_v33, %v5581_v43  ;;  %v662_v49 = vmul.f32 %v4274_v34, %v5581_v43  ;;  %v464_v51 = vadd.f32 %v400_v35, %v203_v27  ;;  %v465_v52 = vadd.f32 %v401_v36, %v204_v28  ;;  %v5374_v21 = vld [vmem:[%s7552_s0 + $0x880] sm:$0xff]   ;;  %v5135_v27 = vld [vmem:[%s7552_s0 + $0x108] sm:$0xff]  }
  0x18   :  { %v922_v53 = vmul.f32 %v4401_v37, %v5583_v44  ;;  %v923_v54 = vmul.f32 %v4402_v38, %v5583_v44  ;;  %v1998_v55 = vadd.f32 %v1934_v17, %v1737_v40  ;;  %v1999_v56 = vadd.f32 %v1935_v18, %v1738_v46  ;;  %v5167_v40 = vld [vmem:[%s7552_s0 + $0x208] sm:$0xff]  }
  0x19   :  { %v4529_v57 = vunpack.c.l.bf16 %v5246_v39  ;;  %v4530_v58 = vunpack.c.h.bf16 %v5246_v39  ;;  %v725_v60 = vadd.f32 %v661_v48, %v464_v51  ;;  %v726_v61 = vadd.f32 %v662_v49, %v465_v52  ;;  %v5199_v46 = vld [vmem:[%s7552_s0 + $0x308] sm:$0xff]  }
  0x1a   :  { %v4657_v62 = vunpack.c.l.bf16 %v5278_v50  ;;  %v4658_v63 = vunpack.c.h.bf16 %v5278_v50  ;;  %v2259_v1 = vadd.f32 %v2195_v24, %v1998_v55  ;;  %v2260_v3 = vadd.f32 %v2196_v25, %v1999_v56 }
  0x1b   :  { %v1183_v4 = vmul.f32 %v4529_v57, %v5585_v45  ;;  %v1184_v5 = vmul.f32 %v4530_v58, %v5585_v45  ;;  %v986_v7 = vadd.f32 %v922_v53, %v725_v60  ;;  %v987_v8 = vadd.f32 %v923_v54, %v726_v61  ;;  %v5231_v61 = vld [vmem:[%s7552_s0 + $0x408] sm:$0xff]  }
  0x1c   :  { %v1444_v9 = vmul.f32 %v4657_v62, %v5587_v47  ;;  %v1445_v11 = vmul.f32 %v4658_v63, %v5587_v47  ;;  %v2330_v12 = vadd.f32 %v5648_v59, %v2259_v1  ;;  %v2331_v13 = vadd.f32 %v5648_v59, %v2260_v3  ;;  %v5263_v3 = vld [vmem:[%s7552_s0 + $0x508] sm:$0xff]  }
  0x1d   :  { %v4785_v14 = vunpack.c.l.bf16 %v5310_v0  ;;  %v4786_v16 = vunpack.c.h.bf16 %v5310_v0  ;;  %v1247_v17 = vadd.f32 %v1183_v4, %v986_v7  ;;  %v1248_v18 = vadd.f32 %v1184_v5, %v987_v8 }
  0x1e   :  { %v4913_v19 = vunpack.c.l.bf16 %v5342_v6  ;;  %v4914_v20 = vunpack.c.h.bf16 %v5342_v6  ;;  %v2394_v23 = vmax.f32 %v2330_v12, 0.0  ;;  %v2395_v24 = vmax.f32 %v2331_v13, 0.0 }
  0x1f   :  { %v1705_v25 = vmul.f32 %v4785_v14, %v5607_v2  ;;  %v1706_v26 = vmul.f32 %v4786_v16, %v5607_v2  ;;  %v1508_v28 = vadd.f32 %v1444_v9, %v1247_v17  ;;  %v1509_v29 = vadd.f32 %v1445_v11, %v1248_v18  ;;  %v5295_v18 = vld [vmem:[%s7552_s0 + $0x608] sm:$0xff]  }
  0x20   :  { %v1966_v30 = vmul.f32 %v4913_v19, %v5614_v10  ;;  %v1967_v31 = vmul.f32 %v4914_v20, %v5614_v10  ;;  %v2458_v32 = vpack.c.bf16 %v2395_v24, %v2394_v23  ;;  %v5041_v33 = vunpack.c.l.bf16 %v5374_v21  ;;  %v5327_v23 = vld [vmem:[%s7552_s0 + $0x708] sm:$0xff]  }
  0x21   :  { %v5042_v34 = vunpack.c.h.bf16 %v5374_v21  ;;  %v3957_v35 = vunpack.c.l.bf16 %v5103_v22  ;;  %v1769_v36 = vadd.f32 %v1705_v25, %v1508_v28  ;;  %v1770_v37 = vadd.f32 %v1706_v26, %v1509_v29  ;;  %v5359_v28 = vld [vmem:[%s7552_s0 + $0x808] sm:$0xff]  }
  0x22   :  { %v3958_v38 = vunpack.c.h.bf16 %v5103_v22  ;;  %v4085_v39 = vunpack.c.l.bf16 %v5135_v27  ;;  %5425 = vmatprep.mubr.msk.bf16.mxu0 %vm2498_vm1, %v2458_v32  ;;  %v2227_v48 = vmul.f32 %v5041_v33, %v5616_v15  ;;  %v4086_v51 = vunpack.c.h.bf16 %v5135_v27 }
  0x23   :  { %v2228_v49 = vmul.f32 %v5042_v34, %v5616_v15  ;;  %v173_v50 = vmul.f32 %v3957_v35, %v5577_v41  ;;  %v2030_v52 = vadd.f32 %v1966_v30, %v1769_v36  ;;  %v2031_v53 = vadd.f32 %v1967_v31, %v1770_v37  ;;  %v5119_v37 = vld [vmem:[%s7552_s0 + $0x88] sm:$0xff]  }
  0x24   :  { %v174_v54 = vmul.f32 %v3958_v38, %v5577_v41  ;;  %v370_v55 = vmul.f32 %v4085_v39, %v5579_v42  ;;  %v371_v56 = vmul.f32 %v4086_v51, %v5579_v42  ;;  %v4213_v57 = vunpack.c.l.bf16 %v5167_v40 }
  0x25   :  { %v4214_v58 = vunpack.c.h.bf16 %v5167_v40  ;;  %v4341_v60 = vunpack.c.l.bf16 %v5199_v46  ;;  %v2291_v62 = vadd.f32 %v2227_v48, %v2030_v52  ;;  %v2292_v63 = vadd.f32 %v2228_v49, %v2031_v53  ;;  %v5151_v48 = vld [vmem:[%s7552_s0 + $0x188] sm:$0xff]  }
  0x26   :  { %v434_v0 = vadd.f32 %v370_v55, %v173_v50  ;;  %v4342_v1 = vunpack.c.h.bf16 %v5199_v46  ;;  %v435_v4 = vadd.f32 %v371_v56, %v174_v54  ;;  %v631_v5 = vmul.f32 %v4213_v57, %v5581_v43  ;;  %v5183_v53 = vld [vmem:[%s7552_s0 + $0x288] sm:$0xff]  }
  0x27   :  { %v632_v6 = vmul.f32 %v4214_v58, %v5581_v43  ;;  %v892_v7 = vmul.f32 %v4341_v60, %v5583_v44  ;;  %v2362_v8 = vadd.f32 %v5648_v59, %v2291_v62  ;;  %v2363_v9 = vadd.f32 %v5648_v59, %v2292_v63  ;;  %v5215_v63 = vld [vmem:[%s7552_s0 + $0x388] sm:$0xff]  }
  0x28   :  { %v893_v11 = vmul.f32 %v4342_v1, %v5583_v44  ;;  %v4469_v12 = vunpack.c.l.bf16 %v5231_v61  ;;  %v695_v13 = vadd.f32 %v631_v5, %v434_v0  ;;  %v4470_v16 = vunpack.c.h.bf16 %v5231_v61 }
  0x29   :  { %v696_v14 = vadd.f32 %v632_v6, %v435_v4  ;;  %v4597_v17 = vunpack.c.l.bf16 %v5263_v3  ;;  %v2426_v19 = vmax.f32 %v2362_v8, 0.0  ;;  %v2427_v20 = vmax.f32 %v2363_v9, 0.0  ;;  %v5247_v9 = vld [vmem:[%s7552_s0 + $0x488] sm:$0xff]  }
  0x2a   :  { %v1153_v21 = vmul.f32 %v4469_v12, %v5585_v45  ;;  %v4598_v22 = vunpack.c.h.bf16 %v5263_v3  ;;  %v956_v24 = vadd.f32 %v892_v7, %v695_v13  ;;  %v1154_v26 = vmul.f32 %v4470_v16, %v5585_v45 }
  0x2b   :  { %v957_v25 = vadd.f32 %v893_v11, %v696_v14  ;;  %v1414_v27 = vmul.f32 %v4597_v17, %v5587_v47  ;;  %v2474_v29 = vpack.c.bf16 %v2427_v20, %v2426_v19  ;;  %v4725_v31 = vunpack.c.l.bf16 %v5295_v18  ;;  %v5279_v20 = vld [vmem:[%s7552_s0 + $0x588] sm:$0xff]  }
  0x2c   :  { %v1415_v30 = vmul.f32 %v4598_v22, %v5587_v47  ;;  %v4726_v32 = vunpack.c.h.bf16 %v5295_v18  ;;  %v1217_v33 = vadd.f32 %v1153_v21, %v956_v24  ;;  %v4853_v35 = vunpack.c.l.bf16 %v5327_v23 }
  0x2d   :  { %v1218_v34 = vadd.f32 %v1154_v26, %v957_v25  ;;  %v4854_v36 = vunpack.c.h.bf16 %v5327_v23  ;;  %5457 = vmatprep.mubr.msk.bf16.mxu1 %vm2498_vm1, %v2474_v29  ;;  %v1675_v38 = vmul.f32 %v4725_v31, %v5607_v2  ;;  %v4981_v40 = vunpack.c.l.bf16 %v5359_v28  ;;  %v5311_v29 = vld [vmem:[%s7552_s0 + $0x688] sm:$0xff]  }
  0x2e   :  { %v1676_v39 = vmul.f32 %v4726_v32, %v5607_v2  ;;  %v4982_v46 = vunpack.c.h.bf16 %v5359_v28  ;;  %v1478_v49 = vadd.f32 %v1414_v27, %v1217_v33  ;;  %v1936_v51 = vmul.f32 %v4853_v35, %v5614_v10 }
  0x2f   :  { %v1479_v50 = vadd.f32 %v1415_v30, %v1218_v34  ;;  %v1937_v52 = vmul.f32 %v4854_v36, %v5614_v10  ;;  %v2197_v54 = vmul.f32 %v4981_v40, %v5616_v15  ;;  %v4021_v56 = vunpack.c.l.bf16 %v5119_v37  ;;  %v5343_v34 = vld [vmem:[%s7552_s0 + $0x788] sm:$0xff]  }
  0x30   :  { %v2198_v55 = vmul.f32 %v4982_v46, %v5616_v15  ;;  %v4022_v57 = vunpack.c.h.bf16 %v5119_v37  ;;  %v1739_v58 = vadd.f32 %v1675_v38, %v1478_v49  ;;  %v4149_v61 = vunpack.c.l.bf16 %v5151_v48 }
  0x31   :  { %v1740_v60 = vadd.f32 %v1676_v39, %v1479_v50  ;;  %v4150_v62 = vunpack.c.h.bf16 %v5151_v48  ;;  %v205_v0 = vmul.f32 %v4021_v56, %v5577_v41  ;;  %v4277_v3 = vunpack.c.l.bf16 %v5183_v53  ;;  %v5375_v39 = vld [vmem:[%s7552_s0 + $0x888] sm:$0xff]  }
  0x32   :  { %v206_v1 = vmul.f32 %v4022_v57, %v5577_v41  ;;  %v4278_v4 = vunpack.c.h.bf16 %v5183_v53  ;;  %v2000_v5 = vadd.f32 %v1936_v51, %v1739_v58  ;;  %v402_v7 = vmul.f32 %v4149_v61, %v5579_v42 }
  0x33   :  { %v2001_v6 = vadd.f32 %v1937_v52, %v1740_v60  ;;  %v403_v8 = vmul.f32 %v4150_v62, %v5579_v42  ;;  %v663_v11 = vmul.f32 %v4277_v3, %v5581_v43  ;;  %v4405_v13 = vunpack.c.l.bf16 %v5215_v63  ;;  %v5136_v60 = vld [vmem:[%s7552_s0 + $0x110] sm:$0xff]  }
  0x34   :  { %v664_v12 = vmul.f32 %v4278_v4, %v5581_v43  ;;  %v4406_v14 = vunpack.c.h.bf16 %v5215_v63  ;;  %v2261_v16 = vadd.f32 %v2197_v54, %v2000_v5  ;;  %v466_v18 = vadd.f32 %v402_v7, %v205_v0  ;;  %v5104_v54 = vld [vmem:[%s7552_s0 + $0x10] sm:$0xff]  }
  0x35   :  { %v2262_v17 = vadd.f32 %v2198_v55, %v2001_v6  ;;  %v467_v19 = vadd.f32 %v403_v8, %v206_v1  ;;  %v924_v21 = vmul.f32 %v4405_v13, %v5583_v44  ;;  %v4533_v23 = vunpack.c.l.bf16 %v5247_v9  ;;  %v5168_v1 = vld [vmem:[%s7552_s0 + $0x210] sm:$0xff]  }
  0x36   :  { %v925_v22 = vmul.f32 %v4406_v14, %v5583_v44  ;;  %v4534_v24 = vunpack.c.h.bf16 %v5247_v9  ;;  %v2332_v25 = vadd.f32 %v5648_v59, %v2261_v16  ;;  %v727_v27 = vadd.f32 %v663_v11, %v466_v18 }
  0x37   :  { %v2333_v26 = vadd.f32 %v5648_v59, %v2262_v17  ;;  %v728_v28 = vadd.f32 %v664_v12, %v467_v19  ;;  %v1185_v30 = vmul.f32 %v4533_v23, %v5585_v45  ;;  %v4661_v32 = vunpack.c.l.bf16 %v5279_v20  ;;  %v5200_v12 = vld [vmem:[%s7552_s0 + $0x310] sm:$0xff]  }
  0x38   :  { %v1186_v31 = vmul.f32 %v4534_v24, %v5585_v45  ;;  %v4662_v33 = vunpack.c.h.bf16 %v5279_v20  ;;  %v2396_v35 = vmax.f32 %v2332_v25, 0.0  ;;  %v988_v37 = vadd.f32 %v924_v21, %v727_v27 }
  0x39   :  { %v2397_v36 = vmax.f32 %v2333_v26, 0.0  ;;  %v989_v38 = vadd.f32 %v925_v22, %v728_v28  ;;  %v1446_v40 = vmul.f32 %v4661_v32, %v5587_v47  ;;  %v4789_v48 = vunpack.c.l.bf16 %v5311_v29  ;;  %v5232_v22 = vld [vmem:[%s7552_s0 + $0x410] sm:$0xff]  }
  0x3a   :  { %v1447_v46 = vmul.f32 %v4662_v33, %v5587_v47  ;;  %v4790_v49 = vunpack.c.h.bf16 %v5311_v29  ;;  %v1249_v51 = vadd.f32 %v1185_v30, %v988_v37  ;;  %v4917_v53 = vunpack.c.l.bf16 %v5343_v34 }
  0x3b   :  { %v2459_v50 = vpack.c.bf16 %v2397_v36, %v2396_v35  ;;  %v1250_v52 = vadd.f32 %v1186_v31, %v989_v38  ;;  %v1707_v55 = vmul.f32 %v4789_v48, %v5607_v2  ;;  %v4918_v57 = vunpack.c.h.bf16 %v5343_v34  ;;  %v5264_v31 = vld [vmem:[%s7552_s0 + $0x510] sm:$0xff]  }
  0x3c   :  { %v1708_v56 = vmul.f32 %v4790_v49, %v5607_v2  ;;  %v5045_v58 = vunpack.c.l.bf16 %v5375_v39  ;;  %v1510_v61 = vadd.f32 %v1446_v40, %v1249_v51  ;;  %v1968_v63 = vmul.f32 %v4917_v53, %v5614_v10  ;;  %v5296_v40 = vld [vmem:[%s7552_s0 + $0x610] sm:$0xff]  }
  0x3d   :  { %5426 = vmatmul.mubr.msk.bf16.vlgmr.msra.gmra.mrb[0].mxu0 %vm2498_vm1, %v2459_v50  ;;  %v1511_v62 = vadd.f32 %v1447_v46, %v1250_v52  ;;  %v5046_v0 = vunpack.c.h.bf16 %v5375_v39  ;;  %v1969_v3 = vmul.f32 %v4918_v57, %v5614_v10  ;;  %v3961_v5 = vunpack.c.l.bf16 %v5104_v54  ;;  %v5328_v51 = vld [vmem:[%s7552_s0 + $0x710] sm:$0xff]  }
  0x3e   :  { %v2229_v4 = vmul.f32 %v5045_v58, %v5616_v15  ;;  %v3962_v6 = vunpack.c.h.bf16 %v5104_v54  ;;  %v1771_v7 = vadd.f32 %v1707_v55, %v1510_v61  ;;  %v4089_v11 = vunpack.c.l.bf16 %v5136_v60 }
  0x3f   :  { %v1772_v8 = vadd.f32 %v1708_v56, %v1511_v62  ;;  %v2230_v9 = vmul.f32 %v5046_v0, %v5616_v15  ;;  %v175_v13 = vmul.f32 %v3961_v5, %v5577_v41  ;;  %v4090_v16 = vunpack.c.h.bf16 %v5136_v60  ;;  %v5360_v56 = vld [vmem:[%s7552_s0 + $0x810] sm:$0xff]  }
  0x40   :  { %v176_v14 = vmul.f32 %v3962_v6, %v5577_v41  ;;  %v4217_v17 = vunpack.c.l.bf16 %v5168_v1  ;;  %v2032_v18 = vadd.f32 %v1968_v63, %v1771_v7  ;;  %v372_v20 = vmul.f32 %v4089_v11, %v5579_v42 }
  0x41   :  { %v2033_v19 = vadd.f32 %v1969_v3, %v1772_v8  ;;  %v4218_v21 = vunpack.c.h.bf16 %v5168_v1  ;;  %v373_v23 = vmul.f32 %v4090_v16, %v5579_v42  ;;  %v4345_v25 = vunpack.c.l.bf16 %v5200_v12  ;;  %v5120_v3 = vld [vmem:[%s7552_s0 + $0x90] sm:$0xff]  }
  0x42   :  { %v633_v24 = vmul.f32 %v4217_v17, %v5581_v43  ;;  %v4346_v26 = vunpack.c.h.bf16 %v5200_v12  ;;  %v2293_v27 = vadd.f32 %v2229_v4, %v2032_v18  ;;  %v436_v29 = vadd.f32 %v372_v20, %v175_v13  ;;  %v5152_v8 = vld [vmem:[%s7552_s0 + $0x190] sm:$0xff]  }
  0x43   :  { %v2294_v28 = vadd.f32 %v2230_v9, %v2033_v19  ;;  %v634_v30 = vmul.f32 %v4218_v21, %v5581_v43  ;;  %v437_v32 = vadd.f32 %v373_v23, %v176_v14  ;;  %v894_v33 = vmul.f32 %v4345_v25, %v5583_v44  ;;  %v5184_v14 = vld [vmem:[%s7552_s0 + $0x290] sm:$0xff]  }
  0x44   :  { %v895_v34 = vmul.f32 %v4346_v26, %v5583_v44  ;;  %v4473_v35 = vunpack.c.l.bf16 %v5232_v22  ;;  %v2364_v36 = vadd.f32 %v5648_v59, %v2293_v27  ;;  %v697_v38 = vadd.f32 %v633_v24, %v436_v29  ;;  %v5216_v24 = vld [vmem:[%s7552_s0 + $0x390] sm:$0xff]  }
  0x45   :  { %v2365_v37 = vadd.f32 %v5648_v59, %v2294_v28  ;;  %v4474_v39 = vunpack.c.h.bf16 %v5232_v22  ;;  %v698_v46 = vadd.f32 %v634_v30, %v437_v32  ;;  %v4601_v49 = vunpack.c.l.bf16 %v5264_v31 }
  0x46   :  { %v1155_v48 = vmul.f32 %v4473_v35, %v5585_v45  ;;  %v4602_v50 = vunpack.c.h.bf16 %v5264_v31  ;;  %v2428_v52 = vmax.f32 %v2364_v36, 0.0  ;;  %v958_v54 = vadd.f32 %v894_v33, %v697_v38  ;;  %v5248_v33 = vld [vmem:[%s7552_s0 + $0x490] sm:$0xff]  }
  0x47   :  { %v2429_v53 = vmax.f32 %v2365_v37, 0.0  ;;  %v1156_v55 = vmul.f32 %v4474_v39, %v5585_v45  ;;  %v959_v57 = vadd.f32 %v895_v34, %v698_v46  ;;  %v1416_v58 = vmul.f32 %v4601_v49, %v5587_v47 }
  0x48   :  { %v1417_v60 = vmul.f32 %v4602_v50, %v5587_v47  ;;  %v4729_v61 = vunpack.c.l.bf16 %v5296_v40  ;;  %v1219_v63 = vadd.f32 %v1155_v48, %v958_v54  ;;  %v4730_v0 = vunpack.c.h.bf16 %v5296_v40  ;;  %v5280_v48 = vld [vmem:[%s7552_s0 + $0x590] sm:$0xff]  }
  0x49   :  { %v2475_v62 = vpack.c.bf16 %v2429_v53, %v2428_v52  ;;  %v4857_v1 = vunpack.c.l.bf16 %v5328_v51  ;;  %v1220_v4 = vadd.f32 %v1156_v55, %v959_v57  ;;  %v4858_v6 = vunpack.c.h.bf16 %v5328_v51  ;;  %v5312_v57 = vld [vmem:[%s7552_s0 + $0x690] sm:$0xff]  }
  0x4a   :  { %v1677_v5 = vmul.f32 %v4729_v61, %v5607_v2  ;;  %v4985_v7 = vunpack.c.l.bf16 %v5360_v56  ;;  %v1480_v9 = vadd.f32 %v1416_v58, %v1219_v63  ;;  %v1678_v11 = vmul.f32 %v4730_v0, %v5607_v2  ;;  %v5344_v63 = vld [vmem:[%s7552_s0 + $0x790] sm:$0xff]  }
  0x4b   :  { %5458 = vmatmul.mubr.msk.bf16.vlgmr.msra.gmra.mrb[0].mxu1 %vm2498_vm1, %v2475_v62  ;;  %v1938_v12 = vmul.f32 %v4857_v1, %v5614_v10  ;;  %v4986_v13 = vunpack.c.h.bf16 %v5360_v56  ;;  %v1481_v16 = vadd.f32 %v1417_v60, %v1220_v4  ;;  %v1939_v17 = vmul.f32 %v4858_v6, %v5614_v10 }
  0x4c   :  { %v2199_v18 = vmul.f32 %v4985_v7, %v5616_v15  ;;  %v4025_v19 = vunpack.c.l.bf16 %v5120_v3  ;;  %v1741_v20 = vadd.f32 %v1677_v5, %v1480_v9  ;;  %v4026_v22 = vunpack.c.h.bf16 %v5120_v3  ;;  %v5376_v9 = vld [vmem:[%s7552_s0 + $0x890] sm:$0xff]  }
  0x4d   :  { %v2200_v21 = vmul.f32 %v4986_v13, %v5616_v15  ;;  %v4153_v23 = vunpack.c.l.bf16 %v5152_v8  ;;  %v1742_v25 = vadd.f32 %v1678_v11, %v1481_v16  ;;  %v4154_v27 = vunpack.c.h.bf16 %v5152_v8  ;;  %v5105_v16 = vld [vmem:[%s7552_s0 + $0x18] sm:$0xff]  }
  0x4e   :  { %v207_v26 = vmul.f32 %v4025_v19, %v5577_v41  ;;  %v4281_v28 = vunpack.c.l.bf16 %v5184_v14  ;;  %v2002_v29 = vadd.f32 %v1938_v12, %v1741_v20  ;;  %v208_v30 = vmul.f32 %v4026_v22, %v5577_v41 }
  0x4f   :  { %v404_v31 = vmul.f32 %v4153_v23, %v5579_v42  ;;  %v4282_v32 = vunpack.c.h.bf16 %v5184_v14  ;;  %v2003_v34 = vadd.f32 %v1939_v17, %v1742_v25  ;;  %v405_v35 = vmul.f32 %v4154_v27, %v5579_v42 }
  0x50   :  { %v665_v36 = vmul.f32 %v4281_v28, %v5581_v43  ;;  %v4409_v37 = vunpack.c.l.bf16 %v5216_v24  ;;  %v2263_v38 = vadd.f32 %v2199_v18, %v2002_v29  ;;  %v4410_v46 = vunpack.c.h.bf16 %v5216_v24 }
  0x51   :  { %v468_v39 = vadd.f32 %v404_v31, %v207_v26  ;;  %v666_v40 = vmul.f32 %v4282_v32, %v5581_v43  ;;  %v2264_v49 = vadd.f32 %v2200_v21, %v2003_v34  ;;  %v469_v50 = vadd.f32 %v405_v35, %v208_v30  ;;  %v5137_v21 = vld [vmem:[%s7552_s0 + $0x118] sm:$0xff]  }
  0x52   :  { %v926_v51 = vmul.f32 %v4409_v37, %v5583_v44  ;;  %v4537_v52 = vunpack.c.l.bf16 %v5248_v33  ;;  %v2334_v53 = vadd.f32 %v5648_v59, %v2263_v38  ;;  %v927_v55 = vmul.f32 %v4410_v46, %v5583_v44  ;;  %v5169_v30 = vld [vmem:[%s7552_s0 + $0x218] sm:$0xff]  }
  0x53   :  { %v729_v54 = vadd.f32 %v665_v36, %v468_v39  ;;  %v4538_v56 = vunpack.c.h.bf16 %v5248_v33  ;;  %v2335_v58 = vadd.f32 %v5648_v59, %v2264_v49  ;;  %v730_v60 = vadd.f32 %v666_v40, %v469_v50  ;;  %v5201_v35 = vld [vmem:[%s7552_s0 + $0x318] sm:$0xff]  }
  0x54   :  { %v1187_v61 = vmul.f32 %v4537_v52, %v5585_v45  ;;  %v4665_v62 = vunpack.c.l.bf16 %v5280_v48  ;;  %v2398_v0 = vmax.f32 %v2334_v53, 0.0  ;;  %v4666_v4 = vunpack.c.h.bf16 %v5280_v48 }
  0x55   :  { %v990_v1 = vadd.f32 %v926_v51, %v729_v54  ;;  %v1188_v3 = vmul.f32 %v4538_v56, %v5585_v45  ;;  %v2399_v5 = vmax.f32 %v2335_v58, 0.0  ;;  %v991_v6 = vadd.f32 %v927_v55, %v730_v60  ;;  %v5233_v54 = vld [vmem:[%s7552_s0 + $0x418] sm:$0xff]  }
  0x56   :  { %v1448_v7 = vmul.f32 %v4665_v62, %v5587_v47  ;;  %v4793_v8 = vunpack.c.l.bf16 %v5312_v57  ;;  %v1449_v12 = vmul.f32 %v4666_v4, %v5587_v47  ;;  %v4794_v13 = vunpack.c.h.bf16 %v5312_v57  ;;  %v5265_v60 = vld [vmem:[%s7552_s0 + $0x518] sm:$0xff]  }
  0x57   :  { %v1251_v11 = vadd.f32 %v1187_v61, %v990_v1  ;;  %v4921_v14 = vunpack.c.l.bf16 %v5344_v63  ;;  %v2460_v17 = vpack.c.bf16 %v2399_v5, %v2398_v0  ;;  %v1252_v18 = vadd.f32 %v1188_v3, %v991_v6 }
  0x58   :  { %v1709_v19 = vmul.f32 %v4793_v8, %v5607_v2  ;;  %v4922_v20 = vunpack.c.h.bf16 %v5344_v63  ;;  %v1710_v23 = vmul.f32 %v4794_v13, %v5607_v2  ;;  %v5049_v25 = vunpack.c.l.bf16 %v5376_v9 }
  0x59   :  { %v1512_v22 = vadd.f32 %v1448_v7, %v1251_v11  ;;  %v1970_v24 = vmul.f32 %v4921_v14, %v5614_v10  ;;  %5429 = vmatprep.mubr.msk.bf16.mxu0 %vm2498_vm1, %v2460_v17  ;;  %v1513_v26 = vadd.f32 %v1449_v12, %v1252_v18  ;;  %v5050_v28 = vunpack.c.h.bf16 %v5376_v9  ;;  %v5297_v11 = vld [vmem:[%s7552_s0 + $0x618] sm:$0xff]  }
  0x5a   :  { %v1971_v27 = vmul.f32 %v4922_v20, %v5614_v10  ;;  %v3965_v29 = vunpack.c.l.bf16 %v5105_v16  ;;  %v2231_v32 = vmul.f32 %v5049_v25, %v5616_v15  ;;  %v3966_v33 = vunpack.c.h.bf16 %v5105_v16  ;;  %v5329_v17 = vld [vmem:[%s7552_s0 + $0x718] sm:$0xff]  }
  0x5b   :  { %v1773_v31 = vadd.f32 %v1709_v19, %v1512_v22  ;;  %v4093_v34 = vunpack.c.l.bf16 %v5137_v21  ;;  %v1774_v36 = vadd.f32 %v1710_v23, %v1513_v26  ;;  %v2232_v37 = vmul.f32 %v5050_v28, %v5616_v15  ;;  %v5361_v22 = vld [vmem:[%s7552_s0 + $0x818] sm:$0xff]  }
  0x5c   :  { %v177_v38 = vmul.f32 %v3965_v29, %v5577_v41  ;;  %v4094_v39 = vunpack.c.h.bf16 %v5137_v21  ;;  %v178_v46 = vmul.f32 %v3966_v33, %v5577_v41  ;;  %v4221_v49 = vunpack.c.l.bf16 %v5169_v30 }
  0x5d   :  { %v2034_v40 = vadd.f32 %v1970_v24, %v1773_v31  ;;  %v374_v48 = vmul.f32 %v4093_v34, %v5579_v42  ;;  %v2035_v50 = vadd.f32 %v1971_v27, %v1774_v36  ;;  %v4222_v52 = vunpack.c.h.bf16 %v5169_v30  ;;  %v5121_v31 = vld [vmem:[%s7552_s0 + $0x98] sm:$0xff]  }
  0x5e   :  { %v375_v51 = vmul.f32 %v4094_v39, %v5579_v42  ;;  %v4349_v53 = vunpack.c.l.bf16 %v5201_v35  ;;  %v635_v57 = vmul.f32 %v4221_v49, %v5581_v43  ;;  %v4350_v58 = vunpack.c.h.bf16 %v5201_v35  ;;  %v5153_v36 = vld [vmem:[%s7552_s0 + $0x198] sm:$0xff]  }
  0x5f   :  { %v2295_v55 = vadd.f32 %v2231_v32, %v2034_v40  ;;  %v438_v56 = vadd.f32 %v374_v48, %v177_v38  ;;  %v2296_v61 = vadd.f32 %v2232_v37, %v2035_v50  ;;  %v636_v63 = vmul.f32 %v4222_v52, %v5581_v43 }
  0x60   :  { %v439_v62 = vadd.f32 %v375_v51, %v178_v46  ;;  %v896_v0 = vmul.f32 %v4349_v53, %v5583_v44  ;;  %v897_v4 = vmul.f32 %v4350_v58, %v5583_v44  ;;  %v4477_v5 = vunpack.c.l.bf16 %v5233_v54  ;;  %v5185_v46 = vld [vmem:[%s7552_s0 + $0x298] sm:$0xff]  }
  0x61   :  { %v2366_v1 = vadd.f32 %v5648_v59, %v2295_v55  ;;  %v699_v3 = vadd.f32 %v635_v57, %v438_v56  ;;  %v2367_v6 = vadd.f32 %v5648_v59, %v2296_v61  ;;  %v4478_v8 = vunpack.c.h.bf16 %v5233_v54  ;;  %v5217_v56 = vld [vmem:[%s7552_s0 + $0x398] sm:$0xff]  }
  0x62   :  { %v700_v7 = vadd.f32 %v636_v63, %v439_v62  ;;  %v4605_v9 = vunpack.c.l.bf16 %v5265_v60  ;;  %v1157_v14 = vmul.f32 %v4477_v5, %v5585_v45  ;;  %v4606_v16 = vunpack.c.h.bf16 %v5265_v60 }
  0x63   :  { %v2430_v12 = vmax.f32 %v2366_v1, 0.0  ;;  %v960_v13 = vadd.f32 %v896_v0, %v699_v3  ;;  %v2431_v18 = vmax.f32 %v2367_v6, 0.0  ;;  %v1158_v20 = vmul.f32 %v4478_v8, %v5585_v45  ;;  %v5249_v3 = vld [vmem:[%s7552_s0 + $0x498] sm:$0xff]  }
  0x64   :  { %v961_v19 = vadd.f32 %v897_v4, %v700_v7  ;;  %v1418_v21 = vmul.f32 %v4605_v9, %v5587_v47  ;;  %v1419_v24 = vmul.f32 %v4606_v16, %v5587_v47  ;;  %v4733_v25 = vunpack.c.l.bf16 %v5297_v11 }
  0x65   :  { %v1221_v23 = vadd.f32 %v1157_v14, %v960_v13  ;;  %v4734_v26 = vunpack.c.h.bf16 %v5297_v11  ;;  %v2476_v27 = vpack.c.bf16 %v2431_v18, %v2430_v12  ;;  %v4861_v29 = vunpack.c.l.bf16 %v5329_v17  ;;  %v5281_v13 = vld [vmem:[%s7552_s0 + $0x598] sm:$0xff]  }
  0x66   :  { %v1222_v28 = vadd.f32 %v1158_v20, %v961_v19  ;;  %v4862_v30 = vunpack.c.h.bf16 %v5329_v17  ;;  %v1679_v33 = vmul.f32 %v4733_v25, %v5607_v2  ;;  %v4989_v35 = vunpack.c.l.bf16 %v5361_v22 }
  0x67   :  { %v1482_v32 = vadd.f32 %v1418_v21, %v1221_v23  ;;  %v1680_v34 = vmul.f32 %v4734_v26, %v5607_v2  ;;  %5461 = vmatprep.mubr.msk.bf16.mxu1 %vm2498_vm1, %v2476_v27  ;;  %v1940_v38 = vmul.f32 %v4861_v29, %v5614_v10  ;;  %v4990_v40 = vunpack.c.h.bf16 %v5361_v22  ;;  %v5313_v23 = vld [vmem:[%s7552_s0 + $0x698] sm:$0xff]  }
  0x68   :  { %v1483_v37 = vadd.f32 %v1419_v24, %v1222_v28  ;;  %v1941_v39 = vmul.f32 %v4862_v30, %v5614_v10  ;;  %v2201_v49 = vmul.f32 %v4989_v35, %v5616_v15  ;;  %v4029_v50 = vunpack.c.l.bf16 %v5121_v31  ;;  %v5345_v28 = vld [vmem:[%s7552_s0 + $0x798] sm:$0xff]  }
  0x69   :  { %v1743_v48 = vadd.f32 %v1679_v33, %v1482_v32  ;;  %v4030_v51 = vunpack.c.h.bf16 %v5121_v31  ;;  %v2202_v53 = vmul.f32 %v4990_v40, %v5616_v15  ;;  %v4157_v54 = vunpack.c.l.bf16 %v5153_v36  ;;  %v5377_v33 = vld [vmem:[%s7552_s0 + $0x898] sm:$0xff]  }
  0x6a   :  { %v1744_v52 = vadd.f32 %v1680_v34, %v1483_v37  ;;  %v4158_v55 = vunpack.c.h.bf16 %v5153_v36  ;;  %v209_v58 = vmul.f32 %v4029_v50, %v5577_v41  ;;  %v4285_v61 = vunpack.c.l.bf16 %v5185_v46 }
  0x6b   :  { %v2004_v57 = vadd.f32 %v1940_v38, %v1743_v48  ;;  %v210_v60 = vmul.f32 %v4030_v51, %v5577_v41  ;;  %v406_v63 = vmul.f32 %v4157_v54, %v5579_v42  ;;  %v4286_v1 = vunpack.c.h.bf16 %v5185_v46  ;;  %v5106_v48 = vld [vmem:[%s7552_s0 + $0x20] sm:$0xff]  }
  0x6c   :  { %v2005_v62 = vadd.f32 %v1941_v39, %v1744_v52  ;;  %v407_v0 = vmul.f32 %v4158_v55, %v5579_v42  ;;  %v667_v5 = vmul.f32 %v4285_v61, %v5581_v43  ;;  %v4413_v6 = vunpack.c.l.bf16 %v5217_v56 }
  0x6d   :  { %v2265_v4 = vadd.f32 %v2201_v49, %v2004_v57  ;;  %v4414_v7 = vunpack.c.h.bf16 %v5217_v56  ;;  %v470_v9 = vadd.f32 %v406_v63, %v209_v58  ;;  %v668_v12 = vmul.f32 %v4286_v1, %v5581_v43  ;;  %v5170_v58 = vld [vmem:[%s7552_s0 + $0x220] sm:$0xff]  }
  0x6e   :  { %v2266_v8 = vadd.f32 %v2202_v53, %v2005_v62  ;;  %v471_v11 = vadd.f32 %v407_v0, %v210_v60  ;;  %v928_v16 = vmul.f32 %v4413_v6, %v5583_v44  ;;  %v4541_v18 = vunpack.c.l.bf16 %v5249_v3  ;;  %v5138_v53 = vld [vmem:[%s7552_s0 + $0x120] sm:$0xff]  }
  0x6f   :  { %v2336_v14 = vadd.f32 %v5648_v59, %v2265_v4  ;;  %v929_v17 = vmul.f32 %v4414_v7, %v5583_v44  ;;  %v731_v20 = vadd.f32 %v667_v5, %v470_v9  ;;  %v4542_v22 = vunpack.c.h.bf16 %v5249_v3  ;;  %v5202_v5 = vld [vmem:[%s7552_s0 + $0x320] sm:$0xff]  }
  0x70   :  { %v2337_v19 = vadd.f32 %v5648_v59, %v2266_v8  ;;  %v732_v21 = vadd.f32 %v668_v12, %v471_v11  ;;  %v1189_v25 = vmul.f32 %v4541_v18, %v5585_v45  ;;  %v4669_v26 = vunpack.c.l.bf16 %v5281_v13 }
  0x71   :  { %v2400_v24 = vmax.f32 %v2336_v14, 0.0  ;;  %v4670_v27 = vunpack.c.h.bf16 %v5281_v13  ;;  %v992_v30 = vadd.f32 %v928_v16, %v731_v20  ;;  %v1190_v32 = vmul.f32 %v4542_v22, %v5585_v45  ;;  %v5234_v16 = vld [vmem:[%s7552_s0 + $0x420] sm:$0xff]  }
  0x72   :  { %v2401_v29 = vmax.f32 %v2337_v19, 0.0  ;;  %v993_v31 = vadd.f32 %v929_v17, %v732_v21  ;;  %v1450_v34 = vmul.f32 %v4669_v26, %v5587_v47  ;;  %v4797_v36 = vunpack.c.l.bf16 %v5313_v23 }
  0x73   :  { %v1451_v35 = vmul.f32 %v4670_v27, %v5587_v47  ;;  %v4798_v37 = vunpack.c.h.bf16 %v5313_v23  ;;  %v1253_v39 = vadd.f32 %v1189_v25, %v992_v30  ;;  %v4925_v46 = vunpack.c.l.bf16 %v5345_v28  ;;  %v5266_v25 = vld [vmem:[%s7552_s0 + $0x520] sm:$0xff]  }
  0x74   :  { %v2461_v38 = vpack.c.bf16 %v2401_v29, %v2400_v24  ;;  %v1254_v40 = vadd.f32 %v1190_v32, %v993_v31  ;;  %v1711_v49 = vmul.f32 %v4797_v36, %v5607_v2  ;;  %v4926_v51 = vunpack.c.h.bf16 %v5345_v28 }
  0x75   :  { %v1712_v50 = vmul.f32 %v4798_v37, %v5607_v2  ;;  %v5053_v52 = vunpack.c.l.bf16 %v5377_v33  ;;  %v1514_v54 = vadd.f32 %v1450_v34, %v1253_v39  ;;  %v1972_v56 = vmul.f32 %v4925_v46, %v5614_v10  ;;  %v5298_v34 = vld [vmem:[%s7552_s0 + $0x620] sm:$0xff]  }
  0x76   :  { %5430 = vmatmul.mubr.msk.bf16.gmra.mrb[4].mxu0 %vm2498_vm1, %v2461_v38  ;;  %v1515_v55 = vadd.f32 %v1451_v35, %v1254_v40  ;;  %v5054_v57 = vunpack.c.h.bf16 %v5377_v33  ;;  %v1973_v60 = vmul.f32 %v4926_v51, %v5614_v10  ;;  %v3969_v62 = vunpack.c.l.bf16 %v5106_v48  ;;  %v5330_v39 = vld [vmem:[%s7552_s0 + $0x720] sm:$0xff]  }
  0x77   :  { %v2233_v61 = vmul.f32 %v5053_v52, %v5616_v15  ;;  %v3970_v63 = vunpack.c.h.bf16 %v5106_v48  ;;  %v1775_v0 = vadd.f32 %v1711_v49, %v1514_v54  ;;  %v4097_v4 = vunpack.c.l.bf16 %v5138_v53  ;;  %v5362_v49 = vld [vmem:[%s7552_s0 + $0x820] sm:$0xff]  }
  0x78   :  { %v1776_v1 = vadd.f32 %v1712_v50, %v1515_v55  ;;  %v2234_v3 = vmul.f32 %v5054_v57, %v5616_v15  ;;  %v179_v6 = vmul.f32 %v3969_v62, %v5577_v41  ;;  %v4098_v8 = vunpack.c.h.bf16 %v5138_v53 }
  0x79   :  { %v180_v7 = vmul.f32 %v3970_v63, %v5577_v41  ;;  %v4225_v9 = vunpack.c.l.bf16 %v5170_v58  ;;  %v2036_v11 = vadd.f32 %v1972_v56, %v1775_v0  ;;  %v376_v13 = vmul.f32 %v4097_v4, %v5579_v42  ;;  %v5154_v0 = vld [vmem:[%s7552_s0 + $0x1a0] sm:$0xff]  }
  0x7a   :  { %v2037_v12 = vadd.f32 %v1973_v60, %v1776_v1  ;;  %v4226_v14 = vunpack.c.h.bf16 %v5170_v58  ;;  %v377_v17 = vmul.f32 %v4098_v8, %v5579_v42  ;;  %v4353_v19 = vunpack.c.l.bf16 %v5202_v5  ;;  %v5122_v58 = vld [vmem:[%s7552_s0 + $0xa0] sm:$0xff]  }
  0x7b   :  { %v637_v18 = vmul.f32 %v4225_v9, %v5581_v43  ;;  %v4354_v20 = vunpack.c.h.bf16 %v5202_v5  ;;  %v2297_v21 = vadd.f32 %v2233_v61, %v2036_v11  ;;  %v440_v23 = vadd.f32 %v376_v13, %v179_v6  ;;  %v5186_v6 = vld [vmem:[%s7552_s0 + $0x2a0] sm:$0xff]  }
  0x7c   :  { %v2298_v22 = vadd.f32 %v2234_v3, %v2037_v12  ;;  %v638_v24 = vmul.f32 %v4226_v14, %v5581_v43  ;;  %v441_v26 = vadd.f32 %v377_v17, %v180_v7  ;;  %v898_v27 = vmul.f32 %v4353_v19, %v5583_v44  ;;  %v5218_v17 = vld [vmem:[%s7552_s0 + $0x3a0] sm:$0xff]  }
  0x7d   :  { %v899_v28 = vmul.f32 %v4354_v20, %v5583_v44  ;;  %v4481_v29 = vunpack.c.l.bf16 %v5234_v16  ;;  %v2368_v30 = vadd.f32 %v5648_v59, %v2297_v21  ;;  %v701_v32 = vadd.f32 %v637_v18, %v440_v23 }
  0x7e   :  { %v2369_v31 = vadd.f32 %v5648_v59, %v2298_v22  ;;  %v4482_v33 = vunpack.c.h.bf16 %v5234_v16  ;;  %v702_v35 = vadd.f32 %v638_v24, %v441_v26  ;;  %v4609_v37 = vunpack.c.l.bf16 %v5266_v25  ;;  %v5250_v26 = vld [vmem:[%s7552_s0 + $0x4a0] sm:$0xff]  }
  0x7f   :  { %v1159_v36 = vmul.f32 %v4481_v29, %v5585_v45  ;;  %v4610_v38 = vunpack.c.h.bf16 %v5266_v25  ;;  %v2432_v40 = vmax.f32 %v2368_v30, 0.0  ;;  %v962_v48 = vadd.f32 %v898_v27, %v701_v32 }
  0x80   :  { %v2433_v46 = vmax.f32 %v2369_v31, 0.0  ;;  %v1160_v59 = vmul.f32 %v4482_v33, %v5585_v45  ;;  %v963_v50 = vadd.f32 %v899_v28, %v702_v35  ;;  %v1420_v51 = vmul.f32 %v4609_v37, %v5587_v47  ;;  %v5282_v35 = vld [vmem:[%s7552_s0 + $0x5a0] sm:$0xff]  }
  0x81   :  { %v1421_v52 = vmul.f32 %v4610_v38, %v5587_v47  ;;  %v4737_v53 = vunpack.c.l.bf16 %v5298_v34  ;;  %v1223_v55 = vadd.f32 %v1159_v36, %v962_v48  ;;  %v4738_v56 = vunpack.c.h.bf16 %v5298_v34 }
  0x82   :  { %v2477_v54 = vpack.c.bf16 %v2433_v46, %v2432_v40  ;;  %v4865_v57 = vunpack.c.l.bf16 %v5330_v39  ;;  %v1224_v60 = vadd.f32 %v1160_v59, %v963_v50  ;;  %v4866_v62 = vunpack.c.h.bf16 %v5330_v39  ;;  %v6036_v40 = vld [vmem:[%s7554_s2] ss:$0 sm:$0xff] }
  0x83   :  { %v1681_v61 = vmul.f32 %v4737_v53, %v5607_v2  ;;  %v4993_v63 = vunpack.c.l.bf16 %v5362_v49  ;;  %v1484_v1 = vadd.f32 %v1420_v51, %v1223_v55  ;;  %v1682_v3 = vmul.f32 %v4738_v56, %v5607_v2  ;;  %v5314_v50 = vld [vmem:[%s7552_s0 + $0x6a0] sm:$0xff]  }
  0x84   :  { %5462 = vmatmul.mubr.msk.bf16.gmra.mrb[4].mxu1 %vm2498_vm1, %v2477_v54  ;;  %v1942_v4 = vmul.f32 %v4865_v57, %v5614_v10  ;;  %v4994_v5 = vunpack.c.h.bf16 %v5362_v49  ;;  %v1485_v7 = vadd.f32 %v1421_v52, %v1224_v60  ;;  %v1943_v8 = vmul.f32 %v4866_v62, %v5614_v10  ;;  %v5346_v55 = vld [vmem:[%s7552_s0 + $0x7a0] sm:$0xff]  }
  0x85   :  { %v2203_v9 = vmul.f32 %v4993_v63, %v5616_v15  ;;  %v4033_v11 = vunpack.c.l.bf16 %v5122_v58  ;;  %v1745_v12 = vadd.f32 %v1681_v61, %v1484_v1  ;;  %v4034_v14 = vunpack.c.h.bf16 %v5122_v58  ;;  %v5378_v1 = vld [vmem:[%s7552_s0 + $0x8a0] sm:$0xff]  }
  0x86   :  { %v2204_v13 = vmul.f32 %v4994_v5, %v5616_v15  ;;  %v4161_v16 = vunpack.c.l.bf16 %v5154_v0  ;;  %v1746_v18 = vadd.f32 %v1682_v3, %v1485_v7  ;;  %v4162_v20 = vunpack.c.h.bf16 %v5154_v0  ;;  %v5107_v7 = vld [vmem:[%s7552_s0 + $0x28] sm:$0xff]  }
  0x87   :  { %v211_v19 = vmul.f32 %v4033_v11, %v5577_v41  ;;  %v4289_v21 = vunpack.c.l.bf16 %v5186_v6  ;;  %v2006_v22 = vadd.f32 %v1942_v4, %v1745_v12  ;;  %v212_v23 = vmul.f32 %v4034_v14, %v5577_v41 }
  0x88   :  { %v408_v24 = vmul.f32 %v4161_v16, %v5579_v42  ;;  %v4290_v25 = vunpack.c.h.bf16 %v5186_v6  ;;  %v2007_v27 = vadd.f32 %v1943_v8, %v1746_v18  ;;  %v409_v28 = vmul.f32 %v4162_v20, %v5579_v42 }
  0x89   :  { %v669_v29 = vmul.f32 %v4289_v21, %v5581_v43  ;;  %v4417_v30 = vunpack.c.l.bf16 %v5218_v17  ;;  %v2267_v31 = vadd.f32 %v2203_v9, %v2006_v22  ;;  %v4418_v34 = vunpack.c.h.bf16 %v5218_v17 }
  0x8a   :  { %v472_v32 = vadd.f32 %v408_v24, %v211_v19  ;;  %v670_v33 = vmul.f32 %v4290_v25, %v5581_v43  ;;  %v2268_v36 = vadd.f32 %v2204_v13, %v2007_v27  ;;  %v473_v37 = vadd.f32 %v409_v28, %v212_v23  ;;  %v5139_v13 = vld [vmem:[%s7552_s0 + $0x128] sm:$0xff]  }
  0x8b   :  { %v930_v38 = vmul.f32 %v4417_v30, %v5583_v44  ;;  %v4545_v39 = vunpack.c.l.bf16 %v5250_v26  ;;  %v2338_v46 = vadd.f32 %v6036_v40, %v2267_v31  ;;  %v931_v59 = vmul.f32 %v4418_v34, %v5583_v44  ;;  %v5171_v23 = vld [vmem:[%s7552_s0 + $0x228] sm:$0xff]  }
  0x8c   :  { %v733_v48 = vadd.f32 %v669_v29, %v472_v32  ;;  %v4546_v49 = vunpack.c.h.bf16 %v5250_v26  ;;  %v2339_v51 = vadd.f32 %v6036_v40, %v2268_v36  ;;  %v734_v52 = vadd.f32 %v670_v33, %v473_v37  ;;  %v5203_v28 = vld [vmem:[%s7552_s0 + $0x328] sm:$0xff]  }
  0x8d   :  { %v1191_v53 = vmul.f32 %v4545_v39, %v5585_v45  ;;  %v4673_v54 = vunpack.c.l.bf16 %v5282_v35  ;;  %v2402_v56 = vmax.f32 %v2338_v46, 0.0  ;;  %v4674_v60 = vunpack.c.h.bf16 %v5282_v35 }
  0x8e   :  { %v994_v57 = vadd.f32 %v930_v38, %v733_v48  ;;  %v1192_v58 = vmul.f32 %v4546_v49, %v5585_v45  ;;  %v2403_v61 = vmax.f32 %v2339_v51, 0.0  ;;  %v995_v62 = vadd.f32 %v931_v59, %v734_v52  ;;  %v5235_v48 = vld [vmem:[%s7552_s0 + $0x428] sm:$0xff]  }
  0x8f   :  { %v1452_v63 = vmul.f32 %v4673_v54, %v5587_v47  ;;  %v4801_v0 = vunpack.c.l.bf16 %v5314_v50  ;;  %v1453_v4 = vmul.f32 %v4674_v60, %v5587_v47  ;;  %v4802_v5 = vunpack.c.h.bf16 %v5314_v50  ;;  %v5267_v52 = vld [vmem:[%s7552_s0 + $0x528] sm:$0xff]  }
  0x90   :  { %v1255_v3 = vadd.f32 %v1191_v53, %v994_v57  ;;  %v4929_v6 = vunpack.c.l.bf16 %v5346_v55  ;;  %v2462_v8 = vpack.c.bf16 %v2403_v61, %v2402_v56  ;;  %v1256_v9 = vadd.f32 %v1192_v58, %v995_v62 }
  0x91   :  { %v1713_v11 = vmul.f32 %v4801_v0, %v5607_v2  ;;  %v4930_v12 = vunpack.c.h.bf16 %v5346_v55  ;;  %v1714_v16 = vmul.f32 %v4802_v5, %v5607_v2  ;;  %v5057_v18 = vunpack.c.l.bf16 %v5378_v1 }
  0x92   :  { %v1516_v14 = vadd.f32 %v1452_v63, %v1255_v3  ;;  %v1974_v17 = vmul.f32 %v4929_v6, %v5614_v10  ;;  %5433 = vmatprep.mubr.msk.bf16.mxu0 %vm2498_vm1, %v2462_v8  ;;  %v1517_v19 = vadd.f32 %v1453_v4, %v1256_v9  ;;  %v5058_v21 = vunpack.c.h.bf16 %v5378_v1  ;;  %v5299_v3 = vld [vmem:[%s7552_s0 + $0x628] sm:$0xff]  }
  0x93   :  { %v1975_v20 = vmul.f32 %v4930_v12, %v5614_v10  ;;  %v3973_v22 = vunpack.c.l.bf16 %v5107_v7  ;;  %v2235_v25 = vmul.f32 %v5057_v18, %v5616_v15  ;;  %v3974_v26 = vunpack.c.h.bf16 %v5107_v7  ;;  %v5331_v8 = vld [vmem:[%s7552_s0 + $0x728] sm:$0xff]  }
  0x94   :  { %v1777_v24 = vadd.f32 %v1713_v11, %v1516_v14  ;;  %v4101_v27 = vunpack.c.l.bf16 %v5139_v13  ;;  %v1778_v29 = vadd.f32 %v1714_v16, %v1517_v19  ;;  %v2236_v30 = vmul.f32 %v5058_v21, %v5616_v15  ;;  %v5363_v14 = vld [vmem:[%s7552_s0 + $0x828] sm:$0xff]  }
  0x95   :  { %v181_v31 = vmul.f32 %v3973_v22, %v5577_v41  ;;  %v4102_v32 = vunpack.c.h.bf16 %v5139_v13  ;;  %v182_v34 = vmul.f32 %v3974_v26, %v5577_v41  ;;  %v4229_v36 = vunpack.c.l.bf16 %v5171_v23 }
  0x96   :  { %v2038_v33 = vadd.f32 %v1974_v17, %v1777_v24  ;;  %v378_v35 = vmul.f32 %v4101_v27, %v5579_v42  ;;  %v2039_v37 = vadd.f32 %v1975_v20, %v1778_v29  ;;  %v4230_v39 = vunpack.c.h.bf16 %v5171_v23  ;;  %v5123_v24 = vld [vmem:[%s7552_s0 + $0xa8] sm:$0xff]  }
  0x97   :  { %v379_v38 = vmul.f32 %v4102_v32, %v5579_v42  ;;  %v4357_v46 = vunpack.c.l.bf16 %v5203_v28  ;;  %v639_v50 = vmul.f32 %v4229_v36, %v5581_v43  ;;  %v4358_v51 = vunpack.c.h.bf16 %v5203_v28  ;;  %v5155_v29 = vld [vmem:[%s7552_s0 + $0x1a8] sm:$0xff]  }
  0x98   :  { %v2299_v59 = vadd.f32 %v2235_v25, %v2038_v33  ;;  %v442_v49 = vadd.f32 %v378_v35, %v181_v31  ;;  %v2300_v53 = vadd.f32 %v2236_v30, %v2039_v37  ;;  %v640_v55 = vmul.f32 %v4230_v39, %v5581_v43 }
  0x99   :  { %v443_v54 = vadd.f32 %v379_v38, %v182_v34  ;;  %v900_v56 = vmul.f32 %v4357_v46, %v5583_v44  ;;  %v901_v60 = vmul.f32 %v4358_v51, %v5583_v44  ;;  %v4485_v61 = vunpack.c.l.bf16 %v5235_v48  ;;  %v5187_v34 = vld [vmem:[%s7552_s0 + $0x2a8] sm:$0xff]  }
  0x9a   :  { %v2370_v57 = vadd.f32 %v6036_v40, %v2299_v59  ;;  %v703_v58 = vadd.f32 %v639_v50, %v442_v49  ;;  %v2371_v62 = vadd.f32 %v6036_v40, %v2300_v53  ;;  %v4486_v0 = vunpack.c.h.bf16 %v5235_v48  ;;  %v5219_v49 = vld [vmem:[%s7552_s0 + $0x3a8] sm:$0xff]  }
  0x9b   :  { %v704_v63 = vadd.f32 %v640_v55, %v443_v54  ;;  %v4613_v1 = vunpack.c.l.bf16 %v5267_v52  ;;  %v1161_v6 = vmul.f32 %v4485_v61, %v5585_v45  ;;  %v4614_v7 = vunpack.c.h.bf16 %v5267_v52 }
  0x9c   :  { %v2434_v4 = vmax.f32 %v2370_v57, 0.0  ;;  %v964_v5 = vadd.f32 %v900_v56, %v703_v58  ;;  %v2435_v9 = vmax.f32 %v2371_v62, 0.0  ;;  %v1162_v12 = vmul.f32 %v4486_v0, %v5585_v45  ;;  %v5251_v58 = vld [vmem:[%s7552_s0 + $0x4a8] sm:$0xff]  }
  0x9d   :  { %v965_v11 = vadd.f32 %v901_v60, %v704_v63  ;;  %v1422_v13 = vmul.f32 %v4613_v1, %v5587_v47  ;;  %v1423_v17 = vmul.f32 %v4614_v7, %v5587_v47  ;;  %v4741_v18 = vunpack.c.l.bf16 %v5299_v3 }
  0x9e   :  { %v1225_v16 = vadd.f32 %v1161_v6, %v964_v5  ;;  %v4742_v19 = vunpack.c.h.bf16 %v5299_v3  ;;  %v2478_v20 = vpack.c.bf16 %v2435_v9, %v2434_v4  ;;  %v4869_v22 = vunpack.c.l.bf16 %v5331_v8  ;;  %v5283_v5 = vld [vmem:[%s7552_s0 + $0x5a8] sm:$0xff]  }
  0x9f   :  { %v1226_v21 = vadd.f32 %v1162_v12, %v965_v11  ;;  %v4870_v23 = vunpack.c.h.bf16 %v5331_v8  ;;  %v1683_v26 = vmul.f32 %v4741_v18, %v5607_v2  ;;  %v4997_v28 = vunpack.c.l.bf16 %v5363_v14 }
  0xa0   :  { %v1486_v25 = vadd.f32 %v1422_v13, %v1225_v16  ;;  %v1684_v27 = vmul.f32 %v4742_v19, %v5607_v2  ;;  %5465 = vmatprep.mubr.msk.bf16.mxu1 %vm2498_vm1, %v2478_v20  ;;  %v1944_v31 = vmul.f32 %v4869_v22, %v5614_v10  ;;  %v4998_v33 = vunpack.c.h.bf16 %v5363_v14  ;;  %v5315_v16 = vld [vmem:[%s7552_s0 + $0x6a8] sm:$0xff]  }
  0xa1   :  { %v1487_v30 = vadd.f32 %v1423_v17, %v1226_v21  ;;  %v1945_v32 = vmul.f32 %v4870_v23, %v5614_v10  ;;  %v2205_v36 = vmul.f32 %v4997_v28, %v5616_v15  ;;  %v4037_v37 = vunpack.c.l.bf16 %v5123_v24  ;;  %v5347_v21 = vld [vmem:[%s7552_s0 + $0x7a8] sm:$0xff]  }
  0xa2   :  { %v1747_v35 = vadd.f32 %v1683_v26, %v1486_v25  ;;  %v4038_v38 = vunpack.c.h.bf16 %v5123_v24  ;;  %v2206_v46 = vmul.f32 %v4998_v33, %v5616_v15  ;;  %v4165_v48 = vunpack.c.l.bf16 %v5155_v29  ;;  %v5379_v26 = vld [vmem:[%s7552_s0 + $0x8a8] sm:$0xff]  }
  0xa3   :  { %v1748_v39 = vadd.f32 %v1684_v27, %v1487_v30  ;;  %v4166_v59 = vunpack.c.h.bf16 %v5155_v29  ;;  %v213_v51 = vmul.f32 %v4037_v37, %v5577_v41  ;;  %v4293_v53 = vunpack.c.l.bf16 %v5187_v34 }
  0xa4   :  { %v2008_v50 = vadd.f32 %v1944_v31, %v1747_v35  ;;  %v214_v52 = vmul.f32 %v4038_v38, %v5577_v41  ;;  %v410_v55 = vmul.f32 %v4165_v48, %v5579_v42  ;;  %v4294_v57 = vunpack.c.h.bf16 %v5187_v34  ;;  %v5108_v35 = vld [vmem:[%s7552_s0 + $0x30] sm:$0xff]  }
  0xa5   :  { %v2009_v54 = vadd.f32 %v1945_v32, %v1748_v39  ;;  %v411_v56 = vmul.f32 %v4166_v59, %v5579_v42  ;;  %v671_v61 = vmul.f32 %v4293_v53, %v5581_v43  ;;  %v4421_v62 = vunpack.c.l.bf16 %v5219_v49 }
  0xa6   :  { %v2269_v60 = vadd.f32 %v2205_v36, %v2008_v50  ;;  %v4422_v63 = vunpack.c.h.bf16 %v5219_v49  ;;  %v474_v1 = vadd.f32 %v410_v55, %v213_v51  ;;  %v672_v4 = vmul.f32 %v4294_v57, %v5581_v43  ;;  %v5172_v51 = vld [vmem:[%s7552_s0 + $0x230] sm:$0xff]  }
  0xa7   :  { %v2270_v0 = vadd.f32 %v2206_v46, %v2009_v54  ;;  %v475_v3 = vadd.f32 %v411_v56, %v214_v52  ;;  %v932_v7 = vmul.f32 %v4421_v62, %v5583_v44  ;;  %v4549_v9 = vunpack.c.l.bf16 %v5251_v58  ;;  %v5140_v46 = vld [vmem:[%s7552_s0 + $0x130] sm:$0xff]  }
  0xa8   :  { %v2340_v6 = vadd.f32 %v6036_v40, %v2269_v60  ;;  %v933_v8 = vmul.f32 %v4422_v63, %v5583_v44  ;;  %v735_v12 = vadd.f32 %v671_v61, %v474_v1  ;;  %v4550_v14 = vunpack.c.h.bf16 %v5251_v58  ;;  %v5204_v61 = vld [vmem:[%s7552_s0 + $0x330] sm:$0xff]  }
  0xa9   :  { %v2341_v11 = vadd.f32 %v6036_v40, %v2270_v0  ;;  %v736_v13 = vadd.f32 %v672_v4, %v475_v3  ;;  %v1193_v18 = vmul.f32 %v4549_v9, %v5585_v45  ;;  %v4677_v19 = vunpack.c.l.bf16 %v5283_v5 }
  0xaa   :  { %v2404_v17 = vmax.f32 %v2340_v6, 0.0  ;;  %v4678_v20 = vunpack.c.h.bf16 %v5283_v5  ;;  %v996_v23 = vadd.f32 %v932_v7, %v735_v12  ;;  %v1194_v25 = vmul.f32 %v4550_v14, %v5585_v45  ;;  %v5236_v7 = vld [vmem:[%s7552_s0 + $0x430] sm:$0xff]  }
  0xab   :  { %v2405_v22 = vmax.f32 %v2341_v11, 0.0  ;;  %v997_v24 = vadd.f32 %v933_v8, %v736_v13  ;;  %v1454_v27 = vmul.f32 %v4677_v19, %v5587_v47  ;;  %v4805_v29 = vunpack.c.l.bf16 %v5315_v16 }
  0xac   :  { %v1455_v28 = vmul.f32 %v4678_v20, %v5587_v47  ;;  %v4806_v30 = vunpack.c.h.bf16 %v5315_v16  ;;  %v1257_v32 = vadd.f32 %v1193_v18, %v996_v23  ;;  %v4933_v34 = vunpack.c.l.bf16 %v5347_v21  ;;  %v5268_v18 = vld [vmem:[%s7552_s0 + $0x530] sm:$0xff]  }
  0xad   :  { %v2463_v31 = vpack.c.bf16 %v2405_v22, %v2404_v17  ;;  %v1258_v33 = vadd.f32 %v1194_v25, %v997_v24  ;;  %v1715_v36 = vmul.f32 %v4805_v29, %v5607_v2  ;;  %v4934_v38 = vunpack.c.h.bf16 %v5347_v21 }
  0xae   :  { %v1716_v37 = vmul.f32 %v4806_v30, %v5607_v2  ;;  %v5061_v39 = vunpack.c.l.bf16 %v5379_v26  ;;  %v1518_v48 = vadd.f32 %v1454_v27, %v1257_v32  ;;  %v1976_v49 = vmul.f32 %v4933_v34, %v5614_v10  ;;  %v5300_v27 = vld [vmem:[%s7552_s0 + $0x630] sm:$0xff]  }
  0xaf   :  { %5434 = vmatmul.mubr.msk.bf16.gmra.mrb[8].mxu0 %vm2498_vm1, %v2463_v31  ;;  %v1519_v59 = vadd.f32 %v1455_v28, %v1258_v33  ;;  %v5062_v50 = vunpack.c.h.bf16 %v5379_v26  ;;  %v1977_v52 = vmul.f32 %v4934_v38, %v5614_v10  ;;  %v3977_v54 = vunpack.c.l.bf16 %v5108_v35  ;;  %v5332_v32 = vld [vmem:[%s7552_s0 + $0x730] sm:$0xff]  }
  0xb0   :  { %v2237_v53 = vmul.f32 %v5061_v39, %v5616_v15  ;;  %v3978_v55 = vunpack.c.h.bf16 %v5108_v35  ;;  %v1779_v56 = vadd.f32 %v1715_v36, %v1518_v48  ;;  %v4105_v60 = vunpack.c.l.bf16 %v5140_v46 }
  0xb1   :  { %v1780_v57 = vadd.f32 %v1716_v37, %v1519_v59  ;;  %v2238_v58 = vmul.f32 %v5062_v50, %v5616_v15  ;;  %v183_v62 = vmul.f32 %v3977_v54, %v5577_v41  ;;  %v4106_v0 = vunpack.c.h.bf16 %v5140_v46  ;;  %v5364_v37 = vld [vmem:[%s7552_s0 + $0x830] sm:$0xff]  }
  0xb2   :  { %v184_v63 = vmul.f32 %v3978_v55, %v5577_v41  ;;  %v4233_v1 = vunpack.c.l.bf16 %v5172_v51  ;;  %v2040_v3 = vadd.f32 %v1976_v49, %v1779_v56  ;;  %v380_v5 = vmul.f32 %v4105_v60, %v5579_v42 }
  0xb3   :  { %v2041_v4 = vadd.f32 %v1977_v52, %v1780_v57  ;;  %v4234_v6 = vunpack.c.h.bf16 %v5172_v51  ;;  %v381_v8 = vmul.f32 %v4106_v0, %v5579_v42  ;;  %v4361_v11 = vunpack.c.l.bf16 %v5204_v61  ;;  %v5124_v52 = vld [vmem:[%s7552_s0 + $0xb0] sm:$0xff]  }
  0xb4   :  { %v641_v9 = vmul.f32 %v4233_v1, %v5581_v43  ;;  %v4362_v12 = vunpack.c.h.bf16 %v5204_v61  ;;  %v2301_v13 = vadd.f32 %v2237_v53, %v2040_v3  ;;  %v444_v16 = vadd.f32 %v380_v5, %v183_v62  ;;  %v5156_v57 = vld [vmem:[%s7552_s0 + $0x1b0] sm:$0xff]  }
  0xb5   :  { %v2302_v14 = vadd.f32 %v2238_v58, %v2041_v4  ;;  %v642_v17 = vmul.f32 %v4234_v6, %v5581_v43  ;;  %v445_v19 = vadd.f32 %v381_v8, %v184_v63  ;;  %v902_v20 = vmul.f32 %v4361_v11, %v5583_v44  ;;  %v5188_v63 = vld [vmem:[%s7552_s0 + $0x2b0] sm:$0xff]  }
  0xb6   :  { %v903_v21 = vmul.f32 %v4362_v12, %v5583_v44  ;;  %v4489_v22 = vunpack.c.l.bf16 %v5236_v7  ;;  %v2372_v23 = vadd.f32 %v6036_v40, %v2301_v13  ;;  %v705_v25 = vadd.f32 %v641_v9, %v444_v16  ;;  %v5220_v9 = vld [vmem:[%s7552_s0 + $0x3b0] sm:$0xff]  }
  0xb7   :  { %v2373_v24 = vadd.f32 %v6036_v40, %v2302_v14  ;;  %v4490_v26 = vunpack.c.h.bf16 %v5236_v7  ;;  %v706_v28 = vadd.f32 %v642_v17, %v445_v19  ;;  %v4617_v30 = vunpack.c.l.bf16 %v5268_v18 }
  0xb8   :  { %v1163_v29 = vmul.f32 %v4489_v22, %v5585_v45  ;;  %v4618_v31 = vunpack.c.h.bf16 %v5268_v18  ;;  %v2436_v33 = vmax.f32 %v2372_v23, 0.0  ;;  %v966_v35 = vadd.f32 %v902_v20, %v705_v25  ;;  %v5252_v20 = vld [vmem:[%s7552_s0 + $0x4b0] sm:$0xff]  }
  0xb9   :  { %v2437_v34 = vmax.f32 %v2373_v24, 0.0  ;;  %v1164_v36 = vmul.f32 %v4490_v26, %v5585_v45  ;;  %v967_v38 = vadd.f32 %v903_v21, %v706_v28  ;;  %v1424_v39 = vmul.f32 %v4617_v30, %v5587_v47 }
  0xba   :  { %v1425_v46 = vmul.f32 %v4618_v31, %v5587_v47  ;;  %v4745_v48 = vunpack.c.l.bf16 %v5300_v27  ;;  %v1227_v49 = vadd.f32 %v1163_v29, %v966_v35  ;;  %v4746_v50 = vunpack.c.h.bf16 %v5300_v27  ;;  %v5284_v29 = vld [vmem:[%s7552_s0 + $0x5b0] sm:$0xff]  }
  0xbb   :  { %v2479_v59 = vpack.c.bf16 %v2437_v34, %v2436_v33  ;;  %v4873_v51 = vunpack.c.l.bf16 %v5332_v32  ;;  %v1228_v53 = vadd.f32 %v1164_v36, %v967_v38  ;;  %v4874_v55 = vunpack.c.h.bf16 %v5332_v32  ;;  %v5316_v38 = vld [vmem:[%s7552_s0 + $0x6b0] sm:$0xff]  }
  0xbc   :  { %v1685_v54 = vmul.f32 %v4745_v48, %v5607_v2  ;;  %v5001_v56 = vunpack.c.l.bf16 %v5364_v37  ;;  %v1488_v58 = vadd.f32 %v1424_v39, %v1227_v49  ;;  %v1686_v60 = vmul.f32 %v4746_v50, %v5607_v2  ;;  %v5348_v49 = vld [vmem:[%s7552_s0 + $0x7b0] sm:$0xff]  }
  0xbd   :  { %5466 = vmatmul.mubr.msk.bf16.gmra.mrb[8].mxu1 %vm2498_vm1, %v2479_v59  ;;  %v1946_v61 = vmul.f32 %v4873_v51, %v5614_v10  ;;  %v5002_v62 = vunpack.c.h.bf16 %v5364_v37  ;;  %v1489_v0 = vadd.f32 %v1425_v46, %v1228_v53  ;;  %v1947_v1 = vmul.f32 %v4874_v55, %v5614_v10 }
  0xbe   :  { %v2207_v3 = vmul.f32 %v5001_v56, %v5616_v15  ;;  %v4041_v4 = vunpack.c.l.bf16 %v5124_v52  ;;  %v1749_v5 = vadd.f32 %v1685_v54, %v1488_v58  ;;  %v4042_v7 = vunpack.c.h.bf16 %v5124_v52  ;;  %v5380_v58 = vld [vmem:[%s7552_s0 + $0x8b0] sm:$0xff]  }
  0xbf   :  { %v2208_v6 = vmul.f32 %v5002_v62, %v5616_v15  ;;  %v4169_v8 = vunpack.c.l.bf16 %v5156_v57  ;;  %v1750_v11 = vadd.f32 %v1686_v60, %v1489_v0  ;;  %v4170_v13 = vunpack.c.h.bf16 %v5156_v57  ;;  %v5109_v0 = vld [vmem:[%s7552_s0 + $0x38] sm:$0xff]  }
  0xc0   :  { %v215_v12 = vmul.f32 %v4041_v4, %v5577_v41  ;;  %v4297_v14 = vunpack.c.l.bf16 %v5188_v63  ;;  %v2010_v16 = vadd.f32 %v1946_v61, %v1749_v5  ;;  %v216_v17 = vmul.f32 %v4042_v7, %v5577_v41 }
  0xc1   :  { %v412_v18 = vmul.f32 %v4169_v8, %v5579_v42  ;;  %v4298_v19 = vunpack.c.h.bf16 %v5188_v63  ;;  %v2011_v21 = vadd.f32 %v1947_v1, %v1750_v11  ;;  %v413_v22 = vmul.f32 %v4170_v13, %v5579_v42 }
  0xc2   :  { %v673_v23 = vmul.f32 %v4297_v14, %v5581_v43  ;;  %v4425_v24 = vunpack.c.l.bf16 %v5220_v9  ;;  %v2271_v25 = vadd.f32 %v2207_v3, %v2010_v16  ;;  %v4426_v28 = vunpack.c.h.bf16 %v5220_v9 }
  0xc3   :  { %v476_v26 = vadd.f32 %v412_v18, %v215_v12  ;;  %v674_v27 = vmul.f32 %v4298_v19, %v5581_v43  ;;  %v2272_v30 = vadd.f32 %v2208_v6, %v2011_v21  ;;  %v477_v31 = vadd.f32 %v413_v22, %v216_v17  ;;  %v5141_v6 = vld [vmem:[%s7552_s0 + $0x138] sm:$0xff]  }
  0xc4   :  { %v934_v32 = vmul.f32 %v4425_v24, %v5583_v44  ;;  %v4553_v33 = vunpack.c.l.bf16 %v5252_v20  ;;  %v2342_v34 = vadd.f32 %v6036_v40, %v2271_v25  ;;  %v935_v36 = vmul.f32 %v4426_v28, %v5583_v44  ;;  %v5173_v17 = vld [vmem:[%s7552_s0 + $0x238] sm:$0xff]  }
  0xc5   :  { %v737_v35 = vadd.f32 %v673_v23, %v476_v26  ;;  %v4554_v37 = vunpack.c.h.bf16 %v5252_v20  ;;  %v2343_v39 = vadd.f32 %v6036_v40, %v2272_v30  ;;  %v738_v46 = vadd.f32 %v674_v27, %v477_v31  ;;  %v5205_v22 = vld [vmem:[%s7552_s0 + $0x338] sm:$0xff]  }
  0xc6   :  { %v1195_v48 = vmul.f32 %v4553_v33, %v5585_v45  ;;  %v4681_v59 = vunpack.c.l.bf16 %v5284_v29  ;;  %v2406_v50 = vmax.f32 %v2342_v34, 0.0  ;;  %v4682_v53 = vunpack.c.h.bf16 %v5284_v29 }
  0xc7   :  { %v998_v51 = vadd.f32 %v934_v32, %v737_v35  ;;  %v1196_v52 = vmul.f32 %v4554_v37, %v5585_v45  ;;  %v2407_v54 = vmax.f32 %v2343_v39, 0.0  ;;  %v999_v55 = vadd.f32 %v935_v36, %v738_v46  ;;  %v5237_v35 = vld [vmem:[%s7552_s0 + $0x438] sm:$0xff]  }
  0xc8   :  { %v1456_v56 = vmul.f32 %v4681_v59, %v5587_v47  ;;  %v4809_v57 = vunpack.c.l.bf16 %v5316_v38  ;;  %v1457_v61 = vmul.f32 %v4682_v53, %v5587_v47  ;;  %v4810_v62 = vunpack.c.h.bf16 %v5316_v38  ;;  %v5269_v46 = vld [vmem:[%s7552_s0 + $0x538] sm:$0xff]  }
  0xc9   :  { %v1259_v60 = vadd.f32 %v1195_v48, %v998_v51  ;;  %v4937_v63 = vunpack.c.l.bf16 %v5348_v49  ;;  %v2464_v1 = vpack.c.bf16 %v2407_v54, %v2406_v50  ;;  %v1260_v3 = vadd.f32 %v1196_v52, %v999_v55 }
  0xca   :  { %v1717_v4 = vmul.f32 %v4809_v57, %v5607_v2  ;;  %v4938_v5 = vunpack.c.h.bf16 %v5348_v49  ;;  %v1718_v8 = vmul.f32 %v4810_v62, %v5607_v2  ;;  %v5065_v11 = vunpack.c.l.bf16 %v5380_v58 }
  0xcb   :  { %v1520_v7 = vadd.f32 %v1456_v56, %v1259_v60  ;;  %v1978_v9 = vmul.f32 %v4937_v63, %v5614_v10  ;;  %5437 = vmatprep.mubr.msk.bf16.mxu0 %vm2498_vm1, %v2464_v1  ;;  %v1521_v12 = vadd.f32 %v1457_v61, %v1260_v3  ;;  %v5066_v14 = vunpack.c.h.bf16 %v5380_v58  ;;  %v5301_v60 = vld [vmem:[%s7552_s0 + $0x638] sm:$0xff]  }
  0xcc   :  { %v1979_v13 = vmul.f32 %v4938_v5, %v5614_v10  ;;  %v3981_v16 = vunpack.c.l.bf16 %v5109_v0  ;;  %v2239_v19 = vmul.f32 %v5065_v11, %v5616_v15  ;;  %v3982_v20 = vunpack.c.h.bf16 %v5109_v0  ;;  %v5333_v1 = vld [vmem:[%s7552_s0 + $0x738] sm:$0xff]  }
  0xcd   :  { %v1781_v18 = vadd.f32 %v1717_v4, %v1520_v7  ;;  %v4109_v21 = vunpack.c.l.bf16 %v5141_v6  ;;  %v1782_v23 = vadd.f32 %v1718_v8, %v1521_v12  ;;  %v2240_v24 = vmul.f32 %v5066_v14, %v5616_v15  ;;  %v5365_v7 = vld [vmem:[%s7552_s0 + $0x838] sm:$0xff]  }
  0xce   :  { %v185_v25 = vmul.f32 %v3981_v16, %v5577_v41  ;;  %v4110_v26 = vunpack.c.h.bf16 %v5141_v6  ;;  %v186_v28 = vmul.f32 %v3982_v20, %v5577_v41  ;;  %v4237_v30 = vunpack.c.l.bf16 %v5173_v17 }
  0xcf   :  { %v2042_v27 = vadd.f32 %v1978_v9, %v1781_v18  ;;  %v382_v29 = vmul.f32 %v4109_v21, %v5579_v42  ;;  %v2043_v31 = vadd.f32 %v1979_v13, %v1782_v23  ;;  %v4238_v33 = vunpack.c.h.bf16 %v5173_v17  ;;  %v5125_v18 = vld [vmem:[%s7552_s0 + $0xb8] sm:$0xff]  }
  0xd0   :  { %v383_v32 = vmul.f32 %v4110_v26, %v5579_v42  ;;  %v4365_v34 = vunpack.c.l.bf16 %v5205_v22  ;;  %v643_v38 = vmul.f32 %v4237_v30, %v5581_v43  ;;  %v4366_v39 = vunpack.c.h.bf16 %v5205_v22  ;;  %v5157_v23 = vld [vmem:[%s7552_s0 + $0x1b8] sm:$0xff]  }
  0xd1   :  { %v2303_v36 = vadd.f32 %v2239_v19, %v2042_v27  ;;  %v446_v37 = vadd.f32 %v382_v29, %v185_v25  ;;  %v2304_v48 = vadd.f32 %v2240_v24, %v2043_v31  ;;  %v644_v49 = vmul.f32 %v4238_v33, %v5581_v43 }
  0xd2   :  { %v447_v59 = vadd.f32 %v383_v32, %v186_v28  ;;  %v904_v50 = vmul.f32 %v4365_v34, %v5583_v44  ;;  %v905_v53 = vmul.f32 %v4366_v39, %v5583_v44  ;;  %v4493_v54 = vunpack.c.l.bf16 %v5237_v35  ;;  %v5189_v28 = vld [vmem:[%s7552_s0 + $0x2b8] sm:$0xff]  }
  0xd3   :  { %v2374_v51 = vadd.f32 %v6036_v40, %v2303_v36  ;;  %v707_v52 = vadd.f32 %v643_v38, %v446_v37  ;;  %v2375_v55 = vadd.f32 %v6036_v40, %v2304_v48  ;;  %v4494_v57 = vunpack.c.h.bf16 %v5237_v35  ;;  %v5221_v37 = vld [vmem:[%s7552_s0 + $0x3b8] sm:$0xff]  }
  0xd4   :  { %v708_v56 = vadd.f32 %v644_v49, %v447_v59  ;;  %v4621_v58 = vunpack.c.l.bf16 %v5269_v46  ;;  %v1165_v63 = vmul.f32 %v4493_v54, %v5585_v45  ;;  %v4622_v0 = vunpack.c.h.bf16 %v5269_v46 }
  0xd5   :  { %v2438_v61 = vmax.f32 %v2374_v51, 0.0  ;;  %v968_v62 = vadd.f32 %v904_v50, %v707_v52  ;;  %v2439_v3 = vmax.f32 %v2375_v55, 0.0  ;;  %v1166_v5 = vmul.f32 %v4494_v57, %v5585_v45  ;;  %v5253_v52 = vld [vmem:[%s7552_s0 + $0x4b8] sm:$0xff]  }
  0xd6   :  { %v969_v4 = vadd.f32 %v905_v53, %v708_v56  ;;  %v1426_v6 = vmul.f32 %v4621_v58, %v5587_v47  ;;  %v1427_v9 = vmul.f32 %v4622_v0, %v5587_v47  ;;  %v4749_v11 = vunpack.c.l.bf16 %v5301_v60 }
  0xd7   :  { %v1229_v8 = vadd.f32 %v1165_v63, %v968_v62  ;;  %v4750_v12 = vunpack.c.h.bf16 %v5301_v60  ;;  %v2480_v13 = vpack.c.bf16 %v2439_v3, %v2438_v61  ;;  %v4877_v16 = vunpack.c.l.bf16 %v5333_v1  ;;  %v5285_v62 = vld [vmem:[%s7552_s0 + $0x5b8] sm:$0xff]  }
  0xd8   :  { %v1230_v14 = vadd.f32 %v1166_v5, %v969_v4  ;;  %v4878_v17 = vunpack.c.h.bf16 %v5333_v1  ;;  %v1687_v20 = vmul.f32 %v4749_v11, %v5607_v2  ;;  %v5005_v22 = vunpack.c.l.bf16 %v5365_v7 }
  0xd9   :  { %v1490_v19 = vadd.f32 %v1426_v6, %v1229_v8  ;;  %v1688_v21 = vmul.f32 %v4750_v12, %v5607_v2  ;;  %5469 = vmatprep.mubr.msk.bf16.mxu1 %vm2498_vm1, %v2480_v13  ;;  %v1948_v25 = vmul.f32 %v4877_v16, %v5614_v10  ;;  %v5006_v27 = vunpack.c.h.bf16 %v5365_v7  ;;  %v5317_v8 = vld [vmem:[%s7552_s0 + $0x6b8] sm:$0xff]  }
  0xda   :  { %v1491_v24 = vadd.f32 %v1427_v9, %v1230_v14  ;;  %v1949_v26 = vmul.f32 %v4878_v17, %v5614_v10  ;;  %v2209_v30 = vmul.f32 %v5005_v22, %v5616_v15  ;;  %v4045_v31 = vunpack.c.l.bf16 %v5125_v18  ;;  %v5349_v14 = vld [vmem:[%s7552_s0 + $0x7b8] sm:$0xff]  }
  0xdb   :  { %v1751_v29 = vadd.f32 %v1687_v20, %v1490_v19  ;;  %v4046_v32 = vunpack.c.h.bf16 %v5125_v18  ;;  %v2210_v34 = vmul.f32 %v5006_v27, %v5616_v15  ;;  %v4173_v35 = vunpack.c.l.bf16 %v5157_v23  ;;  %v5381_v20 = vld [vmem:[%s7552_s0 + $0x8b8] sm:$0xff]  }
  0xdc   :  { %v1752_v33 = vadd.f32 %v1688_v21, %v1491_v24  ;;  %v4174_v36 = vunpack.c.h.bf16 %v5157_v23  ;;  %v217_v39 = vmul.f32 %v4045_v31, %v5577_v41  ;;  %v4301_v48 = vunpack.c.l.bf16 %v5189_v28 }
  0xdd   :  { %v2012_v38 = vadd.f32 %v1948_v25, %v1751_v29  ;;  %v218_v46 = vmul.f32 %v4046_v32, %v5577_v41  ;;  %v414_v49 = vmul.f32 %v4173_v35, %v5579_v42  ;;  %v4302_v51 = vunpack.c.h.bf16 %v5189_v28  ;;  %v5110_v29 = vld [vmem:[%s7552_s0 + $0x40] sm:$0xff]  }
  0xde   :  { %v2013_v59 = vadd.f32 %v1949_v26, %v1752_v33  ;;  %v415_v50 = vmul.f32 %v4174_v36, %v5579_v42  ;;  %v675_v54 = vmul.f32 %v4301_v48, %v5581_v43  ;;  %v4429_v55 = vunpack.c.l.bf16 %v5221_v37 }
  0xdf   :  { %v2273_v53 = vadd.f32 %v2209_v30, %v2012_v38  ;;  %v4430_v56 = vunpack.c.h.bf16 %v5221_v37  ;;  %v478_v58 = vadd.f32 %v414_v49, %v217_v39  ;;  %v676_v61 = vmul.f32 %v4302_v51, %v5581_v43  ;;  %v5174_v39 = vld [vmem:[%s7552_s0 + $0x240] sm:$0xff]  }
  0xe0   :  { %v2274_v57 = vadd.f32 %v2210_v34, %v2013_v59  ;;  %v479_v60 = vadd.f32 %v415_v50, %v218_v46  ;;  %v936_v0 = vmul.f32 %v4429_v55, %v5583_v44  ;;  %v4557_v3 = vunpack.c.l.bf16 %v5253_v52  ;;  %v5142_v34 = vld [vmem:[%s7552_s0 + $0x140] sm:$0xff]  }
  0xe1   :  { %v2344_v63 = vadd.f32 %v6036_v40, %v2273_v53  ;;  %v937_v1 = vmul.f32 %v4430_v56, %v5583_v44  ;;  %v739_v5 = vadd.f32 %v675_v54, %v478_v58  ;;  %v4558_v7 = vunpack.c.h.bf16 %v5253_v52  ;;  %v5206_v54 = vld [vmem:[%s7552_s0 + $0x340] sm:$0xff]  }
  0xe2   :  { %v2345_v4 = vadd.f32 %v6036_v40, %v2274_v57  ;;  %v740_v6 = vadd.f32 %v676_v61, %v479_v60  ;;  %v1197_v11 = vmul.f32 %v4557_v3, %v5585_v45  ;;  %v4685_v12 = vunpack.c.l.bf16 %v5285_v62 }
  0xe3   :  { %v2408_v9 = vmax.f32 %v2344_v63, 0.0  ;;  %v4686_v13 = vunpack.c.h.bf16 %v5285_v62  ;;  %v1000_v17 = vadd.f32 %v936_v0, %v739_v5  ;;  %v1198_v19 = vmul.f32 %v4558_v7, %v5585_v45  ;;  %v5238_v0 = vld [vmem:[%s7552_s0 + $0x440] sm:$0xff]  }
  0xe4   :  { %v2409_v16 = vmax.f32 %v2345_v4, 0.0  ;;  %v1001_v18 = vadd.f32 %v937_v1, %v740_v6  ;;  %v1458_v21 = vmul.f32 %v4685_v12, %v5587_v47  ;;  %v4813_v23 = vunpack.c.l.bf16 %v5317_v8 }
  0xe5   :  { %v1459_v22 = vmul.f32 %v4686_v13, %v5587_v47  ;;  %v4814_v24 = vunpack.c.h.bf16 %v5317_v8  ;;  %v1261_v26 = vadd.f32 %v1197_v11, %v1000_v17  ;;  %v4941_v28 = vunpack.c.l.bf16 %v5349_v14  ;;  %v5270_v11 = vld [vmem:[%s7552_s0 + $0x540] sm:$0xff]  }
  0xe6   :  { %v2465_v25 = vpack.c.bf16 %v2409_v16, %v2408_v9  ;;  %v1262_v27 = vadd.f32 %v1198_v19, %v1001_v18  ;;  %v1719_v30 = vmul.f32 %v4813_v23, %v5607_v2  ;;  %v4942_v32 = vunpack.c.h.bf16 %v5349_v14 }
  0xe7   :  { %v1720_v31 = vmul.f32 %v4814_v24, %v5607_v2  ;;  %v5069_v33 = vunpack.c.l.bf16 %v5381_v20  ;;  %v1522_v35 = vadd.f32 %v1458_v21, %v1261_v26  ;;  %v1980_v37 = vmul.f32 %v4941_v28, %v5614_v10  ;;  %v5302_v21 = vld [vmem:[%s7552_s0 + $0x640] sm:$0xff]  }
  0xe8   :  { %5438 = vmatmul.mubr.msk.bf16.gmra.mrb[12].mxu0 %vm2498_vm1, %v2465_v25  ;;  %v1523_v36 = vadd.f32 %v1459_v22, %v1262_v27  ;;  %v5070_v38 = vunpack.c.h.bf16 %v5381_v20  ;;  %v1981_v46 = vmul.f32 %v4942_v32, %v5614_v10  ;;  %v3985_v59 = vunpack.c.l.bf16 %v5110_v29  ;;  %v5334_v26 = vld [vmem:[%s7552_s0 + $0x740] sm:$0xff]  }
  0xe9   :  { %v2241_v48 = vmul.f32 %v5069_v33, %v5616_v15  ;;  %v3986_v49 = vunpack.c.h.bf16 %v5110_v29  ;;  %v1783_v50 = vadd.f32 %v1719_v30, %v1522_v35  ;;  %v4113_v53 = vunpack.c.l.bf16 %v5142_v34  ;;  %v5366_v30 = vld [vmem:[%s7552_s0 + $0x840] sm:$0xff]  }
  0xea   :  { %v1784_v51 = vadd.f32 %v1720_v31, %v1523_v36  ;;  %v2242_v52 = vmul.f32 %v5070_v38, %v5616_v15  ;;  %v187_v55 = vmul.f32 %v3985_v59, %v5577_v41  ;;  %v4114_v57 = vunpack.c.h.bf16 %v5142_v34 }
  0xeb   :  { %v188_v56 = vmul.f32 %v3986_v49, %v5577_v41  ;;  %v4241_v58 = vunpack.c.l.bf16 %v5174_v39  ;;  %v2044_v60 = vadd.f32 %v1980_v37, %v1783_v50  ;;  %v384_v62 = vmul.f32 %v4113_v53, %v5579_v42  ;;  %v5158_v50 = vld [vmem:[%s7552_s0 + $0x1c0] sm:$0xff]  }
  0xec   :  { %v2045_v61 = vadd.f32 %v1981_v46, %v1784_v51  ;;  %v4242_v63 = vunpack.c.h.bf16 %v5174_v39  ;;  %v385_v1 = vmul.f32 %v4114_v57, %v5579_v42  ;;  %v4369_v4 = vunpack.c.l.bf16 %v5206_v54  ;;  %v5126_v39 = vld [vmem:[%s7552_s0 + $0xc0] sm:$0xff]  }
  0xed   :  { %v645_v3 = vmul.f32 %v4241_v58, %v5581_v43  ;;  %v4370_v5 = vunpack.c.h.bf16 %v5206_v54  ;;  %v2305_v6 = vadd.f32 %v2241_v48, %v2044_v60  ;;  %v448_v8 = vadd.f32 %v384_v62, %v187_v55  ;;  %v5190_v55 = vld [vmem:[%s7552_s0 + $0x2c0] sm:$0xff]  }
  0xee   :  { %v2306_v7 = vadd.f32 %v2242_v52, %v2045_v61  ;;  %v646_v9 = vmul.f32 %v4242_v63, %v5581_v43  ;;  %v449_v12 = vadd.f32 %v385_v1, %v188_v56  ;;  %v906_v13 = vmul.f32 %v4369_v4, %v5583_v44  ;;  %v5222_v1 = vld [vmem:[%s7552_s0 + $0x3c0] sm:$0xff]  }
  0xef   :  { %v907_v14 = vmul.f32 %v4370_v5, %v5583_v44  ;;  %v4497_v16 = vunpack.c.l.bf16 %v5238_v0  ;;  %v2376_v17 = vadd.f32 %v6036_v40, %v2305_v6  ;;  %v709_v19 = vadd.f32 %v645_v3, %v448_v8 }
  0xf0   :  { %v2377_v18 = vadd.f32 %v6036_v40, %v2306_v7  ;;  %v4498_v20 = vunpack.c.h.bf16 %v5238_v0  ;;  %v710_v22 = vadd.f32 %v646_v9, %v449_v12  ;;  %v4625_v24 = vunpack.c.l.bf16 %v5270_v11  ;;  %v5254_v12 = vld [vmem:[%s7552_s0 + $0x4c0] sm:$0xff]  }
  0xf1   :  { %v1167_v23 = vmul.f32 %v4497_v16, %v5585_v45  ;;  %v4626_v25 = vunpack.c.h.bf16 %v5270_v11  ;;  %v2440_v27 = vmax.f32 %v2376_v17, 0.0  ;;  %v970_v29 = vadd.f32 %v906_v13, %v709_v19 }
  0xf2   :  { %v2441_v28 = vmax.f32 %v2377_v18, 0.0  ;;  %v1168_v40 = vmul.f32 %v4498_v20, %v5585_v45  ;;  %v971_v31 = vadd.f32 %v907_v14, %v710_v22  ;;  %v1428_v32 = vmul.f32 %v4625_v24, %v5587_v47  ;;  %v5286_v22 = vld [vmem:[%s7552_s0 + $0x5c0] sm:$0xff]  }
  0xf3   :  { %v1429_v33 = vmul.f32 %v4626_v25, %v5587_v47  ;;  %v4753_v34 = vunpack.c.l.bf16 %v5302_v21  ;;  %v1231_v36 = vadd.f32 %v1167_v23, %v970_v29  ;;  %v4754_v37 = vunpack.c.h.bf16 %v5302_v21 }
  0xf4   :  { %v2481_v35 = vpack.c.bf16 %v2441_v28, %v2440_v27  ;;  %v4881_v38 = vunpack.c.l.bf16 %v5334_v26  ;;  %v1232_v46 = vadd.f32 %v1168_v40, %v971_v31  ;;  %v4882_v59 = vunpack.c.h.bf16 %v5334_v26  ;;  %v6425_v27 = vld [vmem:[%s7554_s2] ss:$0 sm:$0xff] }
  0xf5   :  { %v1689_v48 = vmul.f32 %v4753_v34, %v5607_v2  ;;  %v5009_v49 = vunpack.c.l.bf16 %v5366_v30  ;;  %v1492_v51 = vadd.f32 %v1428_v32, %v1231_v36  ;;  %v1690_v52 = vmul.f32 %v4754_v37, %v5607_v2  ;;  %v5318_v31 = vld [vmem:[%s7552_s0 + $0x6c0] sm:$0xff]  }
  0xf6   :  { %5470 = vmatmul.mubr.msk.bf16.gmra.mrb[12].mxu1 %vm2498_vm1, %v2481_v35  ;;  %v1950_v53 = vmul.f32 %v4881_v38, %v5614_v10  ;;  %v5010_v54 = vunpack.c.h.bf16 %v5366_v30  ;;  %v1493_v56 = vadd.f32 %v1429_v33, %v1232_v46  ;;  %v1951_v57 = vmul.f32 %v4882_v59, %v5614_v10  ;;  %v5350_v36 = vld [vmem:[%s7552_s0 + $0x7c0] sm:$0xff]  }
  0xf7   :  { %v2211_v58 = vmul.f32 %v5009_v49, %v5616_v15  ;;  %v4049_v60 = vunpack.c.l.bf16 %v5126_v39  ;;  %v1753_v61 = vadd.f32 %v1689_v48, %v1492_v51  ;;  %v4050_v63 = vunpack.c.h.bf16 %v5126_v39  ;;  %v5382_v51 = vld [vmem:[%s7552_s0 + $0x8c0] sm:$0xff]  }
  0xf8   :  { %v2212_v62 = vmul.f32 %v5010_v54, %v5616_v15  ;;  %v4177_v0 = vunpack.c.l.bf16 %v5158_v50  ;;  %v1754_v3 = vadd.f32 %v1690_v52, %v1493_v56  ;;  %v4178_v5 = vunpack.c.h.bf16 %v5158_v50  ;;  %v5111_v56 = vld [vmem:[%s7552_s0 + $0x48] sm:$0xff]  }
  0xf9   :  { %v219_v4 = vmul.f32 %v4049_v60, %v5577_v41  ;;  %v4305_v6 = vunpack.c.l.bf16 %v5190_v55  ;;  %v2014_v7 = vadd.f32 %v1950_v53, %v1753_v61  ;;  %v220_v8 = vmul.f32 %v4050_v63, %v5577_v41 }
  0xfa   :  { %v416_v9 = vmul.f32 %v4177_v0, %v5579_v42  ;;  %v4306_v11 = vunpack.c.h.bf16 %v5190_v55  ;;  %v2015_v13 = vadd.f32 %v1951_v57, %v1754_v3  ;;  %v417_v14 = vmul.f32 %v4178_v5, %v5579_v42 }
  0xfb   :  { %v677_v16 = vmul.f32 %v4305_v6, %v5581_v43  ;;  %v4433_v17 = vunpack.c.l.bf16 %v5222_v1  ;;  %v2275_v18 = vadd.f32 %v2211_v58, %v2014_v7  ;;  %v4434_v21 = vunpack.c.h.bf16 %v5222_v1 }
  0xfc   :  { %v480_v19 = vadd.f32 %v416_v9, %v219_v4  ;;  %v678_v20 = vmul.f32 %v4306_v11, %v5581_v43  ;;  %v2276_v23 = vadd.f32 %v2212_v62, %v2015_v13  ;;  %v481_v24 = vadd.f32 %v417_v14, %v220_v8  ;;  %v5143_v62 = vld [vmem:[%s7552_s0 + $0x148] sm:$0xff]  }
  0xfd   :  { %v938_v25 = vmul.f32 %v4433_v17, %v5583_v44  ;;  %v4561_v26 = vunpack.c.l.bf16 %v5254_v12  ;;  %v2346_v28 = vadd.f32 %v6425_v27, %v2275_v18  ;;  %v939_v40 = vmul.f32 %v4434_v21, %v5583_v44  ;;  %v5175_v8 = vld [vmem:[%s7552_s0 + $0x248] sm:$0xff]  }
  0xfe   :  { %v741_v29 = vadd.f32 %v677_v16, %v480_v19  ;;  %v4562_v30 = vunpack.c.h.bf16 %v5254_v12  ;;  %v2347_v32 = vadd.f32 %v6425_v27, %v2276_v23  ;;  %v742_v33 = vadd.f32 %v678_v20, %v481_v24  ;;  %v5207_v14 = vld [vmem:[%s7552_s0 + $0x348] sm:$0xff]  }
  0xff   :  { %v1199_v34 = vmul.f32 %v4561_v26, %v5585_v45  ;;  %v4689_v35 = vunpack.c.l.bf16 %v5286_v22  ;;  %v2410_v37 = vmax.f32 %v2346_v28, 0.0  ;;  %v4690_v46 = vunpack.c.h.bf16 %v5286_v22 }
 0x100   :  { %v1002_v38 = vadd.f32 %v938_v25, %v741_v29  ;;  %v1200_v39 = vmul.f32 %v4562_v30, %v5585_v45  ;;  %v2411_v48 = vmax.f32 %v2347_v32, 0.0  ;;  %v1003_v59 = vadd.f32 %v939_v40, %v742_v33  ;;  %v5239_v29 = vld [vmem:[%s7552_s0 + $0x448] sm:$0xff]  }
 0x101   :  { %v1460_v49 = vmul.f32 %v4689_v35, %v5587_v47  ;;  %v4817_v50 = vunpack.c.l.bf16 %v5318_v31  ;;  %v1461_v53 = vmul.f32 %v4690_v46, %v5587_v47  ;;  %v4818_v54 = vunpack.c.h.bf16 %v5318_v31  ;;  %v5271_v33 = vld [vmem:[%s7552_s0 + $0x548] sm:$0xff]  }
 0x102   :  { %v1263_v52 = vadd.f32 %v1199_v34, %v1002_v38  ;;  %v4945_v55 = vunpack.c.l.bf16 %v5350_v36  ;;  %v2466_v57 = vpack.c.bf16 %v2411_v48, %v2410_v37  ;;  %v1264_v58 = vadd.f32 %v1200_v39, %v1003_v59 }
 0x103   :  { %v1721_v60 = vmul.f32 %v4817_v50, %v5607_v2  ;;  %v4946_v61 = vunpack.c.h.bf16 %v5350_v36  ;;  %v1722_v0 = vmul.f32 %v4818_v54, %v5607_v2  ;;  %v5073_v3 = vunpack.c.l.bf16 %v5382_v51 }
 0x104   :  { %v1524_v63 = vadd.f32 %v1460_v49, %v1263_v52  ;;  %v1982_v1 = vmul.f32 %v4945_v55, %v5614_v10  ;;  %5441 = vmatprep.mubr.msk.bf16.mxu0 %vm2498_vm1, %v2466_v57  ;;  %v1525_v4 = vadd.f32 %v1461_v53, %v1264_v58  ;;  %v5074_v6 = vunpack.c.h.bf16 %v5382_v51  ;;  %v5303_v52 = vld [vmem:[%s7552_s0 + $0x648] sm:$0xff]  }
 0x105   :  { %v1983_v5 = vmul.f32 %v4946_v61, %v5614_v10  ;;  %v3989_v7 = vunpack.c.l.bf16 %v5111_v56  ;;  %v2243_v11 = vmul.f32 %v5073_v3, %v5616_v15  ;;  %v3990_v12 = vunpack.c.h.bf16 %v5111_v56  ;;  %v5335_v57 = vld [vmem:[%s7552_s0 + $0x748] sm:$0xff]  }
 0x106   :  { %v1785_v9 = vadd.f32 %v1721_v60, %v1524_v63  ;;  %v4117_v13 = vunpack.c.l.bf16 %v5143_v62  ;;  %v1786_v16 = vadd.f32 %v1722_v0, %v1525_v4  ;;  %v2244_v17 = vmul.f32 %v5074_v6, %v5616_v15  ;;  %v5367_v63 = vld [vmem:[%s7552_s0 + $0x848] sm:$0xff]  }
 0x107   :  { %v189_v18 = vmul.f32 %v3989_v7, %v5577_v41  ;;  %v4118_v19 = vunpack.c.h.bf16 %v5143_v62  ;;  %v190_v21 = vmul.f32 %v3990_v12, %v5577_v41  ;;  %v4245_v23 = vunpack.c.l.bf16 %v5175_v8 }
 0x108   :  { %v2046_v20 = vadd.f32 %v1982_v1, %v1785_v9  ;;  %v386_v22 = vmul.f32 %v4117_v13, %v5579_v42  ;;  %v2047_v24 = vadd.f32 %v1983_v5, %v1786_v16  ;;  %v4246_v26 = vunpack.c.h.bf16 %v5175_v8  ;;  %v5127_v9 = vld [vmem:[%s7552_s0 + $0xc8] sm:$0xff]  }
 0x109   :  { %v387_v25 = vmul.f32 %v4118_v19, %v5579_v42  ;;  %v4373_v28 = vunpack.c.l.bf16 %v5207_v14  ;;  %v647_v31 = vmul.f32 %v4245_v23, %v5581_v43  ;;  %v4374_v32 = vunpack.c.h.bf16 %v5207_v14  ;;  %v5159_v16 = vld [vmem:[%s7552_s0 + $0x1c8] sm:$0xff]  }
 0x10a   :  { %v2307_v40 = vadd.f32 %v2243_v11, %v2046_v20  ;;  %v450_v30 = vadd.f32 %v386_v22, %v189_v18  ;;  %v2308_v34 = vadd.f32 %v2244_v17, %v2047_v24  ;;  %v648_v36 = vmul.f32 %v4246_v26, %v5581_v43 }
 0x10b   :  { %v451_v35 = vadd.f32 %v387_v25, %v190_v21  ;;  %v908_v37 = vmul.f32 %v4373_v28, %v5583_v44  ;;  %v909_v46 = vmul.f32 %v4374_v32, %v5583_v44  ;;  %v4501_v48 = vunpack.c.l.bf16 %v5239_v29  ;;  %v5191_v21 = vld [vmem:[%s7552_s0 + $0x2c8] sm:$0xff]  }
 0x10c   :  { %v2378_v38 = vadd.f32 %v6425_v27, %v2307_v40  ;;  %v711_v39 = vadd.f32 %v647_v31, %v450_v30  ;;  %v2379_v59 = vadd.f32 %v6425_v27, %v2308_v34  ;;  %v4502_v50 = vunpack.c.h.bf16 %v5239_v29  ;;  %v5223_v30 = vld [vmem:[%s7552_s0 + $0x3c8] sm:$0xff]  }
 0x10d   :  { %v712_v49 = vadd.f32 %v648_v36, %v451_v35  ;;  %v4629_v51 = vunpack.c.l.bf16 %v5271_v33  ;;  %v1169_v55 = vmul.f32 %v4501_v48, %v5585_v45  ;;  %v4630_v56 = vunpack.c.h.bf16 %v5271_v33 }
 0x10e   :  { %v2442_v53 = vmax.f32 %v2378_v38, 0.0  ;;  %v972_v54 = vadd.f32 %v908_v37, %v711_v39  ;;  %v2443_v58 = vmax.f32 %v2379_v59, 0.0  ;;  %v1170_v61 = vmul.f32 %v4502_v50, %v5585_v45  ;;  %v5255_v39 = vld [vmem:[%s7552_s0 + $0x4c8] sm:$0xff]  }
 0x10f   :  { %v973_v60 = vadd.f32 %v909_v46, %v712_v49  ;;  %v1430_v62 = vmul.f32 %v4629_v51, %v5587_v47  ;;  %v1431_v1 = vmul.f32 %v4630_v56, %v5587_v47  ;;  %v4757_v3 = vunpack.c.l.bf16 %v5303_v52 }
 0x110   :  { %v1233_v0 = vadd.f32 %v1169_v55, %v972_v54  ;;  %v4758_v4 = vunpack.c.h.bf16 %v5303_v52  ;;  %v2482_v5 = vpack.c.bf16 %v2443_v58, %v2442_v53  ;;  %v4885_v7 = vunpack.c.l.bf16 %v5335_v57  ;;  %v5287_v54 = vld [vmem:[%s7552_s0 + $0x5c8] sm:$0xff]  }
 0x111   :  { %v1234_v6 = vadd.f32 %v1170_v61, %v973_v60  ;;  %v4886_v8 = vunpack.c.h.bf16 %v5335_v57  ;;  %v1691_v12 = vmul.f32 %v4757_v3, %v5607_v2  ;;  %v5013_v14 = vunpack.c.l.bf16 %v5367_v63 }
 0x112   :  { %v1494_v11 = vadd.f32 %v1430_v62, %v1233_v0  ;;  %v1692_v13 = vmul.f32 %v4758_v4, %v5607_v2  ;;  %5473 = vmatprep.mubr.msk.bf16.mxu1 %vm2498_vm1, %v2482_v5  ;;  %v1952_v18 = vmul.f32 %v4885_v7, %v5614_v10  ;;  %v5014_v20 = vunpack.c.h.bf16 %v5367_v63  ;;  %v5319_v0 = vld [vmem:[%s7552_s0 + $0x6c8] sm:$0xff]  }
 0x113   :  { %v1495_v17 = vadd.f32 %v1431_v1, %v1234_v6  ;;  %v1953_v19 = vmul.f32 %v4886_v8, %v5614_v10  ;;  %v2213_v23 = vmul.f32 %v5013_v14, %v5616_v15  ;;  %v4053_v24 = vunpack.c.l.bf16 %v5127_v9  ;;  %v5351_v6 = vld [vmem:[%s7552_s0 + $0x7c8] sm:$0xff]  }
 0x114   :  { %v1755_v22 = vadd.f32 %v1691_v12, %v1494_v11  ;;  %v4054_v25 = vunpack.c.h.bf16 %v5127_v9  ;;  %v2214_v28 = vmul.f32 %v5014_v20, %v5616_v15  ;;  %v4181_v29 = vunpack.c.l.bf16 %v5159_v16  ;;  %v5383_v12 = vld [vmem:[%s7552_s0 + $0x8c8] sm:$0xff]  }
 0x115   :  { %v1756_v26 = vadd.f32 %v1692_v13, %v1495_v17  ;;  %v4182_v40 = vunpack.c.h.bf16 %v5159_v16  ;;  %v221_v32 = vmul.f32 %v4053_v24, %v5577_v41  ;;  %v4309_v34 = vunpack.c.l.bf16 %v5191_v21 }
 0x116   :  { %v2016_v31 = vadd.f32 %v1952_v18, %v1755_v22  ;;  %v222_v33 = vmul.f32 %v4054_v25, %v5577_v41  ;;  %v418_v36 = vmul.f32 %v4181_v29, %v5579_v42  ;;  %v4310_v38 = vunpack.c.h.bf16 %v5191_v21  ;;  %v5112_v22 = vld [vmem:[%s7552_s0 + $0x50] sm:$0xff]  }
 0x117   :  { %v2017_v35 = vadd.f32 %v1953_v19, %v1756_v26  ;;  %v419_v37 = vmul.f32 %v4182_v40, %v5579_v42  ;;  %v679_v48 = vmul.f32 %v4309_v34, %v5581_v43  ;;  %v4437_v59 = vunpack.c.l.bf16 %v5223_v30 }
 0x118   :  { %v2277_v46 = vadd.f32 %v2213_v23, %v2016_v31  ;;  %v4438_v49 = vunpack.c.h.bf16 %v5223_v30  ;;  %v482_v51 = vadd.f32 %v418_v36, %v221_v32  ;;  %v680_v53 = vmul.f32 %v4310_v38, %v5581_v43  ;;  %v5176_v32 = vld [vmem:[%s7552_s0 + $0x250] sm:$0xff]  }
 0x119   :  { %v2278_v50 = vadd.f32 %v2214_v28, %v2017_v35  ;;  %v483_v52 = vadd.f32 %v419_v37, %v222_v33  ;;  %v940_v56 = vmul.f32 %v4437_v59, %v5583_v44  ;;  %v4565_v58 = vunpack.c.l.bf16 %v5255_v39  ;;  %v5144_v28 = vld [vmem:[%s7552_s0 + $0x150] sm:$0xff]  }
 0x11a   :  { %v2348_v55 = vadd.f32 %v6425_v27, %v2277_v46  ;;  %v941_v57 = vmul.f32 %v4438_v49, %v5583_v44  ;;  %v743_v61 = vadd.f32 %v679_v48, %v482_v51  ;;  %v4566_v63 = vunpack.c.h.bf16 %v5255_v39  ;;  %v5208_v48 = vld [vmem:[%s7552_s0 + $0x350] sm:$0xff]  }
 0x11b   :  { %v2349_v60 = vadd.f32 %v6425_v27, %v2278_v50  ;;  %v744_v62 = vadd.f32 %v680_v53, %v483_v52  ;;  %v1201_v3 = vmul.f32 %v4565_v58, %v5585_v45  ;;  %v4693_v4 = vunpack.c.l.bf16 %v5287_v54 }
 0x11c   :  { %v2412_v1 = vmax.f32 %v2348_v55, 0.0  ;;  %v4694_v5 = vunpack.c.h.bf16 %v5287_v54  ;;  %v1004_v8 = vadd.f32 %v940_v56, %v743_v61  ;;  %v1202_v11 = vmul.f32 %v4566_v63, %v5585_v45  ;;  %v5240_v56 = vld [vmem:[%s7552_s0 + $0x450] sm:$0xff]  }
 0x11d   :  { %v2413_v7 = vmax.f32 %v2349_v60, 0.0  ;;  %v1005_v9 = vadd.f32 %v941_v57, %v744_v62  ;;  %v1462_v13 = vmul.f32 %v4693_v4, %v5587_v47  ;;  %v4821_v16 = vunpack.c.l.bf16 %v5319_v0 }
 0x11e   :  { %v1463_v14 = vmul.f32 %v4694_v5, %v5587_v47  ;;  %v4822_v17 = vunpack.c.h.bf16 %v5319_v0  ;;  %v1265_v19 = vadd.f32 %v1201_v3, %v1004_v8  ;;  %v4949_v21 = vunpack.c.l.bf16 %v5351_v6  ;;  %v5272_v3 = vld [vmem:[%s7552_s0 + $0x550] sm:$0xff]  }
 0x11f   :  { %v2467_v18 = vpack.c.bf16 %v2413_v7, %v2412_v1  ;;  %v1266_v20 = vadd.f32 %v1202_v11, %v1005_v9  ;;  %v1723_v23 = vmul.f32 %v4821_v16, %v5607_v2  ;;  %v4950_v25 = vunpack.c.h.bf16 %v5351_v6 }
 0x120   :  { %v1724_v24 = vmul.f32 %v4822_v17, %v5607_v2  ;;  %v5077_v26 = vunpack.c.l.bf16 %v5383_v12  ;;  %v1526_v29 = vadd.f32 %v1462_v13, %v1265_v19  ;;  %v1984_v30 = vmul.f32 %v4949_v21, %v5614_v10  ;;  %v5304_v13 = vld [vmem:[%s7552_s0 + $0x650] sm:$0xff]  }
 0x121   :  { %5442 = vmatmul.mubr.msk.bf16.gmra.mrb[16].mxu0 %vm2498_vm1, %v2467_v18  ;;  %v1527_v40 = vadd.f32 %v1463_v14, %v1266_v20  ;;  %v5078_v31 = vunpack.c.h.bf16 %v5383_v12  ;;  %v1985_v33 = vmul.f32 %v4950_v25, %v5614_v10  ;;  %v3993_v35 = vunpack.c.l.bf16 %v5112_v22  ;;  %v5336_v19 = vld [vmem:[%s7552_s0 + $0x750] sm:$0xff]  }
 0x122   :  { %v2245_v34 = vmul.f32 %v5077_v26, %v5616_v15  ;;  %v3994_v36 = vunpack.c.h.bf16 %v5112_v22  ;;  %v1787_v37 = vadd.f32 %v1723_v23, %v1526_v29  ;;  %v4121_v46 = vunpack.c.l.bf16 %v5144_v28 }
 0x123   :  { %v1788_v38 = vadd.f32 %v1724_v24, %v1527_v40  ;;  %v2246_v39 = vmul.f32 %v5078_v31, %v5616_v15  ;;  %v191_v59 = vmul.f32 %v3993_v35, %v5577_v41  ;;  %v4122_v50 = vunpack.c.h.bf16 %v5144_v28  ;;  %v5368_v24 = vld [vmem:[%s7552_s0 + $0x850] sm:$0xff]  }
 0x124   :  { %v192_v49 = vmul.f32 %v3994_v36, %v5577_v41  ;;  %v4249_v51 = vunpack.c.l.bf16 %v5176_v32  ;;  %v2048_v52 = vadd.f32 %v1984_v30, %v1787_v37  ;;  %v388_v54 = vmul.f32 %v4121_v46, %v5579_v42 }
 0x125   :  { %v2049_v53 = vadd.f32 %v1985_v33, %v1788_v38  ;;  %v4250_v55 = vunpack.c.h.bf16 %v5176_v32  ;;  %v389_v57 = vmul.f32 %v4122_v50, %v5579_v42  ;;  %v4377_v60 = vunpack.c.l.bf16 %v5208_v48  ;;  %v5128_v33 = vld [vmem:[%s7552_s0 + $0xd0] sm:$0xff]  }
 0x126   :  { %v649_v58 = vmul.f32 %v4249_v51, %v5581_v43  ;;  %v4378_v61 = vunpack.c.h.bf16 %v5208_v48  ;;  %v2309_v62 = vadd.f32 %v2245_v34, %v2048_v52  ;;  %v452_v0 = vadd.f32 %v388_v54, %v191_v59  ;;  %v5160_v38 = vld [vmem:[%s7552_s0 + $0x1d0] sm:$0xff]  }
 0x127   :  { %v2310_v63 = vadd.f32 %v2246_v39, %v2049_v53  ;;  %v650_v1 = vmul.f32 %v4250_v55, %v5581_v43  ;;  %v453_v4 = vadd.f32 %v389_v57, %v192_v49  ;;  %v910_v5 = vmul.f32 %v4377_v60, %v5583_v44  ;;  %v5192_v49 = vld [vmem:[%s7552_s0 + $0x2d0] sm:$0xff]  }
 0x128   :  { %v911_v6 = vmul.f32 %v4378_v61, %v5583_v44  ;;  %v4505_v7 = vunpack.c.l.bf16 %v5240_v56  ;;  %v2380_v8 = vadd.f32 %v6425_v27, %v2309_v62  ;;  %v713_v11 = vadd.f32 %v649_v58, %v452_v0  ;;  %v5224_v58 = vld [vmem:[%s7552_s0 + $0x3d0] sm:$0xff]  }
 0x129   :  { %v2381_v9 = vadd.f32 %v6425_v27, %v2310_v63  ;;  %v4506_v12 = vunpack.c.h.bf16 %v5240_v56  ;;  %v714_v14 = vadd.f32 %v650_v1, %v453_v4  ;;  %v4633_v17 = vunpack.c.l.bf16 %v5272_v3 }
 0x12a   :  { %v1171_v16 = vmul.f32 %v4505_v7, %v5585_v45  ;;  %v4634_v18 = vunpack.c.h.bf16 %v5272_v3  ;;  %v2444_v20 = vmax.f32 %v2380_v8, 0.0  ;;  %v974_v22 = vadd.f32 %v910_v5, %v713_v11  ;;  %v5256_v5 = vld [vmem:[%s7552_s0 + $0x4d0] sm:$0xff]  }
 0x12b   :  { %v2445_v21 = vmax.f32 %v2381_v9, 0.0  ;;  %v1172_v23 = vmul.f32 %v4506_v12, %v5585_v45  ;;  %v975_v25 = vadd.f32 %v911_v6, %v714_v14  ;;  %v1432_v26 = vmul.f32 %v4633_v17, %v5587_v47 }
 0x12c   :  { %v1433_v28 = vmul.f32 %v4634_v18, %v5587_v47  ;;  %v4761_v29 = vunpack.c.l.bf16 %v5304_v13  ;;  %v1235_v30 = vadd.f32 %v1171_v16, %v974_v22  ;;  %v4762_v31 = vunpack.c.h.bf16 %v5304_v13  ;;  %v5288_v16 = vld [vmem:[%s7552_s0 + $0x5d0] sm:$0xff]  }
 0x12d   :  { %v2483_v40 = vpack.c.bf16 %v2445_v21, %v2444_v20  ;;  %v4889_v32 = vunpack.c.l.bf16 %v5336_v19  ;;  %v1236_v34 = vadd.f32 %v1172_v23, %v975_v25  ;;  %v4890_v36 = vunpack.c.h.bf16 %v5336_v19  ;;  %v5320_v25 = vld [vmem:[%s7552_s0 + $0x6d0] sm:$0xff]  }
 0x12e   :  { %v1693_v35 = vmul.f32 %v4761_v29, %v5607_v2  ;;  %v5017_v37 = vunpack.c.l.bf16 %v5368_v24  ;;  %v1496_v39 = vadd.f32 %v1432_v26, %v1235_v30  ;;  %v1694_v46 = vmul.f32 %v4762_v31, %v5607_v2  ;;  %v5352_v30 = vld [vmem:[%s7552_s0 + $0x7d0] sm:$0xff]  }
 0x12f   :  { %5474 = vmatmul.mubr.msk.bf16.gmra.mrb[16].mxu1 %vm2498_vm1, %v2483_v40  ;;  %v1954_v48 = vmul.f32 %v4889_v32, %v5614_v10  ;;  %v5018_v59 = vunpack.c.h.bf16 %v5368_v24  ;;  %v1497_v50 = vadd.f32 %v1433_v28, %v1236_v34  ;;  %v1955_v51 = vmul.f32 %v4890_v36, %v5614_v10 }
 0x130   :  { %v2215_v52 = vmul.f32 %v5017_v37, %v5616_v15  ;;  %v4057_v53 = vunpack.c.l.bf16 %v5128_v33  ;;  %v1757_v54 = vadd.f32 %v1693_v35, %v1496_v39  ;;  %v4058_v56 = vunpack.c.h.bf16 %v5128_v33  ;;  %v5384_v39 = vld [vmem:[%s7552_s0 + $0x8d0] sm:$0xff]  }
 0x131   :  { %v2216_v55 = vmul.f32 %v5018_v59, %v5616_v15  ;;  %v4185_v57 = vunpack.c.l.bf16 %v5160_v38  ;;  %v1758_v60 = vadd.f32 %v1694_v46, %v1497_v50  ;;  %v4186_v62 = vunpack.c.h.bf16 %v5160_v38  ;;  %v5113_v50 = vld [vmem:[%s7552_s0 + $0x58] sm:$0xff]  }
 0x132   :  { %v223_v61 = vmul.f32 %v4057_v53, %v5577_v41  ;;  %v4313_v63 = vunpack.c.l.bf16 %v5192_v49  ;;  %v2018_v0 = vadd.f32 %v1954_v48, %v1757_v54  ;;  %v224_v1 = vmul.f32 %v4058_v56, %v5577_v41 }
 0x133   :  { %v420_v3 = vmul.f32 %v4185_v57, %v5579_v42  ;;  %v4314_v4 = vunpack.c.h.bf16 %v5192_v49  ;;  %v2019_v6 = vadd.f32 %v1955_v51, %v1758_v60  ;;  %v421_v7 = vmul.f32 %v4186_v62, %v5579_v42 }
 0x134   :  { %v681_v8 = vmul.f32 %v4313_v63, %v5581_v43  ;;  %v4441_v9 = vunpack.c.l.bf16 %v5224_v58  ;;  %v2279_v11 = vadd.f32 %v2215_v52, %v2018_v0  ;;  %v4442_v14 = vunpack.c.h.bf16 %v5224_v58 }
 0x135   :  { %v484_v12 = vadd.f32 %v420_v3, %v223_v61  ;;  %v682_v13 = vmul.f32 %v4314_v4, %v5581_v43  ;;  %v2280_v17 = vadd.f32 %v2216_v55, %v2019_v6  ;;  %v485_v18 = vadd.f32 %v421_v7, %v224_v1  ;;  %v5145_v55 = vld [vmem:[%s7552_s0 + $0x158] sm:$0xff]  }
 0x136   :  { %v942_v19 = vmul.f32 %v4441_v9, %v5583_v44  ;;  %v4569_v20 = vunpack.c.l.bf16 %v5256_v5  ;;  %v2350_v21 = vadd.f32 %v6425_v27, %v2279_v11  ;;  %v943_v23 = vmul.f32 %v4442_v14, %v5583_v44  ;;  %v5177_v1 = vld [vmem:[%s7552_s0 + $0x258] sm:$0xff]  }
 0x137   :  { %v745_v22 = vadd.f32 %v681_v8, %v484_v12  ;;  %v4570_v24 = vunpack.c.h.bf16 %v5256_v5  ;;  %v2351_v26 = vadd.f32 %v6425_v27, %v2280_v17  ;;  %v746_v28 = vadd.f32 %v682_v13, %v485_v18  ;;  %v5209_v7 = vld [vmem:[%s7552_s0 + $0x358] sm:$0xff]  }
 0x138   :  { %v1203_v29 = vmul.f32 %v4569_v20, %v5585_v45  ;;  %v4697_v40 = vunpack.c.l.bf16 %v5288_v16  ;;  %v2414_v31 = vmax.f32 %v2350_v21, 0.0  ;;  %v4698_v34 = vunpack.c.h.bf16 %v5288_v16 }
 0x139   :  { %v1006_v32 = vadd.f32 %v942_v19, %v745_v22  ;;  %v1204_v33 = vmul.f32 %v4570_v24, %v5585_v45  ;;  %v2415_v35 = vmax.f32 %v2351_v26, 0.0  ;;  %v1007_v36 = vadd.f32 %v943_v23, %v746_v28  ;;  %v5241_v22 = vld [vmem:[%s7552_s0 + $0x458] sm:$0xff]  }
 0x13a   :  { %v1464_v37 = vmul.f32 %v4697_v40, %v5587_v47  ;;  %v4825_v38 = vunpack.c.l.bf16 %v5320_v25  ;;  %v1465_v48 = vmul.f32 %v4698_v34, %v5587_v47  ;;  %v4826_v59 = vunpack.c.h.bf16 %v5320_v25  ;;  %v5273_v28 = vld [vmem:[%s7552_s0 + $0x558] sm:$0xff]  }
 0x13b   :  { %v1267_v46 = vadd.f32 %v1203_v29, %v1006_v32  ;;  %v4953_v49 = vunpack.c.l.bf16 %v5352_v30  ;;  %v2468_v51 = vpack.c.bf16 %v2415_v35, %v2414_v31  ;;  %v1268_v52 = vadd.f32 %v1204_v33, %v1007_v36 }
 0x13c   :  { %v1725_v53 = vmul.f32 %v4825_v38, %v5607_v2  ;;  %v4954_v54 = vunpack.c.h.bf16 %v5352_v30  ;;  %v1726_v57 = vmul.f32 %v4826_v59, %v5607_v2  ;;  %v5081_v60 = vunpack.c.l.bf16 %v5384_v39 }
 0x13d   :  { %v1528_v56 = vadd.f32 %v1464_v37, %v1267_v46  ;;  %v1986_v58 = vmul.f32 %v4953_v49, %v5614_v10  ;;  %5445 = vmatprep.mubr.msk.bf16.mxu0 %vm2498_vm1, %v2468_v51  ;;  %v1529_v61 = vadd.f32 %v1465_v48, %v1268_v52  ;;  %v5082_v63 = vunpack.c.h.bf16 %v5384_v39  ;;  %v5305_v46 = vld [vmem:[%s7552_s0 + $0x658] sm:$0xff]  }
 0x13e   :  { %v1987_v62 = vmul.f32 %v4954_v54, %v5614_v10  ;;  %v3997_v0 = vunpack.c.l.bf16 %v5113_v50  ;;  %v2247_v4 = vmul.f32 %v5081_v60, %v5616_v15  ;;  %v3998_v5 = vunpack.c.h.bf16 %v5113_v50  ;;  %v5337_v51 = vld [vmem:[%s7552_s0 + $0x758] sm:$0xff]  }
 0x13f   :  { %v1789_v3 = vadd.f32 %v1725_v53, %v1528_v56  ;;  %v4125_v6 = vunpack.c.l.bf16 %v5145_v55  ;;  %v1790_v8 = vadd.f32 %v1726_v57, %v1529_v61  ;;  %v2248_v9 = vmul.f32 %v5082_v63, %v5616_v15  ;;  %v5369_v56 = vld [vmem:[%s7552_s0 + $0x858] sm:$0xff]  }
 0x140   :  { %v193_v11 = vmul.f32 %v3997_v0, %v5577_v41  ;;  %v4126_v12 = vunpack.c.h.bf16 %v5145_v55  ;;  %v194_v14 = vmul.f32 %v3998_v5, %v5577_v41  ;;  %v4253_v17 = vunpack.c.l.bf16 %v5177_v1 }
 0x141   :  { %v2050_v13 = vadd.f32 %v1986_v58, %v1789_v3  ;;  %v390_v16 = vmul.f32 %v4125_v6, %v5579_v42  ;;  %v2051_v18 = vadd.f32 %v1987_v62, %v1790_v8  ;;  %v4254_v20 = vunpack.c.h.bf16 %v5177_v1  ;;  %v5129_v3 = vld [vmem:[%s7552_s0 + $0xd8] sm:$0xff]  }
 0x142   :  { %v391_v19 = vmul.f32 %v4126_v12, %v5579_v42  ;;  %v4381_v21 = vunpack.c.l.bf16 %v5209_v7  ;;  %v651_v25 = vmul.f32 %v4253_v17, %v5581_v43  ;;  %v4382_v26 = vunpack.c.h.bf16 %v5209_v7  ;;  %v5161_v8 = vld [vmem:[%s7552_s0 + $0x1d8] sm:$0xff]  }
 0x143   :  { %v2311_v23 = vadd.f32 %v2247_v4, %v2050_v13  ;;  %v454_v24 = vadd.f32 %v390_v16, %v193_v11  ;;  %v2312_v29 = vadd.f32 %v2248_v9, %v2051_v18  ;;  %v652_v30 = vmul.f32 %v4254_v20, %v5581_v43 }
 0x144   :  { %v455_v40 = vadd.f32 %v391_v19, %v194_v14  ;;  %v912_v31 = vmul.f32 %v4381_v21, %v5583_v44  ;;  %v913_v34 = vmul.f32 %v4382_v26, %v5583_v44  ;;  %v4509_v35 = vunpack.c.l.bf16 %v5241_v22  ;;  %v5193_v14 = vld [vmem:[%s7552_s0 + $0x2d8] sm:$0xff]  }
 0x145   :  { %v2382_v32 = vadd.f32 %v6425_v27, %v2311_v23  ;;  %v715_v33 = vadd.f32 %v651_v25, %v454_v24  ;;  %v2383_v36 = vadd.f32 %v6425_v27, %v2312_v29  ;;  %v4510_v38 = vunpack.c.h.bf16 %v5241_v22  ;;  %v5225_v24 = vld [vmem:[%s7552_s0 + $0x3d8] sm:$0xff]  }
 0x146   :  { %v716_v37 = vadd.f32 %v652_v30, %v455_v40  ;;  %v4637_v39 = vunpack.c.l.bf16 %v5273_v28  ;;  %v1173_v49 = vmul.f32 %v4509_v35, %v5585_v45  ;;  %v4638_v50 = vunpack.c.h.bf16 %v5273_v28 }
 0x147   :  { %v2446_v48 = vmax.f32 %v2382_v32, 0.0  ;;  %v976_v59 = vadd.f32 %v912_v31, %v715_v33  ;;  %v2447_v52 = vmax.f32 %v2383_v36, 0.0  ;;  %v1174_v54 = vmul.f32 %v4510_v38, %v5585_v45  ;;  %v5257_v33 = vld [vmem:[%s7552_s0 + $0x4d8] sm:$0xff]  }
 0x148   :  { %v977_v53 = vadd.f32 %v913_v34, %v716_v37  ;;  %v1434_v55 = vmul.f32 %v4637_v39, %v5587_v47  ;;  %v1435_v58 = vmul.f32 %v4638_v50, %v5587_v47  ;;  %v4765_v60 = vunpack.c.l.bf16 %v5305_v46 }
 0x149   :  { %v1237_v57 = vadd.f32 %v1173_v49, %v976_v59  ;;  %v4766_v61 = vunpack.c.h.bf16 %v5305_v46  ;;  %v2484_v62 = vpack.c.bf16 %v2447_v52, %v2446_v48  ;;  %v4893_v0 = vunpack.c.l.bf16 %v5337_v51  ;;  %v5289_v59 = vld [vmem:[%s7552_s0 + $0x5d8] sm:$0xff]  }
 0x14a   :  { %v1238_v63 = vadd.f32 %v1174_v54, %v977_v53  ;;  %v4894_v1 = vunpack.c.h.bf16 %v5337_v51  ;;  %v1695_v5 = vmul.f32 %v4765_v60, %v5607_v2  ;;  %v5021_v7 = vunpack.c.l.bf16 %v5369_v56 }
 0x14b   :  { %v1498_v4 = vadd.f32 %v1434_v55, %v1237_v57  ;;  %v1696_v6 = vmul.f32 %v4766_v61, %v5607_v2  ;;  %5477 = vmatprep.mubr.msk.bf16.mxu1 %vm2498_vm1, %v2484_v62  ;;  %v1956_v11 = vmul.f32 %v4893_v0, %v5614_v10  ;;  %v5022_v13 = vunpack.c.h.bf16 %v5369_v56  ;;  %v5321_v57 = vld [vmem:[%s7552_s0 + $0x6d8] sm:$0xff]  }
 0x14c   :  { %v1499_v9 = vadd.f32 %v1435_v58, %v1238_v63  ;;  %v1957_v12 = vmul.f32 %v4894_v1, %v5614_v10  ;;  %v2217_v17 = vmul.f32 %v5021_v7, %v5616_v15  ;;  %v4061_v18 = vunpack.c.l.bf16 %v5129_v3  ;;  %v5353_v63 = vld [vmem:[%s7552_s0 + $0x7d8] sm:$0xff]  }
 0x14d   :  { %v1759_v16 = vadd.f32 %v1695_v5, %v1498_v4  ;;  %v4062_v19 = vunpack.c.h.bf16 %v5129_v3  ;;  %v2218_v21 = vmul.f32 %v5022_v13, %v5616_v15  ;;  %v4189_v22 = vunpack.c.l.bf16 %v5161_v8  ;;  %v5385_v5 = vld [vmem:[%s7552_s0 + $0x8d8] sm:$0xff]  }
 0x14e   :  { %v1760_v20 = vadd.f32 %v1696_v6, %v1499_v9  ;;  %v4190_v23 = vunpack.c.h.bf16 %v5161_v8  ;;  %v225_v26 = vmul.f32 %v4061_v18, %v5577_v41  ;;  %v4317_v29 = vunpack.c.l.bf16 %v5193_v14 }
 0x14f   :  { %v2020_v25 = vadd.f32 %v1956_v11, %v1759_v16  ;;  %v226_v28 = vmul.f32 %v4062_v19, %v5577_v41  ;;  %v422_v30 = vmul.f32 %v4189_v22, %v5579_v42  ;;  %v4318_v32 = vunpack.c.h.bf16 %v5193_v14  ;;  %v5114_v16 = vld [vmem:[%s7552_s0 + $0x60] sm:$0xff]  }
 0x150   :  { %v2021_v40 = vadd.f32 %v1957_v12, %v1760_v20  ;;  %v423_v31 = vmul.f32 %v4190_v23, %v5579_v42  ;;  %v683_v35 = vmul.f32 %v4317_v29, %v5581_v43  ;;  %v4445_v36 = vunpack.c.l.bf16 %v5225_v24  ;;  %v6746_v29 = vpop.f32.mrb[0].mxu1 }
 0x151   :  { %v2281_v34 = vadd.f32 %v2217_v17, %v2020_v25  ;;  %v4446_v37 = vunpack.c.h.bf16 %v5225_v24  ;;  %v486_v39 = vadd.f32 %v422_v30, %v225_v26  ;;  %v684_v48 = vmul.f32 %v4318_v32, %v5581_v43  ;;  %v5178_v26 = vld [vmem:[%s7552_s0 + $0x260] sm:$0xff]  }
 0x152   :  { %v2282_v38 = vadd.f32 %v2218_v21, %v2021_v40  ;;  %v487_v46 = vadd.f32 %v423_v31, %v226_v28  ;;  %v944_v50 = vmul.f32 %v4445_v36, %v5583_v44  ;;  %v4573_v52 = vunpack.c.l.bf16 %v5257_v33  ;;  %v5146_v21 = vld [vmem:[%s7552_s0 + $0x160] sm:$0xff]   ;;  %v6744_v28 = vpop.f32.mrb[0].mxu0 }
 0x153   :  { %v2352_v49 = vadd.f32 %v6425_v27, %v2281_v34  ;;  %v945_v51 = vmul.f32 %v4446_v37, %v5583_v44  ;;  %v747_v54 = vadd.f32 %v683_v35, %v486_v39  ;;  %v4574_v56 = vunpack.c.h.bf16 %v5257_v33  ;;  %v6750_v33 = vpop.f32.mrb[1].mxu0  ;;  %v6752_v34 = vpop.f32.mrb[1].mxu1  ;;  %v5210_v39 = vld [vmem:[%s7552_s0 + $0x360] sm:$0xff]  }
 0x154   :  { %v2353_v53 = vadd.f32 %v6425_v27, %v2282_v38  ;;  %v748_v55 = vadd.f32 %v684_v48, %v487_v46  ;;  %v1205_v60 = vmul.f32 %v4573_v52, %v5585_v45  ;;  %v4701_v61 = vunpack.c.l.bf16 %v5289_v59  ;;  %v6758_v46 = vpop.f32.mrb[2].mxu0  ;;  %v6760_v48 = vpop.f32.mrb[2].mxu1 }
 0x155   :  { %v2416_v58 = vmax.f32 %v2352_v49, 0.0  ;;  %v4702_v62 = vunpack.c.h.bf16 %v5289_v59  ;;  %v1008_v1 = vadd.f32 %v944_v50, %v747_v54  ;;  %v1206_v4 = vmul.f32 %v4574_v56, %v5585_v45  ;;  %v6764_v52 = vpop.f32.mrb[3].mxu0 }
 0x156   :  { %v2417_v0 = vmax.f32 %v2353_v53, 0.0  ;;  %v1009_v3 = vadd.f32 %v945_v51, %v748_v55  ;;  %v1466_v6 = vmul.f32 %v4701_v61, %v5587_v47  ;;  %v4829_v8 = vunpack.c.l.bf16 %v5321_v57  ;;  %v6766_v53 = vpop.f32.mrb[3].mxu1 }
 0x157   :  { %v1467_v7 = vmul.f32 %v4702_v62, %v5587_v47  ;;  %v4830_v9 = vunpack.c.h.bf16 %v5321_v57  ;;  %v1269_v12 = vadd.f32 %v1205_v60, %v1008_v1  ;;  %v4957_v14 = vunpack.c.l.bf16 %v5353_v63  ;;  %v6772_v60 = vpop.f32.mrb[4].mxu0  ;;  %v6774_v61 = vpop.f32.mrb[4].mxu1 }
 0x158   :  { %v2469_v11 = vpack.c.bf16 %v2417_v0, %v2416_v58  ;;  %v1270_v13 = vadd.f32 %v1206_v4, %v1009_v3  ;;  %v1727_v17 = vmul.f32 %v4829_v8, %v5607_v2  ;;  %v4958_v19 = vunpack.c.h.bf16 %v5353_v63  ;;  %v5242_v58 = vld [vmem:[%s7552_s0 + $0x460] sm:$0xff]   ;;  %v6778_v3 = vpop.f32.mrb[5].mxu0  ;;  %v6780_v4 = vpop.f32.mrb[5].mxu1 }
 0x159   :  { %v1728_v18 = vmul.f32 %v4830_v9, %v5607_v2  ;;  %v5085_v20 = vunpack.c.l.bf16 %v5385_v5  ;;  %v1530_v22 = vadd.f32 %v1466_v6, %v1269_v12  ;;  %v1988_v24 = vmul.f32 %v4957_v14, %v5614_v10  ;;  %v5274_v9 = vld [vmem:[%s7552_s0 + $0x560] sm:$0xff]   ;;  %v6788_v12 = vpop.f32.mrb[6].mxu1 }
 0x15a   :  { %5446 = vmatmul.mubr.msk.bf16.gmra.mrb[20].mxu0 %vm2498_vm1, %v2469_v11  ;;  %v1531_v23 = vadd.f32 %v1467_v7, %v1270_v13  ;;  %v5086_v25 = vunpack.c.h.bf16 %v5385_v5  ;;  %v1989_v40 = vmul.f32 %v4958_v19, %v5614_v10  ;;  %v4001_v31 = vunpack.c.l.bf16 %v5114_v16  ;;  %v6786_v11 = vpop.f32.mrb[6].mxu0  ;;  %v6794_v19 = vpop.f32.mrb[7].mxu1 }
 0x15b   :  { %v2249_v30 = vmul.f32 %v5085_v20, %v5616_v15  ;;  %v4002_v32 = vunpack.c.h.bf16 %v5114_v16  ;;  %v1791_v35 = vadd.f32 %v1727_v17, %v1530_v22  ;;  %v4129_v38 = vunpack.c.l.bf16 %v5146_v21 }
 0x15c   :  { %v1792_v36 = vadd.f32 %v1728_v18, %v1531_v23  ;;  %v2250_v37 = vmul.f32 %v5086_v25, %v5616_v15  ;;  %v195_v59 = vmul.f32 %v4001_v31, %v5577_v41  ;;  %v4130_v50 = vunpack.c.h.bf16 %v5146_v21  ;;  %v6792_v18 = vpop.f32.mrb[7].mxu0  ;;  %v5338_v31 = vld [vmem:[%s7552_s0 + $0x760] sm:$0xff]  }
 0x15d   :  { %v196_v49 = vmul.f32 %v4002_v32, %v5577_v41  ;;  %v4257_v51 = vunpack.c.l.bf16 %v5178_v26  ;;  %v2052_v54 = vadd.f32 %v1988_v24, %v1791_v35  ;;  %v392_v56 = vmul.f32 %v4129_v38, %v5579_v42  ;;  %v5306_v24 = vld [vmem:[%s7552_s0 + $0x660] sm:$0xff]  }
 0x15e   :  { %v2053_v55 = vadd.f32 %v1989_v40, %v1792_v36  ;;  %v4258_v57 = vunpack.c.h.bf16 %v5178_v26  ;;  %v393_v62 = vmul.f32 %v4130_v50, %v5579_v42  ;;  %v4385_v0 = vunpack.c.l.bf16 %v5210_v39 }
 0x15f   :  { %v653_v63 = vmul.f32 %v4257_v51, %v5581_v43  ;;  %v4386_v1 = vunpack.c.h.bf16 %v5210_v39  ;;  %v2313_v5 = vadd.f32 %v2249_v30, %v2052_v54  ;;  %v456_v7 = vadd.f32 %v392_v56, %v195_v59  ;;  %v5130_v56 = vld [vmem:[%s7552_s0 + $0xe0] sm:$0xff]  }
 0x160   :  { %v2314_v6 = vadd.f32 %v2250_v37, %v2053_v55  ;;  %v654_v8 = vmul.f32 %v4258_v57, %v5581_v43  ;;  %v457_v13 = vadd.f32 %v393_v62, %v196_v49  ;;  %v914_v14 = vmul.f32 %v4385_v0, %v5583_v44  ;;  %v5370_v37 = vld [vmem:[%s7552_s0 + $0x860] sm:$0xff]  }
 0x161   :  { %v915_v16 = vmul.f32 %v4386_v1, %v5583_v44  ;;  %v4513_v17 = vunpack.c.l.bf16 %v5242_v58  ;;  %v2384_v20 = vadd.f32 %v6425_v27, %v2313_v5  ;;  %v717_v22 = vadd.f32 %v653_v63, %v456_v7  ;;  %v5162_v0 = vld [vmem:[%s7552_s0 + $0x1e0] sm:$0xff]  }
 0x162   :  { %v2385_v21 = vadd.f32 %v6425_v27, %v2314_v6  ;;  %v4514_v23 = vunpack.c.h.bf16 %v5242_v58  ;;  %v718_v25 = vadd.f32 %v654_v8, %v457_v13  ;;  %v4641_v40 = vunpack.c.l.bf16 %v5274_v9  ;;  %v5194_v8 = vld [vmem:[%s7552_s0 + $0x2e0] sm:$0xff]  }
 0x163   :  { %v1175_v26 = vmul.f32 %v4513_v17, %v5585_v45  ;;  %v4642_v30 = vunpack.c.h.bf16 %v5274_v9  ;;  %v2448_v32 = vmax.f32 %v2384_v20, 0.0  ;;  %v978_v36 = vadd.f32 %v914_v14, %v717_v22 }
 0x164   :  { %v2449_v35 = vmax.f32 %v2385_v21, 0.0  ;;  %v1176_v27 = vmul.f32 %v4514_v23, %v5585_v45  ;;  %v979_v38 = vadd.f32 %v915_v16, %v718_v25  ;;  %v1436_v39 = vmul.f32 %v4641_v40, %v5587_v47  ;;  %v5226_v23 = vld [vmem:[%s7552_s0 + $0x3e0] sm:$0xff]  }
 0x165   :  { %v1437_v59 = vmul.f32 %v4642_v30, %v5587_v47  ;;  %v4769_v49 = vunpack.c.l.bf16 %v5306_v24  ;;  %v1239_v51 = vadd.f32 %v1175_v26, %v978_v36  ;;  %v4770_v54 = vunpack.c.h.bf16 %v5306_v24  ;;  %v5258_v36 = vld [vmem:[%s7552_s0 + $0x4e0] sm:$0xff]  }
 0x166   :  { %v2485_v50 = vpack.c.bf16 %v2449_v35, %v2448_v32  ;;  %v4897_v55 = vunpack.c.l.bf16 %v5338_v31  ;;  %v1240_v57 = vadd.f32 %v1176_v27, %v979_v38  ;;  %v4898_v62 = vunpack.c.h.bf16 %v5338_v31 }
 0x167   :  { %v1697_v58 = vmul.f32 %v4769_v49, %v5607_v2  ;;  %v5025_v63 = vunpack.c.l.bf16 %v5370_v37  ;;  %v1500_v1 = vadd.f32 %v1436_v39, %v1239_v51  ;;  %v1698_v5 = vmul.f32 %v4770_v54, %v5607_v2  ;;  %v5290_v54 = vld [vmem:[%s7552_s0 + $0x5e0] sm:$0xff]  }
 0x168   :  { %5478 = vmatmul.mubr.msk.bf16.gmra.mrb[20].mxu1 %vm2498_vm1, %v2485_v50  ;;  %v1958_v6 = vmul.f32 %v4897_v55, %v5614_v10  ;;  %v5026_v7 = vunpack.c.h.bf16 %v5370_v37  ;;  %v1501_v9 = vadd.f32 %v1437_v59, %v1240_v57  ;;  %v1959_v13 = vmul.f32 %v4898_v62, %v5614_v10  ;;  %v6846_v62 = vld [vmem:[%s7554_s2] ss:$0 sm:$0xff] }
 0x169   :  { %v2219_v14 = vmul.f32 %v5025_v63, %v5616_v15  ;;  %v4065_v16 = vunpack.c.l.bf16 %v5130_v56  ;;  %v1761_v17 = vadd.f32 %v1697_v58, %v1500_v1  ;;  %v4066_v21 = vunpack.c.h.bf16 %v5130_v56 }
 0x16a   :  { %v2220_v20 = vmul.f32 %v5026_v7, %v5616_v15  ;;  %v4193_v22 = vunpack.c.l.bf16 %v5162_v0  ;;  %v1762_v24 = vadd.f32 %v1698_v5, %v1501_v9  ;;  %v4194_v26 = vunpack.c.h.bf16 %v5162_v0 }
 0x16b   :  { %v227_v25 = vmul.f32 %v4065_v16, %v5577_v41  ;;  %v4321_v40 = vunpack.c.l.bf16 %v5194_v8  ;;  %v2022_v30 = vadd.f32 %v1958_v6, %v1761_v17  ;;  %v228_v31 = vmul.f32 %v4066_v21, %v5577_v41  ;;  %v5322_v6 = vld [vmem:[%s7552_s0 + $0x6e0] sm:$0xff]  }
 0x16c   :  { %v424_v32 = vmul.f32 %v4193_v22, %v5579_v42  ;;  %v4322_v35 = vunpack.c.h.bf16 %v5194_v8  ;;  %v2023_v27 = vadd.f32 %v1959_v13, %v1762_v24  ;;  %v425_v37 = vmul.f32 %v4194_v26, %v5579_v42  ;;  %v5386_v26 = vld [vmem:[%s7552_s0 + $0x8e0] sm:$0xff]  }
 0x16d   :  { %v685_v38 = vmul.f32 %v4321_v40, %v5581_v43  ;;  %v4449_v39 = vunpack.c.l.bf16 %v5226_v23  ;;  %v2283_v59 = vadd.f32 %v2219_v14, %v2022_v30  ;;  %v4450_v51 = vunpack.c.h.bf16 %v5226_v23  ;;  %v5354_v14 = vld [vmem:[%s7552_s0 + $0x7e0] sm:$0xff]  }
 0x16e   :  { %v488_v49 = vadd.f32 %v424_v32, %v227_v25  ;;  %v686_v50 = vmul.f32 %v4322_v35, %v5581_v43  ;;  %v2284_v55 = vadd.f32 %v2220_v20, %v2023_v27  ;;  %v489_v56 = vadd.f32 %v425_v37, %v228_v31  ;;  %v5115_v35 = vld [vmem:[%s7552_s0 + $0x68] sm:$0xff]  }
 0x16f   :  { %v946_v57 = vmul.f32 %v4449_v39, %v5583_v44  ;;  %v4577_v58 = vunpack.c.l.bf16 %v5258_v36  ;;  %v2354_v63 = vadd.f32 %v6846_v62, %v2283_v59  ;;  %v947_v1 = vmul.f32 %v4450_v51, %v5583_v44  ;;  %v5147_v39 = vld [vmem:[%s7552_s0 + $0x168] sm:$0xff]  }
 0x170   :  { %v749_v0 = vadd.f32 %v685_v38, %v488_v49  ;;  %v4578_v5 = vunpack.c.h.bf16 %v5258_v36  ;;  %v2355_v7 = vadd.f32 %v6846_v62, %v2284_v55  ;;  %v750_v8 = vadd.f32 %v686_v50, %v489_v56 }
 0x171   :  { %v1207_v9 = vmul.f32 %v4577_v58, %v5585_v45  ;;  %v4705_v13 = vunpack.c.l.bf16 %v5290_v54  ;;  %v2418_v16 = vmax.f32 %v2354_v63, 0.0  ;;  %v4706_v21 = vunpack.c.h.bf16 %v5290_v54  ;;  %v5179_v58 = vld [vmem:[%s7552_s0 + $0x268] sm:$0xff]  }
 0x172   :  { %v1010_v17 = vadd.f32 %v946_v57, %v749_v0  ;;  %v1208_v20 = vmul.f32 %v4578_v5, %v5585_v45  ;;  %v2419_v22 = vmax.f32 %v2355_v7, 0.0  ;;  %v1011_v23 = vadd.f32 %v947_v1, %v750_v8 }
 0x173   :  { %v1468_v24 = vmul.f32 %v4705_v13, %v5587_v47  ;;  %v4833_v25 = vunpack.c.l.bf16 %v5322_v6  ;;  %v1469_v30 = vmul.f32 %v4706_v21, %v5587_v47  ;;  %v4834_v31 = vunpack.c.h.bf16 %v5322_v6  ;;  %v5211_v6 = vld [vmem:[%s7552_s0 + $0x368] sm:$0xff]  }
 0x174   :  { %v1271_v40 = vadd.f32 %v1207_v9, %v1010_v17  ;;  %v4961_v32 = vunpack.c.l.bf16 %v5354_v14  ;;  %v2470_v36 = vpack.c.bf16 %v2419_v22, %v2418_v16  ;;  %v1272_v27 = vadd.f32 %v1208_v20, %v1011_v23 }
 0x175   :  { %v1729_v37 = vmul.f32 %v4833_v25, %v5607_v2  ;;  %v4962_v38 = vunpack.c.h.bf16 %v5354_v14  ;;  %v1730_v49 = vmul.f32 %v4834_v31, %v5607_v2  ;;  %v5089_v51 = vunpack.c.l.bf16 %v5386_v26  ;;  %v5243_v25 = vld [vmem:[%s7552_s0 + $0x468] sm:$0xff]  }
 0x176   :  { %v1532_v59 = vadd.f32 %v1468_v24, %v1271_v40  ;;  %v1990_v50 = vmul.f32 %v4961_v32, %v5614_v10  ;;  %5449 = vmatprep.mubr.msk.bf16.mxu0 %vm2498_vm1, %v2470_v36  ;;  %v1533_v54 = vadd.f32 %v1469_v30, %v1272_v27  ;;  %v5090_v56 = vunpack.c.h.bf16 %v5386_v26  ;;  %v5275_v32 = vld [vmem:[%s7552_s0 + $0x568] sm:$0xff]  }
 0x177   :  { %v1991_v55 = vmul.f32 %v4962_v38, %v5614_v10  ;;  %v4005_v57 = vunpack.c.l.bf16 %v5115_v35  ;;  %v2251_v0 = vmul.f32 %v5089_v51, %v5616_v15  ;;  %v4006_v1 = vunpack.c.h.bf16 %v5115_v35 }
 0x178   :  { %v1793_v63 = vadd.f32 %v1729_v37, %v1532_v59  ;;  %v4133_v5 = vunpack.c.l.bf16 %v5147_v39  ;;  %v1794_v7 = vadd.f32 %v1730_v49, %v1533_v54  ;;  %v2252_v8 = vmul.f32 %v5090_v56, %v5616_v15  ;;  %v5307_v56 = vld [vmem:[%s7552_s0 + $0x668] sm:$0xff]  }
 0x179   :  { %v197_v9 = vmul.f32 %v4005_v57, %v5577_v41  ;;  %v4134_v13 = vunpack.c.h.bf16 %v5147_v39  ;;  %v198_v16 = vmul.f32 %v4006_v1, %v5577_v41  ;;  %v4261_v20 = vunpack.c.l.bf16 %v5179_v58  ;;  %v5339_v1 = vld [vmem:[%s7552_s0 + $0x768] sm:$0xff]  }
 0x17a   :  { %v2054_v14 = vadd.f32 %v1990_v50, %v1793_v63  ;;  %v394_v17 = vmul.f32 %v4133_v5, %v5579_v42  ;;  %v2055_v21 = vadd.f32 %v1991_v55, %v1794_v7  ;;  %v4262_v23 = vunpack.c.h.bf16 %v5179_v58 }
 0x17b   :  { %v395_v22 = vmul.f32 %v4134_v13, %v5579_v42  ;;  %v4389_v24 = vunpack.c.l.bf16 %v5211_v6  ;;  %v655_v30 = vmul.f32 %v4261_v20, %v5581_v43  ;;  %v4390_v31 = vunpack.c.h.bf16 %v5211_v6 }
 0x17c   :  { %v2315_v26 = vadd.f32 %v2251_v0, %v2054_v14  ;;  %v458_v40 = vadd.f32 %v394_v17, %v197_v9  ;;  %v2316_v35 = vadd.f32 %v2252_v8, %v2055_v21  ;;  %v656_v27 = vmul.f32 %v4262_v23, %v5581_v43  ;;  %v5371_v9 = vld [vmem:[%s7552_s0 + $0x868] sm:$0xff]  }
 0x17d   :  { %v459_v36 = vadd.f32 %v395_v22, %v198_v16  ;;  %v916_v37 = vmul.f32 %v4389_v24, %v5583_v44  ;;  %v917_v59 = vmul.f32 %v4390_v31, %v5583_v44  ;;  %v4517_v49 = vunpack.c.l.bf16 %v5243_v25 }
 0x17e   :  { %v2386_v38 = vadd.f32 %v6846_v62, %v2315_v26  ;;  %v719_v39 = vadd.f32 %v655_v30, %v458_v40  ;;  %v2387_v50 = vadd.f32 %v6846_v62, %v2316_v35  ;;  %v4518_v54 = vunpack.c.h.bf16 %v5243_v25  ;;  %v5131_v25 = vld [vmem:[%s7552_s0 + $0xe8] sm:$0xff]  }
 0x17f   :  { %v720_v51 = vadd.f32 %v656_v27, %v459_v36  ;;  %v4645_v55 = vunpack.c.l.bf16 %v5275_v32  ;;  %v1177_v63 = vmul.f32 %v4517_v49, %v5585_v45  ;;  %v4646_v0 = vunpack.c.h.bf16 %v5275_v32  ;;  %v5163_v35 = vld [vmem:[%s7552_s0 + $0x1e8] sm:$0xff]  }
 0x180   :  { %v2450_v57 = vmax.f32 %v2386_v38, 0.0  ;;  %v980_v58 = vadd.f32 %v916_v37, %v719_v39  ;;  %v2451_v5 = vmax.f32 %v2387_v50, 0.0  ;;  %v1178_v7 = vmul.f32 %v4518_v54, %v5585_v45 }
 0x181   :  { %v981_v6 = vadd.f32 %v917_v59, %v720_v51  ;;  %v1438_v8 = vmul.f32 %v4645_v55, %v5587_v47  ;;  %v1439_v14 = vmul.f32 %v4646_v0, %v5587_v47  ;;  %v4773_v16 = vunpack.c.l.bf16 %v5307_v56  ;;  %v5195_v59 = vld [vmem:[%s7552_s0 + $0x2e8] sm:$0xff]  }
 0x182   :  { %v1241_v13 = vadd.f32 %v1177_v63, %v980_v58  ;;  %v4774_v17 = vunpack.c.h.bf16 %v5307_v56  ;;  %v6912_v20 = vpop.f32.mrb[8].mxu0  ;;  %v2486_v21 = vpack.c.bf16 %v2451_v5, %v2450_v57  ;;  %v4901_v23 = vunpack.c.l.bf16 %v5339_v1  ;;  %v5227_v0 = vld [vmem:[%s7552_s0 + $0x3e8] sm:$0xff]  }
 0x183   :  { %v1242_v22 = vadd.f32 %v1178_v7, %v981_v6  ;;  %v4902_v24 = vunpack.c.h.bf16 %v5339_v1  ;;  %v6917_v26 = vpop.f32.mrb[9].mxu0  ;;  %v1699_v30 = vmul.f32 %v4773_v16, %v5607_v2  ;;  %v5029_v32 = vunpack.c.l.bf16 %v5371_v9  ;;  %v5259_v16 = vld [vmem:[%s7552_s0 + $0x4e8] sm:$0xff]  }
 0x184   :  { %v1502_v40 = vadd.f32 %v1438_v8, %v1241_v13  ;;  %v1700_v31 = vmul.f32 %v4774_v17, %v5607_v2  ;;  %v6924_v36 = vpop.f32.mrb[10].mxu0  ;;  %5481 = vmatprep.mubr.msk.bf16.mxu1 %vm2498_vm1, %v2486_v21  ;;  %v1960_v37 = vmul.f32 %v4901_v23, %v5614_v10  ;;  %v5030_v39 = vunpack.c.h.bf16 %v5371_v9 }
 0x185   :  { %v1503_v27 = vadd.f32 %v1439_v14, %v1242_v22  ;;  %v1961_v38 = vmul.f32 %v4902_v24, %v5614_v10  ;;  %v6932_v49 = vpop.f32.mrb[11].mxu0  ;;  %v2221_v51 = vmul.f32 %v5029_v32, %v5616_v15  ;;  %v4069_v54 = vunpack.c.l.bf16 %v5131_v25 }
 0x186   :  { %v1763_v50 = vadd.f32 %v1699_v30, %v1502_v40  ;;  %v4070_v55 = vunpack.c.h.bf16 %v5131_v25  ;;  %v2222_v57 = vmul.f32 %v5030_v39, %v5616_v15  ;;  %v4197_v58 = vunpack.c.l.bf16 %v5163_v35 }
 0x187   :  { %v1764_v56 = vadd.f32 %v1700_v31, %v1503_v27  ;;  %v4198_v63 = vunpack.c.h.bf16 %v5163_v35  ;;  %v229_v5 = vmul.f32 %v4069_v54, %v5577_v41  ;;  %v4325_v7 = vunpack.c.l.bf16 %v5195_v59  ;;  %v5291_v31 = vld [vmem:[%s7552_s0 + $0x5e8] sm:$0xff]  }
 0x188   :  { %v2024_v1 = vadd.f32 %v1960_v37, %v1763_v50  ;;  %v230_v6 = vmul.f32 %v4070_v55, %v5577_v41  ;;  %v426_v9 = vmul.f32 %v4197_v58, %v5579_v42  ;;  %v4326_v14 = vunpack.c.h.bf16 %v5195_v59  ;;  %v5355_v58 = vld [vmem:[%s7552_s0 + $0x7e8] sm:$0xff]  }
 0x189   :  { %v2025_v8 = vadd.f32 %v1961_v38, %v1764_v56  ;;  %v427_v13 = vmul.f32 %v4198_v63, %v5579_v42  ;;  %v687_v21 = vmul.f32 %v4325_v7, %v5581_v43  ;;  %v4453_v22 = vunpack.c.l.bf16 %v5227_v0 }
 0x18a   :  { %v2285_v17 = vadd.f32 %v2221_v51, %v2024_v1  ;;  %v4454_v23 = vunpack.c.h.bf16 %v5227_v0  ;;  %v490_v25 = vadd.f32 %v426_v9, %v229_v5  ;;  %v688_v30 = vmul.f32 %v4326_v14, %v5581_v43  ;;  %v5323_v51 = vld [vmem:[%s7552_s0 + $0x6e8] sm:$0xff]  }
 0x18b   :  { %v2286_v24 = vadd.f32 %v2222_v57, %v2025_v8  ;;  %v491_v40 = vadd.f32 %v427_v13, %v230_v6  ;;  %v948_v35 = vmul.f32 %v4453_v22, %v5583_v44  ;;  %v4581_v37 = vunpack.c.l.bf16 %v5259_v16  ;;  %v5387_v6 = vld [vmem:[%s7552_s0 + $0x8e8] sm:$0xff]  }
 0x18c   :  { %v2356_v32 = vadd.f32 %v6846_v62, %v2285_v17  ;;  %v949_v27 = vmul.f32 %v4454_v23, %v5583_v44  ;;  %v751_v39 = vadd.f32 %v687_v21, %v490_v25  ;;  %v4582_v50 = vunpack.c.h.bf16 %v5259_v16  ;;  %v5116_v23 = vld [vmem:[%s7552_s0 + $0x70] sm:$0xff]  }
 0x18d   :  { %v2357_v38 = vadd.f32 %v6846_v62, %v2286_v24  ;;  %v752_v59 = vadd.f32 %v688_v30, %v491_v40  ;;  %v1209_v55 = vmul.f32 %v4581_v37, %v5585_v45  ;;  %v4709_v56 = vunpack.c.l.bf16 %v5291_v31 }
 0x18e   :  { %v2420_v54 = vmax.f32 %v2356_v32, 0.0  ;;  %v4710_v57 = vunpack.c.h.bf16 %v5291_v31  ;;  %v1012_v0 = vadd.f32 %v948_v35, %v751_v39  ;;  %v1210_v5 = vmul.f32 %v4582_v50, %v5585_v45  ;;  %v5148_v32 = vld [vmem:[%s7552_s0 + $0x170] sm:$0xff]  }
 0x18f   :  { %v2421_v63 = vmax.f32 %v2357_v38, 0.0  ;;  %v1013_v1 = vadd.f32 %v949_v27, %v752_v59  ;;  %v1470_v7 = vmul.f32 %v4709_v56, %v5587_v47  ;;  %v4837_v9 = vunpack.c.l.bf16 %v5323_v51  ;;  %v5180_v59 = vld [vmem:[%s7552_s0 + $0x270] sm:$0xff]  }
 0x190   :  { %v1471_v8 = vmul.f32 %v4710_v57, %v5587_v47  ;;  %v4838_v13 = vunpack.c.h.bf16 %v5323_v51  ;;  %v6968_v14 = vpop.f32.mrb[8].mxu1  ;;  %v1273_v17 = vadd.f32 %v1209_v55, %v1012_v0  ;;  %v4965_v22 = vunpack.c.l.bf16 %v5355_v58 }
 0x191   :  { %v2471_v16 = vpack.c.bf16 %v2421_v63, %v2420_v54  ;;  %v1274_v21 = vadd.f32 %v1210_v5, %v1013_v1  ;;  %v6973_v24 = vpop.f32.mrb[9].mxu1  ;;  %v1731_v25 = vmul.f32 %v4837_v9, %v5607_v2  ;;  %v4966_v30 = vunpack.c.h.bf16 %v5355_v58  ;;  %v5212_v1 = vld [vmem:[%s7552_s0 + $0x370] sm:$0xff]  }
 0x192   :  { %v1732_v40 = vmul.f32 %v4838_v13, %v5607_v2  ;;  %v5093_v31 = vunpack.c.l.bf16 %v5387_v6  ;;  %v6980_v35 = vpop.f32.mrb[10].mxu1  ;;  %v1534_v27 = vadd.f32 %v1470_v7, %v1273_v17  ;;  %v1992_v38 = vmul.f32 %v4965_v22, %v5614_v10 }
 0x193   :  { %5450 = vmatmul.mubr.msk.bf16.gmra.mrb[24].mxu0 %vm2498_vm1, %v2471_v16  ;;  %v1535_v37 = vadd.f32 %v1471_v8, %v1274_v21  ;;  %v5094_v39 = vunpack.c.h.bf16 %v5387_v6  ;;  %v6987_v50 = vpop.f32.mrb[11].mxu1  ;;  %v1993_v51 = vmul.f32 %v4966_v30, %v5614_v10  ;;  %v4009_v55 = vunpack.c.l.bf16 %v5116_v23  ;;  %v5244_v21 = vld [vmem:[%s7552_s0 + $0x470] sm:$0xff]  }
 0x194   :  { %v2253_v54 = vmul.f32 %v5093_v31, %v5616_v15  ;;  %v4010_v56 = vunpack.c.h.bf16 %v5116_v23  ;;  %v1795_v57 = vadd.f32 %v1731_v25, %v1534_v27  ;;  %v4137_v0 = vunpack.c.l.bf16 %v5148_v32 }
 0x195   :  { %v1796_v58 = vadd.f32 %v1732_v40, %v1535_v37  ;;  %v2254_v63 = vmul.f32 %v5094_v39, %v5616_v15  ;;  %v199_v5 = vmul.f32 %v4009_v55, %v5577_v41  ;;  %v4138_v7 = vunpack.c.h.bf16 %v5148_v32  ;;  %v5276_v37 = vld [vmem:[%s7552_s0 + $0x570] sm:$0xff]  }
 0x196   :  { %v200_v6 = vmul.f32 %v4010_v56, %v5577_v41  ;;  %v4265_v8 = vunpack.c.l.bf16 %v5180_v59  ;;  %v2056_v9 = vadd.f32 %v1992_v38, %v1795_v57  ;;  %v396_v16 = vmul.f32 %v4137_v0, %v5579_v42 }
 0x197   :  { %v2057_v13 = vadd.f32 %v1993_v51, %v1796_v58  ;;  %v4266_v17 = vunpack.c.h.bf16 %v5180_v59  ;;  %v397_v22 = vmul.f32 %v4138_v7, %v5579_v42  ;;  %v4393_v25 = vunpack.c.l.bf16 %v5212_v1  ;;  %v5308_v58 = vld [vmem:[%s7552_s0 + $0x670] sm:$0xff]  }
 0x198   :  { %v657_v23 = vmul.f32 %v4265_v8, %v5581_v43  ;;  %v4394_v40 = vunpack.c.h.bf16 %v5212_v1  ;;  %v2317_v30 = vadd.f32 %v2253_v54, %v2056_v9  ;;  %v460_v27 = vadd.f32 %v396_v16, %v199_v5  ;;  %v5372_v16 = vld [vmem:[%s7552_s0 + $0x870] sm:$0xff]  }
 0x199   :  { %v2318_v31 = vadd.f32 %v2254_v63, %v2057_v13  ;;  %v658_v32 = vmul.f32 %v4266_v17, %v5581_v43  ;;  %v461_v38 = vadd.f32 %v397_v22, %v200_v6  ;;  %v918_v39 = vmul.f32 %v4393_v25, %v5583_v44  ;;  %v5340_v6 = vld [vmem:[%s7552_s0 + $0x770] sm:$0xff]  }
 0x19a   :  { %v919_v59 = vmul.f32 %v4394_v40, %v5583_v44  ;;  %v4521_v51 = vunpack.c.l.bf16 %v5244_v21  ;;  %v2388_v55 = vadd.f32 %v6846_v62, %v2317_v30  ;;  %v721_v57 = vadd.f32 %v657_v23, %v460_v27  ;;  %v5132_v27 = vld [vmem:[%s7552_s0 + $0xf0] sm:$0xff]  }
 0x19b   :  { %v2389_v56 = vadd.f32 %v6846_v62, %v2318_v31  ;;  %v4522_v54 = vunpack.c.h.bf16 %v5244_v21  ;;  %v722_v63 = vadd.f32 %v658_v32, %v461_v38  ;;  %v4649_v1 = vunpack.c.l.bf16 %v5276_v37 }
 0x19c   :  { %v1179_v0 = vmul.f32 %v4521_v51, %v5585_v45  ;;  %v4650_v5 = vunpack.c.h.bf16 %v5276_v37  ;;  %v2452_v7 = vmax.f32 %v2388_v55, 0.0  ;;  %v982_v9 = vadd.f32 %v918_v39, %v721_v57 }
 0x19d   :  { %v2453_v8 = vmax.f32 %v2389_v56, 0.0  ;;  %v1180_v13 = vmul.f32 %v4522_v54, %v5585_v45  ;;  %v983_v17 = vadd.f32 %v919_v59, %v722_v63  ;;  %v1440_v21 = vmul.f32 %v4649_v1, %v5587_v47  ;;  %v5164_v59 = vld [vmem:[%s7552_s0 + $0x1f0] sm:$0xff]  }
 0x19e   :  { %v1441_v22 = vmul.f32 %v4650_v5, %v5587_v47  ;;  %v4777_v23 = vunpack.c.l.bf16 %v5308_v58  ;;  %v1243_v40 = vadd.f32 %v1179_v0, %v982_v9  ;;  %v4778_v30 = vunpack.c.h.bf16 %v5308_v58  ;;  %v5196_v54 = vld [vmem:[%s7552_s0 + $0x2f0] sm:$0xff]  }
 0x19f   :  { %v2487_v25 = vpack.c.bf16 %v2453_v8, %v2452_v7  ;;  %v4905_v31 = vunpack.c.l.bf16 %v5340_v6  ;;  %v1244_v32 = vadd.f32 %v1180_v13, %v983_v17  ;;  %v4906_v38 = vunpack.c.h.bf16 %v5340_v6  ;;  %v5228_v9 = vld [vmem:[%s7552_s0 + $0x3f0] sm:$0xff]  }
 0x1a0   :  { %v1701_v37 = vmul.f32 %v4777_v23, %v5607_v2  ;;  %v5033_v39 = vunpack.c.l.bf16 %v5372_v16  ;;  %v1504_v51 = vadd.f32 %v1440_v21, %v1243_v40  ;;  %v1702_v55 = vmul.f32 %v4778_v30, %v5607_v2  ;;  %v5260_v30 = vld [vmem:[%s7552_s0 + $0x4f0] sm:$0xff]  }
 0x1a1   :  { %5482 = vmatmul.mubr.msk.bf16.gmra.mrb[24].mxu1 %vm2498_vm1, %v2487_v25  ;;  %v1962_v56 = vmul.f32 %v4905_v31, %v5614_v10  ;;  %v5034_v57 = vunpack.c.h.bf16 %v5372_v16  ;;  %v1505_v58 = vadd.f32 %v1441_v22, %v1244_v32  ;;  %v1963_v63 = vmul.f32 %v4906_v38, %v5614_v10 }
 0x1a2   :  { %v2223_v0 = vmul.f32 %v5033_v39, %v5616_v15  ;;  %v4073_v1 = vunpack.c.l.bf16 %v5132_v27  ;;  %v1765_v5 = vadd.f32 %v1701_v37, %v1504_v51  ;;  %v4074_v7 = vunpack.c.h.bf16 %v5132_v27 }
 0x1a3   :  { %v2224_v6 = vmul.f32 %v5034_v57, %v5616_v15  ;;  %v4201_v8 = vunpack.c.l.bf16 %v5164_v59  ;;  %v1766_v13 = vadd.f32 %v1702_v55, %v1505_v58  ;;  %v4202_v17 = vunpack.c.h.bf16 %v5164_v59  ;;  %v5292_v55 = vld [vmem:[%s7552_s0 + $0x5f0] sm:$0xff]  }
 0x1a4   :  { %v231_v16 = vmul.f32 %v4073_v1, %v5577_v41  ;;  %v4329_v21 = vunpack.c.l.bf16 %v5196_v54  ;;  %v2026_v22 = vadd.f32 %v1962_v56, %v1765_v5  ;;  %v232_v23 = vmul.f32 %v4074_v7, %v5577_v41 }
 0x1a5   :  { %v428_v25 = vmul.f32 %v4201_v8, %v5579_v42  ;;  %v4330_v40 = vunpack.c.h.bf16 %v5196_v54  ;;  %v2027_v31 = vadd.f32 %v1963_v63, %v1766_v13  ;;  %v429_v27 = vmul.f32 %v4202_v17, %v5579_v42 }
 0x1a6   :  { %v689_v32 = vmul.f32 %v4329_v21, %v5581_v43  ;;  %v4457_v37 = vunpack.c.l.bf16 %v5228_v9  ;;  %v2287_v38 = vadd.f32 %v2223_v0, %v2026_v22  ;;  %v4458_v51 = vunpack.c.h.bf16 %v5228_v9  ;;  %v5324_v0 = vld [vmem:[%s7552_s0 + $0x6f0] sm:$0xff]  }
 0x1a7   :  { %v492_v39 = vadd.f32 %v428_v25, %v231_v16  ;;  %v690_v59 = vmul.f32 %v4330_v40, %v5581_v43  ;;  %v2288_v56 = vadd.f32 %v2224_v6, %v2027_v31  ;;  %v493_v57 = vadd.f32 %v429_v27, %v232_v23  ;;  %v5356_v16 = vld [vmem:[%s7552_s0 + $0x7f0] sm:$0xff]  }
 0x1a8   :  { %v950_v54 = vmul.f32 %v4457_v37, %v5583_v44  ;;  %v4585_v58 = vunpack.c.l.bf16 %v5260_v30  ;;  %v2358_v63 = vadd.f32 %v6846_v62, %v2287_v38  ;;  %v951_v5 = vmul.f32 %v4458_v51, %v5583_v44  ;;  %v5388_v27 = vld [vmem:[%s7552_s0 + $0x8f0] sm:$0xff]  }
 0x1a9   :  { %v753_v1 = vadd.f32 %v689_v32, %v492_v39  ;;  %v4586_v7 = vunpack.c.h.bf16 %v5260_v30  ;;  %v2359_v8 = vadd.f32 %v6846_v62, %v2288_v56  ;;  %v754_v9 = vadd.f32 %v690_v59, %v493_v57  ;;  %v5117_v59 = vld [vmem:[%s7552_s0 + $0x78] sm:$0xff]  }
 0x1aa   :  { %v1211_v13 = vmul.f32 %v4585_v58, %v5585_v45  ;;  %v4713_v6 = vunpack.c.l.bf16 %v5292_v55  ;;  %v2422_v17 = vmax.f32 %v2358_v63, 0.0  ;;  %v4714_v23 = vunpack.c.h.bf16 %v5292_v55 }
 0x1ab   :  { %v1014_v21 = vadd.f32 %v950_v54, %v753_v1  ;;  %v1212_v22 = vmul.f32 %v4586_v7, %v5585_v45  ;;  %v2423_v25 = vmax.f32 %v2359_v8, 0.0  ;;  %v1015_v40 = vadd.f32 %v951_v5, %v754_v9  ;;  %v5149_v54 = vld [vmem:[%s7552_s0 + $0x178] sm:$0xff]  }
 0x1ac   :  { %v1472_v30 = vmul.f32 %v4713_v6, %v5587_v47  ;;  %v4841_v31 = vunpack.c.l.bf16 %v5324_v0  ;;  %v1473_v37 = vmul.f32 %v4714_v23, %v5587_v47  ;;  %v4842_v38 = vunpack.c.h.bf16 %v5324_v0 }
 0x1ad   :  { %v1275_v32 = vadd.f32 %v1211_v13, %v1014_v21  ;;  %v4969_v39 = vunpack.c.l.bf16 %v5356_v16  ;;  %v2472_v51 = vpack.c.bf16 %v2423_v25, %v2422_v17  ;;  %v1276_v55 = vadd.f32 %v1212_v22, %v1015_v40  ;;  %v5181_v13 = vld [vmem:[%s7552_s0 + $0x278] sm:$0xff]  }
 0x1ae   :  { %v1733_v56 = vmul.f32 %v4841_v31, %v5607_v2  ;;  %v4970_v57 = vunpack.c.h.bf16 %v5356_v16  ;;  %v1734_v63 = vmul.f32 %v4842_v38, %v5607_v2  ;;  %v5097_v5 = vunpack.c.l.bf16 %v5388_v27  ;;  %v5213_v22 = vld [vmem:[%s7552_s0 + $0x378] sm:$0xff]  }
 0x1af   :  { %v1536_v58 = vadd.f32 %v1472_v30, %v1275_v32  ;;  %v1994_v1 = vmul.f32 %v4969_v39, %v5614_v10  ;;  %5453 = vmatprep.mubr.msk.bf16.mxu0 %vm2498_vm1, %v2472_v51  ;;  %v1537_v7 = vadd.f32 %v1473_v37, %v1276_v55  ;;  %v5098_v8 = vunpack.c.h.bf16 %v5388_v27  ;;  %v5245_v55 = vld [vmem:[%s7552_s0 + $0x478] sm:$0xff]  }
 0x1b0   :  { %v1995_v0 = vmul.f32 %v4970_v57, %v5614_v10  ;;  %v4013_v9 = vunpack.c.l.bf16 %v5117_v59  ;;  %v2255_v16 = vmul.f32 %v5097_v5, %v5616_v15  ;;  %v4014_v17 = vunpack.c.h.bf16 %v5117_v59 }
 0x1b1   :  { %v1797_v6 = vadd.f32 %v1733_v56, %v1536_v58  ;;  %v4141_v21 = vunpack.c.l.bf16 %v5149_v54  ;;  %v1798_v23 = vadd.f32 %v1734_v63, %v1537_v7  ;;  %v2256_v25 = vmul.f32 %v5098_v8, %v5616_v15  ;;  %v5277_v63 = vld [vmem:[%s7552_s0 + $0x578] sm:$0xff]  }
 0x1b2   :  { %v201_v40 = vmul.f32 %v4013_v9, %v5577_v41  ;;  %v4142_v30 = vunpack.c.h.bf16 %v5149_v54  ;;  %v202_v27 = vmul.f32 %v4014_v17, %v5577_v41  ;;  %v4269_v37 = vunpack.c.l.bf16 %v5181_v13 }
 0x1b3   :  { %v2058_v31 = vadd.f32 %v1994_v1, %v1797_v6  ;;  %v398_v32 = vmul.f32 %v4141_v21, %v5579_v42  ;;  %v2059_v38 = vadd.f32 %v1995_v0, %v1798_v23  ;;  %v4270_v59 = vunpack.c.h.bf16 %v5181_v13  ;;  %v5309_v23 = vld [vmem:[%s7552_s0 + $0x678] sm:$0xff]  }
 0x1b4   :  { %v399_v39 = vmul.f32 %v4142_v30, %v5579_v42  ;;  %v4397_v51 = vunpack.c.l.bf16 %v5213_v22  ;;  %v659_v58 = vmul.f32 %v4269_v37, %v5581_v43  ;;  %v4398_v54 = vunpack.c.h.bf16 %v5213_v22 }
 0x1b5   :  { %v2319_v56 = vadd.f32 %v2255_v16, %v2058_v31  ;;  %v462_v57 = vadd.f32 %v398_v32, %v201_v40  ;;  %v2320_v1 = vadd.f32 %v2256_v25, %v2059_v38  ;;  %v660_v7 = vmul.f32 %v4270_v59, %v5581_v43  ;;  %v5373_v59 = vld [vmem:[%s7552_s0 + $0x878] sm:$0xff]  }
 0x1b6   :  { %v463_v5 = vadd.f32 %v399_v39, %v202_v27  ;;  %v920_v0 = vmul.f32 %v4397_v51, %v5583_v44  ;;  %v921_v13 = vmul.f32 %v4398_v54, %v5583_v44  ;;  %v4525_v6 = vunpack.c.l.bf16 %v5245_v55  ;;  %v5341_v27 = vld [vmem:[%s7552_s0 + $0x778] sm:$0xff]  }
 0x1b7   :  { %v2390_v8 = vadd.f32 %v6846_v62, %v2319_v56  ;;  %v723_v9 = vadd.f32 %v659_v58, %v462_v57  ;;  %v2391_v16 = vadd.f32 %v6846_v62, %v2320_v1  ;;  %v4526_v21 = vunpack.c.h.bf16 %v5245_v55 }
 0x1b8   :  { %v724_v17 = vadd.f32 %v660_v7, %v463_v5  ;;  %v4653_v22 = vunpack.c.l.bf16 %v5277_v63  ;;  %v1181_v30 = vmul.f32 %v4525_v6, %v5585_v45  ;;  %v4654_v31 = vunpack.c.h.bf16 %v5277_v63  ;;  %v5133_v7 = vld [vmem:[%s7552_s0 + $0xf8] sm:$0xff]  }
 0x1b9   :  { %v2454_v25 = vmax.f32 %v2390_v8, 0.0  ;;  %v984_v40 = vadd.f32 %v920_v0, %v723_v9  ;;  %v2455_v32 = vmax.f32 %v2391_v16, 0.0  ;;  %v1182_v38 = vmul.f32 %v4526_v21, %v5585_v45  ;;  %v5165_v16 = vld [vmem:[%s7552_s0 + $0x1f8] sm:$0xff]  }
 0x1ba   :  { %v985_v37 = vadd.f32 %v921_v13, %v724_v17  ;;  %v1442_v39 = vmul.f32 %v4653_v22, %v5587_v47  ;;  %v1443_v55 = vmul.f32 %v4654_v31, %v5587_v47  ;;  %v4781_v56 = vunpack.c.l.bf16 %v5309_v23 }
 0x1bb   :  { %v1245_v51 = vadd.f32 %v1181_v30, %v984_v40  ;;  %v4782_v57 = vunpack.c.h.bf16 %v5309_v23  ;;  %v7120_v58 = vpop.f32.mrb[12].mxu0  ;;  %v2488_v54 = vpack.c.bf16 %v2455_v32, %v2454_v25  ;;  %v4909_v1 = vunpack.c.l.bf16 %v5341_v27  ;;  %v5197_v40 = vld [vmem:[%s7552_s0 + $0x2f8] sm:$0xff]  }
 0x1bc   :  { %v1246_v63 = vadd.f32 %v1182_v38, %v985_v37  ;;  %v4910_v5 = vunpack.c.h.bf16 %v5341_v27  ;;  %v7125_v0 = vpop.f32.mrb[13].mxu0  ;;  %v1703_v9 = vmul.f32 %v4781_v56, %v5607_v2  ;;  %v5037_v6 = vunpack.c.l.bf16 %v5373_v59 }
 0x1bd   :  { %v1506_v8 = vadd.f32 %v1442_v39, %v1245_v51  ;;  %v1704_v13 = vmul.f32 %v4782_v57, %v5607_v2  ;;  %v7132_v17 = vpop.f32.mrb[14].mxu0  ;;  %5485 = vmatprep.mubr.msk.bf16.mxu1 %vm2498_vm1, %v2488_v54  ;;  %v1964_v22 = vmul.f32 %v4909_v1, %v5614_v10  ;;  %v5038_v25 = vunpack.c.h.bf16 %v5373_v59  ;;  %v5229_v59 = vld [vmem:[%s7552_s0 + $0x3f8] sm:$0xff]  }
 0x1be   :  { %v1507_v21 = vadd.f32 %v1443_v55, %v1246_v63  ;;  %v1965_v23 = vmul.f32 %v4910_v5, %v5614_v10  ;;  %v7140_v30 = vpop.f32.mrb[15].mxu0  ;;  %v2225_v27 = vmul.f32 %v5037_v6, %v5616_v15  ;;  %v4077_v32 = vunpack.c.l.bf16 %v5133_v7 }
 0x1bf   :  { %v1767_v31 = vadd.f32 %v1703_v9, %v1506_v8  ;;  %v4078_v37 = vunpack.c.h.bf16 %v5133_v7  ;;  %v2226_v39 = vmul.f32 %v5038_v25, %v5616_v15  ;;  %v4205_v51 = vunpack.c.l.bf16 %v5165_v16  ;;  %v5261_v9 = vld [vmem:[%s7552_s0 + $0x4f8] sm:$0xff]  }
 0x1c0   :  { %v1768_v38 = vadd.f32 %v1704_v13, %v1507_v21  ;;  %v4206_v55 = vunpack.c.h.bf16 %v5165_v16  ;;  %v233_v57 = vmul.f32 %v4077_v32, %v5577_v41  ;;  %v4333_v63 = vunpack.c.l.bf16 %v5197_v40 }
 0x1c1   :  { %v2028_v56 = vadd.f32 %v1964_v22, %v1767_v31  ;;  %v234_v54 = vmul.f32 %v4078_v37, %v5577_v41  ;;  %v430_v5 = vmul.f32 %v4205_v51, %v5579_v42  ;;  %v4334_v8 = vunpack.c.h.bf16 %v5197_v40 }
 0x1c2   :  { %v2029_v1 = vadd.f32 %v1965_v23, %v1768_v38  ;;  %v431_v7 = vmul.f32 %v4206_v55, %v5579_v42  ;;  %v691_v6 = vmul.f32 %v4333_v63, %v5581_v43  ;;  %v4461_v16 = vunpack.c.l.bf16 %v5229_v59  ;;  %v5293_v23 = vld [vmem:[%s7552_s0 + $0x5f8] sm:$0xff]  }
 0x1c3   :  { %v2289_v13 = vadd.f32 %v2225_v27, %v2028_v56  ;;  %v4462_v21 = vunpack.c.h.bf16 %v5229_v59  ;;  %v494_v25 = vadd.f32 %v430_v5, %v233_v57  ;;  %v692_v41 = vmul.f32 %v4334_v8, %v5581_v43  ;;  %v5325_v43 = vld [vmem:[%s7552_s0 + $0x6f8] sm:$0xff]  }
 0x1c4   :  { %v2290_v22 = vadd.f32 %v2226_v39, %v2029_v1  ;;  %v495_v31 = vadd.f32 %v431_v7, %v234_v54  ;;  %v952_v40 = vmul.f32 %v4461_v16, %v5583_v44  ;;  %v4589_v27 = vunpack.c.l.bf16 %v5261_v9  ;;  %v5357_v54 = vld [vmem:[%s7552_s0 + $0x7f8] sm:$0xff]  }
 0x1c5   :  { %v2360_v42 = vadd.f32 %v6846_v62, %v2289_v13  ;;  %v953_v32 = vmul.f32 %v4462_v21, %v5583_v44  ;;  %v755_v38 = vadd.f32 %v691_v6, %v494_v25  ;;  %v4590_v39 = vunpack.c.h.bf16 %v5261_v9  ;;  %v5389_v7 = vld [vmem:[%s7552_s0 + $0x8f8] sm:$0xff]  }
 0x1c6   :  { %v2361_v37 = vadd.f32 %v6846_v62, %v2290_v22  ;;  %v756_v51 = vadd.f32 %v692_v41, %v495_v31  ;;  %v1213_v59 = vmul.f32 %v4589_v27, %v5585_v45  ;;  %v4717_v56 = vunpack.c.l.bf16 %v5293_v23 }
 0x1c7   :  { %v2424_v55 = vmax.f32 %v2360_v42, 0.0  ;;  %v4718_v57 = vunpack.c.h.bf16 %v5293_v23  ;;  %v1016_v63 = vadd.f32 %v952_v40, %v755_v38  ;;  %v1214_v5 = vmul.f32 %v4590_v39, %v5585_v45  ;;  %v7181_v45 = vld [vmem:[%s7555_s4] ss:$0 sm:$0xff] }
 0x1c8   :  { %v2425_v44 = vmax.f32 %v2361_v37, 0.0  ;;  %v1017_v1 = vadd.f32 %v953_v32, %v756_v51  ;;  %v1474_v8 = vmul.f32 %v4717_v56, %v5587_v47  ;;  %v4845_v13 = vunpack.c.l.bf16 %v5325_v43 }
 0x1c9   :  { %v1475_v9 = vmul.f32 %v4718_v57, %v5587_v47  ;;  %v4846_v6 = vunpack.c.h.bf16 %v5325_v43  ;;  %v7176_v16 = vpop.f32.mrb[12].mxu1  ;;  %v1277_v22 = vadd.f32 %v1213_v59, %v1016_v63  ;;  %v4973_v31 = vunpack.c.l.bf16 %v5357_v54 }
 0x1ca   :  { %v2473_v21 = vpack.c.bf16 %v2425_v44, %v2424_v55  ;;  %v1278_v25 = vadd.f32 %v1214_v5, %v1017_v1  ;;  %v7183_v41 = vpop.f32.mrb[13].mxu1  ;;  %v1735_v23 = vmul.f32 %v4845_v13, %v5607_v2  ;;  %v4974_v47 = vunpack.c.h.bf16 %v5357_v54 }
 0x1cb   :  { %v1736_v42 = vmul.f32 %v4846_v6, %v5607_v2  ;;  %v5101_v40 = vunpack.c.l.bf16 %v5389_v7  ;;  %v7187_v32 = vpop.f32.mrb[14].mxu1  ;;  %v1538_v27 = vadd.f32 %v1474_v8, %v1277_v22  ;;  %v1996_v38 = vmul.f32 %v4973_v31, %v5614_v10 }
 0x1cc   :  { %5454 = vmatmul.mubr.msk.bf16.gmra.mrb[28].mxu0 %vm2498_vm1, %v2473_v21  ;;  %v1539_v37 = vadd.f32 %v1475_v9, %v1278_v25  ;;  %v5102_v51 = vunpack.c.h.bf16 %v5389_v7  ;;  %v7191_v39 = vpop.f32.mrb[15].mxu1  ;;  %v1997_v43 = vmul.f32 %v4974_v47, %v5614_v10  ;;  %v2642_v2 = vadd.f32 %v6744_v28, %v7181_v45 }
 0x1cd   :  { %v2257_v55 = vmul.f32 %v5101_v40, %v5616_v15  ;;  %v1799_v59 = vadd.f32 %v1735_v23, %v1538_v27  ;;  %v2770_v54 = vadd.f32 %v6746_v29, %v7181_v45  ;;  %v2634_v63 = vadd.f32 %v7181_v45, %v6750_v33 }
 0x1ce   :  { %v1800_v56 = vadd.f32 %v1736_v42, %v1539_v37  ;;  %v2258_v57 = vmul.f32 %v5102_v51, %v5616_v15  ;;  %v2890_v44 = vmax.f32 %v2642_v2, 0.0  ;;  %v2762_v10 = vadd.f32 %v7181_v45, %v6752_v34 }
 0x1cf   :  { %v2645_v1 = vadd.f32 %v6758_v46, %v7181_v45  ;;  %v2060_v5 = vadd.f32 %v1996_v38, %v1799_v59  ;;  %v2922_v7 = vmax.f32 %v2770_v54, 0.0  ;;  %v2773_v8 = vadd.f32 %v6760_v48, %v7181_v45 }
 0x1d0   :  { %v2061_v28 = vadd.f32 %v1997_v43, %v1800_v56  ;;  %v3889_v15 = vpack.c.bf16 %v2890_v44, %v2890_v44  ;;  %v2888_v9 = vmax.f32 %v2634_v63, 0.0  ;;  %v2920_v13 = vmax.f32 %v2762_v10, 0.0 }
 0x1d1   :  { %v2891_v29 = vmax.f32 %v2645_v1, 0.0  ;;  %v2321_v6 = vadd.f32 %v2257_v55, %v2060_v5  ;;  %v3921_v22 = vpack.c.bf16 %v2922_v7, %v2922_v7  ;;  %v2923_v33 = vmax.f32 %v2773_v8, 0.0 }
 0x1d2   :  { %v2322_v21 = vadd.f32 %v2258_v57, %v2061_v28  ;;  %3211 = vst.msk [vmem:[%s7556_s5 + $0x8] sm:$0xf] %vm3208_vm2, %v3889_v15  ;;  %v3887_v34 = vpack.c.bf16 %v2888_v9, %v2888_v9  ;;  %v3919_v46 = vpack.c.bf16 %v2920_v13, %v2920_v13  ;;  %v2637_v31 = vadd.f32 %v7181_v45, %v6764_v52 }
 0x1d3   :  { %v3890_v25 = vpack.c.bf16 %v2891_v29, %v2891_v29  ;;  %v2392_v48 = vadd.f32 %v6846_v62, %v2321_v6  ;;  %3243 = vst.msk [vmem:[%s7556_s5 + $0x88] sm:$0xf] %vm3208_vm2, %v3921_v22  ;;  %v3922_v42 = vpack.c.bf16 %v2923_v33, %v2923_v33  ;;  %v2765_v47 = vadd.f32 %v7181_v45, %v6766_v53 }
 0x1d4   :  { %v2393_v23 = vadd.f32 %v6846_v62, %v2322_v21  ;;  %3209 = vst.msk [vmem:[%s7556_s5] sm:$0xf] %vm3208_vm2, %v3887_v34  ;;  %3241 = vst.msk [vmem:[%s7556_s5 + $0x80] sm:$0xf] %vm3208_vm2, %v3919_v46  ;;  %v2889_v52 = vmax.f32 %v2637_v31, 0.0  ;;  %v2658_v62 = vadd.f32 %v6772_v60, %v7181_v45  ;;  %v2786_v53 = vadd.f32 %v6774_v61, %v7181_v45 }
 0x1d5   :  { %3212 = vst.msk [vmem:[%s7556_s5 + $0xc] sm:$0xf] %vm3208_vm2, %v3890_v25  ;;  %v2650_v40 = vadd.f32 %v7181_v45, %v6778_v3  ;;  %v2456_v27 = vmax.f32 %v2392_v48, 0.0  ;;  %3244 = vst.msk [vmem:[%s7556_s5 + $0x8c] sm:$0xf] %vm3208_vm2, %v3922_v42  ;;  %v2921_v38 = vmax.f32 %v2765_v47, 0.0  ;;  %v2778_v51 = vadd.f32 %v7181_v45, %v6780_v4 }
 0x1d6   :  { %v2457_v37 = vmax.f32 %v2393_v23, 0.0  ;;  %v3888_v43 = vpack.c.bf16 %v2889_v52, %v2889_v52  ;;  %v2894_v55 = vmax.f32 %v2658_v62, 0.0  ;;  %v2926_v60 = vmax.f32 %v2786_v53, 0.0 }
 0x1d7   :  { %v2892_v2 = vmax.f32 %v2650_v40, 0.0  ;;  %v3920_v61 = vpack.c.bf16 %v2921_v38, %v2921_v38  ;;  %v2924_v56 = vmax.f32 %v2778_v51, 0.0  ;;  %v2661_v3 = vadd.f32 %v6786_v11, %v7181_v45 }
 0x1d8   :  { %v2489_v59 = vpack.c.bf16 %v2457_v37, %v2456_v27  ;;  %3210 = vst.msk [vmem:[%s7556_s5 + $0x4] sm:$0xf] %vm3208_vm2, %v3888_v43  ;;  %v3893_v57 = vpack.c.bf16 %v2894_v55, %v2894_v55  ;;  %v3925_v54 = vpack.c.bf16 %v2926_v60, %v2926_v60  ;;  %v2789_v4 = vadd.f32 %v6788_v12, %v7181_v45 }
 0x1d9   :  { %v3891_v44 = vpack.c.bf16 %v2892_v2, %v2892_v2  ;;  %3242 = vst.msk [vmem:[%s7556_s5 + $0x84] sm:$0xf] %vm3208_vm2, %v3920_v61  ;;  %v3923_v63 = vpack.c.bf16 %v2924_v56, %v2924_v56  ;;  %v2895_v11 = vmax.f32 %v2661_v3, 0.0  ;;  %v2653_v10 = vadd.f32 %v7181_v45, %v6792_v18 }
 0x1da   :  { %5486 = vmatmul.mubr.msk.bf16.gmra.mrb[28].mxu1 %vm2498_vm1, %v2489_v59  ;;  %v2781_v1 = vadd.f32 %v7181_v45, %v6794_v19  ;;  %3215 = vst.msk [vmem:[%s7556_s5 + $0x18] sm:$0xf] %vm3208_vm2, %v3893_v57  ;;  %3247 = vst.msk [vmem:[%s7556_s5 + $0x98] sm:$0xf] %vm3208_vm2, %v3925_v54  ;;  %v2927_v12 = vmax.f32 %v2789_v4, 0.0  ;;  %v2674_v18 = vadd.f32 %v6912_v20, %v7181_v45 }
 0x1db   :  { %3213 = vst.msk [vmem:[%s7556_s5 + $0x10] sm:$0xf] %vm3208_vm2, %v3891_v44  ;;  %v2802_v19 = vadd.f32 %v6968_v14, %v7181_v45  ;;  %v2666_v5 = vadd.f32 %v7181_v45, %v6917_v26  ;;  %3245 = vst.msk [vmem:[%s7556_s5 + $0x90] sm:$0xf] %vm3208_vm2, %v3923_v63  ;;  %v3894_v28 = vpack.c.bf16 %v2895_v11, %v2895_v11  ;;  %v2893_v7 = vmax.f32 %v2653_v10, 0.0 }
 0x1dc   :  { %v2925_v8 = vmax.f32 %v2781_v1, 0.0  ;;  %v2794_v15 = vadd.f32 %v7181_v45, %v6973_v24  ;;  %v3926_v9 = vpack.c.bf16 %v2927_v12, %v2927_v12  ;;  %v2898_v13 = vmax.f32 %v2674_v18, 0.0 }
 0x1dd   :  { %v2930_v20 = vmax.f32 %v2802_v19, 0.0  ;;  %v2896_v29 = vmax.f32 %v2666_v5, 0.0  ;;  %3216 = vst.msk [vmem:[%s7556_s5 + $0x1c] sm:$0xf] %vm3208_vm2, %v3894_v28  ;;  %v3892_v26 = vpack.c.bf16 %v2893_v7, %v2893_v7  ;;  %v2677_v21 = vadd.f32 %v6924_v36, %v7181_v45 }
 0x1de   :  { %v3924_v14 = vpack.c.bf16 %v2925_v8, %v2925_v8  ;;  %v2928_v6 = vmax.f32 %v2794_v15, 0.0  ;;  %3248 = vst.msk [vmem:[%s7556_s5 + $0x9c] sm:$0xf] %vm3208_vm2, %v3926_v9  ;;  %v3897_v24 = vpack.c.bf16 %v2898_v13, %v2898_v13  ;;  %v2805_v34 = vadd.f32 %v6980_v35, %v7181_v45 }
 0x1df   :  { %v3929_v22 = vpack.c.bf16 %v2930_v20, %v2930_v20  ;;  %v3895_v33 = vpack.c.bf16 %v2896_v29, %v2896_v29  ;;  %3214 = vst.msk [vmem:[%s7556_s5 + $0x14] sm:$0xf] %vm3208_vm2, %v3892_v26  ;;  %v2899_v46 = vmax.f32 %v2677_v21, 0.0  ;;  %v2669_v25 = vadd.f32 %v7181_v45, %v6932_v49 }
 0x1e0   :  { %3246 = vst.msk [vmem:[%s7556_s5 + $0x94] sm:$0xf] %vm3208_vm2, %v3924_v14  ;;  %v3927_v36 = vpack.c.bf16 %v2928_v6, %v2928_v6  ;;  %v2797_v31 = vadd.f32 %v7181_v45, %v6987_v50  ;;  %3219 = vst.msk [vmem:[%s7556_s5 + $0x28] sm:$0xf] %vm3208_vm2, %v3897_v24  ;;  %v2931_v35 = vmax.f32 %v2805_v34, 0.0  ;;  %v2690_v49 = vadd.f32 %v7120_v58, %v7181_v45 }
 0x1e1   :  { %3251 = vst.msk [vmem:[%s7556_s5 + $0xa8] sm:$0xf] %vm3208_vm2, %v3929_v22  ;;  %3217 = vst.msk [vmem:[%s7556_s5 + $0x20] sm:$0xf] %vm3208_vm2, %v3895_v33  ;;  %v2818_v50 = vadd.f32 %v7176_v16, %v7181_v45  ;;  %v2682_v48 = vadd.f32 %v7181_v45, %v7125_v0  ;;  %v3898_v23 = vpack.c.bf16 %v2899_v46, %v2899_v46  ;;  %v2897_v42 = vmax.f32 %v2669_v25, 0.0 }
 0x1e2   :  { %3249 = vst.msk [vmem:[%s7556_s5 + $0xa0] sm:$0xf] %vm3208_vm2, %v3927_v36  ;;  %v2929_v47 = vmax.f32 %v2797_v31, 0.0  ;;  %v2810_v52 = vadd.f32 %v7181_v45, %v7183_v41  ;;  %v3930_v62 = vpack.c.bf16 %v2931_v35, %v2931_v35  ;;  %v2902_v53 = vmax.f32 %v2690_v49, 0.0 }
 0x1e3   :  { %v2934_v58 = vmax.f32 %v2818_v50, 0.0  ;;  %v2900_v40 = vmax.f32 %v2682_v48, 0.0  ;;  %3220 = vst.msk [vmem:[%s7556_s5 + $0x2c] sm:$0xf] %vm3208_vm2, %v3898_v23  ;;  %v3896_v0 = vpack.c.bf16 %v2897_v42, %v2897_v42  ;;  %v2693_v37 = vadd.f32 %v7132_v17, %v7181_v45 }
 0x1e4   :  { %v3928_v16 = vpack.c.bf16 %v2929_v47, %v2929_v47  ;;  %v2932_v27 = vmax.f32 %v2810_v52, 0.0  ;;  %3252 = vst.msk [vmem:[%s7556_s5 + $0xac] sm:$0xf] %vm3208_vm2, %v3930_v62  ;;  %v3901_v41 = vpack.c.bf16 %v2902_v53, %v2902_v53  ;;  %v2821_v43 = vadd.f32 %v7187_v32, %v7181_v45 }
 0x1e5   :  { %v3933_v38 = vpack.c.bf16 %v2934_v58, %v2934_v58  ;;  %v3899_v51 = vpack.c.bf16 %v2900_v40, %v2900_v40  ;;  %3218 = vst.msk [vmem:[%s7556_s5 + $0x24] sm:$0xf] %vm3208_vm2, %v3896_v0  ;;  %v2903_v55 = vmax.f32 %v2693_v37, 0.0  ;;  %v2685_v60 = vadd.f32 %v7181_v45, %v7140_v30 }
 0x1e6   :  { %3250 = vst.msk [vmem:[%s7556_s5 + $0xa4] sm:$0xf] %vm3208_vm2, %v3928_v16  ;;  %v3931_v17 = vpack.c.bf16 %v2932_v27, %v2932_v27  ;;  %v2813_v2 = vadd.f32 %v7181_v45, %v7191_v39  ;;  %3223 = vst.msk [vmem:[%s7556_s5 + $0x38] sm:$0xf] %vm3208_vm2, %v3901_v41  ;;  %v2935_v32 = vmax.f32 %v2821_v43, 0.0 }
 0x1e7   :  { %3255 = vst.msk [vmem:[%s7556_s5 + $0xb8] sm:$0xf] %vm3208_vm2, %v3933_v38  ;;  %3221 = vst.msk [vmem:[%s7556_s5 + $0x30] sm:$0xf] %vm3208_vm2, %v3899_v51  ;;  %v3902_v30 = vpack.c.bf16 %v2903_v55, %v2903_v55  ;;  %v2901_v39 = vmax.f32 %v2685_v60, 0.0 }
 0x1e8   :  { %3253 = vst.msk [vmem:[%s7556_s5 + $0xb0] sm:$0xf] %vm3208_vm2, %v3931_v17  ;;  %v2933_v59 = vmax.f32 %v2813_v2, 0.0  ;;  %v3934_v61 = vpack.c.bf16 %v2935_v32, %v2935_v32 }
 0x1e9   :  { %3224 = vst.msk [vmem:[%s7556_s5 + $0x3c] sm:$0xf] %vm3208_vm2, %v3902_v30  ;;  %v3900_v56 = vpack.c.bf16 %v2901_v39, %v2901_v39 }
 0x1ea   :  { %v3932_v3 = vpack.c.bf16 %v2933_v59, %v2933_v59  ;;  %3256 = vst.msk [vmem:[%s7556_s5 + $0xbc] sm:$0xf] %vm3208_vm2, %v3934_v61 }
 0x1eb   :  { %3222 = vst.msk [vmem:[%s7556_s5 + $0x34] sm:$0xf] %vm3208_vm2, %v3900_v56 }
 0x1ec   :  { %3254 = vst.msk [vmem:[%s7556_s5 + $0xb4] sm:$0xf] %vm3208_vm2, %v3932_v3 }
 0x1f4   :  { %v5443_v57 = vpop.f32.mrb[16].mxu0 }
 0x1f5   :  { %v2706_v54 = vadd.f32 %v5443_v57, %v7181_v45  ;;  %v2697_v44 = vpop.f32.mrb[17].mxu0 }
 0x1f6   :  { %v2698_v4 = vadd.f32 %v7181_v45, %v2697_v44  ;;  %v5444_v63 = vpop.f32.mrb[18].mxu0 }
 0x1f7   :  { %v2906_v11 = vmax.f32 %v2706_v54, 0.0  ;;  %v2709_v10 = vadd.f32 %v5444_v63, %v7181_v45  ;;  %v2700_v1 = vpop.f32.mrb[19].mxu0 }
 0x1f8   :  { %v2904_v12 = vmax.f32 %v2698_v4, 0.0  ;;  %v2701_v18 = vadd.f32 %v7181_v45, %v2700_v1 }
 0x1f9   :  { %v3905_v19 = vpack.c.bf16 %v2906_v11, %v2906_v11  ;;  %v2907_v5 = vmax.f32 %v2709_v10, 0.0 }
 0x1fa   :  { %v3903_v28 = vpack.c.bf16 %v2904_v12, %v2904_v12  ;;  %v2905_v7 = vmax.f32 %v2701_v18, 0.0 }
 0x1fb   :  { %3227 = vst.msk [vmem:[%s7556_s5 + $0x48] sm:$0xf] %vm3208_vm2, %v3905_v19  ;;  %v3906_v8 = vpack.c.bf16 %v2907_v5, %v2907_v5 }
 0x1fc   :  { %3225 = vst.msk [vmem:[%s7556_s5 + $0x40] sm:$0xf] %vm3208_vm2, %v3903_v28  ;;  %v3904_v15 = vpack.c.bf16 %v2905_v7, %v2905_v7 }
 0x1fd   :  { %3228 = vst.msk [vmem:[%s7556_s5 + $0x4c] sm:$0xf] %vm3208_vm2, %v3906_v8 }
 0x1fe   :  { %3226 = vst.msk [vmem:[%s7556_s5 + $0x44] sm:$0xf] %vm3208_vm2, %v3904_v15 }
 0x202   :  { %v5475_v9 = vpop.f32.mrb[16].mxu1 }
 0x203   :  { %v2834_v13 = vadd.f32 %v5475_v9, %v7181_v45  ;;  %v2825_v20 = vpop.f32.mrb[17].mxu1 }
 0x204   :  { %v2826_v29 = vadd.f32 %v7181_v45, %v2825_v20  ;;  %v5476_v26 = vpop.f32.mrb[18].mxu1 }
 0x205   :  { %v2938_v14 = vmax.f32 %v2834_v13, 0.0  ;;  %v2837_v6 = vadd.f32 %v5476_v26, %v7181_v45  ;;  %v2828_v21 = vpop.f32.mrb[19].mxu1 }
 0x206   :  { %v2936_v24 = vmax.f32 %v2826_v29, 0.0  ;;  %v2829_v22 = vadd.f32 %v7181_v45, %v2828_v21 }
 0x207   :  { %v3937_v33 = vpack.c.bf16 %v2938_v14, %v2938_v14  ;;  %v2939_v34 = vmax.f32 %v2837_v6, 0.0 }
 0x208   :  { %v3935_v36 = vpack.c.bf16 %v2936_v24, %v2936_v24  ;;  %v2937_v46 = vmax.f32 %v2829_v22, 0.0 }
 0x209   :  { %3259 = vst.msk [vmem:[%s7556_s5 + $0xc8] sm:$0xf] %vm3208_vm2, %v3937_v33  ;;  %v3938_v25 = vpack.c.bf16 %v2939_v34, %v2939_v34 }
 0x20a   :  { %3257 = vst.msk [vmem:[%s7556_s5 + $0xc0] sm:$0xf] %vm3208_vm2, %v3935_v36  ;;  %v3936_v31 = vpack.c.bf16 %v2937_v46, %v2937_v46 }
 0x20b   :  { %3260 = vst.msk [vmem:[%s7556_s5 + $0xcc] sm:$0xf] %vm3208_vm2, %v3938_v25 }
 0x20c   :  { %3258 = vst.msk [vmem:[%s7556_s5 + $0xc4] sm:$0xf] %vm3208_vm2, %v3936_v31 }
 0x22d   :  { %v5447_v35 = vpop.f32.mrb[20].mxu0 }
 0x22e   :  { %v2722_v49 = vadd.f32 %v5447_v35, %v7181_v45  ;;  %v2713_v50 = vpop.f32.mrb[21].mxu0 }
 0x22f   :  { %v2714_v48 = vadd.f32 %v7181_v45, %v2713_v50  ;;  %v5448_v23 = vpop.f32.mrb[22].mxu0 }
 0x230   :  { %v2910_v42 = vmax.f32 %v2722_v49, 0.0  ;;  %v2725_v47 = vadd.f32 %v5448_v23, %v7181_v45  ;;  %v2716_v52 = vpop.f32.mrb[23].mxu0 }
 0x231   :  { %v2908_v62 = vmax.f32 %v2714_v48, 0.0  ;;  %v2717_v53 = vadd.f32 %v7181_v45, %v2716_v52 }
 0x232   :  { %v3909_v58 = vpack.c.bf16 %v2910_v42, %v2910_v42  ;;  %v2911_v40 = vmax.f32 %v2725_v47, 0.0 }
 0x233   :  { %v3907_v0 = vpack.c.bf16 %v2908_v62, %v2908_v62  ;;  %v2909_v16 = vmax.f32 %v2717_v53, 0.0 }
 0x234   :  { %3231 = vst.msk [vmem:[%s7556_s5 + $0x58] sm:$0xf] %vm3208_vm2, %v3909_v58  ;;  %v3910_v27 = vpack.c.bf16 %v2911_v40, %v2911_v40 }
 0x235   :  { %3229 = vst.msk [vmem:[%s7556_s5 + $0x50] sm:$0xf] %vm3208_vm2, %v3907_v0  ;;  %v3908_v37 = vpack.c.bf16 %v2909_v16, %v2909_v16 }
 0x236   :  { %3232 = vst.msk [vmem:[%s7556_s5 + $0x5c] sm:$0xf] %vm3208_vm2, %v3910_v27 }
 0x237   :  { %3230 = vst.msk [vmem:[%s7556_s5 + $0x54] sm:$0xf] %vm3208_vm2, %v3908_v37 }
 0x23b   :  { %v5479_v41 = vpop.f32.mrb[20].mxu1 }
 0x23c   :  { %v2850_v38 = vadd.f32 %v5479_v41, %v7181_v45  ;;  %v2841_v51 = vpop.f32.mrb[21].mxu1 }
 0x23d   :  { %v2842_v43 = vadd.f32 %v7181_v45, %v2841_v51  ;;  %v5480_v17 = vpop.f32.mrb[22].mxu1 }
 0x23e   :  { %v2942_v55 = vmax.f32 %v2850_v38, 0.0  ;;  %v2853_v60 = vadd.f32 %v5480_v17, %v7181_v45  ;;  %v2844_v2 = vpop.f32.mrb[23].mxu1 }
 0x23f   :  { %v2940_v32 = vmax.f32 %v2842_v43, 0.0  ;;  %v2845_v30 = vadd.f32 %v7181_v45, %v2844_v2 }
 0x240   :  { %v3941_v39 = vpack.c.bf16 %v2942_v55, %v2942_v55  ;;  %v2943_v59 = vmax.f32 %v2853_v60, 0.0 }
 0x241   :  { %v3939_v61 = vpack.c.bf16 %v2940_v32, %v2940_v32  ;;  %v2941_v56 = vmax.f32 %v2845_v30, 0.0 }
 0x242   :  { %3263 = vst.msk [vmem:[%s7556_s5 + $0xd8] sm:$0xf] %vm3208_vm2, %v3941_v39  ;;  %v3942_v3 = vpack.c.bf16 %v2943_v59, %v2943_v59 }
 0x243   :  { %3261 = vst.msk [vmem:[%s7556_s5 + $0xd0] sm:$0xf] %vm3208_vm2, %v3939_v61  ;;  %v3940_v57 = vpack.c.bf16 %v2941_v56, %v2941_v56 }
 0x244   :  { %3264 = vst.msk [vmem:[%s7556_s5 + $0xdc] sm:$0xf] %vm3208_vm2, %v3942_v3 }
 0x245   :  { %3262 = vst.msk [vmem:[%s7556_s5 + $0xd4] sm:$0xf] %vm3208_vm2, %v3940_v57 }
 0x266   :  { %v5451_v54 = vpop.f32.mrb[24].mxu0 }
 0x267   :  { %v2738_v44 = vadd.f32 %v5451_v54, %v7181_v45  ;;  %v2729_v4 = vpop.f32.mrb[25].mxu0 }
 0x268   :  { %v2730_v63 = vadd.f32 %v7181_v45, %v2729_v4  ;;  %v5452_v11 = vpop.f32.mrb[26].mxu0 }
 0x269   :  { %v2914_v10 = vmax.f32 %v2738_v44, 0.0  ;;  %v2741_v1 = vadd.f32 %v5452_v11, %v7181_v45  ;;  %v2732_v12 = vpop.f32.mrb[27].mxu0 }
 0x26a   :  { %v2912_v18 = vmax.f32 %v2730_v63, 0.0  ;;  %v2733_v19 = vadd.f32 %v7181_v45, %v2732_v12 }
 0x26b   :  { %v3913_v5 = vpack.c.bf16 %v2914_v10, %v2914_v10  ;;  %v2915_v28 = vmax.f32 %v2741_v1, 0.0 }
 0x26c   :  { %v3911_v7 = vpack.c.bf16 %v2912_v18, %v2912_v18  ;;  %v2913_v8 = vmax.f32 %v2733_v19, 0.0 }
 0x26d   :  { %3235 = vst.msk [vmem:[%s7556_s5 + $0x68] sm:$0xf] %vm3208_vm2, %v3913_v5  ;;  %v3914_v15 = vpack.c.bf16 %v2915_v28, %v2915_v28 }
 0x26e   :  { %3233 = vst.msk [vmem:[%s7556_s5 + $0x60] sm:$0xf] %vm3208_vm2, %v3911_v7  ;;  %v3912_v9 = vpack.c.bf16 %v2913_v8, %v2913_v8 }
 0x26f   :  { %3236 = vst.msk [vmem:[%s7556_s5 + $0x6c] sm:$0xf] %vm3208_vm2, %v3914_v15 }
 0x270   :  { %3234 = vst.msk [vmem:[%s7556_s5 + $0x64] sm:$0xf] %vm3208_vm2, %v3912_v9 }
 0x274   :  { %v5483_v13 = vpop.f32.mrb[24].mxu1 }
 0x275   :  { %v2866_v20 = vadd.f32 %v5483_v13, %v7181_v45  ;;  %v2857_v29 = vpop.f32.mrb[25].mxu1 }
 0x276   :  { %v2858_v26 = vadd.f32 %v7181_v45, %v2857_v29  ;;  %v5484_v14 = vpop.f32.mrb[26].mxu1 }
 0x277   :  { %v2946_v6 = vmax.f32 %v2866_v20, 0.0  ;;  %v2869_v21 = vadd.f32 %v5484_v14, %v7181_v45  ;;  %v2860_v24 = vpop.f32.mrb[27].mxu1 }
 0x278   :  { %v2944_v22 = vmax.f32 %v2858_v26, 0.0  ;;  %v2861_v33 = vadd.f32 %v7181_v45, %v2860_v24 }
 0x279   :  { %v3945_v34 = vpack.c.bf16 %v2946_v6, %v2946_v6  ;;  %v2947_v36 = vmax.f32 %v2869_v21, 0.0 }
 0x27a   :  { %v3943_v46 = vpack.c.bf16 %v2944_v22, %v2944_v22  ;;  %v2945_v25 = vmax.f32 %v2861_v33, 0.0 }
 0x27b   :  { %3267 = vst.msk [vmem:[%s7556_s5 + $0xe8] sm:$0xf] %vm3208_vm2, %v3945_v34  ;;  %v3946_v31 = vpack.c.bf16 %v2947_v36, %v2947_v36 }
 0x27c   :  { %3265 = vst.msk [vmem:[%s7556_s5 + $0xe0] sm:$0xf] %vm3208_vm2, %v3943_v46  ;;  %v3944_v35 = vpack.c.bf16 %v2945_v25, %v2945_v25 }
 0x27d   :  { %3268 = vst.msk [vmem:[%s7556_s5 + $0xec] sm:$0xf] %vm3208_vm2, %v3946_v31 }
 0x27e   :  { %3266 = vst.msk [vmem:[%s7556_s5 + $0xe4] sm:$0xf] %vm3208_vm2, %v3944_v35 }
 0x29f   :  { %v5455_v49 = vpop.f32.mrb[28].mxu0 }
 0x2a0   :  { %v2754_v50 = vadd.f32 %v5455_v49, %v7181_v45  ;;  %v2745_v48 = vpop.f32.mrb[29].mxu0 }
 0x2a1   :  { %v2746_v23 = vadd.f32 %v7181_v45, %v2745_v48  ;;  %v5456_v42 = vpop.f32.mrb[30].mxu0 }
 0x2a2   :  { %v2918_v47 = vmax.f32 %v2754_v50, 0.0  ;;  %v2757_v52 = vadd.f32 %v5456_v42, %v7181_v45  ;;  %v2748_v62 = vpop.f32.mrb[31].mxu0 }
 0x2a3   :  { %v2916_v53 = vmax.f32 %v2746_v23, 0.0  ;;  %v2749_v58 = vadd.f32 %v7181_v45, %v2748_v62 }
 0x2a4   :  { %v3917_v40 = vpack.c.bf16 %v2918_v47, %v2918_v47  ;;  %v2919_v0 = vmax.f32 %v2757_v52, 0.0 }
 0x2a5   :  { %v3915_v16 = vpack.c.bf16 %v2916_v53, %v2916_v53  ;;  %v2917_v27 = vmax.f32 %v2749_v58, 0.0 }
 0x2a6   :  { %3239 = vst.msk [vmem:[%s7556_s5 + $0x78] sm:$0xf] %vm3208_vm2, %v3917_v40  ;;  %v3918_v37 = vpack.c.bf16 %v2919_v0, %v2919_v0 }
 0x2a7   :  { %3237 = vst.msk [vmem:[%s7556_s5 + $0x70] sm:$0xf] %vm3208_vm2, %v3915_v16  ;;  %v3916_v41 = vpack.c.bf16 %v2917_v27, %v2917_v27 }
 0x2a8   :  { %3240 = vst.msk [vmem:[%s7556_s5 + $0x7c] sm:$0xf] %vm3208_vm2, %v3918_v37 }
 0x2a9   :  { %3238 = vst.msk [vmem:[%s7556_s5 + $0x74] sm:$0xf] %vm3208_vm2, %v3916_v41 }
 0x2ad   :  { %v5487_v38 = vpop.f32.mrb[28].mxu1 }
 0x2ae   :  { %v2882_v51 = vadd.f32 %v5487_v38, %v7181_v45  ;;  %v2873_v43 = vpop.f32.mrb[29].mxu1 }
 0x2af   :  { %v2874_v17 = vadd.f32 %v7181_v45, %v2873_v43  ;;  %v5488_v55 = vpop.f32.mrb[30].mxu1 }
 0x2b0   :  { %v2950_v60 = vmax.f32 %v2882_v51, 0.0  ;;  %v2885_v2 = vadd.f32 %v5488_v55, %v7181_v45  ;;  %v2876_v32 = vpop.f32.mrb[31].mxu1 }
 0x2b1   :  { %v2948_v30 = vmax.f32 %v2874_v17, 0.0  ;;  %v2877_v39 = vadd.f32 %v7181_v45, %v2876_v32 }
 0x2b2   :  { %v3949_v59 = vpack.c.bf16 %v2950_v60, %v2950_v60  ;;  %v2951_v61 = vmax.f32 %v2885_v2, 0.0 }
 0x2b3   :  { %v3947_v56 = vpack.c.bf16 %v2948_v30, %v2948_v30  ;;  %v2949_v3 = vmax.f32 %v2877_v39, 0.0 }
 0x2b4   :  { %3271 = vst.msk [vmem:[%s7556_s5 + $0xf8] sm:$0xf] %vm3208_vm2, %v3949_v59  ;;  %v3950_v57 = vpack.c.bf16 %v2951_v61, %v2951_v61 }
 0x2b5   :  { %3269 = vst.msk [vmem:[%s7556_s5 + $0xf0] sm:$0xf] %vm3208_vm2, %v3947_v56  ;;  %v3948_v54 = vpack.c.bf16 %v2949_v3, %v2949_v3 }
 0x2b6   :  { %3272 = vst.msk [vmem:[%s7556_s5 + $0xfc] sm:$0xf] %vm3208_vm2, %v3950_v57 }
 0x2b7   :  { %3270 = vst.msk [vmem:[%s7556_s5 + $0xf4] sm:$0xf] %vm3208_vm2, %v3948_v54 }

// kernel: mobilenet_forward.17
= control target key start
LH: loop header
LB: loop body
LE: loop exit
PB: predicated region body
PF: predicated region fallthrough
CT: control target
= control target key end

     0   :  { %v71_v1 = vlaneseq  ;;  %vm705_vm0 = vcmask 130048   ;;  %vm907_vm1 = vcmask 257024   ;;  %s2046_s3 = inlined_call_operand.vmem [shape: bf16[16,32], index: 3, kind: input, shape index: {}]   ;;  %s2047_s1 = inlined_call_operand.vmem [shape: bf16[9,1,16], index: 1, kind: input, shape index: {}]   ;;  %s2048_s0 = inlined_call_operand.vmem [shape: bf16[9,128,16], index: 0, kind: input, shape index: {}]   ;;  %s2049_s2 = inlined_call_operand.vmem [shape: f32[1,16], index: 2, kind: input, shape index: {}]   ;;  %s2050_s4 = inlined_call_operand.vmem [shape: f32[1,32], index: 4, kind: input, shape index: {}]   ;;  %s2051_s5 = inlined_call_operand.vmem [shape: bf16[128,32], index: 5, kind: output, shape index: {}]  }
   0x1   :  { %v1487_v0 = vld [vmem:[%s2046_s3] sm:$0xff]   ;;  %v1550_v12 = vld [vmem:[%s2047_s1 + $0x8] sm:$0x1] }
   0x2   :  { %v21_v2 = vld [vmem:[%s2047_s1] sm:$0x1]  ;;  %v22_v3 = vld [vmem:[%s2047_s1 + $0x1] sm:$0x1]  ;;  %v23_v4 = vld [vmem:[%s2047_s1 + $0x2] sm:$0x1]  ;;  %1467 = vmatprep.subr.bf16.mxu0 %v1487_v0  ;;  %1485 = vmatprep.subr.bf16.mxu1 %v1487_v0  ;;  %v38_v19 = vunpack.c.l.bf16 %v1550_v12 }
   0x3   :  { %v24_v5 = vld [vmem:[%s2047_s1 + $0x3] sm:$0x1]  ;;  %v25_v6 = vld [vmem:[%s2047_s1 + $0x4] sm:$0x1]  ;;  %v26_v7 = vld [vmem:[%s2047_s1 + $0x5] sm:$0x1]  ;;  %v30_v8 = vunpack.c.l.bf16 %v21_v2  ;;  %v31_v9 = vunpack.c.l.bf16 %v22_v3  ;;  %1468 = vmatpush3.bf16.msra.mxu0 %v1487_v0  ;;  %1486 = vmatpush3.bf16.msra.mxu1 %v1487_v0  ;;  %v32_v13 = vunpack.c.l.bf16 %v23_v4 }
   0x4   :  { %v27_v10 = vld [vmem:[%s2047_s1 + $0x6] sm:$0x1]  ;;  %v1545_v11 = vld [vmem:[%s2047_s1 + $0x7] sm:$0x1]  ;;  %v33_v14 = vunpack.c.l.bf16 %v24_v5  ;;  %v34_v15 = vunpack.c.l.bf16 %v25_v6  ;;  %v35_v16 = vunpack.c.l.bf16 %v26_v7  ;;  %v72_v21 = vshrl.u32 %v71_v1, 7 }
   0x5   :  { %v36_v17 = vunpack.c.l.bf16 %v27_v10  ;;  %v37_v18 = vunpack.c.l.bf16 %v1545_v11  ;;  %v1100_v20 = vld [vmem:[%s2048_s0] sm:$0xff]  }
   0x6   :  { %v1394_v22 = vld [vmem:[%s2048_s0 + $0x40] sm:$0xff]   ;;  %v1101_v24 = vunpack.c.l.bf16 %v1100_v20  ;;  %v1102_v25 = vunpack.c.h.bf16 %v1100_v20  ;;  %v73_v31 = vsub.s32 0, %v72_v21 }
   0x7   :  { %v1402_v23 = vld [vmem:[%s2048_s0 + $0x80] sm:$0xff]   ;;  %v1133_v26 = vunpack.c.l.bf16 %v1394_v22  ;;  %v1134_v27 = vunpack.c.h.bf16 %v1394_v22 }
   0x8   :  { %v1410_v28 = vld [vmem:[%s2048_s0 + $0xc0] sm:$0xff]   ;;  %v1165_v32 = vunpack.c.l.bf16 %v1402_v23  ;;  %v1166_v33 = vunpack.c.h.bf16 %v1402_v23  ;;  %v1575_v40 = vrot.slane %v30_v8, %v73_v31  ;;  %v1577_v41 = vrot.slane %v31_v9, %v73_v31 }
   0x9   :  { %v1418_v29 = vld [vmem:[%s2048_s0 + $0x100] sm:$0xff]   ;;  %v1197_v34 = vunpack.c.l.bf16 %v1410_v28  ;;  %v1198_v36 = vunpack.c.h.bf16 %v1410_v28  ;;  %v1579_v42 = vrot.slane %v32_v13, %v73_v31  ;;  %v1581_v43 = vrot.slane %v33_v14, %v73_v31 }
   0xa   :  { %v1426_v30 = vld [vmem:[%s2048_s0 + $0x140] sm:$0xff]   ;;  %v1229_v37 = vunpack.c.l.bf16 %v1418_v29  ;;  %v1230_v38 = vunpack.c.h.bf16 %v1418_v29  ;;  %v1583_v44 = vrot.slane %v34_v15, %v73_v31  ;;  %v1585_v46 = vrot.slane %v35_v16, %v73_v31 }
   0xb   :  { %v1434_v35 = vld [vmem:[%s2048_s0 + $0x180] sm:$0xff]   ;;  %v1261_v39 = vunpack.c.l.bf16 %v1426_v30  ;;  %v1262_v45 = vunpack.c.h.bf16 %v1426_v30  ;;  %v75_v48 = vmul.f32 %v1101_v24, %v1575_v40  ;;  %v76_v49 = vmul.f32 %v1102_v25, %v1575_v40 }
   0xc   :  { %v1293_v47 = vunpack.c.l.bf16 %v1434_v35  ;;  %v128_v50 = vmul.f32 %v1133_v26, %v1577_v41  ;;  %v129_v51 = vmul.f32 %v1134_v27, %v1577_v41  ;;  %v197_v52 = vmul.f32 %v1165_v32, %v1579_v42  ;;  %v1442_v56 = vld [vmem:[%s2048_s0 + $0x1c0] sm:$0xff]  }
   0xd   :  { %v198_v53 = vmul.f32 %v1166_v33, %v1579_v42  ;;  %v266_v54 = vmul.f32 %v1197_v34, %v1581_v43  ;;  %v267_v55 = vmul.f32 %v1198_v36, %v1581_v43  ;;  %v335_v59 = vmul.f32 %v1229_v37, %v1583_v44  ;;  %v1450_v61 = vld [vmem:[%s2048_s0 + $0x200] sm:$0xff]  }
   0xe   :  { %v144_v57 = vadd.f32 %v128_v50, %v75_v48  ;;  %v145_v58 = vadd.f32 %v129_v51, %v76_v49  ;;  %v336_v60 = vmul.f32 %v1230_v38, %v1583_v44  ;;  %v404_v62 = vmul.f32 %v1261_v39, %v1585_v46  ;;  %v1390_v6 = vld [vmem:[%s2048_s0 + $0x20] sm:$0xff]  }
   0xf   :  { %v405_v63 = vmul.f32 %v1262_v45, %v1585_v46  ;;  %v1294_v0 = vunpack.c.h.bf16 %v1434_v35  ;;  %v1605_v1 = vrot.slane %v36_v17, %v73_v31  ;;  %v1325_v4 = vunpack.c.l.bf16 %v1442_v56  ;;  %v1398_v15 = vld [vmem:[%s2048_s0 + $0x60] sm:$0xff]  }
  0x10   :  { %v213_v2 = vadd.f32 %v197_v52, %v144_v57  ;;  %v214_v3 = vadd.f32 %v198_v53, %v145_v58  ;;  %v1326_v5 = vunpack.c.h.bf16 %v1442_v56  ;;  %v1612_v9 = vrot.slane %v37_v18, %v73_v31  ;;  %v1406_v18 = vld [vmem:[%s2048_s0 + $0xa0] sm:$0xff]  }
  0x11   :  { %v473_v7 = vmul.f32 %v1293_v47, %v1605_v1  ;;  %v474_v8 = vmul.f32 %v1294_v0, %v1605_v1  ;;  %v1357_v10 = vunpack.c.l.bf16 %v1450_v61  ;;  %v1358_v13 = vunpack.c.h.bf16 %v1450_v61  ;;  %v1414_v25 = vld [vmem:[%s2048_s0 + $0xe0] sm:$0xff]  }
  0x12   :  { %v282_v11 = vadd.f32 %v266_v54, %v213_v2  ;;  %v283_v12 = vadd.f32 %v267_v55, %v214_v3  ;;  %v1614_v14 = vrot.slane %v38_v19, %v73_v31  ;;  %v542_v16 = vmul.f32 %v1325_v4, %v1612_v9  ;;  %v1422_v38 = vld [vmem:[%s2048_s0 + $0x120] sm:$0xff]  }
  0x13   :  { %v543_v17 = vmul.f32 %v1326_v5, %v1612_v9  ;;  %v1117_v20 = vunpack.c.l.bf16 %v1390_v6  ;;  %v1118_v21 = vunpack.c.h.bf16 %v1390_v6  ;;  %v1149_v28 = vunpack.c.l.bf16 %v1398_v15  ;;  %v1430_v49 = vld [vmem:[%s2048_s0 + $0x160] sm:$0xff]  }
  0x14   :  { %v351_v22 = vadd.f32 %v335_v59, %v282_v11  ;;  %v352_v23 = vadd.f32 %v336_v60, %v283_v12  ;;  %v611_v24 = vmul.f32 %v1357_v10, %v1614_v14  ;;  %v612_v19 = vmul.f32 %v1358_v13, %v1614_v14  ;;  %v1646_v58 = vld [vmem:[%s2049_s2] ss:$0 sm:$0xff] }
  0x15   :  { %v83_v26 = vmul.f32 %v1117_v20, %v1575_v40  ;;  %v84_v27 = vmul.f32 %v1118_v21, %v1575_v40  ;;  %v1150_v29 = vunpack.c.h.bf16 %v1398_v15  ;;  %v1181_v32 = vunpack.c.l.bf16 %v1406_v18  ;;  %v1446_v5 = vld [vmem:[%s2048_s0 + $0x1e0] sm:$0xff]  }
  0x16   :  { %v420_v30 = vadd.f32 %v404_v62, %v351_v22  ;;  %v421_v31 = vadd.f32 %v405_v63, %v352_v23  ;;  %v1182_v33 = vunpack.c.h.bf16 %v1406_v18  ;;  %v136_v34 = vmul.f32 %v1149_v28, %v1577_v41  ;;  %v1438_v63 = vld [vmem:[%s2048_s0 + $0x1a0] sm:$0xff]   ;;  %v1387_v22 = vld [vmem:[%s2048_s0 + $0x8] sm:$0xff]  }
  0x17   :  { %v137_v35 = vmul.f32 %v1150_v29, %v1577_v41  ;;  %v1213_v36 = vunpack.c.l.bf16 %v1414_v25  ;;  %v1214_v37 = vunpack.c.h.bf16 %v1414_v25  ;;  %v205_v47 = vmul.f32 %v1181_v32, %v1579_v42  ;;  %v1454_v18 = vld [vmem:[%s2048_s0 + $0x220] sm:$0xff]  }
  0x18   :  { %v489_v39 = vadd.f32 %v473_v7, %v420_v30  ;;  %v490_v45 = vadd.f32 %v474_v8, %v421_v31  ;;  %v206_v48 = vmul.f32 %v1182_v33, %v1579_v42  ;;  %v152_v50 = vadd.f32 %v136_v34, %v83_v26  ;;  %v1395_v26 = vld [vmem:[%s2048_s0 + $0x48] sm:$0xff]  }
  0x19   :  { %v153_v51 = vadd.f32 %v137_v35, %v84_v27  ;;  %v274_v52 = vmul.f32 %v1213_v36, %v1581_v43  ;;  %v275_v53 = vmul.f32 %v1214_v37, %v1581_v43  ;;  %v1245_v56 = vunpack.c.l.bf16 %v1422_v38 }
  0x1a   :  { %v558_v54 = vadd.f32 %v542_v16, %v489_v39  ;;  %v559_v55 = vadd.f32 %v543_v17, %v490_v45  ;;  %v1246_v57 = vunpack.c.h.bf16 %v1422_v38  ;;  %v221_v59 = vadd.f32 %v205_v47, %v152_v50  ;;  %v1403_v39 = vld [vmem:[%s2048_s0 + $0x88] sm:$0xff]  }
  0x1b   :  { %v222_v60 = vadd.f32 %v206_v48, %v153_v51  ;;  %v1277_v61 = vunpack.c.l.bf16 %v1430_v49  ;;  %v1278_v62 = vunpack.c.h.bf16 %v1430_v49  ;;  %v343_v3 = vmul.f32 %v1245_v56, %v1583_v44  ;;  %v1411_v45 = vld [vmem:[%s2048_s0 + $0xc8] sm:$0xff]  }
  0x1c   :  { %v627_v0 = vadd.f32 %v611_v24, %v558_v54  ;;  %v628_v2 = vadd.f32 %v612_v19, %v559_v55  ;;  %v344_v4 = vmul.f32 %v1246_v57, %v1583_v44  ;;  %v290_v6 = vadd.f32 %v274_v52, %v221_v59 }
  0x1d   :  { %v291_v7 = vadd.f32 %v275_v53, %v222_v60  ;;  %v412_v8 = vmul.f32 %v1277_v61, %v1585_v46  ;;  %v413_v10 = vmul.f32 %v1278_v62, %v1585_v46  ;;  %v1309_v13 = vunpack.c.l.bf16 %v1438_v63  ;;  %v1419_v60 = vld [vmem:[%s2048_s0 + $0x108] sm:$0xff]  }
  0x1e   :  { %v650_v11 = vadd.f32 %v1646_v58, %v627_v0  ;;  %v651_v12 = vadd.f32 %v1646_v58, %v628_v2  ;;  %v1310_v15 = vunpack.c.h.bf16 %v1438_v63  ;;  %v359_v16 = vadd.f32 %v343_v3, %v290_v6  ;;  %v1427_v2 = vld [vmem:[%s2048_s0 + $0x148] sm:$0xff]  }
  0x1f   :  { %v360_v17 = vadd.f32 %v344_v4, %v291_v7  ;;  %v1341_v20 = vunpack.c.l.bf16 %v1446_v5  ;;  %v1342_v21 = vunpack.c.h.bf16 %v1446_v5  ;;  %v481_v19 = vmul.f32 %v1309_v13, %v1605_v1 }
  0x20   :  { %v666_v23 = vmax.f32 %v650_v11, 0.0  ;;  %v667_v24 = vmax.f32 %v651_v12, 0.0  ;;  %v482_v25 = vmul.f32 %v1310_v15, %v1605_v1  ;;  %v428_v27 = vadd.f32 %v412_v8, %v359_v16 }
  0x21   :  { %v429_v28 = vadd.f32 %v413_v10, %v360_v17  ;;  %v550_v29 = vmul.f32 %v1341_v20, %v1612_v9  ;;  %v551_v30 = vmul.f32 %v1342_v21, %v1612_v9  ;;  %v1373_v32 = vunpack.c.l.bf16 %v1454_v18  ;;  %v1435_v17 = vld [vmem:[%s2048_s0 + $0x188] sm:$0xff]  }
  0x22   :  { %v682_v31 = vpack.c.bf16 %v667_v24, %v666_v23  ;;  %v1374_v33 = vunpack.c.h.bf16 %v1454_v18  ;;  %v1105_v34 = vunpack.c.l.bf16 %v1387_v22  ;;  %v497_v35 = vadd.f32 %v481_v19, %v428_v27  ;;  %v1443_v23 = vld [vmem:[%s2048_s0 + $0x1c8] sm:$0xff]  }
  0x23   :  { %v498_v36 = vadd.f32 %v482_v25, %v429_v28  ;;  %v1106_v37 = vunpack.c.h.bf16 %v1387_v22  ;;  %v1137_v38 = vunpack.c.l.bf16 %v1395_v26  ;;  %v619_v47 = vmul.f32 %v1373_v32, %v1614_v14  ;;  %v1451_v27 = vld [vmem:[%s2048_s0 + $0x208] sm:$0xff]  }
  0x24   :  { %1469 = vmatprep.mubr.msk.bf16.mxu0 %vm705_vm0, %v682_v31  ;;  %v620_v48 = vmul.f32 %v1374_v33, %v1614_v14  ;;  %v77_v49 = vmul.f32 %v1105_v34, %v1575_v40  ;;  %v1138_v50 = vunpack.c.h.bf16 %v1395_v26  ;;  %v566_v51 = vadd.f32 %v550_v29, %v497_v35 }
  0x25   :  { %v567_v52 = vadd.f32 %v551_v30, %v498_v36  ;;  %v78_v53 = vmul.f32 %v1106_v37, %v1575_v40  ;;  %v130_v54 = vmul.f32 %v1137_v38, %v1577_v41  ;;  %v1169_v56 = vunpack.c.l.bf16 %v1403_v39  ;;  %v1391_v36 = vld [vmem:[%s2048_s0 + $0x28] sm:$0xff]  }
  0x26   :  { %v131_v55 = vmul.f32 %v1138_v50, %v1577_v41  ;;  %v1170_v57 = vunpack.c.h.bf16 %v1403_v39  ;;  %v1201_v59 = vunpack.c.l.bf16 %v1411_v45  ;;  %v635_v61 = vadd.f32 %v619_v47, %v566_v51  ;;  %v1399_v47 = vld [vmem:[%s2048_s0 + $0x68] sm:$0xff]  }
  0x27   :  { %v636_v62 = vadd.f32 %v620_v48, %v567_v52  ;;  %v146_v63 = vadd.f32 %v130_v54, %v77_v49  ;;  %v1202_v0 = vunpack.c.h.bf16 %v1411_v45  ;;  %v199_v4 = vmul.f32 %v1169_v56, %v1579_v42  ;;  %v1407_v52 = vld [vmem:[%s2048_s0 + $0xa8] sm:$0xff]  }
  0x28   :  { %v147_v3 = vadd.f32 %v131_v55, %v78_v53  ;;  %v200_v5 = vmul.f32 %v1170_v57, %v1579_v42  ;;  %v268_v6 = vmul.f32 %v1201_v59, %v1581_v43  ;;  %v658_v7 = vadd.f32 %v1646_v58, %v635_v61 }
  0x29   :  { %v659_v8 = vadd.f32 %v1646_v58, %v636_v62  ;;  %v269_v10 = vmul.f32 %v1202_v0, %v1581_v43  ;;  %v1233_v11 = vunpack.c.l.bf16 %v1419_v60  ;;  %v215_v12 = vadd.f32 %v199_v4, %v146_v63  ;;  %v1415_v62 = vld [vmem:[%s2048_s0 + $0xe8] sm:$0xff]  }
  0x2a   :  { %v216_v13 = vadd.f32 %v200_v5, %v147_v3  ;;  %v1234_v15 = vunpack.c.h.bf16 %v1419_v60  ;;  %v1265_v16 = vunpack.c.l.bf16 %v1427_v2  ;;  %v674_v20 = vmax.f32 %v658_v7, 0.0 }
  0x2b   :  { %v675_v21 = vmax.f32 %v659_v8, 0.0  ;;  %v337_v18 = vmul.f32 %v1233_v11, %v1583_v44  ;;  %v1266_v22 = vunpack.c.h.bf16 %v1427_v2  ;;  %v284_v24 = vadd.f32 %v268_v6, %v215_v12  ;;  %v1423_v8 = vld [vmem:[%s2048_s0 + $0x128] sm:$0xff]  }
  0x2c   :  { %v285_v19 = vadd.f32 %v269_v10, %v216_v13  ;;  %v338_v25 = vmul.f32 %v1234_v15, %v1583_v44  ;;  %v406_v26 = vmul.f32 %v1265_v16, %v1585_v46  ;;  %v1297_v30 = vunpack.c.l.bf16 %v1435_v17 }
  0x2d   :  { %v686_v28 = vpack.c.bf16 %v675_v21, %v674_v20  ;;  %v407_v29 = vmul.f32 %v1266_v22, %v1585_v46  ;;  %v1298_v31 = vunpack.c.h.bf16 %v1435_v17  ;;  %v353_v32 = vadd.f32 %v337_v18, %v284_v24  ;;  %v1431_v21 = vld [vmem:[%s2048_s0 + $0x168] sm:$0xff]  }
  0x2e   :  { %v354_v33 = vadd.f32 %v338_v25, %v285_v19  ;;  %v1329_v34 = vunpack.c.l.bf16 %v1443_v23  ;;  %v1330_v35 = vunpack.c.h.bf16 %v1443_v23  ;;  %v475_v37 = vmul.f32 %v1297_v30, %v1605_v1 }
  0x2f   :  { %1477 = vmatprep.mubr.msk.bf16.mxu1 %vm705_vm0, %v686_v28  ;;  %v476_v38 = vmul.f32 %v1298_v31, %v1605_v1  ;;  %v1361_v39 = vunpack.c.l.bf16 %v1451_v27  ;;  %v1362_v45 = vunpack.c.h.bf16 %v1451_v27  ;;  %v422_v48 = vadd.f32 %v406_v26, %v353_v32  ;;  %v1439_v28 = vld [vmem:[%s2048_s0 + $0x1a8] sm:$0xff]  }
  0x30   :  { %v423_v49 = vadd.f32 %v407_v29, %v354_v33  ;;  %v544_v50 = vmul.f32 %v1329_v34, %v1612_v9  ;;  %v545_v51 = vmul.f32 %v1330_v35, %v1612_v9  ;;  %v1121_v55 = vunpack.c.l.bf16 %v1391_v36  ;;  %v1447_v33 = vld [vmem:[%s2048_s0 + $0x1e8] sm:$0xff]  }
  0x31   :  { %v613_v53 = vmul.f32 %v1361_v39, %v1614_v14  ;;  %v614_v54 = vmul.f32 %v1362_v45, %v1614_v14  ;;  %v1122_v56 = vunpack.c.h.bf16 %v1391_v36  ;;  %v491_v57 = vadd.f32 %v475_v37, %v422_v48 }
  0x32   :  { %v492_v59 = vadd.f32 %v476_v38, %v423_v49  ;;  %v1153_v60 = vunpack.c.l.bf16 %v1399_v47  ;;  %v1154_v61 = vunpack.c.h.bf16 %v1399_v47  ;;  %v85_v63 = vmul.f32 %v1121_v55, %v1575_v40  ;;  %v1455_v38 = vld [vmem:[%s2048_s0 + $0x228] sm:$0xff]  }
  0x33   :  { %v86_v0 = vmul.f32 %v1122_v56, %v1575_v40  ;;  %v1185_v2 = vunpack.c.l.bf16 %v1407_v52  ;;  %v1186_v3 = vunpack.c.h.bf16 %v1407_v52  ;;  %v560_v4 = vadd.f32 %v544_v50, %v491_v57 }
  0x34   :  { %v561_v5 = vadd.f32 %v545_v51, %v492_v59  ;;  %v138_v6 = vmul.f32 %v1153_v60, %v1577_v41  ;;  %v139_v7 = vmul.f32 %v1154_v61, %v1577_v41  ;;  %v1217_v12 = vunpack.c.l.bf16 %v1415_v62  ;;  %v1396_v59 = vld [vmem:[%s2048_s0 + $0x50] sm:$0xff]  }
  0x35   :  { %v207_v10 = vmul.f32 %v1185_v2, %v1579_v42  ;;  %v208_v11 = vmul.f32 %v1186_v3, %v1579_v42  ;;  %v1218_v13 = vunpack.c.h.bf16 %v1415_v62  ;;  %v629_v15 = vadd.f32 %v613_v53, %v560_v4  ;;  %v1388_v53 = vld [vmem:[%s2048_s0 + $0x10] sm:$0xff]  }
  0x36   :  { %v630_v16 = vadd.f32 %v614_v54, %v561_v5  ;;  %v154_v17 = vadd.f32 %v138_v6, %v85_v63  ;;  %v155_v20 = vadd.f32 %v139_v7, %v86_v0  ;;  %v276_v18 = vmul.f32 %v1217_v12, %v1581_v43  ;;  %v1404_v0 = vld [vmem:[%s2048_s0 + $0x90] sm:$0xff]  }
  0x37   :  { %v277_v22 = vmul.f32 %v1218_v13, %v1581_v43  ;;  %v1249_v23 = vunpack.c.l.bf16 %v1423_v8  ;;  %v1250_v24 = vunpack.c.h.bf16 %v1423_v8  ;;  %v652_v19 = vadd.f32 %v1646_v58, %v629_v15 }
  0x38   :  { %v653_v25 = vadd.f32 %v1646_v58, %v630_v16  ;;  %v223_v26 = vadd.f32 %v207_v10, %v154_v17  ;;  %v224_v27 = vadd.f32 %v208_v11, %v155_v20  ;;  %v1281_v31 = vunpack.c.l.bf16 %v1431_v21  ;;  %v1412_v11 = vld [vmem:[%s2048_s0 + $0xd0] sm:$0xff]  }
  0x39   :  { %v345_v29 = vmul.f32 %v1249_v23, %v1583_v44  ;;  %v346_v30 = vmul.f32 %v1250_v24, %v1583_v44  ;;  %v1282_v32 = vunpack.c.h.bf16 %v1431_v21  ;;  %v668_v34 = vmax.f32 %v652_v19, 0.0 }
  0x3a   :  { %v669_v35 = vmax.f32 %v653_v25, 0.0  ;;  %v292_v36 = vadd.f32 %v276_v18, %v223_v26  ;;  %v293_v37 = vadd.f32 %v277_v22, %v224_v27  ;;  %v414_v39 = vmul.f32 %v1281_v31, %v1585_v46  ;;  %v1420_v22 = vld [vmem:[%s2048_s0 + $0x110] sm:$0xff]  }
  0x3b   :  { %v415_v45 = vmul.f32 %v1282_v32, %v1585_v46  ;;  %v1313_v47 = vunpack.c.l.bf16 %v1439_v28  ;;  %v1314_v48 = vunpack.c.h.bf16 %v1439_v28  ;;  %v1345_v52 = vunpack.c.l.bf16 %v1447_v33 }
  0x3c   :  { %v683_v49 = vpack.c.bf16 %v669_v35, %v668_v34  ;;  %v361_v50 = vadd.f32 %v345_v29, %v292_v36  ;;  %v362_v51 = vadd.f32 %v346_v30, %v293_v37  ;;  %v1346_v56 = vunpack.c.h.bf16 %v1447_v33  ;;  %v1428_v30 = vld [vmem:[%s2048_s0 + $0x150] sm:$0xff]  }
  0x3d   :  { %v483_v54 = vmul.f32 %v1313_v47, %v1605_v1  ;;  %v484_v55 = vmul.f32 %v1314_v48, %v1605_v1  ;;  %v1377_v57 = vunpack.c.l.bf16 %v1455_v38  ;;  %v552_v62 = vmul.f32 %v1345_v52, %v1612_v9 }
  0x3e   :  { %1470 = vmatmul.mubr.msk.bf16.vlgmr.msra.gmra.mrb[0].mxu0 %vm705_vm0, %v683_v49  ;;  %v430_v60 = vadd.f32 %v414_v39, %v361_v50  ;;  %v431_v61 = vadd.f32 %v415_v45, %v362_v51  ;;  %v1378_v63 = vunpack.c.h.bf16 %v1455_v38  ;;  %v553_v2 = vmul.f32 %v1346_v56, %v1612_v9  ;;  %v1436_v39 = vld [vmem:[%s2048_s0 + $0x190] sm:$0xff]  }
  0x3f   :  { %v621_v3 = vmul.f32 %v1377_v57, %v1614_v14  ;;  %v1109_v4 = vunpack.c.l.bf16 %v1388_v53  ;;  %v1110_v5 = vunpack.c.h.bf16 %v1388_v53  ;;  %v1141_v10 = vunpack.c.l.bf16 %v1396_v59  ;;  %v1444_v50 = vld [vmem:[%s2048_s0 + $0x1d0] sm:$0xff]  }
  0x40   :  { %v499_v6 = vadd.f32 %v483_v54, %v430_v60  ;;  %v500_v7 = vadd.f32 %v484_v55, %v431_v61  ;;  %v622_v8 = vmul.f32 %v1378_v63, %v1614_v14  ;;  %v1142_v15 = vunpack.c.h.bf16 %v1396_v59  ;;  %v1452_v55 = vld [vmem:[%s2048_s0 + $0x210] sm:$0xff]  }
  0x41   :  { %v79_v12 = vmul.f32 %v1109_v4, %v1575_v40  ;;  %v80_v13 = vmul.f32 %v1110_v5, %v1575_v40  ;;  %v1173_v16 = vunpack.c.l.bf16 %v1404_v0  ;;  %v132_v21 = vmul.f32 %v1141_v10, %v1577_v41 }
  0x42   :  { %v568_v17 = vadd.f32 %v552_v62, %v499_v6  ;;  %v569_v20 = vadd.f32 %v553_v2, %v500_v7  ;;  %v1174_v18 = vunpack.c.h.bf16 %v1404_v0  ;;  %v133_v23 = vmul.f32 %v1142_v15, %v1577_v41  ;;  %v1392_v2 = vld [vmem:[%s2048_s0 + $0x30] sm:$0xff]  }
  0x43   :  { %v201_v24 = vmul.f32 %v1173_v16, %v1579_v42  ;;  %v1205_v19 = vunpack.c.l.bf16 %v1412_v11  ;;  %v1206_v25 = vunpack.c.h.bf16 %v1412_v11  ;;  %v148_v28 = vadd.f32 %v132_v21, %v79_v12  ;;  %v1400_v7 = vld [vmem:[%s2048_s0 + $0x70] sm:$0xff]  }
  0x44   :  { %v637_v26 = vadd.f32 %v621_v3, %v568_v17  ;;  %v638_v27 = vadd.f32 %v622_v8, %v569_v20  ;;  %v202_v29 = vmul.f32 %v1174_v18, %v1579_v42  ;;  %v149_v31 = vadd.f32 %v133_v23, %v80_v13  ;;  %v1408_v13 = vld [vmem:[%s2048_s0 + $0xb0] sm:$0xff]  }
  0x45   :  { %v270_v32 = vmul.f32 %v1205_v19, %v1581_v43  ;;  %v271_v33 = vmul.f32 %v1206_v25, %v1581_v43  ;;  %v1237_v34 = vunpack.c.l.bf16 %v1420_v22  ;;  %v217_v37 = vadd.f32 %v201_v24, %v148_v28  ;;  %v1416_v24 = vld [vmem:[%s2048_s0 + $0xf0] sm:$0xff]  }
  0x46   :  { %v660_v35 = vadd.f32 %v1646_v58, %v637_v26  ;;  %v661_v36 = vadd.f32 %v1646_v58, %v638_v27  ;;  %v1238_v38 = vunpack.c.h.bf16 %v1420_v22  ;;  %v218_v45 = vadd.f32 %v202_v29, %v149_v31 }
  0x47   :  { %v339_v47 = vmul.f32 %v1237_v34, %v1583_v44  ;;  %v1269_v48 = vunpack.c.l.bf16 %v1428_v30  ;;  %v1270_v49 = vunpack.c.h.bf16 %v1428_v30  ;;  %v286_v53 = vadd.f32 %v270_v32, %v217_v37  ;;  %v1424_v32 = vld [vmem:[%s2048_s0 + $0x130] sm:$0xff]  }
  0x48   :  { %v676_v51 = vmax.f32 %v660_v35, 0.0  ;;  %v677_v52 = vmax.f32 %v661_v36, 0.0  ;;  %v340_v54 = vmul.f32 %v1238_v38, %v1583_v44  ;;  %v287_v56 = vadd.f32 %v271_v33, %v218_v45 }
  0x49   :  { %v408_v57 = vmul.f32 %v1269_v48, %v1585_v46  ;;  %v409_v59 = vmul.f32 %v1270_v49, %v1585_v46  ;;  %v1301_v60 = vunpack.c.l.bf16 %v1436_v39  ;;  %v355_v62 = vadd.f32 %v339_v47, %v286_v53  ;;  %v1432_v47 = vld [vmem:[%s2048_s0 + $0x170] sm:$0xff]  }
  0x4a   :  { %v687_v61 = vpack.c.bf16 %v677_v52, %v676_v51  ;;  %v1302_v63 = vunpack.c.h.bf16 %v1436_v39  ;;  %v1333_v0 = vunpack.c.l.bf16 %v1444_v50  ;;  %v356_v3 = vadd.f32 %v340_v54, %v287_v56  ;;  %v1440_v56 = vld [vmem:[%s2048_s0 + $0x1b0] sm:$0xff]  }
  0x4b   :  { %v477_v4 = vmul.f32 %v1301_v60, %v1605_v1  ;;  %v1334_v5 = vunpack.c.h.bf16 %v1444_v50  ;;  %v1365_v6 = vunpack.c.l.bf16 %v1452_v55  ;;  %v424_v8 = vadd.f32 %v408_v57, %v355_v62  ;;  %v1448_v62 = vld [vmem:[%s2048_s0 + $0x1f0] sm:$0xff]  }
  0x4c   :  { %1478 = vmatmul.mubr.msk.bf16.vlgmr.msra.gmra.mrb[0].mxu1 %vm705_vm0, %v687_v61  ;;  %v478_v10 = vmul.f32 %v1302_v63, %v1605_v1  ;;  %v546_v11 = vmul.f32 %v1333_v0, %v1612_v9  ;;  %v1366_v12 = vunpack.c.h.bf16 %v1452_v55  ;;  %v425_v15 = vadd.f32 %v409_v59, %v356_v3 }
  0x4d   :  { %v547_v16 = vmul.f32 %v1334_v5, %v1612_v9  ;;  %v615_v17 = vmul.f32 %v1365_v6, %v1614_v14  ;;  %v1125_v20 = vunpack.c.l.bf16 %v1392_v2  ;;  %v493_v21 = vadd.f32 %v477_v4, %v424_v8  ;;  %v1456_v8 = vld [vmem:[%s2048_s0 + $0x230] sm:$0xff]  }
  0x4e   :  { %v616_v18 = vmul.f32 %v1366_v12, %v1614_v14  ;;  %v1126_v22 = vunpack.c.h.bf16 %v1392_v2  ;;  %v1157_v23 = vunpack.c.l.bf16 %v1400_v7  ;;  %v494_v19 = vadd.f32 %v478_v10, %v425_v15  ;;  %v1389_v15 = vld [vmem:[%s2048_s0 + $0x18] sm:$0xff]  }
  0x4f   :  { %v87_v25 = vmul.f32 %v1125_v20, %v1575_v40  ;;  %v1158_v26 = vunpack.c.h.bf16 %v1400_v7  ;;  %v1189_v27 = vunpack.c.l.bf16 %v1408_v13  ;;  %v562_v28 = vadd.f32 %v546_v11, %v493_v21 }
  0x50   :  { %v88_v29 = vmul.f32 %v1126_v22, %v1575_v40  ;;  %v140_v30 = vmul.f32 %v1157_v23, %v1577_v41  ;;  %v1190_v31 = vunpack.c.h.bf16 %v1408_v13  ;;  %v563_v33 = vadd.f32 %v547_v16, %v494_v19 }
  0x51   :  { %v141_v34 = vmul.f32 %v1158_v26, %v1577_v41  ;;  %v209_v35 = vmul.f32 %v1189_v27, %v1579_v42  ;;  %v1221_v36 = vunpack.c.l.bf16 %v1416_v24  ;;  %v631_v37 = vadd.f32 %v615_v17, %v562_v28 }
  0x52   :  { %v156_v38 = vadd.f32 %v140_v30, %v87_v25  ;;  %v210_v39 = vmul.f32 %v1190_v31, %v1579_v42  ;;  %v1222_v45 = vunpack.c.h.bf16 %v1416_v24  ;;  %v632_v48 = vadd.f32 %v616_v18, %v563_v33  ;;  %v1397_v18 = vld [vmem:[%s2048_s0 + $0x58] sm:$0xff]  }
  0x53   :  { %v157_v49 = vadd.f32 %v141_v34, %v88_v29  ;;  %v278_v50 = vmul.f32 %v1221_v36, %v1581_v43  ;;  %v1253_v51 = vunpack.c.l.bf16 %v1424_v32  ;;  %v654_v52 = vadd.f32 %v1646_v58, %v631_v37  ;;  %v1405_v29 = vld [vmem:[%s2048_s0 + $0x98] sm:$0xff]  }
  0x54   :  { %v225_v53 = vadd.f32 %v209_v35, %v156_v38  ;;  %v279_v54 = vmul.f32 %v1222_v45, %v1581_v43  ;;  %v1254_v55 = vunpack.c.h.bf16 %v1424_v32  ;;  %v655_v57 = vadd.f32 %v1646_v58, %v632_v48  ;;  %v1413_v34 = vld [vmem:[%s2048_s0 + $0xd8] sm:$0xff]  }
  0x55   :  { %v226_v59 = vadd.f32 %v210_v39, %v157_v49  ;;  %v347_v60 = vmul.f32 %v1253_v51, %v1583_v44  ;;  %v1285_v61 = vunpack.c.l.bf16 %v1432_v47  ;;  %v670_v63 = vmax.f32 %v654_v52, 0.0 }
  0x56   :  { %v294_v0 = vadd.f32 %v278_v50, %v225_v53  ;;  %v348_v2 = vmul.f32 %v1254_v55, %v1583_v44  ;;  %v1286_v3 = vunpack.c.h.bf16 %v1432_v47  ;;  %v671_v4 = vmax.f32 %v655_v57, 0.0  ;;  %v1421_v53 = vld [vmem:[%s2048_s0 + $0x118] sm:$0xff]  }
  0x57   :  { %v295_v5 = vadd.f32 %v279_v54, %v226_v59  ;;  %v416_v6 = vmul.f32 %v1285_v61, %v1585_v46  ;;  %v1317_v7 = vunpack.c.l.bf16 %v1440_v56  ;;  %v1318_v12 = vunpack.c.h.bf16 %v1440_v56  ;;  %v1429_v59 = vld [vmem:[%s2048_s0 + $0x158] sm:$0xff]  }
  0x58   :  { %v363_v10 = vadd.f32 %v347_v60, %v294_v0  ;;  %v417_v11 = vmul.f32 %v1286_v3, %v1585_v46  ;;  %v1349_v13 = vunpack.c.l.bf16 %v1448_v62  ;;  %v684_v16 = vpack.c.bf16 %v671_v4, %v670_v63 }
  0x59   :  { %v364_v17 = vadd.f32 %v348_v2, %v295_v5  ;;  %v485_v20 = vmul.f32 %v1317_v7, %v1605_v1  ;;  %v1350_v21 = vunpack.c.h.bf16 %v1448_v62  ;;  %v486_v23 = vmul.f32 %v1318_v12, %v1605_v1 }
  0x5a   :  { %v432_v22 = vadd.f32 %v416_v6, %v363_v10  ;;  %v554_v24 = vmul.f32 %v1349_v13, %v1612_v9  ;;  %v1381_v19 = vunpack.c.l.bf16 %v1456_v8  ;;  %1473 = vmatprep.mubr.msk.bf16.mxu0 %vm705_vm0, %v684_v16  ;;  %v1382_v27 = vunpack.c.h.bf16 %v1456_v8  ;;  %v1437_v10 = vld [vmem:[%s2048_s0 + $0x198] sm:$0xff]  }
  0x5b   :  { %v433_v25 = vadd.f32 %v417_v11, %v364_v17  ;;  %v555_v26 = vmul.f32 %v1350_v21, %v1612_v9  ;;  %v1113_v28 = vunpack.c.l.bf16 %v1389_v15  ;;  %v1114_v32 = vunpack.c.h.bf16 %v1389_v15  ;;  %v1445_v16 = vld [vmem:[%s2048_s0 + $0x1d8] sm:$0xff]  }
  0x5c   :  { %v501_v30 = vadd.f32 %v485_v20, %v432_v22  ;;  %v623_v31 = vmul.f32 %v1381_v19, %v1614_v14  ;;  %v1145_v33 = vunpack.c.l.bf16 %v1397_v18  ;;  %v624_v36 = vmul.f32 %v1382_v27, %v1614_v14  ;;  %v1453_v22 = vld [vmem:[%s2048_s0 + $0x218] sm:$0xff]  }
  0x5d   :  { %v502_v35 = vadd.f32 %v486_v23, %v433_v25  ;;  %v81_v37 = vmul.f32 %v1113_v28, %v1575_v40  ;;  %v1146_v38 = vunpack.c.h.bf16 %v1397_v18  ;;  %v82_v45 = vmul.f32 %v1114_v32, %v1575_v40 }
  0x5e   :  { %v570_v39 = vadd.f32 %v554_v24, %v501_v30  ;;  %v134_v47 = vmul.f32 %v1145_v33, %v1577_v41  ;;  %v1177_v48 = vunpack.c.l.bf16 %v1405_v29  ;;  %v1178_v51 = vunpack.c.h.bf16 %v1405_v29  ;;  %v1393_v30 = vld [vmem:[%s2048_s0 + $0x38] sm:$0xff]  }
  0x5f   :  { %v571_v49 = vadd.f32 %v555_v26, %v502_v35  ;;  %v135_v50 = vmul.f32 %v1146_v38, %v1577_v41  ;;  %v1209_v52 = vunpack.c.l.bf16 %v1413_v34  ;;  %v1210_v57 = vunpack.c.h.bf16 %v1413_v34  ;;  %v1401_v35 = vld [vmem:[%s2048_s0 + $0x78] sm:$0xff]  }
  0x60   :  { %v639_v54 = vadd.f32 %v623_v31, %v570_v39  ;;  %v150_v55 = vadd.f32 %v134_v47, %v81_v37  ;;  %v203_v56 = vmul.f32 %v1177_v48, %v1579_v42  ;;  %v204_v62 = vmul.f32 %v1178_v51, %v1579_v42 }
  0x61   :  { %v640_v60 = vadd.f32 %v624_v36, %v571_v49  ;;  %v151_v61 = vadd.f32 %v135_v50, %v82_v45  ;;  %v272_v63 = vmul.f32 %v1209_v52, %v1581_v43  ;;  %v273_v3 = vmul.f32 %v1210_v57, %v1581_v43  ;;  %v1409_v45 = vld [vmem:[%s2048_s0 + $0xb8] sm:$0xff]  }
  0x62   :  { %v662_v0 = vadd.f32 %v1646_v58, %v639_v54  ;;  %v219_v2 = vadd.f32 %v203_v56, %v150_v55  ;;  %v1241_v4 = vunpack.c.l.bf16 %v1421_v53  ;;  %v1242_v7 = vunpack.c.h.bf16 %v1421_v53  ;;  %v1417_v55 = vld [vmem:[%s2048_s0 + $0xf8] sm:$0xff]  }
  0x63   :  { %v663_v5 = vadd.f32 %v1646_v58, %v640_v60  ;;  %v220_v6 = vadd.f32 %v204_v62, %v151_v61  ;;  %v1273_v8 = vunpack.c.l.bf16 %v1429_v59  ;;  %v1274_v15 = vunpack.c.h.bf16 %v1429_v59 }
  0x64   :  { %v678_v11 = vmax.f32 %v662_v0, 0.0  ;;  %v288_v12 = vadd.f32 %v272_v63, %v219_v2  ;;  %v341_v13 = vmul.f32 %v1241_v4, %v1583_v44  ;;  %v342_v21 = vmul.f32 %v1242_v7, %v1583_v44  ;;  %v1425_v2 = vld [vmem:[%s2048_s0 + $0x138] sm:$0xff]  }
  0x65   :  { %v679_v17 = vmax.f32 %v663_v5, 0.0  ;;  %v289_v20 = vadd.f32 %v273_v3, %v220_v6  ;;  %v410_v18 = vmul.f32 %v1273_v8, %v1585_v46  ;;  %v411_v24 = vmul.f32 %v1274_v15, %v1585_v46 }
  0x66   :  { %v357_v23 = vadd.f32 %v341_v13, %v288_v12  ;;  %v1305_v19 = vunpack.c.l.bf16 %v1437_v10  ;;  %v1306_v25 = vunpack.c.h.bf16 %v1437_v10  ;;  %v1337_v28 = vunpack.c.l.bf16 %v1445_v16 }
  0x67   :  { %v688_v26 = vpack.c.bf16 %v679_v17, %v678_v11  ;;  %v358_v27 = vadd.f32 %v342_v21, %v289_v20  ;;  %v1338_v29 = vunpack.c.h.bf16 %v1445_v16  ;;  %v1369_v34 = vunpack.c.l.bf16 %v1453_v22  ;;  %v1433_v11 = vld [vmem:[%s2048_s0 + $0x178] sm:$0xff]  }
  0x68   :  { %v426_v31 = vadd.f32 %v410_v18, %v357_v23  ;;  %v479_v32 = vmul.f32 %v1305_v19, %v1605_v1  ;;  %v480_v33 = vmul.f32 %v1306_v25, %v1605_v1  ;;  %v548_v37 = vmul.f32 %v1337_v28, %v1612_v9  ;;  %v1449_v19 = vld [vmem:[%s2048_s0 + $0x1f8] sm:$0xff]  }
  0x69   :  { %1481 = vmatprep.mubr.msk.bf16.mxu1 %vm705_vm0, %v688_v26  ;;  %v427_v36 = vadd.f32 %v411_v24, %v358_v27  ;;  %v549_v38 = vmul.f32 %v1338_v29, %v1612_v9  ;;  %v1370_v39 = vunpack.c.h.bf16 %v1453_v22  ;;  %v617_v48 = vmul.f32 %v1369_v34, %v1614_v14  ;;  %v1457_v28 = vld [vmem:[%s2048_s0 + $0x238] sm:$0xff]  }
  0x6a   :  { %v495_v47 = vadd.f32 %v479_v32, %v426_v31  ;;  %v1129_v49 = vunpack.c.l.bf16 %v1393_v30  ;;  %v1130_v50 = vunpack.c.h.bf16 %v1393_v30  ;;  %v1161_v53 = vunpack.c.l.bf16 %v1401_v35 }
  0x6b   :  { %v496_v51 = vadd.f32 %v480_v33, %v427_v36  ;;  %v618_v52 = vmul.f32 %v1370_v39, %v1614_v14  ;;  %v1162_v54 = vunpack.c.h.bf16 %v1401_v35  ;;  %v1193_v60 = vunpack.c.l.bf16 %v1409_v45 }
  0x6c   :  { %v564_v56 = vadd.f32 %v548_v37, %v495_v47  ;;  %v89_v57 = vmul.f32 %v1129_v49, %v1575_v40  ;;  %v90_v59 = vmul.f32 %v1130_v50, %v1575_v40  ;;  %v142_v62 = vmul.f32 %v1161_v53, %v1577_v41 }
  0x6d   :  { %v565_v61 = vadd.f32 %v549_v38, %v496_v51  ;;  %v143_v63 = vmul.f32 %v1162_v54, %v1577_v41  ;;  %v1194_v0 = vunpack.c.h.bf16 %v1409_v45  ;;  %v211_v4 = vmul.f32 %v1193_v60, %v1579_v42 }
  0x6e   :  { %v633_v3 = vadd.f32 %v617_v48, %v564_v56  ;;  %v1225_v5 = vunpack.c.l.bf16 %v1417_v55  ;;  %v1226_v6 = vunpack.c.h.bf16 %v1417_v55  ;;  %v158_v8 = vadd.f32 %v142_v62, %v89_v57 }
  0x6f   :  { %v634_v7 = vadd.f32 %v618_v52, %v565_v61  ;;  %v159_v10 = vadd.f32 %v143_v63, %v90_v59  ;;  %v212_v40 = vmul.f32 %v1194_v0, %v1579_v42  ;;  %v1257_v15 = vunpack.c.l.bf16 %v1425_v2  ;;  %v1441_v42 = vld [vmem:[%s2048_s0 + $0x1b8] sm:$0xff]  }
  0x70   :  { %v656_v41 = vadd.f32 %v1646_v58, %v633_v3  ;;  %v280_v12 = vmul.f32 %v1225_v5, %v1581_v43  ;;  %v281_v13 = vmul.f32 %v1226_v6, %v1581_v43  ;;  %v227_v17 = vadd.f32 %v211_v4, %v158_v8 }
  0x71   :  { %v657_v16 = vadd.f32 %v1646_v58, %v634_v7  ;;  %v228_v20 = vadd.f32 %v212_v40, %v159_v10  ;;  %v1258_v21 = vunpack.c.h.bf16 %v1425_v2  ;;  %v349_v22 = vmul.f32 %v1257_v15, %v1583_v44 }
  0x72   :  { %v672_v18 = vmax.f32 %v656_v41, 0.0  ;;  %v1289_v23 = vunpack.c.l.bf16 %v1433_v11  ;;  %v1290_v24 = vunpack.c.h.bf16 %v1433_v11  ;;  %v296_v25 = vadd.f32 %v280_v12, %v227_v17 }
  0x73   :  { %v673_v43 = vmax.f32 %v657_v16, 0.0  ;;  %v297_v26 = vadd.f32 %v281_v13, %v228_v20  ;;  %v350_v27 = vmul.f32 %v1258_v21, %v1583_v44  ;;  %v1321_v31 = vunpack.c.l.bf16 %v1441_v42 }
  0x74   :  { %v418_v29 = vmul.f32 %v1289_v23, %v1585_v46  ;;  %v419_v30 = vmul.f32 %v1290_v24, %v1585_v46  ;;  %v1322_v32 = vunpack.c.h.bf16 %v1441_v42  ;;  %v365_v34 = vadd.f32 %v349_v22, %v296_v25 }
  0x75   :  { %v685_v33 = vpack.c.bf16 %v673_v43, %v672_v18  ;;  %v366_v35 = vadd.f32 %v350_v27, %v297_v26  ;;  %v1353_v36 = vunpack.c.l.bf16 %v1449_v19  ;;  %v487_v37 = vmul.f32 %v1321_v31, %v1605_v1 }
  0x76   :  { %v488_v38 = vmul.f32 %v1322_v32, %v1605_v1  ;;  %v1354_v39 = vunpack.c.h.bf16 %v1449_v19  ;;  %v1385_v44 = vunpack.c.l.bf16 %v1457_v28  ;;  %v434_v45 = vadd.f32 %v418_v29, %v365_v34 }
  0x77   :  { %1474 = vmatmul.mubr.msk.bf16.gmra.mrb[4].mxu0 %vm705_vm0, %v685_v33  ;;  %v435_v47 = vadd.f32 %v419_v30, %v366_v35  ;;  %v556_v48 = vmul.f32 %v1353_v36, %v1612_v9  ;;  %v1386_v49 = vunpack.c.h.bf16 %v1457_v28 }
  0x78   :  { %v557_v46 = vmul.f32 %v1354_v39, %v1612_v9  ;;  %v503_v50 = vadd.f32 %v487_v37, %v434_v45  ;;  %v625_v52 = vmul.f32 %v1385_v44, %v1614_v14  ;;  %v1964_v9 = vld [vmem:[%s2050_s4] ss:$0 sm:$0xff] }
  0x79   :  { %v504_v51 = vadd.f32 %v488_v38, %v435_v47  ;;  %v626_v53 = vmul.f32 %v1386_v49, %v1614_v14 }
  0x7a   :  { %v572_v54 = vadd.f32 %v556_v48, %v503_v50 }
  0x7b   :  { %v573_v55 = vadd.f32 %v557_v46, %v504_v51 }
  0x7c   :  { %v641_v1 = vadd.f32 %v625_v52, %v572_v54 }
  0x7d   :  { %v642_v56 = vadd.f32 %v626_v53, %v573_v55 }
  0x7e   :  { %v664_v57 = vadd.f32 %v1646_v58, %v641_v1 }
  0x7f   :  { %v665_v59 = vadd.f32 %v1646_v58, %v642_v56 }
  0x80   :  { %v680_v60 = vmax.f32 %v664_v57, 0.0 }
  0x81   :  { %v681_v61 = vmax.f32 %v665_v59, 0.0 }
  0x83   :  { %v689_v62 = vpack.c.bf16 %v681_v61, %v680_v60 }
  0x85   :  { %1482 = vmatmul.mubr.msk.bf16.gmra.mrb[4].mxu1 %vm705_vm0, %v689_v62 }
 0x111   :  { %v1471_v63 = vpop.f32.mrb[0].mxu0 }
 0x112   :  { %v773_v14 = vadd.f32 %v1471_v63, %v1964_v9  ;;  %v764_v0 = vpop.f32.mrb[1].mxu0 }
 0x113   :  { %v765_v2 = vadd.f32 %v1964_v9, %v764_v0  ;;  %v1472_v3 = vpop.f32.mrb[2].mxu0 }
 0x114   :  { %v829_v4 = vmax.f32 %v773_v14, 0.0  ;;  %v776_v58 = vadd.f32 %v1472_v3, %v1964_v9  ;;  %v767_v5 = vpop.f32.mrb[3].mxu0 }
 0x115   :  { %v827_v6 = vmax.f32 %v765_v2, 0.0  ;;  %v768_v7 = vadd.f32 %v1964_v9, %v767_v5 }
 0x116   :  { %v1085_v8 = vpack.c.bf16 %v829_v4, %v829_v4  ;;  %v830_v10 = vmax.f32 %v776_v58, 0.0 }
 0x117   :  { %v1083_v40 = vpack.c.bf16 %v827_v6, %v827_v6  ;;  %v828_v11 = vmax.f32 %v768_v7, 0.0 }
 0x118   :  { %910 = vst.msk [vmem:[%s2051_s5 + $0x8] sm:$0xf] %vm907_vm1, %v1085_v8  ;;  %v1086_v41 = vpack.c.bf16 %v830_v10, %v830_v10 }
 0x119   :  { %908 = vst.msk [vmem:[%s2051_s5] sm:$0xf] %vm907_vm1, %v1083_v40  ;;  %v1084_v12 = vpack.c.bf16 %v828_v11, %v828_v11 }
 0x11a   :  { %911 = vst.msk [vmem:[%s2051_s5 + $0xc] sm:$0xf] %vm907_vm1, %v1086_v41 }
 0x11b   :  { %909 = vst.msk [vmem:[%s2051_s5 + $0x4] sm:$0xf] %vm907_vm1, %v1084_v12 }
 0x11f   :  { %v1479_v13 = vpop.f32.mrb[0].mxu1 }
 0x120   :  { %v805_v15 = vadd.f32 %v1479_v13, %v1964_v9  ;;  %v796_v16 = vpop.f32.mrb[1].mxu1 }
 0x121   :  { %v797_v17 = vadd.f32 %v1964_v9, %v796_v16  ;;  %v1480_v20 = vpop.f32.mrb[2].mxu1 }
 0x122   :  { %v837_v21 = vmax.f32 %v805_v15, 0.0  ;;  %v808_v42 = vadd.f32 %v1480_v20, %v1964_v9  ;;  %v799_v18 = vpop.f32.mrb[3].mxu1 }
 0x123   :  { %v835_v22 = vmax.f32 %v797_v17, 0.0  ;;  %v800_v23 = vadd.f32 %v1964_v9, %v799_v18 }
 0x124   :  { %v1093_v24 = vpack.c.bf16 %v837_v21, %v837_v21  ;;  %v838_v19 = vmax.f32 %v808_v42, 0.0 }
 0x125   :  { %v1091_v43 = vpack.c.bf16 %v835_v22, %v835_v22  ;;  %v836_v25 = vmax.f32 %v800_v23, 0.0 }
 0x126   :  { %918 = vst.msk [vmem:[%s2051_s5 + $0x28] sm:$0xf] %vm907_vm1, %v1093_v24  ;;  %v1094_v26 = vpack.c.bf16 %v838_v19, %v838_v19 }
 0x127   :  { %916 = vst.msk [vmem:[%s2051_s5 + $0x20] sm:$0xf] %vm907_vm1, %v1091_v43  ;;  %v1092_v27 = vpack.c.bf16 %v836_v25, %v836_v25 }
 0x128   :  { %919 = vst.msk [vmem:[%s2051_s5 + $0x2c] sm:$0xf] %vm907_vm1, %v1094_v26 }
 0x129   :  { %917 = vst.msk [vmem:[%s2051_s5 + $0x24] sm:$0xf] %vm907_vm1, %v1092_v27 }
 0x14a   :  { %v1475_v28 = vpop.f32.mrb[4].mxu0 }
 0x14b   :  { %v789_v29 = vadd.f32 %v1475_v28, %v1964_v9  ;;  %v780_v30 = vpop.f32.mrb[5].mxu0 }
 0x14c   :  { %v781_v31 = vadd.f32 %v1964_v9, %v780_v30  ;;  %v1476_v32 = vpop.f32.mrb[6].mxu0 }
 0x14d   :  { %v833_v33 = vmax.f32 %v789_v29, 0.0  ;;  %v792_v34 = vadd.f32 %v1476_v32, %v1964_v9  ;;  %v783_v35 = vpop.f32.mrb[7].mxu0 }
 0x14e   :  { %v831_v36 = vmax.f32 %v781_v31, 0.0  ;;  %v784_v37 = vadd.f32 %v1964_v9, %v783_v35 }
 0x14f   :  { %v1089_v38 = vpack.c.bf16 %v833_v33, %v833_v33  ;;  %v834_v39 = vmax.f32 %v792_v34, 0.0 }
 0x150   :  { %v1087_v44 = vpack.c.bf16 %v831_v36, %v831_v36  ;;  %v832_v45 = vmax.f32 %v784_v37, 0.0 }
 0x151   :  { %914 = vst.msk [vmem:[%s2051_s5 + $0x18] sm:$0xf] %vm907_vm1, %v1089_v38  ;;  %v1090_v47 = vpack.c.bf16 %v834_v39, %v834_v39 }
 0x152   :  { %912 = vst.msk [vmem:[%s2051_s5 + $0x10] sm:$0xf] %vm907_vm1, %v1087_v44  ;;  %v1088_v48 = vpack.c.bf16 %v832_v45, %v832_v45 }
 0x153   :  { %915 = vst.msk [vmem:[%s2051_s5 + $0x1c] sm:$0xf] %vm907_vm1, %v1090_v47 }
 0x154   :  { %913 = vst.msk [vmem:[%s2051_s5 + $0x14] sm:$0xf] %vm907_vm1, %v1088_v48 }
 0x158   :  { %v1483_v49 = vpop.f32.mrb[4].mxu1 }
 0x159   :  { %v821_v46 = vadd.f32 %v1483_v49, %v1964_v9  ;;  %v812_v50 = vpop.f32.mrb[5].mxu1 }
 0x15a   :  { %v813_v51 = vadd.f32 %v1964_v9, %v812_v50  ;;  %v1484_v52 = vpop.f32.mrb[6].mxu1 }
 0x15b   :  { %v841_v53 = vmax.f32 %v821_v46, 0.0  ;;  %v824_v54 = vadd.f32 %v1484_v52, %v1964_v9  ;;  %v815_v55 = vpop.f32.mrb[7].mxu1 }
 0x15c   :  { %v839_v1 = vmax.f32 %v813_v51, 0.0  ;;  %v816_v56 = vadd.f32 %v1964_v9, %v815_v55 }
 0x15d   :  { %v1097_v57 = vpack.c.bf16 %v841_v53, %v841_v53  ;;  %v842_v59 = vmax.f32 %v824_v54, 0.0 }
 0x15e   :  { %v1095_v60 = vpack.c.bf16 %v839_v1, %v839_v1  ;;  %v840_v61 = vmax.f32 %v816_v56, 0.0 }
 0x15f   :  { %922 = vst.msk [vmem:[%s2051_s5 + $0x38] sm:$0xf] %vm907_vm1, %v1097_v57  ;;  %v1098_v62 = vpack.c.bf16 %v842_v59, %v842_v59 }
 0x160   :  { %920 = vst.msk [vmem:[%s2051_s5 + $0x30] sm:$0xf] %vm907_vm1, %v1095_v60  ;;  %v1096_v63 = vpack.c.bf16 %v840_v61, %v840_v61 }
 0x161   :  { %923 = vst.msk [vmem:[%s2051_s5 + $0x3c] sm:$0xf] %vm907_vm1, %v1098_v62 }
 0x162   :  { %921 = vst.msk [vmem:[%s2051_s5 + $0x34] sm:$0xf] %vm907_vm1, %v1096_v63 }

// kernel: mobilenet_forward.18
= control target key start
LH: loop header
LB: loop body
LE: loop exit
PB: predicated region body
PF: predicated region fallthrough
CT: control target
= control target key end

     0   :  { %v71_v0 = vlaneseq  ;;  %vm713_vm0 = vcmask 261120   ;;  %vm915_vm1 = vcmask 257024   ;;  %s2077_s3 = inlined_call_operand.vmem [shape: bf16[32,32], index: 3, kind: input, shape index: {}]   ;;  %s2078_s1 = inlined_call_operand.vmem [shape: bf16[9,1,32], index: 1, kind: input, shape index: {}]   ;;  %s2079_s0 = inlined_call_operand.vmem [shape: bf16[9,128,32], index: 0, kind: input, shape index: {}]   ;;  %s2080_s2 = inlined_call_operand.vmem [shape: f32[1,32], index: 2, kind: input, shape index: {}]   ;;  %s2081_s4 = inlined_call_operand.vmem [shape: f32[1,32], index: 4, kind: input, shape index: {}]   ;;  %s2082_s5 = inlined_call_operand.vmem [shape: bf16[128,32], index: 5, kind: output, shape index: {}]  }
   0x1   :  { %v1501_v1 = vld [vmem:[%s2077_s3] sm:$0xff]   ;;  %v1502_v2 = vld [vmem:[%s2077_s3 + $0x8] sm:$0xff]  }
   0x2   :  { %v72_v3 = vshrl.u32 %v71_v0, 7  ;;  %1477 = vmatprep.subr.bf16.mxu0 %v1501_v1  ;;  %1497 = vmatprep.subr.bf16.mxu1 %v1501_v1  ;;  %v21_v4 = vld [vmem:[%s2078_s1] sm:$0x1]  ;;  %v22_v5 = vld [vmem:[%s2078_s1 + $0x1] sm:$0x1] }
   0x3   :  { %v23_v6 = vld [vmem:[%s2078_s1 + $0x2] sm:$0x1]  ;;  %1478 = vmatpush3.bf16.msra.mxu0 %v1501_v1  ;;  %1499 = vmatpush3.bf16.msra.mxu1 %v1501_v1  ;;  %v24_v7 = vld [vmem:[%s2078_s1 + $0x3] sm:$0x1]  ;;  %v25_v8 = vld [vmem:[%s2078_s1 + $0x4] sm:$0x1]  ;;  %v30_v10 = vunpack.c.l.bf16 %v21_v4  ;;  %v31_v11 = vunpack.c.l.bf16 %v22_v5 }
   0x4   :  { %v26_v9 = vld [vmem:[%s2078_s1 + $0x5] sm:$0x1]  ;;  %1479 = vmatprep.subr.bf16.mxu0 %v1502_v2  ;;  %1498 = vmatprep.subr.bf16.mxu1 %v1502_v2  ;;  %v27_v12 = vld [vmem:[%s2078_s1 + $0x6] sm:$0x1]  ;;  %v1563_v13 = vld [vmem:[%s2078_s1 + $0x7] sm:$0x1]  ;;  %v32_v15 = vunpack.c.l.bf16 %v23_v6  ;;  %v33_v16 = vunpack.c.l.bf16 %v24_v7  ;;  %v34_v17 = vunpack.c.l.bf16 %v25_v8 }
   0x5   :  { %v1568_v14 = vld [vmem:[%s2078_s1 + $0x8] sm:$0x1]  ;;  %v35_v18 = vunpack.c.l.bf16 %v26_v9  ;;  %v36_v19 = vunpack.c.l.bf16 %v27_v12  ;;  %v37_v20 = vunpack.c.l.bf16 %v1563_v13  ;;  %v1109_v22 = vld [vmem:[%s2079_s0] sm:$0xff]   ;;  %v1575_v23 = vsub.s32 0, %v72_v3 }
   0x6   :  { %v38_v21 = vunpack.c.l.bf16 %v1568_v14  ;;  %v1403_v24 = vld [vmem:[%s2079_s0 + $0x40] sm:$0xff]   ;;  %v1110_v26 = vunpack.c.l.bf16 %v1109_v22  ;;  %v1111_v27 = vunpack.c.h.bf16 %v1109_v22 }
   0x7   :  { %v1411_v25 = vld [vmem:[%s2079_s0 + $0x80] sm:$0xff]   ;;  %v1142_v28 = vunpack.c.l.bf16 %v1403_v24  ;;  %v1143_v29 = vunpack.c.h.bf16 %v1403_v24  ;;  %1480 = vmatpush3.bf16.msra.mxu0 %v1502_v2  ;;  %1500 = vmatpush3.bf16.msra.mxu1 %v1502_v2  ;;  %v1587_v31 = vrot.slane %v30_v10, %v1575_v23  ;;  %v1590_v32 = vrot.slane %v31_v11, %v1575_v23 }
   0x8   :  { %v1419_v30 = vld [vmem:[%s2079_s0 + $0xc0] sm:$0xff]   ;;  %v1174_v33 = vunpack.c.l.bf16 %v1411_v25  ;;  %v1175_v34 = vunpack.c.h.bf16 %v1411_v25  ;;  %v1593_v35 = vrot.slane %v32_v15, %v1575_v23  ;;  %v1596_v38 = vrot.slane %v33_v16, %v1575_v23 }
   0x9   :  { %v1206_v36 = vunpack.c.l.bf16 %v1419_v30  ;;  %v1207_v37 = vunpack.c.h.bf16 %v1419_v30  ;;  %v1427_v39 = vld [vmem:[%s2079_s0 + $0x100] sm:$0xff]   ;;  %v75_v40 = vmul.f32 %v1110_v26, %v1587_v31  ;;  %v76_v41 = vmul.f32 %v1111_v27, %v1587_v31 }
   0xa   :  { %v128_v42 = vmul.f32 %v1142_v28, %v1590_v32  ;;  %v129_v43 = vmul.f32 %v1143_v29, %v1590_v32  ;;  %v1435_v44 = vld [vmem:[%s2079_s0 + $0x140] sm:$0xff]   ;;  %v197_v45 = vmul.f32 %v1174_v33, %v1593_v35  ;;  %v198_v46 = vmul.f32 %v1175_v34, %v1593_v35 }
   0xb   :  { %v266_v47 = vmul.f32 %v1206_v36, %v1596_v38  ;;  %v267_v48 = vmul.f32 %v1207_v37, %v1596_v38  ;;  %v1443_v49 = vld [vmem:[%s2079_s0 + $0x180] sm:$0xff]   ;;  %v1238_v52 = vunpack.c.l.bf16 %v1427_v39  ;;  %v1239_v53 = vunpack.c.h.bf16 %v1427_v39 }
   0xc   :  { %v144_v50 = vadd.f32 %v128_v42, %v75_v40  ;;  %v145_v51 = vadd.f32 %v129_v43, %v76_v41  ;;  %v1616_v54 = vrot.slane %v34_v17, %v1575_v23  ;;  %v1270_v55 = vunpack.c.l.bf16 %v1435_v44  ;;  %v1451_v58 = vld [vmem:[%s2079_s0 + $0x1c0] sm:$0xff]  }
   0xd   :  { %v1271_v56 = vunpack.c.h.bf16 %v1435_v44  ;;  %v1619_v57 = vrot.slane %v35_v18, %v1575_v23  ;;  %v1302_v61 = vunpack.c.l.bf16 %v1443_v49  ;;  %v1303_v62 = vunpack.c.h.bf16 %v1443_v49  ;;  %v1459_v63 = vld [vmem:[%s2079_s0 + $0x200] sm:$0xff]  }
   0xe   :  { %v213_v59 = vadd.f32 %v197_v45, %v144_v50  ;;  %v214_v60 = vadd.f32 %v198_v46, %v145_v51  ;;  %v335_v0 = vmul.f32 %v1238_v52, %v1616_v54  ;;  %v336_v1 = vmul.f32 %v1239_v53, %v1616_v54  ;;  %v1399_v8 = vld [vmem:[%s2079_s0 + $0x20] sm:$0xff]  }
   0xf   :  { %v404_v2 = vmul.f32 %v1270_v55, %v1619_v57  ;;  %v405_v3 = vmul.f32 %v1271_v56, %v1619_v57  ;;  %v1632_v6 = vrot.slane %v36_v19, %v1575_v23  ;;  %v1334_v7 = vunpack.c.l.bf16 %v1451_v58  ;;  %v1407_v13 = vld [vmem:[%s2079_s0 + $0x60] sm:$0xff]  }
  0x10   :  { %v282_v4 = vadd.f32 %v266_v47, %v213_v59  ;;  %v283_v5 = vadd.f32 %v267_v48, %v214_v60  ;;  %v1335_v9 = vunpack.c.h.bf16 %v1451_v58  ;;  %v1638_v10 = vrot.slane %v37_v20, %v1575_v23  ;;  %v1415_v29 = vld [vmem:[%s2079_s0 + $0xa0] sm:$0xff]  }
  0x11   :  { %v1366_v11 = vunpack.c.l.bf16 %v1459_v63  ;;  %v1367_v12 = vunpack.c.h.bf16 %v1459_v63  ;;  %v473_v17 = vmul.f32 %v1302_v61, %v1632_v6  ;;  %v474_v18 = vmul.f32 %v1303_v62, %v1632_v6  ;;  %v1423_v30 = vld [vmem:[%s2079_s0 + $0xe0] sm:$0xff]  }
  0x12   :  { %v351_v15 = vadd.f32 %v335_v0, %v282_v4  ;;  %v352_v16 = vadd.f32 %v336_v1, %v283_v5  ;;  %v542_v19 = vmul.f32 %v1334_v7, %v1638_v10  ;;  %v543_v22 = vmul.f32 %v1335_v9, %v1638_v10  ;;  %v1431_v44 = vld [vmem:[%s2079_s0 + $0x120] sm:$0xff]  }
  0x13   :  { %v1650_v20 = vrot.slane %v38_v21, %v1575_v23  ;;  %v1126_v24 = vunpack.c.l.bf16 %v1399_v8  ;;  %v1127_v27 = vunpack.c.h.bf16 %v1399_v8  ;;  %v1158_v28 = vunpack.c.l.bf16 %v1407_v13  ;;  %v1439_v49 = vld [vmem:[%s2079_s0 + $0x160] sm:$0xff]  }
  0x14   :  { %v420_v25 = vadd.f32 %v404_v2, %v351_v15  ;;  %v421_v26 = vadd.f32 %v405_v3, %v352_v16  ;;  %v1159_v21 = vunpack.c.h.bf16 %v1407_v13  ;;  %v1190_v41 = vunpack.c.l.bf16 %v1415_v29  ;;  %v1673_v50 = vld [vmem:[%s2080_s2] ss:$0 sm:$0xff] }
  0x15   :  { %v611_v33 = vmul.f32 %v1366_v11, %v1650_v20  ;;  %v612_v34 = vmul.f32 %v1367_v12, %v1650_v20  ;;  %v83_v14 = vmul.f32 %v1126_v24, %v1587_v31  ;;  %v84_v37 = vmul.f32 %v1127_v27, %v1587_v31  ;;  %v1447_v1 = vld [vmem:[%s2079_s0 + $0x1a0] sm:$0xff]  }
  0x16   :  { %v489_v23 = vadd.f32 %v473_v17, %v420_v25  ;;  %v490_v36 = vadd.f32 %v474_v18, %v421_v26  ;;  %v136_v39 = vmul.f32 %v1158_v28, %v1590_v32  ;;  %v137_v40 = vmul.f32 %v1159_v21, %v1590_v32  ;;  %v1455_v7 = vld [vmem:[%s2079_s0 + $0x1e0] sm:$0xff]   ;;  %v1396_v26 = vld [vmem:[%s2079_s0 + $0x8] sm:$0xff]  }
  0x17   :  { %v1191_v42 = vunpack.c.h.bf16 %v1415_v29  ;;  %v1222_v43 = vunpack.c.l.bf16 %v1423_v30  ;;  %v1223_v48 = vunpack.c.h.bf16 %v1423_v30  ;;  %v205_v52 = vmul.f32 %v1190_v41, %v1593_v35  ;;  %v1463_v13 = vld [vmem:[%s2079_s0 + $0x220] sm:$0xff]  }
  0x18   :  { %v558_v45 = vadd.f32 %v542_v19, %v489_v23  ;;  %v559_v46 = vadd.f32 %v543_v22, %v490_v36  ;;  %v152_v47 = vadd.f32 %v136_v39, %v83_v14  ;;  %v153_v51 = vadd.f32 %v137_v40, %v84_v37  ;;  %v1412_v36 = vld [vmem:[%s2079_s0 + $0x88] sm:$0xff]  }
  0x19   :  { %v206_v53 = vmul.f32 %v1191_v42, %v1593_v35  ;;  %v274_v55 = vmul.f32 %v1222_v43, %v1596_v38  ;;  %v275_v59 = vmul.f32 %v1223_v48, %v1596_v38  ;;  %v1254_v60 = vunpack.c.l.bf16 %v1431_v44 }
  0x1a   :  { %v627_v56 = vadd.f32 %v611_v33, %v558_v45  ;;  %v628_v58 = vadd.f32 %v612_v34, %v559_v46  ;;  %v221_v61 = vadd.f32 %v205_v52, %v152_v47  ;;  %v1255_v63 = vunpack.c.h.bf16 %v1431_v44  ;;  %v1404_v33 = vld [vmem:[%s2079_s0 + $0x48] sm:$0xff]  }
  0x1b   :  { %v222_v62 = vadd.f32 %v206_v53, %v153_v51  ;;  %v1286_v0 = vunpack.c.l.bf16 %v1439_v49  ;;  %v343_v4 = vmul.f32 %v1254_v60, %v1616_v54  ;;  %v1287_v5 = vunpack.c.h.bf16 %v1439_v49  ;;  %v1420_v46 = vld [vmem:[%s2079_s0 + $0xc8] sm:$0xff]  }
  0x1c   :  { %v650_v2 = vadd.f32 %v1673_v50, %v627_v56  ;;  %v651_v3 = vadd.f32 %v1673_v50, %v628_v58  ;;  %v290_v8 = vadd.f32 %v274_v55, %v221_v61  ;;  %v344_v11 = vmul.f32 %v1255_v63, %v1616_v54  ;;  %v1428_v58 = vld [vmem:[%s2079_s0 + $0x108] sm:$0xff]  }
  0x1d   :  { %v291_v9 = vadd.f32 %v275_v59, %v222_v62  ;;  %v412_v12 = vmul.f32 %v1286_v0, %v1619_v57  ;;  %v413_v17 = vmul.f32 %v1287_v5, %v1619_v57  ;;  %v1318_v18 = vunpack.c.l.bf16 %v1447_v1 }
  0x1e   :  { %v666_v15 = vmax.f32 %v650_v2, 0.0  ;;  %v667_v16 = vmax.f32 %v651_v3, 0.0  ;;  %v359_v19 = vadd.f32 %v343_v4, %v290_v8  ;;  %v1319_v24 = vunpack.c.h.bf16 %v1447_v1  ;;  %v1436_v3 = vld [vmem:[%s2079_s0 + $0x148] sm:$0xff]  }
  0x1f   :  { %v360_v22 = vadd.f32 %v344_v11, %v291_v9  ;;  %v1350_v25 = vunpack.c.l.bf16 %v1455_v7  ;;  %v481_v28 = vmul.f32 %v1318_v18, %v1632_v6  ;;  %v1351_v29 = vunpack.c.h.bf16 %v1455_v7 }
  0x20   :  { %v682_v27 = vpack.c.bf16 %v667_v16, %v666_v15  ;;  %v1382_v30 = vunpack.c.l.bf16 %v1463_v13  ;;  %v428_v34 = vadd.f32 %v412_v12, %v359_v19  ;;  %v482_v21 = vmul.f32 %v1319_v24, %v1632_v6  ;;  %v1444_v15 = vld [vmem:[%s2079_s0 + $0x188] sm:$0xff]  }
  0x21   :  { %v429_v14 = vadd.f32 %v413_v17, %v360_v22  ;;  %v550_v23 = vmul.f32 %v1350_v25, %v1638_v10  ;;  %v551_v37 = vmul.f32 %v1351_v29, %v1638_v10  ;;  %v1383_v39 = vunpack.c.h.bf16 %v1463_v13 }
  0x22   :  { %1481 = vmatprep.mubr.msk.bf16.mxu0 %vm713_vm0, %v682_v27  ;;  %v619_v40 = vmul.f32 %v1382_v30, %v1650_v20  ;;  %v1114_v41 = vunpack.c.l.bf16 %v1396_v26  ;;  %v497_v42 = vadd.f32 %v481_v28, %v428_v34  ;;  %v1115_v44 = vunpack.c.h.bf16 %v1396_v26  ;;  %v1452_v27 = vld [vmem:[%s2079_s0 + $0x1c8] sm:$0xff]  }
  0x23   :  { %v498_v43 = vadd.f32 %v482_v21, %v429_v14  ;;  %v1146_v45 = vunpack.c.l.bf16 %v1404_v33  ;;  %v620_v47 = vmul.f32 %v1383_v39, %v1650_v20  ;;  %v1147_v49 = vunpack.c.h.bf16 %v1404_v33  ;;  %v1460_v34 = vld [vmem:[%s2079_s0 + $0x208] sm:$0xff]  }
  0x24   :  { %v77_v48 = vmul.f32 %v1114_v41, %v1587_v31  ;;  %v1178_v51 = vunpack.c.l.bf16 %v1412_v36  ;;  %v566_v52 = vadd.f32 %v550_v23, %v497_v42  ;;  %v78_v55 = vmul.f32 %v1115_v44, %v1587_v31 }
  0x25   :  { %v567_v53 = vadd.f32 %v551_v37, %v498_v43  ;;  %v130_v56 = vmul.f32 %v1146_v45, %v1590_v32  ;;  %v131_v59 = vmul.f32 %v1147_v49, %v1590_v32  ;;  %v1179_v60 = vunpack.c.h.bf16 %v1412_v36  ;;  %v1400_v37 = vld [vmem:[%s2079_s0 + $0x28] sm:$0xff]  }
  0x26   :  { %v199_v61 = vmul.f32 %v1178_v51, %v1593_v35  ;;  %v1210_v62 = vunpack.c.l.bf16 %v1420_v46  ;;  %v635_v63 = vadd.f32 %v619_v40, %v566_v52  ;;  %v1211_v2 = vunpack.c.h.bf16 %v1420_v46 }
  0x27   :  { %v636_v0 = vadd.f32 %v620_v47, %v567_v53  ;;  %v146_v1 = vadd.f32 %v130_v56, %v77_v48  ;;  %v147_v4 = vadd.f32 %v131_v59, %v78_v55  ;;  %v200_v5 = vmul.f32 %v1179_v60, %v1593_v35  ;;  %v1408_v47 = vld [vmem:[%s2079_s0 + $0x68] sm:$0xff]  }
  0x28   :  { %v268_v7 = vmul.f32 %v1210_v62, %v1596_v38  ;;  %v1242_v8 = vunpack.c.l.bf16 %v1428_v58  ;;  %v658_v9 = vadd.f32 %v1673_v50, %v635_v63  ;;  %v269_v13 = vmul.f32 %v1211_v2, %v1596_v38  ;;  %v1416_v53 = vld [vmem:[%s2079_s0 + $0xa8] sm:$0xff]  }
  0x29   :  { %v659_v11 = vadd.f32 %v1673_v50, %v636_v0  ;;  %v215_v12 = vadd.f32 %v199_v61, %v146_v1  ;;  %v216_v16 = vadd.f32 %v200_v5, %v147_v4  ;;  %v1243_v17 = vunpack.c.h.bf16 %v1428_v58  ;;  %v1424_v60 = vld [vmem:[%s2079_s0 + $0xe8] sm:$0xff]  }
  0x2a   :  { %v337_v18 = vmul.f32 %v1242_v8, %v1616_v54  ;;  %v1274_v19 = vunpack.c.l.bf16 %v1436_v3  ;;  %v674_v22 = vmax.f32 %v658_v9, 0.0  ;;  %v1275_v26 = vunpack.c.h.bf16 %v1436_v3 }
  0x2b   :  { %v675_v24 = vmax.f32 %v659_v11, 0.0  ;;  %v284_v25 = vadd.f32 %v268_v7, %v215_v12  ;;  %v285_v28 = vadd.f32 %v269_v13, %v216_v16  ;;  %v338_v29 = vmul.f32 %v1243_v17, %v1616_v54  ;;  %v1432_v11 = vld [vmem:[%s2079_s0 + $0x128] sm:$0xff]  }
  0x2c   :  { %v406_v30 = vmul.f32 %v1274_v19, %v1619_v57  ;;  %v1306_v33 = vunpack.c.l.bf16 %v1444_v15  ;;  %v407_v23 = vmul.f32 %v1275_v26, %v1619_v57  ;;  %v1307_v36 = vunpack.c.h.bf16 %v1444_v15  ;;  %v1440_v17 = vld [vmem:[%s2079_s0 + $0x168] sm:$0xff]  }
  0x2d   :  { %v686_v14 = vpack.c.bf16 %v675_v24, %v674_v22  ;;  %v353_v21 = vadd.f32 %v337_v18, %v284_v25  ;;  %v354_v39 = vadd.f32 %v338_v29, %v285_v28  ;;  %v1338_v41 = vunpack.c.l.bf16 %v1452_v27 }
  0x2e   :  { %v475_v40 = vmul.f32 %v1306_v33, %v1632_v6  ;;  %v1339_v42 = vunpack.c.h.bf16 %v1452_v27  ;;  %v476_v44 = vmul.f32 %v1307_v36, %v1632_v6  ;;  %v1370_v45 = vunpack.c.l.bf16 %v1460_v34 }
  0x2f   :  { %1489 = vmatprep.mubr.msk.bf16.mxu1 %vm713_vm0, %v686_v14  ;;  %v422_v43 = vadd.f32 %v406_v30, %v353_v21  ;;  %v1371_v46 = vunpack.c.h.bf16 %v1460_v34  ;;  %v423_v48 = vadd.f32 %v407_v23, %v354_v39  ;;  %v544_v49 = vmul.f32 %v1338_v41, %v1638_v10  ;;  %v1448_v14 = vld [vmem:[%s2079_s0 + $0x1a8] sm:$0xff]  }
  0x30   :  { %v545_v51 = vmul.f32 %v1339_v42, %v1638_v10  ;;  %v1130_v52 = vunpack.c.l.bf16 %v1400_v37  ;;  %v613_v56 = vmul.f32 %v1370_v45, %v1650_v20  ;;  %v1131_v59 = vunpack.c.h.bf16 %v1400_v37  ;;  %v1456_v21 = vld [vmem:[%s2079_s0 + $0x1e8] sm:$0xff]  }
  0x31   :  { %v491_v55 = vadd.f32 %v475_v40, %v422_v43  ;;  %v614_v58 = vmul.f32 %v1371_v46, %v1650_v20  ;;  %v492_v61 = vadd.f32 %v476_v44, %v423_v48  ;;  %v1162_v63 = vunpack.c.l.bf16 %v1408_v47  ;;  %v1464_v44 = vld [vmem:[%s2079_s0 + $0x228] sm:$0xff]  }
  0x32   :  { %v85_v62 = vmul.f32 %v1130_v52, %v1587_v31  ;;  %v1163_v0 = vunpack.c.h.bf16 %v1408_v47  ;;  %v86_v2 = vmul.f32 %v1131_v59, %v1587_v31  ;;  %v1194_v3 = vunpack.c.l.bf16 %v1416_v53 }
  0x33   :  { %v560_v1 = vadd.f32 %v544_v49, %v491_v55  ;;  %v1195_v4 = vunpack.c.h.bf16 %v1416_v53  ;;  %v561_v5 = vadd.f32 %v545_v51, %v492_v61  ;;  %v138_v7 = vmul.f32 %v1162_v63, %v1590_v32  ;;  %v1397_v55 = vld [vmem:[%s2079_s0 + $0x10] sm:$0xff]  }
  0x34   :  { %v139_v8 = vmul.f32 %v1163_v0, %v1590_v32  ;;  %v1226_v9 = vunpack.c.l.bf16 %v1424_v60  ;;  %v207_v13 = vmul.f32 %v1194_v3, %v1593_v35  ;;  %v1227_v16 = vunpack.c.h.bf16 %v1424_v60 }
  0x35   :  { %v629_v12 = vadd.f32 %v613_v56, %v560_v1  ;;  %v208_v15 = vmul.f32 %v1195_v4, %v1593_v35  ;;  %v630_v18 = vadd.f32 %v614_v58, %v561_v5  ;;  %v154_v19 = vadd.f32 %v138_v7, %v85_v62  ;;  %v1405_v56 = vld [vmem:[%s2079_s0 + $0x50] sm:$0xff]  }
  0x36   :  { %v155_v22 = vadd.f32 %v139_v8, %v86_v2  ;;  %v276_v24 = vmul.f32 %v1226_v9, %v1596_v38  ;;  %v277_v26 = vmul.f32 %v1227_v16, %v1596_v38  ;;  %v1258_v27 = vunpack.c.l.bf16 %v1432_v11  ;;  %v1413_v2 = vld [vmem:[%s2079_s0 + $0x90] sm:$0xff]  }
  0x37   :  { %v652_v25 = vadd.f32 %v1673_v50, %v629_v12  ;;  %v1259_v28 = vunpack.c.h.bf16 %v1432_v11  ;;  %v653_v29 = vadd.f32 %v1673_v50, %v630_v18  ;;  %v223_v30 = vadd.f32 %v207_v13, %v154_v19  ;;  %v1421_v13 = vld [vmem:[%s2079_s0 + $0xd0] sm:$0xff]  }
  0x38   :  { %v224_v33 = vadd.f32 %v208_v15, %v155_v22  ;;  %v1290_v34 = vunpack.c.l.bf16 %v1440_v17  ;;  %v345_v36 = vmul.f32 %v1258_v27, %v1616_v54  ;;  %v1291_v39 = vunpack.c.h.bf16 %v1440_v17 }
  0x39   :  { %v668_v23 = vmax.f32 %v652_v25, 0.0  ;;  %v346_v37 = vmul.f32 %v1259_v28, %v1616_v54  ;;  %v669_v40 = vmax.f32 %v653_v29, 0.0  ;;  %v292_v41 = vadd.f32 %v276_v24, %v223_v30 }
  0x3a   :  { %v293_v42 = vadd.f32 %v277_v26, %v224_v33  ;;  %v414_v43 = vmul.f32 %v1290_v34, %v1619_v57  ;;  %v415_v45 = vmul.f32 %v1291_v39, %v1619_v57  ;;  %v1322_v46 = vunpack.c.l.bf16 %v1448_v14  ;;  %v1429_v26 = vld [vmem:[%s2079_s0 + $0x110] sm:$0xff]  }
  0x3b   :  { %v1323_v47 = vunpack.c.h.bf16 %v1448_v14  ;;  %v1354_v48 = vunpack.c.l.bf16 %v1456_v21  ;;  %v683_v49 = vpack.c.bf16 %v669_v40, %v668_v23  ;;  %v361_v51 = vadd.f32 %v345_v36, %v292_v41  ;;  %v1437_v23 = vld [vmem:[%s2079_s0 + $0x150] sm:$0xff]  }
  0x3c   :  { %v362_v52 = vadd.f32 %v346_v37, %v293_v42  ;;  %v1355_v53 = vunpack.c.h.bf16 %v1456_v21  ;;  %v483_v58 = vmul.f32 %v1322_v46, %v1632_v6  ;;  %v1386_v61 = vunpack.c.l.bf16 %v1464_v44 }
  0x3d   :  { %v484_v59 = vmul.f32 %v1323_v47, %v1632_v6  ;;  %v552_v60 = vmul.f32 %v1354_v48, %v1638_v10  ;;  %1482 = vmatmul.mubr.msk.bf16.vlgmr.msra.gmra.mrb[0].mxu0 %vm713_vm0, %v683_v49  ;;  %v430_v62 = vadd.f32 %v414_v43, %v361_v51  ;;  %v1387_v1 = vunpack.c.h.bf16 %v1464_v44  ;;  %v1453_v51 = vld [vmem:[%s2079_s0 + $0x1d0] sm:$0xff]  }
  0x3e   :  { %v431_v63 = vadd.f32 %v415_v45, %v362_v52  ;;  %v553_v0 = vmul.f32 %v1355_v53, %v1638_v10  ;;  %v621_v3 = vmul.f32 %v1386_v61, %v1650_v20  ;;  %v1118_v4 = vunpack.c.l.bf16 %v1397_v55  ;;  %v1445_v45 = vld [vmem:[%s2079_s0 + $0x190] sm:$0xff]  }
  0x3f   :  { %v1119_v5 = vunpack.c.h.bf16 %v1397_v55  ;;  %v1150_v7 = vunpack.c.l.bf16 %v1405_v56  ;;  %v499_v8 = vadd.f32 %v483_v58, %v430_v62  ;;  %v622_v11 = vmul.f32 %v1387_v1, %v1650_v20  ;;  %v1461_v58 = vld [vmem:[%s2079_s0 + $0x210] sm:$0xff]  }
  0x40   :  { %v500_v9 = vadd.f32 %v484_v59, %v431_v63  ;;  %v1151_v12 = vunpack.c.h.bf16 %v1405_v56  ;;  %v79_v15 = vmul.f32 %v1118_v4, %v1587_v31  ;;  %v1182_v18 = vunpack.c.l.bf16 %v1413_v2 }
  0x41   :  { %v80_v16 = vmul.f32 %v1119_v5, %v1587_v31  ;;  %v132_v17 = vmul.f32 %v1150_v7, %v1590_v32  ;;  %v568_v19 = vadd.f32 %v552_v60, %v499_v8  ;;  %v1183_v25 = vunpack.c.h.bf16 %v1413_v2 }
  0x42   :  { %v569_v22 = vadd.f32 %v553_v0, %v500_v9  ;;  %v133_v24 = vmul.f32 %v1151_v12, %v1590_v32  ;;  %v201_v28 = vmul.f32 %v1182_v18, %v1593_v35  ;;  %v1214_v29 = vunpack.c.l.bf16 %v1421_v13  ;;  %v1409_v9 = vld [vmem:[%s2079_s0 + $0x70] sm:$0xff]  }
  0x43   :  { %v148_v27 = vadd.f32 %v132_v17, %v79_v15  ;;  %v1215_v30 = vunpack.c.h.bf16 %v1421_v13  ;;  %v637_v33 = vadd.f32 %v621_v3, %v568_v19  ;;  %v202_v21 = vmul.f32 %v1183_v25, %v1593_v35  ;;  %v1401_v3 = vld [vmem:[%s2079_s0 + $0x30] sm:$0xff]  }
  0x44   :  { %v638_v34 = vadd.f32 %v622_v11, %v569_v22  ;;  %v149_v14 = vadd.f32 %v133_v24, %v80_v16  ;;  %v270_v37 = vmul.f32 %v1214_v29, %v1596_v38  ;;  %v1246_v40 = vunpack.c.l.bf16 %v1429_v26  ;;  %v1417_v16 = vld [vmem:[%s2079_s0 + $0xb0] sm:$0xff]  }
  0x45   :  { %v217_v36 = vadd.f32 %v201_v28, %v148_v27  ;;  %v271_v39 = vmul.f32 %v1215_v30, %v1596_v38  ;;  %v660_v41 = vadd.f32 %v1673_v50, %v637_v33  ;;  %v1247_v44 = vunpack.c.h.bf16 %v1429_v26  ;;  %v1425_v28 = vld [vmem:[%s2079_s0 + $0xf0] sm:$0xff]  }
  0x46   :  { %v661_v42 = vadd.f32 %v1673_v50, %v638_v34  ;;  %v218_v43 = vadd.f32 %v202_v21, %v149_v14  ;;  %v339_v47 = vmul.f32 %v1246_v40, %v1616_v54  ;;  %v1278_v48 = vunpack.c.l.bf16 %v1437_v23 }
  0x47   :  { %v286_v46 = vadd.f32 %v270_v37, %v217_v36  ;;  %v1279_v49 = vunpack.c.h.bf16 %v1437_v23  ;;  %v676_v52 = vmax.f32 %v660_v41, 0.0  ;;  %v340_v56 = vmul.f32 %v1247_v44, %v1616_v54  ;;  %v1433_v37 = vld [vmem:[%s2079_s0 + $0x130] sm:$0xff]  }
  0x48   :  { %v677_v53 = vmax.f32 %v661_v42, 0.0  ;;  %v287_v55 = vadd.f32 %v271_v39, %v218_v43  ;;  %v408_v60 = vmul.f32 %v1278_v48, %v1619_v57  ;;  %v1310_v62 = vunpack.c.l.bf16 %v1445_v45 }
  0x49   :  { %v355_v59 = vadd.f32 %v339_v47, %v286_v46  ;;  %v409_v61 = vmul.f32 %v1279_v49, %v1619_v57  ;;  %v1311_v1 = vunpack.c.h.bf16 %v1445_v45  ;;  %v1342_v2 = vunpack.c.l.bf16 %v1453_v51  ;;  %v1441_v47 = vld [vmem:[%s2079_s0 + $0x170] sm:$0xff]  }
  0x4a   :  { %v687_v63 = vpack.c.bf16 %v677_v53, %v676_v52  ;;  %v356_v0 = vadd.f32 %v340_v56, %v287_v55  ;;  %v477_v5 = vmul.f32 %v1310_v62, %v1632_v6  ;;  %v1343_v7 = vunpack.c.h.bf16 %v1453_v51 }
  0x4b   :  { %v424_v4 = vadd.f32 %v408_v60, %v355_v59  ;;  %v1374_v8 = vunpack.c.l.bf16 %v1461_v58  ;;  %v478_v12 = vmul.f32 %v1311_v1, %v1632_v6  ;;  %v546_v13 = vmul.f32 %v1342_v2, %v1638_v10  ;;  %v1449_v59 = vld [vmem:[%s2079_s0 + $0x1b0] sm:$0xff]  }
  0x4c   :  { %1490 = vmatmul.mubr.msk.bf16.vlgmr.msra.gmra.mrb[0].mxu1 %vm713_vm0, %v687_v63  ;;  %v425_v11 = vadd.f32 %v409_v61, %v356_v0  ;;  %v1375_v15 = vunpack.c.h.bf16 %v1461_v58  ;;  %v547_v18 = vmul.f32 %v1343_v7, %v1638_v10  ;;  %v1134_v22 = vunpack.c.l.bf16 %v1401_v3  ;;  %v1457_v0 = vld [vmem:[%s2079_s0 + $0x1f0] sm:$0xff]  }
  0x4d   :  { %v493_v17 = vadd.f32 %v477_v5, %v424_v4  ;;  %v615_v19 = vmul.f32 %v1374_v8, %v1650_v20  ;;  %v1135_v26 = vunpack.c.h.bf16 %v1401_v3  ;;  %v1166_v27 = vunpack.c.l.bf16 %v1409_v9 }
  0x4e   :  { %v494_v24 = vadd.f32 %v478_v12, %v425_v11  ;;  %v616_v25 = vmul.f32 %v1375_v15, %v1650_v20  ;;  %v87_v30 = vmul.f32 %v1134_v22, %v1587_v31  ;;  %v1167_v33 = vunpack.c.h.bf16 %v1409_v9  ;;  %v1465_v11 = vld [vmem:[%s2079_s0 + $0x230] sm:$0xff]  }
  0x4f   :  { %v562_v29 = vadd.f32 %v546_v13, %v493_v17  ;;  %v1198_v34 = vunpack.c.l.bf16 %v1417_v16  ;;  %v88_v21 = vmul.f32 %v1135_v26, %v1587_v31  ;;  %v140_v23 = vmul.f32 %v1166_v27, %v1590_v32  ;;  %v1398_v17 = vld [vmem:[%s2079_s0 + $0x18] sm:$0xff]  }
  0x50   :  { %v563_v14 = vadd.f32 %v547_v18, %v494_v24  ;;  %v1199_v36 = vunpack.c.h.bf16 %v1417_v16  ;;  %v141_v40 = vmul.f32 %v1167_v33, %v1590_v32  ;;  %v1230_v42 = vunpack.c.l.bf16 %v1425_v28 }
  0x51   :  { %v631_v39 = vadd.f32 %v615_v19, %v562_v29  ;;  %v209_v41 = vmul.f32 %v1198_v34, %v1593_v35  ;;  %v156_v44 = vadd.f32 %v140_v23, %v87_v30  ;;  %v1231_v46 = vunpack.c.h.bf16 %v1425_v28 }
  0x52   :  { %v632_v43 = vadd.f32 %v616_v25, %v563_v14  ;;  %v210_v45 = vmul.f32 %v1199_v36, %v1593_v35  ;;  %v157_v49 = vadd.f32 %v141_v40, %v88_v21  ;;  %v278_v51 = vmul.f32 %v1230_v42, %v1596_v38  ;;  %v1406_v25 = vld [vmem:[%s2079_s0 + $0x58] sm:$0xff]  }
  0x53   :  { %v654_v48 = vadd.f32 %v1673_v50, %v631_v39  ;;  %v1262_v52 = vunpack.c.l.bf16 %v1433_v37  ;;  %v225_v55 = vadd.f32 %v209_v41, %v156_v44  ;;  %v279_v56 = vmul.f32 %v1231_v46, %v1596_v38  ;;  %v1414_v21 = vld [vmem:[%s2079_s0 + $0x98] sm:$0xff]  }
  0x54   :  { %v655_v53 = vadd.f32 %v1673_v50, %v632_v43  ;;  %v1263_v58 = vunpack.c.h.bf16 %v1433_v37  ;;  %v226_v61 = vadd.f32 %v210_v45, %v157_v49  ;;  %v1294_v63 = vunpack.c.l.bf16 %v1441_v47  ;;  %v1422_v40 = vld [vmem:[%s2079_s0 + $0xd8] sm:$0xff]  }
  0x55   :  { %v670_v60 = vmax.f32 %v654_v48, 0.0  ;;  %v347_v62 = vmul.f32 %v1262_v52, %v1616_v54  ;;  %v294_v2 = vadd.f32 %v278_v51, %v225_v55  ;;  %v1295_v4 = vunpack.c.h.bf16 %v1441_v47  ;;  %v1430_v55 = vld [vmem:[%s2079_s0 + $0x118] sm:$0xff]  }
  0x56   :  { %v671_v1 = vmax.f32 %v655_v53, 0.0  ;;  %v348_v3 = vmul.f32 %v1263_v58, %v1616_v54  ;;  %v295_v5 = vadd.f32 %v279_v56, %v226_v61  ;;  %v416_v7 = vmul.f32 %v1294_v63, %v1619_v57  ;;  %v1438_v61 = vld [vmem:[%s2079_s0 + $0x158] sm:$0xff]  }
  0x57   :  { %v1326_v8 = vunpack.c.l.bf16 %v1449_v59  ;;  %v1327_v9 = vunpack.c.h.bf16 %v1449_v59  ;;  %v363_v13 = vadd.f32 %v347_v62, %v294_v2  ;;  %v417_v15 = vmul.f32 %v1295_v4, %v1619_v57 }
  0x58   :  { %v684_v12 = vpack.c.bf16 %v671_v1, %v670_v60  ;;  %v1358_v16 = vunpack.c.l.bf16 %v1457_v0  ;;  %v364_v18 = vadd.f32 %v348_v3, %v295_v5  ;;  %v1359_v24 = vunpack.c.h.bf16 %v1457_v0 }
  0x59   :  { %v485_v19 = vmul.f32 %v1326_v8, %v1632_v6  ;;  %v486_v22 = vmul.f32 %v1327_v9, %v1632_v6  ;;  %v432_v26 = vadd.f32 %v416_v7, %v363_v13  ;;  %v1390_v28 = vunpack.c.l.bf16 %v1465_v11  ;;  %v1454_v13 = vld [vmem:[%s2079_s0 + $0x1d8] sm:$0xff]  }
  0x5a   :  { %1485 = vmatprep.mubr.msk.bf16.mxu0 %vm713_vm0, %v684_v12  ;;  %v554_v27 = vmul.f32 %v1358_v16, %v1638_v10  ;;  %v1391_v29 = vunpack.c.h.bf16 %v1465_v11  ;;  %v433_v30 = vadd.f32 %v417_v15, %v364_v18  ;;  %v555_v33 = vmul.f32 %v1359_v24, %v1638_v10  ;;  %v1446_v12 = vld [vmem:[%s2079_s0 + $0x198] sm:$0xff]  }
  0x5b   :  { %v1122_v34 = vunpack.c.l.bf16 %v1398_v17  ;;  %v1123_v14 = vunpack.c.h.bf16 %v1398_v17  ;;  %v501_v23 = vadd.f32 %v485_v19, %v432_v26  ;;  %v623_v36 = vmul.f32 %v1390_v28, %v1650_v20  ;;  %v1462_v19 = vld [vmem:[%s2079_s0 + $0x218] sm:$0xff]  }
  0x5c   :  { %v624_v37 = vmul.f32 %v1391_v29, %v1650_v20  ;;  %v1154_v39 = vunpack.c.l.bf16 %v1406_v25  ;;  %v502_v41 = vadd.f32 %v486_v22, %v433_v30  ;;  %v1155_v44 = vunpack.c.h.bf16 %v1406_v25 }
  0x5d   :  { %v81_v42 = vmul.f32 %v1122_v34, %v1587_v31  ;;  %v82_v43 = vmul.f32 %v1123_v14, %v1587_v31  ;;  %v570_v45 = vadd.f32 %v554_v27, %v501_v23  ;;  %v1186_v47 = vunpack.c.l.bf16 %v1414_v21  ;;  %v1402_v23 = vld [vmem:[%s2079_s0 + $0x38] sm:$0xff]  }
  0x5e   :  { %v134_v46 = vmul.f32 %v1154_v39, %v1590_v32  ;;  %v1187_v48 = vunpack.c.h.bf16 %v1414_v21  ;;  %v571_v49 = vadd.f32 %v555_v33, %v502_v41  ;;  %v135_v51 = vmul.f32 %v1155_v44, %v1590_v32 }
  0x5f   :  { %v1218_v52 = vunpack.c.l.bf16 %v1422_v40  ;;  %v1219_v53 = vunpack.c.h.bf16 %v1422_v40  ;;  %v639_v56 = vadd.f32 %v623_v36, %v570_v45  ;;  %v203_v59 = vmul.f32 %v1186_v47, %v1593_v35  ;;  %v1410_v36 = vld [vmem:[%s2079_s0 + $0x78] sm:$0xff]  }
  0x60   :  { %v150_v58 = vadd.f32 %v134_v46, %v81_v42  ;;  %v204_v60 = vmul.f32 %v1187_v48, %v1593_v35  ;;  %v640_v62 = vadd.f32 %v624_v37, %v571_v49  ;;  %v151_v63 = vadd.f32 %v135_v51, %v82_v43  ;;  %v1418_v42 = vld [vmem:[%s2079_s0 + $0xb8] sm:$0xff]  }
  0x61   :  { %v272_v0 = vmul.f32 %v1218_v52, %v1596_v38  ;;  %v273_v1 = vmul.f32 %v1219_v53, %v1596_v38  ;;  %v662_v2 = vadd.f32 %v1673_v50, %v639_v56  ;;  %v1250_v4 = vunpack.c.l.bf16 %v1430_v55 }
  0x62   :  { %v219_v3 = vadd.f32 %v203_v59, %v150_v58  ;;  %v1251_v5 = vunpack.c.h.bf16 %v1430_v55  ;;  %v663_v7 = vadd.f32 %v1673_v50, %v640_v62  ;;  %v220_v8 = vadd.f32 %v204_v60, %v151_v63  ;;  %v1426_v58 = vld [vmem:[%s2079_s0 + $0xf8] sm:$0xff]  }
  0x63   :  { %v1282_v9 = vunpack.c.l.bf16 %v1438_v61  ;;  %v1283_v11 = vunpack.c.h.bf16 %v1438_v61  ;;  %v678_v15 = vmax.f32 %v662_v2, 0.0  ;;  %v341_v17 = vmul.f32 %v1250_v4, %v1616_v54  ;;  %v1434_v63 = vld [vmem:[%s2079_s0 + $0x138] sm:$0xff]  }
  0x64   :  { %v288_v16 = vadd.f32 %v272_v0, %v219_v3  ;;  %v342_v18 = vmul.f32 %v1251_v5, %v1616_v54  ;;  %v679_v22 = vmax.f32 %v663_v7, 0.0  ;;  %v289_v24 = vadd.f32 %v273_v1, %v220_v8 }
  0x65   :  { %v410_v25 = vmul.f32 %v1282_v9, %v1619_v57  ;;  %v411_v26 = vmul.f32 %v1283_v11, %v1619_v57  ;;  %v1314_v28 = vunpack.c.l.bf16 %v1446_v12  ;;  %v1315_v29 = vunpack.c.h.bf16 %v1446_v12 }
  0x66   :  { %v357_v27 = vadd.f32 %v341_v17, %v288_v16  ;;  %v1346_v30 = vunpack.c.l.bf16 %v1454_v13  ;;  %v688_v33 = vpack.c.bf16 %v679_v22, %v678_v15  ;;  %v358_v34 = vadd.f32 %v342_v18, %v289_v24  ;;  %v1450_v18 = vld [vmem:[%s2079_s0 + $0x1b8] sm:$0xff]  }
  0x67   :  { %v1347_v14 = vunpack.c.h.bf16 %v1454_v13  ;;  %v1378_v21 = vunpack.c.l.bf16 %v1462_v19  ;;  %v479_v39 = vmul.f32 %v1314_v28, %v1632_v6  ;;  %v480_v40 = vmul.f32 %v1315_v29, %v1632_v6  ;;  %v1442_v13 = vld [vmem:[%s2079_s0 + $0x178] sm:$0xff]  }
  0x68   :  { %v426_v37 = vadd.f32 %v410_v25, %v357_v27  ;;  %v548_v41 = vmul.f32 %v1346_v30, %v1638_v10  ;;  %1493 = vmatprep.mubr.msk.bf16.mxu1 %vm713_vm0, %v688_v33  ;;  %v427_v43 = vadd.f32 %v411_v26, %v358_v34  ;;  %v1379_v45 = vunpack.c.h.bf16 %v1462_v19  ;;  %v1458_v29 = vld [vmem:[%s2079_s0 + $0x1f8] sm:$0xff]  }
  0x69   :  { %v549_v44 = vmul.f32 %v1347_v14, %v1638_v10  ;;  %v617_v46 = vmul.f32 %v1378_v21, %v1650_v20  ;;  %v1138_v48 = vunpack.c.l.bf16 %v1402_v23  ;;  %v1139_v49 = vunpack.c.h.bf16 %v1402_v23  ;;  %v1466_v14 = vld [vmem:[%s2079_s0 + $0x238] sm:$0xff]  }
  0x6a   :  { %v495_v47 = vadd.f32 %v479_v39, %v426_v37  ;;  %v1170_v51 = vunpack.c.l.bf16 %v1410_v36  ;;  %v496_v52 = vadd.f32 %v480_v40, %v427_v43  ;;  %v618_v53 = vmul.f32 %v1379_v45, %v1650_v20 }
  0x6b   :  { %v1171_v55 = vunpack.c.h.bf16 %v1410_v36  ;;  %v1202_v56 = vunpack.c.l.bf16 %v1418_v42  ;;  %v89_v60 = vmul.f32 %v1138_v48, %v1587_v31  ;;  %v90_v61 = vmul.f32 %v1139_v49, %v1587_v31 }
  0x6c   :  { %v564_v59 = vadd.f32 %v548_v41, %v495_v47  ;;  %v142_v62 = vmul.f32 %v1170_v51, %v1590_v32  ;;  %v565_v0 = vadd.f32 %v549_v44, %v496_v52  ;;  %v1203_v2 = vunpack.c.h.bf16 %v1418_v42 }
  0x6d   :  { %v143_v1 = vmul.f32 %v1171_v55, %v1590_v32  ;;  %v211_v3 = vmul.f32 %v1202_v56, %v1593_v35  ;;  %v1234_v7 = vunpack.c.l.bf16 %v1426_v58  ;;  %v1235_v8 = vunpack.c.h.bf16 %v1426_v58 }
  0x6e   :  { %v633_v4 = vadd.f32 %v617_v46, %v564_v59  ;;  %v158_v5 = vadd.f32 %v142_v62, %v89_v60  ;;  %v634_v9 = vadd.f32 %v618_v53, %v565_v0  ;;  %v212_v31 = vmul.f32 %v1203_v2, %v1593_v35 }
  0x6f   :  { %v159_v11 = vadd.f32 %v143_v1, %v90_v61  ;;  %v1266_v12 = vunpack.c.l.bf16 %v1434_v63  ;;  %v280_v32 = vmul.f32 %v1234_v7, %v1596_v38  ;;  %v281_v17 = vmul.f32 %v1235_v8, %v1596_v38 }
  0x70   :  { %v656_v15 = vadd.f32 %v1673_v50, %v633_v4  ;;  %v227_v16 = vadd.f32 %v211_v3, %v158_v5  ;;  %v657_v19 = vadd.f32 %v1673_v50, %v634_v9  ;;  %v1267_v35 = vunpack.c.h.bf16 %v1434_v63 }
  0x71   :  { %v228_v22 = vadd.f32 %v212_v31, %v159_v11  ;;  %v349_v24 = vmul.f32 %v1266_v12, %v1616_v54  ;;  %v1298_v27 = vunpack.c.l.bf16 %v1442_v13  ;;  %v1299_v28 = vunpack.c.h.bf16 %v1442_v13 }
  0x72   :  { %v672_v25 = vmax.f32 %v656_v15, 0.0  ;;  %v296_v26 = vadd.f32 %v280_v32, %v227_v16  ;;  %v673_v30 = vmax.f32 %v657_v19, 0.0  ;;  %v350_v33 = vmul.f32 %v1267_v35, %v1616_v54 }
  0x73   :  { %v297_v38 = vadd.f32 %v281_v17, %v228_v22  ;;  %v1330_v34 = vunpack.c.l.bf16 %v1450_v18  ;;  %v418_v23 = vmul.f32 %v1298_v27, %v1619_v57  ;;  %v419_v36 = vmul.f32 %v1299_v28, %v1619_v57 }
  0x74   :  { %v365_v21 = vadd.f32 %v349_v24, %v296_v26  ;;  %v1331_v37 = vunpack.c.h.bf16 %v1450_v18  ;;  %v685_v39 = vpack.c.bf16 %v673_v30, %v672_v25  ;;  %v1362_v42 = vunpack.c.l.bf16 %v1458_v29 }
  0x75   :  { %v366_v40 = vadd.f32 %v350_v33, %v297_v38  ;;  %v487_v41 = vmul.f32 %v1330_v34, %v1632_v6  ;;  %v1363_v54 = vunpack.c.h.bf16 %v1458_v29  ;;  %v1394_v45 = vunpack.c.l.bf16 %v1466_v14 }
  0x76   :  { %v434_v43 = vadd.f32 %v418_v23, %v365_v21  ;;  %v488_v44 = vmul.f32 %v1331_v37, %v1632_v6  ;;  %1486 = vmatmul.mubr.msk.bf16.gmra.mrb[4].mxu0 %vm713_vm0, %v685_v39  ;;  %v556_v47 = vmul.f32 %v1362_v42, %v1638_v10  ;;  %v1395_v48 = vunpack.c.h.bf16 %v1466_v14 }
  0x77   :  { %v435_v46 = vadd.f32 %v419_v36, %v366_v40  ;;  %v557_v57 = vmul.f32 %v1363_v54, %v1638_v10  ;;  %v625_v51 = vmul.f32 %v1394_v45, %v1650_v20  ;;  %v1995_v10 = vld [vmem:[%s2081_s4] ss:$0 sm:$0xff] }
  0x78   :  { %v503_v49 = vadd.f32 %v487_v41, %v434_v43  ;;  %v626_v53 = vmul.f32 %v1395_v48, %v1650_v20 }
  0x79   :  { %v504_v52 = vadd.f32 %v488_v44, %v435_v46 }
  0x7a   :  { %v572_v55 = vadd.f32 %v556_v47, %v503_v49 }
  0x7b   :  { %v573_v56 = vadd.f32 %v557_v57, %v504_v52 }
  0x7c   :  { %v641_v58 = vadd.f32 %v625_v51, %v572_v55 }
  0x7d   :  { %v642_v6 = vadd.f32 %v626_v53, %v573_v56 }
  0x7e   :  { %v664_v59 = vadd.f32 %v1673_v50, %v641_v58 }
  0x7f   :  { %v665_v60 = vadd.f32 %v1673_v50, %v642_v6 }
  0x80   :  { %v680_v61 = vmax.f32 %v664_v59, 0.0 }
  0x81   :  { %v681_v62 = vmax.f32 %v665_v60, 0.0 }
  0x83   :  { %v689_v63 = vpack.c.bf16 %v681_v62, %v680_v61 }
  0x85   :  { %1494 = vmatmul.mubr.msk.bf16.gmra.mrb[4].mxu1 %vm713_vm0, %v689_v63 }
 0x110   :  { %v1483_v0 = vpop.f32.mrb[0].mxu0 }
 0x111   :  { %v781_v20 = vadd.f32 %v1483_v0, %v1995_v10  ;;  %v772_v1 = vpop.f32.mrb[1].mxu0 }
 0x112   :  { %v773_v2 = vadd.f32 %v1995_v10, %v772_v1  ;;  %v1484_v3 = vpop.f32.mrb[2].mxu0 }
 0x113   :  { %v837_v4 = vmax.f32 %v781_v20, 0.0  ;;  %v784_v50 = vadd.f32 %v1484_v3, %v1995_v10  ;;  %v775_v5 = vpop.f32.mrb[3].mxu0 }
 0x114   :  { %v835_v7 = vmax.f32 %v773_v2, 0.0  ;;  %v776_v8 = vadd.f32 %v1995_v10, %v775_v5 }
 0x115   :  { %v1094_v9 = vpack.c.bf16 %v837_v4, %v837_v4  ;;  %v838_v11 = vmax.f32 %v784_v50, 0.0 }
 0x116   :  { %v1092_v31 = vpack.c.bf16 %v835_v7, %v835_v7  ;;  %v836_v12 = vmax.f32 %v776_v8, 0.0 }
 0x117   :  { %918 = vst.msk [vmem:[%s2082_s5 + $0x8] sm:$0xf] %vm915_vm1, %v1094_v9  ;;  %v1095_v13 = vpack.c.bf16 %v838_v11, %v838_v11 }
 0x118   :  { %916 = vst.msk [vmem:[%s2082_s5] sm:$0xf] %vm915_vm1, %v1092_v31  ;;  %v1093_v15 = vpack.c.bf16 %v836_v12, %v836_v12 }
 0x119   :  { %919 = vst.msk [vmem:[%s2082_s5 + $0xc] sm:$0xf] %vm915_vm1, %v1095_v13 }
 0x11a   :  { %917 = vst.msk [vmem:[%s2082_s5 + $0x4] sm:$0xf] %vm915_vm1, %v1093_v15 }
 0x11f   :  { %v1491_v16 = vpop.f32.mrb[0].mxu1 }
 0x120   :  { %v813_v32 = vadd.f32 %v1491_v16, %v1995_v10  ;;  %v804_v17 = vpop.f32.mrb[1].mxu1 }
 0x121   :  { %v805_v18 = vadd.f32 %v1995_v10, %v804_v17  ;;  %v1492_v19 = vpop.f32.mrb[2].mxu1 }
 0x122   :  { %v845_v22 = vmax.f32 %v813_v32, 0.0  ;;  %v816_v35 = vadd.f32 %v1492_v19, %v1995_v10  ;;  %v807_v24 = vpop.f32.mrb[3].mxu1 }
 0x123   :  { %v843_v25 = vmax.f32 %v805_v18, 0.0  ;;  %v808_v26 = vadd.f32 %v1995_v10, %v807_v24 }
 0x124   :  { %v1102_v27 = vpack.c.bf16 %v845_v22, %v845_v22  ;;  %v846_v28 = vmax.f32 %v816_v35, 0.0 }
 0x125   :  { %v1100_v29 = vpack.c.bf16 %v843_v25, %v843_v25  ;;  %v844_v30 = vmax.f32 %v808_v26, 0.0 }
 0x126   :  { %926 = vst.msk [vmem:[%s2082_s5 + $0x28] sm:$0xf] %vm915_vm1, %v1102_v27  ;;  %v1103_v38 = vpack.c.bf16 %v846_v28, %v846_v28 }
 0x127   :  { %924 = vst.msk [vmem:[%s2082_s5 + $0x20] sm:$0xf] %vm915_vm1, %v1100_v29  ;;  %v1101_v33 = vpack.c.bf16 %v844_v30, %v844_v30 }
 0x128   :  { %927 = vst.msk [vmem:[%s2082_s5 + $0x2c] sm:$0xf] %vm915_vm1, %v1103_v38 }
 0x129   :  { %925 = vst.msk [vmem:[%s2082_s5 + $0x24] sm:$0xf] %vm915_vm1, %v1101_v33 }
 0x149   :  { %v1487_v34 = vpop.f32.mrb[4].mxu0 }
 0x14a   :  { %v797_v14 = vadd.f32 %v1487_v34, %v1995_v10  ;;  %v788_v21 = vpop.f32.mrb[5].mxu0 }
 0x14b   :  { %v789_v23 = vadd.f32 %v1995_v10, %v788_v21  ;;  %v1488_v36 = vpop.f32.mrb[6].mxu0 }
 0x14c   :  { %v841_v37 = vmax.f32 %v797_v14, 0.0  ;;  %v800_v39 = vadd.f32 %v1488_v36, %v1995_v10  ;;  %v791_v40 = vpop.f32.mrb[7].mxu0 }
 0x14d   :  { %v839_v41 = vmax.f32 %v789_v23, 0.0  ;;  %v792_v42 = vadd.f32 %v1995_v10, %v791_v40 }
 0x14e   :  { %v1098_v43 = vpack.c.bf16 %v841_v37, %v841_v37  ;;  %v842_v44 = vmax.f32 %v800_v39, 0.0 }
 0x14f   :  { %v1096_v54 = vpack.c.bf16 %v839_v41, %v839_v41  ;;  %v840_v45 = vmax.f32 %v792_v42, 0.0 }
 0x150   :  { %922 = vst.msk [vmem:[%s2082_s5 + $0x18] sm:$0xf] %vm915_vm1, %v1098_v43  ;;  %v1099_v46 = vpack.c.bf16 %v842_v44, %v842_v44 }
 0x151   :  { %920 = vst.msk [vmem:[%s2082_s5 + $0x10] sm:$0xf] %vm915_vm1, %v1096_v54  ;;  %v1097_v47 = vpack.c.bf16 %v840_v45, %v840_v45 }
 0x152   :  { %923 = vst.msk [vmem:[%s2082_s5 + $0x1c] sm:$0xf] %vm915_vm1, %v1099_v46 }
 0x153   :  { %921 = vst.msk [vmem:[%s2082_s5 + $0x14] sm:$0xf] %vm915_vm1, %v1097_v47 }
 0x158   :  { %v1495_v48 = vpop.f32.mrb[4].mxu1 }
 0x159   :  { %v829_v49 = vadd.f32 %v1495_v48, %v1995_v10  ;;  %v820_v57 = vpop.f32.mrb[5].mxu1 }
 0x15a   :  { %v821_v51 = vadd.f32 %v1995_v10, %v820_v57  ;;  %v1496_v52 = vpop.f32.mrb[6].mxu1 }
 0x15b   :  { %v849_v53 = vmax.f32 %v829_v49, 0.0  ;;  %v832_v55 = vadd.f32 %v1496_v52, %v1995_v10  ;;  %v823_v56 = vpop.f32.mrb[7].mxu1 }
 0x15c   :  { %v847_v58 = vmax.f32 %v821_v51, 0.0  ;;  %v824_v6 = vadd.f32 %v1995_v10, %v823_v56 }
 0x15d   :  { %v1106_v59 = vpack.c.bf16 %v849_v53, %v849_v53  ;;  %v850_v60 = vmax.f32 %v832_v55, 0.0 }
 0x15e   :  { %v1104_v61 = vpack.c.bf16 %v847_v58, %v847_v58  ;;  %v848_v62 = vmax.f32 %v824_v6, 0.0 }
 0x15f   :  { %930 = vst.msk [vmem:[%s2082_s5 + $0x38] sm:$0xf] %vm915_vm1, %v1106_v59  ;;  %v1107_v63 = vpack.c.bf16 %v850_v60, %v850_v60 }
 0x160   :  { %928 = vst.msk [vmem:[%s2082_s5 + $0x30] sm:$0xf] %vm915_vm1, %v1104_v61  ;;  %v1105_v0 = vpack.c.bf16 %v848_v62, %v848_v62 }
 0x161   :  { %931 = vst.msk [vmem:[%s2082_s5 + $0x3c] sm:$0xf] %vm915_vm1, %v1107_v63 }
 0x162   :  { %929 = vst.msk [vmem:[%s2082_s5 + $0x34] sm:$0xf] %vm915_vm1, %v1105_v0 }

// kernel: mobilenet_forward.19
= control target key start
LH: loop header
LB: loop body
LE: loop exit
PB: predicated region body
PF: predicated region fallthrough
CT: control target
= control target key end

     0   :  { %v47_v0 = vlaneseq  ;;  %vm263_vm0 = vcmask 261120   ;;  %vm339_vm1 = vcmask 519168   ;;  %s696_s3 = inlined_call_operand.vmem [shape: bf16[32,64], index: 3, kind: input, shape index: {}]   ;;  %s697_s1 = inlined_call_operand.vmem [shape: bf16[9,1,32], index: 1, kind: input, shape index: {}]   ;;  %s698_s0 = inlined_call_operand.vmem [shape: bf16[9,32,32], index: 0, kind: input, shape index: {}]   ;;  %s699_s2 = inlined_call_operand.vmem [shape: f32[1,32], index: 2, kind: input, shape index: {}]   ;;  %s700_s4 = inlined_call_operand.vmem [shape: f32[1,64], index: 4, kind: input, shape index: {}]   ;;  %s701_s5 = inlined_call_operand.vmem [shape: bf16[32,64], index: 5, kind: output, shape index: {}]  }
   0x1   :  { %v495_v1 = vld [vmem:[%s696_s3] sm:$0xff]   ;;  %v496_v2 = vld [vmem:[%s696_s3 + $0x8] sm:$0xff]   ;;  %v467_v24 = vld [vmem:[%s698_s0 + $0x10] sm:$0xff]  }
   0x2   :  { %v48_v3 = vshrl.u32 %v47_v0, 7  ;;  %487 = vmatprep.subr.bf16.mxu0 %v495_v1  ;;  %v21_v4 = vld [vmem:[%s697_s1] sm:$0x1]  ;;  %v22_v5 = vld [vmem:[%s697_s1 + $0x1] sm:$0x1]  ;;  %v404_v28 = vunpack.c.l.bf16 %v467_v24  ;;  %v405_v29 = vunpack.c.h.bf16 %v467_v24  ;;  %v471_v30 = vld [vmem:[%s698_s0 + $0x30] sm:$0xff]  }
   0x3   :  { %v23_v6 = vld [vmem:[%s697_s1 + $0x2] sm:$0x1]  ;;  %488 = vmatpush3.bf16.msra.mxu0 %v495_v1  ;;  %v24_v7 = vld [vmem:[%s697_s1 + $0x3] sm:$0x1]  ;;  %v25_v8 = vld [vmem:[%s697_s1 + $0x4] sm:$0x1]  ;;  %v30_v10 = vunpack.c.l.bf16 %v21_v4  ;;  %v31_v11 = vunpack.c.l.bf16 %v22_v5  ;;  %v420_v36 = vunpack.c.l.bf16 %v471_v30  ;;  %v421_v37 = vunpack.c.h.bf16 %v471_v30 }
   0x4   :  { %v26_v9 = vld [vmem:[%s697_s1 + $0x5] sm:$0x1]  ;;  %489 = vmatprep.subr.bf16.mxu0 %v496_v2  ;;  %v27_v12 = vld [vmem:[%s697_s1 + $0x6] sm:$0x1]  ;;  %v557_v13 = vld [vmem:[%s697_s1 + $0x7] sm:$0x1]  ;;  %v32_v15 = vunpack.c.l.bf16 %v23_v6  ;;  %v33_v16 = vunpack.c.l.bf16 %v24_v7  ;;  %v34_v17 = vunpack.c.l.bf16 %v25_v8 }
   0x5   :  { %v562_v14 = vld [vmem:[%s697_s1 + $0x8] sm:$0x1]  ;;  %v35_v18 = vunpack.c.l.bf16 %v26_v9  ;;  %v36_v19 = vunpack.c.l.bf16 %v27_v12  ;;  %v37_v20 = vunpack.c.l.bf16 %v557_v13  ;;  %v395_v22 = vld [vmem:[%s698_s0] sm:$0xff]   ;;  %v49_v23 = vsub.s32 0, %v48_v3  ;;  %v475_v44 = vld [vmem:[%s698_s0 + $0x50] sm:$0xff]  }
   0x6   :  { %v38_v21 = vunpack.c.l.bf16 %v562_v14  ;;  %v469_v25 = vld [vmem:[%s698_s0 + $0x20] sm:$0xff]   ;;  %v396_v26 = vunpack.c.l.bf16 %v395_v22  ;;  %v397_v27 = vunpack.c.h.bf16 %v395_v22  ;;  %v436_v55 = vunpack.c.l.bf16 %v475_v44  ;;  %v479_v58 = vld [vmem:[%s698_s0 + $0x70] sm:$0xff]   ;;  %v466_v8 = vld [vmem:[%s698_s0 + $0x8] sm:$0xff]  }
   0x7   :  { %490 = vmatpush3.bf16.msra.mxu0 %v496_v2  ;;  %v578_v31 = vrot.slane %v30_v10, %v49_v23  ;;  %v580_v32 = vrot.slane %v31_v11, %v49_v23  ;;  %v412_v33 = vunpack.c.l.bf16 %v469_v25  ;;  %v413_v34 = vunpack.c.h.bf16 %v469_v25  ;;  %v473_v39 = vld [vmem:[%s698_s0 + $0x40] sm:$0xff]   ;;  %v468_v13 = vld [vmem:[%s698_s0 + $0x18] sm:$0xff]  }
   0x8   :  { %v582_v35 = vrot.slane %v32_v15, %v49_v23  ;;  %v584_v38 = vrot.slane %v33_v16, %v49_v23  ;;  %v477_v49 = vld [vmem:[%s698_s0 + $0x60] sm:$0xff]   ;;  %v428_v52 = vunpack.c.l.bf16 %v473_v39  ;;  %v429_v53 = vunpack.c.h.bf16 %v473_v39  ;;  %v472_v30 = vld [vmem:[%s698_s0 + $0x38] sm:$0xff]  }
   0x9   :  { %v51_v40 = vmul.f32 %v396_v26, %v578_v31  ;;  %v52_v41 = vmul.f32 %v397_v27, %v578_v31  ;;  %v68_v42 = vmul.f32 %v404_v28, %v580_v32  ;;  %v69_v43 = vmul.f32 %v405_v29, %v580_v32  ;;  %v481_v63 = vld [vmem:[%s698_s0 + $0x80] sm:$0xff]   ;;  %v470_v29 = vld [vmem:[%s698_s0 + $0x28] sm:$0xff]  }
   0xa   :  { %v89_v45 = vmul.f32 %v412_v33, %v582_v35  ;;  %v90_v46 = vmul.f32 %v413_v34, %v582_v35  ;;  %v110_v47 = vmul.f32 %v420_v36, %v584_v38  ;;  %v111_v48 = vmul.f32 %v421_v37, %v584_v38 }
   0xb   :  { %v72_v50 = vadd.f32 %v68_v42, %v51_v40  ;;  %v73_v51 = vadd.f32 %v69_v43, %v52_v41  ;;  %v603_v54 = vrot.slane %v34_v17, %v49_v23  ;;  %v437_v56 = vunpack.c.h.bf16 %v475_v44  ;;  %v474_v44 = vld [vmem:[%s698_s0 + $0x48] sm:$0xff]  }
   0xc   :  { %v605_v57 = vrot.slane %v35_v18, %v49_v23  ;;  %v444_v61 = vunpack.c.l.bf16 %v477_v49  ;;  %v445_v62 = vunpack.c.h.bf16 %v477_v49  ;;  %v617_v6 = vrot.slane %v36_v19, %v49_v23  ;;  %v380_v49 = vld [vmem:[%s699_s2] ss:$0 sm:$0xff] }
   0xd   :  { %v93_v59 = vadd.f32 %v89_v45, %v72_v50  ;;  %v94_v60 = vadd.f32 %v90_v46, %v73_v51  ;;  %v131_v0 = vmul.f32 %v428_v52, %v603_v54  ;;  %v132_v1 = vmul.f32 %v429_v53, %v603_v54 }
   0xe   :  { %v152_v2 = vmul.f32 %v436_v55, %v605_v57  ;;  %v153_v3 = vmul.f32 %v437_v56, %v605_v57  ;;  %v452_v7 = vunpack.c.l.bf16 %v479_v58  ;;  %v453_v9 = vunpack.c.h.bf16 %v479_v58 }
   0xf   :  { %v114_v4 = vadd.f32 %v110_v47, %v93_v59  ;;  %v115_v5 = vadd.f32 %v111_v48, %v94_v60  ;;  %v622_v10 = vrot.slane %v37_v20, %v49_v23  ;;  %v460_v11 = vunpack.c.l.bf16 %v481_v63 }
  0x10   :  { %v461_v12 = vunpack.c.h.bf16 %v481_v63  ;;  %v173_v17 = vmul.f32 %v444_v61, %v617_v6  ;;  %v174_v18 = vmul.f32 %v445_v62, %v617_v6  ;;  %v633_v20 = vrot.slane %v38_v21, %v49_v23  ;;  %v478_v63 = vld [vmem:[%s698_s0 + $0x68] sm:$0xff]  }
  0x11   :  { %v135_v15 = vadd.f32 %v131_v0, %v114_v4  ;;  %v136_v16 = vadd.f32 %v132_v1, %v115_v5  ;;  %v194_v19 = vmul.f32 %v452_v7, %v622_v10  ;;  %v195_v22 = vmul.f32 %v453_v9, %v622_v10 }
  0x12   :  { %v400_v24 = vunpack.c.l.bf16 %v466_v8  ;;  %v401_v27 = vunpack.c.h.bf16 %v466_v8  ;;  %v408_v28 = vunpack.c.l.bf16 %v468_v13  ;;  %v215_v33 = vmul.f32 %v460_v11, %v633_v20  ;;  %v482_v8 = vld [vmem:[%s698_s0 + $0x88] sm:$0xff]  }
  0x13   :  { %v156_v25 = vadd.f32 %v152_v2, %v135_v15  ;;  %v157_v26 = vadd.f32 %v153_v3, %v136_v16  ;;  %v216_v34 = vmul.f32 %v461_v12, %v633_v20  ;;  %v409_v21 = vunpack.c.h.bf16 %v468_v13  ;;  %v480_v3 = vld [vmem:[%s698_s0 + $0x78] sm:$0xff]  }
  0x14   :  { %v53_v14 = vmul.f32 %v400_v24, %v578_v31  ;;  %v54_v37 = vmul.f32 %v401_v27, %v578_v31  ;;  %v70_v39 = vmul.f32 %v408_v28, %v580_v32  ;;  %v416_v41 = vunpack.c.l.bf16 %v470_v29  ;;  %v476_v31 = vld [vmem:[%s698_s0 + $0x58] sm:$0xff]  }
  0x15   :  { %v177_v23 = vadd.f32 %v173_v17, %v156_v25  ;;  %v178_v36 = vadd.f32 %v174_v18, %v157_v26  ;;  %v71_v40 = vmul.f32 %v409_v21, %v580_v32  ;;  %v417_v42 = vunpack.c.h.bf16 %v470_v29 }
  0x16   :  { %v424_v43 = vunpack.c.l.bf16 %v472_v30  ;;  %v74_v47 = vadd.f32 %v70_v39, %v53_v14  ;;  %v425_v48 = vunpack.c.h.bf16 %v472_v30  ;;  %v91_v50 = vmul.f32 %v416_v41, %v582_v35 }
  0x17   :  { %v198_v45 = vadd.f32 %v194_v19, %v177_v23  ;;  %v199_v46 = vadd.f32 %v195_v22, %v178_v36  ;;  %v75_v32 = vadd.f32 %v71_v40, %v54_v37  ;;  %v92_v51 = vmul.f32 %v417_v42, %v582_v35 }
  0x18   :  { %v112_v52 = vmul.f32 %v424_v43, %v584_v38  ;;  %v113_v56 = vmul.f32 %v425_v48, %v584_v38  ;;  %v432_v58 = vunpack.c.l.bf16 %v474_v44  ;;  %v95_v59 = vadd.f32 %v91_v50, %v74_v47 }
  0x19   :  { %v219_v53 = vadd.f32 %v215_v33, %v198_v45  ;;  %v220_v55 = vadd.f32 %v216_v34, %v199_v46  ;;  %v96_v60 = vadd.f32 %v92_v51, %v75_v32  ;;  %v433_v61 = vunpack.c.h.bf16 %v474_v44 }
  0x1a   :  { %v440_v62 = vunpack.c.l.bf16 %v476_v31  ;;  %v133_v2 = vmul.f32 %v432_v58, %v603_v54  ;;  %v441_v35 = vunpack.c.h.bf16 %v476_v31  ;;  %v116_v4 = vadd.f32 %v112_v52, %v95_v59 }
  0x1b   :  { %v230_v0 = vadd.f32 %v380_v49, %v219_v53  ;;  %v231_v1 = vadd.f32 %v380_v49, %v220_v55  ;;  %v117_v38 = vadd.f32 %v113_v56, %v96_v60  ;;  %v134_v5 = vmul.f32 %v433_v61, %v603_v54 }
  0x1c   :  { %v154_v7 = vmul.f32 %v440_v62, %v605_v57  ;;  %v155_v12 = vmul.f32 %v441_v35, %v605_v57  ;;  %v448_v13 = vunpack.c.l.bf16 %v478_v63  ;;  %v137_v15 = vadd.f32 %v133_v2, %v116_v4 }
  0x1d   :  { %v234_v9 = vmax.f32 %v230_v0, 0.0  ;;  %v235_v11 = vmax.f32 %v231_v1, 0.0  ;;  %v138_v16 = vadd.f32 %v134_v5, %v117_v38  ;;  %v449_v17 = vunpack.c.h.bf16 %v478_v63 }
  0x1e   :  { %v456_v18 = vunpack.c.l.bf16 %v480_v3  ;;  %v175_v22 = vmul.f32 %v448_v13, %v617_v6  ;;  %v457_v24 = vunpack.c.h.bf16 %v480_v3  ;;  %v464_v54 = vunpack.c.l.bf16 %v482_v8 }
  0x1f   :  { %v238_v19 = vpack.c.bf16 %v235_v11, %v234_v9  ;;  %v158_v25 = vadd.f32 %v154_v7, %v137_v15  ;;  %v159_v26 = vadd.f32 %v155_v12, %v138_v16  ;;  %v176_v27 = vmul.f32 %v449_v17, %v617_v6 }
  0x20   :  { %v196_v28 = vmul.f32 %v456_v18, %v622_v10  ;;  %v197_v57 = vmul.f32 %v457_v24, %v622_v10  ;;  %v465_v29 = vunpack.c.h.bf16 %v482_v8  ;;  %v217_v34 = vmul.f32 %v464_v54, %v633_v20  ;;  %v381_v10 = vld [vmem:[%s700_s4] ss:$0 sm:$0xff] }
  0x21   :  { %491 = vmatprep.mubr.msk.bf16.mxu0 %vm263_vm0, %v238_v19  ;;  %v179_v30 = vadd.f32 %v175_v22, %v158_v25  ;;  %v180_v33 = vadd.f32 %v176_v27, %v159_v26 }
  0x22   :  { %v218_v14 = vmul.f32 %v465_v29, %v633_v20 }
  0x23   :  { %v200_v21 = vadd.f32 %v196_v28, %v179_v30  ;;  %v201_v23 = vadd.f32 %v197_v57, %v180_v33 }
  0x25   :  { %v221_v36 = vadd.f32 %v217_v34, %v200_v21  ;;  %v222_v37 = vadd.f32 %v218_v14, %v201_v23 }
  0x27   :  { %v232_v39 = vadd.f32 %v380_v49, %v221_v36  ;;  %v233_v40 = vadd.f32 %v380_v49, %v222_v37 }
  0x29   :  { %v236_v6 = vmax.f32 %v232_v39, 0.0  ;;  %v237_v41 = vmax.f32 %v233_v40, 0.0 }
  0x2b   :  { %v239_v42 = vpack.c.bf16 %v237_v41, %v236_v6 }
  0x2d   :  { %492 = vmatmul.mubr.msk.bf16.vlgmr.msra.gmra.mrb[0].mxu0 %vm263_vm0, %v239_v42 }
 0x100   :  { %v493_v43 = vpop.f32.mrb[0].mxu0 }
 0x101   :  { %v313_v44 = vadd.f32 %v493_v43, %v381_v10  ;;  %v304_v45 = vpop.f32.mrb[1].mxu0 }
 0x102   :  { %v305_v46 = vadd.f32 %v381_v10, %v304_v45  ;;  %v494_v20 = vpop.f32.mrb[2].mxu0 }
 0x103   :  { %v321_v47 = vmax.f32 %v313_v44, 0.0  ;;  %v316_v48 = vadd.f32 %v494_v20, %v381_v10  ;;  %v307_v31 = vpop.f32.mrb[3].mxu0 }
 0x104   :  { %v319_v32 = vmax.f32 %v305_v46, 0.0  ;;  %v308_v49 = vadd.f32 %v381_v10, %v307_v31 }
 0x105   :  { %v392_v50 = vpack.c.bf16 %v321_v47, %v321_v47  ;;  %v322_v51 = vmax.f32 %v316_v48, 0.0 }
 0x106   :  { %v390_v52 = vpack.c.bf16 %v319_v32, %v319_v32  ;;  %v320_v53 = vmax.f32 %v308_v49, 0.0 }
 0x107   :  { %342 = vst.msk [vmem:[%s701_s5 + $0x8] sm:$0xf] %vm339_vm1, %v392_v50  ;;  %v393_v55 = vpack.c.bf16 %v322_v51, %v322_v51 }
 0x108   :  { %340 = vst.msk [vmem:[%s701_s5] sm:$0xf] %vm339_vm1, %v390_v52  ;;  %v391_v56 = vpack.c.bf16 %v320_v53, %v320_v53 }
 0x109   :  { %343 = vst.msk [vmem:[%s701_s5 + $0xc] sm:$0xf] %vm339_vm1, %v393_v55 }
 0x10a   :  { %341 = vst.msk [vmem:[%s701_s5 + $0x4] sm:$0xf] %vm339_vm1, %v391_v56 }

// kernel: mobilenet_forward.20
= control target key start
LH: loop header
LB: loop body
LE: loop exit
PB: predicated region body
PF: predicated region fallthrough
CT: control target
= control target key end

     0   :  { %v47_v0 = vlaneseq  ;;  %vm279_vm0 = vcmask 523264   ;;  %vm355_vm1 = vcmask 519168   ;;  %s739_s3 = inlined_call_operand.vmem [shape: bf16[64,64], index: 3, kind: input, shape index: {}]   ;;  %s740_s1 = inlined_call_operand.vmem [shape: bf16[9,1,64], index: 1, kind: input, shape index: {}]   ;;  %s741_s0 = inlined_call_operand.vmem [shape: bf16[9,32,64], index: 0, kind: input, shape index: {}]   ;;  %s742_s2 = inlined_call_operand.vmem [shape: f32[1,64], index: 2, kind: input, shape index: {}]   ;;  %s743_s4 = inlined_call_operand.vmem [shape: f32[1,64], index: 4, kind: input, shape index: {}]   ;;  %s744_s5 = inlined_call_operand.vmem [shape: bf16[32,64], index: 5, kind: output, shape index: {}]  }
   0x1   :  { %v519_v1 = vld [vmem:[%s739_s3] sm:$0xff]   ;;  %v520_v2 = vld [vmem:[%s739_s3 + $0x8] sm:$0xff]   ;;  %v521_v4 = vld [vmem:[%s739_s3 + $0x10] sm:$0xff]  }
   0x2   :  { %v48_v3 = vshrl.u32 %v47_v0, 7  ;;  %507 = vmatprep.subr.bf16.mxu0 %v519_v1  ;;  %v21_v6 = vld [vmem:[%s740_s1] sm:$0x1]  ;;  %v22_v7 = vld [vmem:[%s740_s1 + $0x1] sm:$0x1]  ;;  %v485_v26 = vld [vmem:[%s741_s0 + $0x10] sm:$0xff]  }
   0x3   :  { %508 = vmatpush3.bf16.msra.mxu0 %v519_v1  ;;  %v23_v8 = vld [vmem:[%s740_s1 + $0x2] sm:$0x1]  ;;  %v24_v9 = vld [vmem:[%s740_s1 + $0x3] sm:$0x1]  ;;  %v25_v10 = vld [vmem:[%s740_s1 + $0x4] sm:$0x1]  ;;  %v30_v12 = vunpack.c.l.bf16 %v21_v6  ;;  %v31_v13 = vunpack.c.l.bf16 %v22_v7  ;;  %v422_v31 = vunpack.c.l.bf16 %v485_v26  ;;  %v423_v32 = vunpack.c.h.bf16 %v485_v26 }
   0x4   :  { %v562_v5 = vsub.s32 0, %v48_v3  ;;  %509 = vmatprep.subr.bf16.mxu0 %v520_v2  ;;  %v26_v11 = vld [vmem:[%s740_s1 + $0x5] sm:$0x1]  ;;  %v32_v14 = vunpack.c.l.bf16 %v23_v8  ;;  %v27_v15 = vld [vmem:[%s740_s1 + $0x6] sm:$0x1]  ;;  %v33_v18 = vunpack.c.l.bf16 %v24_v9  ;;  %v34_v19 = vunpack.c.l.bf16 %v25_v10  ;;  %v522_v28 = vld [vmem:[%s739_s3 + $0x18] sm:$0xff]  }
   0x5   :  { %v588_v16 = vld [vmem:[%s740_s1 + $0x7] sm:$0x1]  ;;  %v593_v17 = vld [vmem:[%s740_s1 + $0x8] sm:$0x1]  ;;  %v35_v20 = vunpack.c.l.bf16 %v26_v11  ;;  %v36_v21 = vunpack.c.l.bf16 %v27_v15  ;;  %v489_v33 = vld [vmem:[%s741_s0 + $0x30] sm:$0xff]  }
   0x6   :  { %v37_v22 = vunpack.c.l.bf16 %v588_v16  ;;  %v38_v23 = vunpack.c.l.bf16 %v593_v17  ;;  %v413_v24 = vld [vmem:[%s741_s0] sm:$0xff]   ;;  %v601_v25 = vrot.slane %v30_v12, %v562_v5  ;;  %v616_v34 = vrot.slane %v31_v13, %v562_v5  ;;  %v493_v43 = vld [vmem:[%s741_s0 + $0x50] sm:$0xff]   ;;  %v484_v12 = vld [vmem:[%s741_s0 + $0x8] sm:$0xff]  }
   0x7   :  { %510 = vmatpush3.bf16.msra.mxu0 %v520_v2  ;;  %v487_v27 = vld [vmem:[%s741_s0 + $0x20] sm:$0xff]   ;;  %v414_v29 = vunpack.c.l.bf16 %v413_v24  ;;  %v415_v30 = vunpack.c.h.bf16 %v413_v24  ;;  %v619_v37 = vrot.slane %v32_v14, %v562_v5  ;;  %v438_v41 = vunpack.c.l.bf16 %v489_v33  ;;  %v497_v57 = vld [vmem:[%s741_s0 + $0x70] sm:$0xff]   ;;  %v486_v24 = vld [vmem:[%s741_s0 + $0x18] sm:$0xff]  }
   0x8   :  { %511 = vmatprep.subr.bf16.mxu0 %v521_v4  ;;  %v430_v35 = vunpack.c.l.bf16 %v487_v27  ;;  %v431_v36 = vunpack.c.h.bf16 %v487_v27  ;;  %v491_v38 = vld [vmem:[%s741_s0 + $0x40] sm:$0xff]   ;;  %v439_v42 = vunpack.c.h.bf16 %v489_v33  ;;  %v68_v44 = vmul.f32 %v422_v31, %v616_v34 }
   0x9   :  { %v51_v39 = vmul.f32 %v414_v29, %v601_v25  ;;  %v52_v40 = vmul.f32 %v415_v30, %v601_v25  ;;  %v69_v45 = vmul.f32 %v423_v32, %v616_v34  ;;  %v634_v48 = vrot.slane %v33_v18, %v562_v5  ;;  %v495_v52 = vld [vmem:[%s741_s0 + $0x60] sm:$0xff]   ;;  %v488_v29 = vld [vmem:[%s741_s0 + $0x28] sm:$0xff]  }
   0xa   :  { %v89_v46 = vmul.f32 %v430_v35, %v619_v37  ;;  %v90_v47 = vmul.f32 %v431_v36, %v619_v37  ;;  %v446_v49 = vunpack.c.l.bf16 %v491_v38  ;;  %v447_v50 = vunpack.c.h.bf16 %v491_v38  ;;  %v499_v2 = vld [vmem:[%s741_s0 + $0x80] sm:$0xff]  }
   0xb   :  { %512 = vmatpush3.bf16.msra.mxu0 %v521_v4  ;;  %v637_v51 = vrot.slane %v34_v19, %v562_v5  ;;  %v72_v53 = vadd.f32 %v68_v44, %v51_v39  ;;  %v73_v54 = vadd.f32 %v69_v45, %v52_v40  ;;  %v454_v55 = vunpack.c.l.bf16 %v493_v43 }
   0xc   :  { %513 = vmatprep.subr.bf16.mxu0 %v522_v28  ;;  %v455_v56 = vunpack.c.h.bf16 %v493_v43  ;;  %v110_v58 = vmul.f32 %v438_v41, %v634_v48  ;;  %v111_v59 = vmul.f32 %v439_v42, %v634_v48  ;;  %v650_v0 = vrot.slane %v35_v20, %v562_v5 }
   0xd   :  { %v131_v60 = vmul.f32 %v446_v49, %v637_v51  ;;  %v132_v61 = vmul.f32 %v447_v50, %v637_v51  ;;  %v93_v62 = vadd.f32 %v89_v46, %v72_v53  ;;  %v94_v63 = vadd.f32 %v90_v47, %v73_v54  ;;  %v492_v46 = vld [vmem:[%s741_s0 + $0x48] sm:$0xff]  }
   0xe   :  { %v462_v1 = vunpack.c.l.bf16 %v495_v52  ;;  %v463_v3 = vunpack.c.h.bf16 %v495_v52  ;;  %v656_v4 = vrot.slane %v36_v21, %v562_v5  ;;  %v470_v6 = vunpack.c.l.bf16 %v497_v57  ;;  %v494_v52 = vld [vmem:[%s741_s0 + $0x58] sm:$0xff]  }
   0xf   :  { %514 = vmatpush3.bf16.msra.mxu0 %v522_v28  ;;  %v471_v7 = vunpack.c.h.bf16 %v497_v57  ;;  %v114_v8 = vadd.f32 %v110_v58, %v93_v62  ;;  %v115_v9 = vadd.f32 %v111_v59, %v94_v63  ;;  %v152_v10 = vmul.f32 %v454_v55, %v650_v0 }
  0x10   :  { %v153_v11 = vmul.f32 %v455_v56, %v650_v0  ;;  %v173_v13 = vmul.f32 %v462_v1, %v656_v4  ;;  %v174_v14 = vmul.f32 %v463_v3, %v656_v4  ;;  %v666_v15 = vrot.slane %v37_v22, %v562_v5  ;;  %v496_v1 = vld [vmem:[%s741_s0 + $0x68] sm:$0xff]  }
  0x11   :  { %v478_v16 = vunpack.c.l.bf16 %v499_v2  ;;  %v135_v18 = vadd.f32 %v131_v60, %v114_v8  ;;  %v136_v19 = vadd.f32 %v132_v61, %v115_v9  ;;  %v479_v20 = vunpack.c.h.bf16 %v499_v2 }
  0x12   :  { %v671_v21 = vrot.slane %v38_v23, %v562_v5  ;;  %v194_v26 = vmul.f32 %v470_v6, %v666_v15  ;;  %v195_v27 = vmul.f32 %v471_v7, %v666_v15  ;;  %v418_v28 = vunpack.c.l.bf16 %v484_v12  ;;  %v490_v23 = vld [vmem:[%s741_s0 + $0x38] sm:$0xff]  }
  0x13   :  { %v419_v22 = vunpack.c.h.bf16 %v484_v12  ;;  %v156_v30 = vadd.f32 %v152_v10, %v135_v18  ;;  %v157_v31 = vadd.f32 %v153_v11, %v136_v19  ;;  %v426_v35 = vunpack.c.l.bf16 %v486_v24  ;;  %v500_v12 = vld [vmem:[%s741_s0 + $0x88] sm:$0xff]  }
  0x14   :  { %v215_v17 = vmul.f32 %v478_v16, %v671_v21  ;;  %v216_v5 = vmul.f32 %v479_v20, %v671_v21  ;;  %v53_v32 = vmul.f32 %v418_v28, %v601_v25  ;;  %v427_v36 = vunpack.c.h.bf16 %v486_v24 }
  0x15   :  { %v54_v33 = vmul.f32 %v419_v22, %v601_v25  ;;  %v177_v38 = vadd.f32 %v173_v13, %v156_v30  ;;  %v178_v39 = vadd.f32 %v174_v14, %v157_v31  ;;  %v434_v40 = vunpack.c.l.bf16 %v488_v29 }
  0x16   :  { %v435_v41 = vunpack.c.h.bf16 %v488_v29  ;;  %v70_v42 = vmul.f32 %v426_v35, %v616_v34  ;;  %v71_v43 = vmul.f32 %v427_v36, %v616_v34  ;;  %v442_v44 = vunpack.c.l.bf16 %v490_v23  ;;  %v396_v34 = vld [vmem:[%s742_s2] ss:$0 sm:$0xff] }
  0x17   :  { %v443_v45 = vunpack.c.h.bf16 %v490_v23  ;;  %v198_v47 = vadd.f32 %v194_v26, %v177_v38  ;;  %v199_v49 = vadd.f32 %v195_v27, %v178_v39  ;;  %v91_v25 = vmul.f32 %v434_v40, %v619_v37 }
  0x18   :  { %v92_v50 = vmul.f32 %v435_v41, %v619_v37  ;;  %v74_v53 = vadd.f32 %v70_v42, %v53_v32  ;;  %v75_v54 = vadd.f32 %v71_v43, %v54_v33  ;;  %v112_v55 = vmul.f32 %v442_v44, %v634_v48 }
  0x19   :  { %v113_v56 = vmul.f32 %v443_v45, %v634_v48  ;;  %v219_v57 = vadd.f32 %v215_v17, %v198_v47  ;;  %v220_v58 = vadd.f32 %v216_v5, %v199_v49  ;;  %v450_v59 = vunpack.c.l.bf16 %v492_v46  ;;  %v498_v48 = vld [vmem:[%s741_s0 + $0x78] sm:$0xff]  }
  0x1a   :  { %v451_v60 = vunpack.c.h.bf16 %v492_v46  ;;  %v95_v61 = vadd.f32 %v91_v25, %v74_v53  ;;  %v96_v37 = vadd.f32 %v92_v50, %v75_v54  ;;  %v458_v62 = vunpack.c.l.bf16 %v494_v52 }
  0x1b   :  { %v459_v63 = vunpack.c.h.bf16 %v494_v52  ;;  %v230_v2 = vadd.f32 %v396_v34, %v219_v57  ;;  %v231_v3 = vadd.f32 %v396_v34, %v220_v58  ;;  %v133_v6 = vmul.f32 %v450_v59, %v637_v51 }
  0x1c   :  { %v134_v7 = vmul.f32 %v451_v60, %v637_v51  ;;  %v116_v8 = vadd.f32 %v112_v55, %v95_v61  ;;  %v117_v9 = vadd.f32 %v113_v56, %v96_v37  ;;  %v154_v10 = vmul.f32 %v458_v62, %v650_v0 }
  0x1d   :  { %v155_v11 = vmul.f32 %v459_v63, %v650_v0  ;;  %v234_v13 = vmax.f32 %v230_v2, 0.0  ;;  %v235_v14 = vmax.f32 %v231_v3, 0.0  ;;  %v466_v16 = vunpack.c.l.bf16 %v496_v1 }
  0x1e   :  { %v467_v18 = vunpack.c.h.bf16 %v496_v1  ;;  %v137_v19 = vadd.f32 %v133_v6, %v116_v8  ;;  %v138_v51 = vadd.f32 %v134_v7, %v117_v9  ;;  %v474_v20 = vunpack.c.l.bf16 %v498_v48 }
  0x1f   :  { %v475_v24 = vunpack.c.h.bf16 %v498_v48  ;;  %v238_v26 = vpack.c.bf16 %v235_v14, %v234_v13  ;;  %v175_v27 = vmul.f32 %v466_v16, %v656_v4  ;;  %v482_v22 = vunpack.c.l.bf16 %v500_v12 }
  0x20   :  { %v176_v28 = vmul.f32 %v467_v18, %v656_v4  ;;  %v158_v29 = vadd.f32 %v154_v10, %v137_v19  ;;  %v159_v0 = vadd.f32 %v155_v11, %v138_v51  ;;  %v196_v30 = vmul.f32 %v474_v20, %v666_v15 }
  0x21   :  { %v197_v31 = vmul.f32 %v475_v24, %v666_v15  ;;  %515 = vmatprep.mubr.msk.bf16.mxu0 %vm279_vm0, %v238_v26  ;;  %v483_v17 = vunpack.c.h.bf16 %v500_v12  ;;  %v217_v32 = vmul.f32 %v482_v22, %v671_v21  ;;  %v397_v15 = vld [vmem:[%s743_s4] ss:$0 sm:$0xff] }
  0x22   :  { %v179_v5 = vadd.f32 %v175_v27, %v158_v29  ;;  %v180_v23 = vadd.f32 %v176_v28, %v159_v0 }
  0x23   :  { %v218_v33 = vmul.f32 %v483_v17, %v671_v21 }
  0x24   :  { %v200_v35 = vadd.f32 %v196_v30, %v179_v5  ;;  %v201_v36 = vadd.f32 %v197_v31, %v180_v23 }
  0x26   :  { %v221_v38 = vadd.f32 %v217_v32, %v200_v35  ;;  %v222_v4 = vadd.f32 %v218_v33, %v201_v36 }
  0x28   :  { %v232_v39 = vadd.f32 %v396_v34, %v221_v38  ;;  %v233_v40 = vadd.f32 %v396_v34, %v222_v4 }
  0x2a   :  { %v236_v41 = vmax.f32 %v232_v39, 0.0  ;;  %v237_v42 = vmax.f32 %v233_v40, 0.0 }
  0x2c   :  { %v239_v43 = vpack.c.bf16 %v237_v42, %v236_v41 }
  0x2e   :  { %516 = vmatmul.mubr.msk.bf16.vlgmr.msra.gmra.mrb[0].mxu0 %vm279_vm0, %v239_v43 }
 0x101   :  { %v517_v44 = vpop.f32.mrb[0].mxu0 }
 0x102   :  { %v329_v45 = vadd.f32 %v517_v44, %v397_v15  ;;  %v320_v46 = vpop.f32.mrb[1].mxu0 }
 0x103   :  { %v321_v47 = vadd.f32 %v397_v15, %v320_v46  ;;  %v518_v21 = vpop.f32.mrb[2].mxu0 }
 0x104   :  { %v337_v49 = vmax.f32 %v329_v45, 0.0  ;;  %v332_v25 = vadd.f32 %v518_v21, %v397_v15  ;;  %v323_v50 = vpop.f32.mrb[3].mxu0 }
 0x105   :  { %v335_v52 = vmax.f32 %v321_v47, 0.0  ;;  %v324_v34 = vadd.f32 %v397_v15, %v323_v50 }
 0x106   :  { %v410_v53 = vpack.c.bf16 %v337_v49, %v337_v49  ;;  %v338_v54 = vmax.f32 %v332_v25, 0.0 }
 0x107   :  { %v408_v55 = vpack.c.bf16 %v335_v52, %v335_v52  ;;  %v336_v56 = vmax.f32 %v324_v34, 0.0 }
 0x108   :  { %358 = vst.msk [vmem:[%s744_s5 + $0x8] sm:$0xf] %vm355_vm1, %v410_v53  ;;  %v411_v57 = vpack.c.bf16 %v338_v54, %v338_v54 }
 0x109   :  { %356 = vst.msk [vmem:[%s744_s5] sm:$0xf] %vm355_vm1, %v408_v55  ;;  %v409_v58 = vpack.c.bf16 %v336_v56, %v336_v56 }
 0x10a   :  { %359 = vst.msk [vmem:[%s744_s5 + $0xc] sm:$0xf] %vm355_vm1, %v411_v57 }
 0x10b   :  { %357 = vst.msk [vmem:[%s744_s5 + $0x4] sm:$0xf] %vm355_vm1, %v409_v58 }

// kernel: mobilenet_forward.21
= control target key start
LH: loop header
LB: loop body
LE: loop exit
PB: predicated region body
PF: predicated region fallthrough
CT: control target
= control target key end

     0   :  { %v41_v0 = vlaneseq  ;;  %v256_v1 = vmov 0.0   ;;  %vm257_vm0 = vmmov 0   ;;  %vm167_vm1 = vcmask 523264   ;;  %s351_s3 = inlined_call_operand.vmem [shape: bf16[64,128], index: 3, kind: input, shape index: {}]   ;;  %s352_s1 = inlined_call_operand.vmem [shape: bf16[9,1,64], index: 1, kind: input, shape index: {}]   ;;  %s353_s0 = inlined_call_operand.vmem [shape: bf16[9,8,64], index: 0, kind: input, shape index: {}]   ;;  %s354_s2 = inlined_call_operand.vmem [shape: f32[1,64], index: 2, kind: input, shape index: {}]   ;;  %s355_s4 = inlined_call_operand.vmem [shape: f32[1,128], index: 4, kind: input, shape index: {}]   ;;  %s356_s5 = inlined_call_operand.vmem [shape: bf16[8,128], index: 5, kind: output, shape index: {}]  }
   0x1   :  { %238 = vmatprep.subr.bf16.mxu0 %v256_v1  ;;  %v252_v2 = vld [vmem:[%s351_s3] sm:$0xff]   ;;  %246 = vmatprep.mubr.msk.bf16.mxu0 %vm257_vm0, %v256_v1  ;;  %v253_v4 = vld [vmem:[%s351_s3 + $0x8] sm:$0xff]   ;;  %v254_v15 = vld [vmem:[%s351_s3 + $0x10] sm:$0xff]  }
   0x2   :  { %v42_v3 = vshrl.u32 %v41_v0, 7  ;;  %239 = vmatpush3.bf16.msra.mxu0 %v252_v2  ;;  %v21_v6 = vld [vmem:[%s352_s1] sm:$0x1]  ;;  %v22_v7 = vld [vmem:[%s352_s1 + $0x1] sm:$0x1]  ;;  %v219_v22 = vld [vmem:[%s353_s0 + $0x8] sm:$0xff]  }
   0x3   :  { %240 = vmatprep.subr.bf16.mxu0 %v256_v1  ;;  %v23_v8 = vld [vmem:[%s352_s1 + $0x2] sm:$0x1]  ;;  %v24_v9 = vld [vmem:[%s352_s1 + $0x3] sm:$0x1]  ;;  %v25_v10 = vld [vmem:[%s352_s1 + $0x4] sm:$0x1]  ;;  %v30_v12 = vunpack.c.l.bf16 %v21_v6  ;;  %v31_v13 = vunpack.c.l.bf16 %v22_v7  ;;  %v57_v28 = vunpack.c.l.bf16 %v219_v22  ;;  %v66_v31 = vunpack.c.h.bf16 %v219_v22 }
   0x4   :  { %v43_v5 = vsub.s32 0, %v42_v3  ;;  %v26_v11 = vld [vmem:[%s352_s1 + $0x5] sm:$0x1]  ;;  %v32_v14 = vunpack.c.l.bf16 %v23_v8  ;;  %v27_v16 = vld [vmem:[%s352_s1 + $0x6] sm:$0x1]  ;;  %v33_v17 = vunpack.c.l.bf16 %v24_v9  ;;  %v34_v18 = vunpack.c.l.bf16 %v25_v10  ;;  %v221_v23 = vld [vmem:[%s353_s0 + $0x10] sm:$0xff]  }
   0x5   :  { %v35_v19 = vunpack.c.l.bf16 %v26_v11  ;;  %v39_v20 = vld [vmem:[%s353_s0] sm:$0xff]   ;;  %v36_v29 = vunpack.c.l.bf16 %v27_v16  ;;  %v255_v33 = vld [vmem:[%s351_s3 + $0x18] sm:$0xff]   ;;  %v29_v34 = vld [vmem:[%s352_s1 + $0x8] sm:$0x1]  ;;  %v75_v37 = vunpack.c.l.bf16 %v221_v23  ;;  %v84_v44 = vunpack.c.h.bf16 %v221_v23 }
   0x6   :  { %241 = vmatpush3.bf16.msra.mxu0 %v253_v4  ;;  %v44_v21 = vrot.slane %v30_v12, %v43_v5  ;;  %v28_v24 = vld [vmem:[%s352_s1 + $0x7] sm:$0x1]  ;;  %v40_v25 = vunpack.c.l.bf16 %v39_v20  ;;  %v48_v26 = vunpack.c.h.bf16 %v39_v20  ;;  %v52_v27 = vrot.slane %v31_v13, %v43_v5  ;;  %v223_v41 = vld [vmem:[%s353_s0 + $0x18] sm:$0xff]   ;;  %v225_v51 = vld [vmem:[%s353_s0 + $0x20] sm:$0xf] }
   0x7   :  { %242 = vmatprep.subr.bf16.mxu0 %v256_v1  ;;  %v61_v30 = vrot.slane %v32_v14, %v43_v5  ;;  %v70_v32 = vrot.slane %v33_v17, %v43_v5  ;;  %v79_v38 = vrot.slane %v34_v18, %v43_v5  ;;  %v37_v39 = vunpack.c.l.bf16 %v28_v24  ;;  %v227_v7 = vld [vmem:[%s355_s4] ss:$0 sm:$0xff] }
   0x8   :  { %v45_v35 = vmul.f32 %v44_v21, %v40_v25  ;;  %v53_v36 = vmul.f32 %v52_v27, %v48_v26  ;;  %v88_v45 = vrot.slane %v35_v19, %v43_v5  ;;  %v38_v46 = vunpack.c.l.bf16 %v29_v34 }
   0x9   :  { %v62_v40 = vmul.f32 %v61_v30, %v57_v28  ;;  %v71_v43 = vmul.f32 %v70_v32, %v66_v31  ;;  %v80_v48 = vmul.f32 %v79_v38, %v75_v37  ;;  %v93_v49 = vunpack.c.l.bf16 %v223_v41 }
   0xa   :  { %243 = vmatpush3.bf16.msra.mxu0 %v254_v15  ;;  %v54_v42 = vadd.f32 %v53_v36, %v45_v35  ;;  %v97_v50 = vrot.slane %v36_v29, %v43_v5  ;;  %v89_v53 = vmul.f32 %v88_v45, %v84_v44  ;;  %v102_v54 = vunpack.c.h.bf16 %v223_v41 }
   0xb   :  { %244 = vmatprep.subr.bf16.mxu0 %v256_v1  ;;  %v106_v55 = vrot.slane %v37_v39, %v43_v5  ;;  %v111_v58 = vunpack.c.l.bf16 %v225_v51  ;;  %v115_v59 = vrot.slane %v38_v46, %v43_v5  ;;  %v226_v1 = vld [vmem:[%s354_s2] ss:$0 sm:$0xff] }
   0xc   :  { %v63_v47 = vadd.f32 %v62_v40, %v54_v42  ;;  %v98_v57 = vmul.f32 %v97_v50, %v93_v49 }
   0xd   :  { %v107_v61 = vmul.f32 %v106_v55, %v102_v54  ;;  %v116_v63 = vmul.f32 %v115_v59, %v111_v58 }
   0xe   :  { %245 = vmatpush3.bf16.msra.mxu0 %v255_v33  ;;  %v72_v52 = vadd.f32 %v71_v43, %v63_v47 }
  0x10   :  { %v81_v56 = vadd.f32 %v80_v48, %v72_v52 }
  0x12   :  { %v90_v60 = vadd.f32 %v89_v53, %v81_v56 }
  0x14   :  { %v99_v62 = vadd.f32 %v98_v57, %v90_v60 }
  0x16   :  { %v108_v0 = vadd.f32 %v107_v61, %v99_v62 }
  0x18   :  { %v117_v2 = vadd.f32 %v116_v63, %v108_v0 }
  0x1a   :  { %v125_v3 = vadd.f32 %v226_v1, %v117_v2 }
  0x1c   :  { %v126_v4 = vmax.f32 %v125_v3, 0.0 }
  0x1e   :  { %v127_v6 = vpack.c.bf16 %v126_v4, %v126_v4 }
  0x20   :  { %247 = vmatmul.mubr.msk.bf16.vlgmr.msra.gmra.mrb[0].mxu0 %vm167_vm1, %v127_v6 }
  0xf3   :  { %v205_v5 = vpop.f32.mrb[0].mxu0 }
  0xf4   :  { %v206_v8 = vadd.f32 %v227_v7, %v205_v5  ;;  %v248_v9 = vpop.f32.mrb[1].mxu0 }
  0xf5   :  { %v208_v10 = vpop.f32.mrb[2].mxu0 }
  0xf6   :  { %v211_v11 = vmax.f32 %v206_v8, 0.0  ;;  %v249_v12 = vpop.f32.mrb[3].mxu0 }
  0xf8   :  { %v212_v13 = vpack.c.bf16 %v211_v11, %v211_v11 }
  0xfa   :  { %213 = vst [vmem:[%s356_s5] sm:$0xf] %v212_v13 }

// kernel: mobilenet_forward.22
= control target key start
LH: loop header
LB: loop body
LE: loop exit
PB: predicated region body
PF: predicated region fallthrough
CT: control target
= control target key end

     0   :  { %v41_v0 = vlaneseq  ;;  %v303_v1 = vmov 0.0   ;;  %vm304_vm0 = vmmov 0   ;;  %s430_s3 = inlined_call_operand.vmem [shape: bf16[128,128], index: 3, kind: input, shape index: {}]   ;;  %s431_s1 = inlined_call_operand.vmem [shape: bf16[9,1,128], index: 1, kind: input, shape index: {}]   ;;  %s432_s0 = inlined_call_operand.vmem [shape: bf16[9,8,128], index: 0, kind: input, shape index: {}]   ;;  %s433_s2 = inlined_call_operand.vmem [shape: f32[1,128], index: 2, kind: input, shape index: {}]   ;;  %s434_s4 = inlined_call_operand.vmem [shape: f32[1,128], index: 4, kind: input, shape index: {}]   ;;  %s435_s5 = inlined_call_operand.vmem [shape: bf16[8,128], index: 5, kind: output, shape index: {}]  }
   0x1   :  { %273 = vmatprep.subr.bf16.mxu0 %v303_v1  ;;  %v295_v2 = vld [vmem:[%s430_s3] sm:$0xff]   ;;  %289 = vmatprep.mubr.msk.bf16.mxu0 %vm304_vm0, %v303_v1  ;;  %v296_v3 = vld [vmem:[%s430_s3 + $0x8] sm:$0xff]   ;;  %v297_v5 = vld [vmem:[%s430_s3 + $0x10] sm:$0xff]  }
   0x2   :  { %274 = vmatpush3.bf16.msra.mxu0 %v295_v2  ;;  %v42_v4 = vshrl.u32 %v41_v0, 7  ;;  %v21_v7 = vld [vmem:[%s431_s1] sm:$0x1]  ;;  %v22_v8 = vld [vmem:[%s431_s1 + $0x1] sm:$0x1]  ;;  %v298_v16 = vld [vmem:[%s430_s3 + $0x18] sm:$0xff]  }
   0x3   :  { %275 = vmatprep.subr.bf16.mxu0 %v303_v1  ;;  %v23_v9 = vld [vmem:[%s431_s1 + $0x2] sm:$0x1]  ;;  %v24_v10 = vld [vmem:[%s431_s1 + $0x3] sm:$0x1]  ;;  %v25_v11 = vld [vmem:[%s431_s1 + $0x4] sm:$0x1]  ;;  %v30_v13 = vunpack.c.l.bf16 %v21_v7  ;;  %v31_v14 = vunpack.c.l.bf16 %v22_v8 }
   0x4   :  { %v348_v6 = vsub.s32 0, %v42_v4  ;;  %v26_v12 = vld [vmem:[%s431_s1 + $0x5] sm:$0x1]  ;;  %v32_v15 = vunpack.c.l.bf16 %v23_v9  ;;  %v27_v17 = vld [vmem:[%s431_s1 + $0x6] sm:$0x1]  ;;  %v33_v18 = vunpack.c.l.bf16 %v24_v10  ;;  %v34_v19 = vunpack.c.l.bf16 %v25_v11  ;;  %v247_v23 = vld [vmem:[%s432_s0 + $0x8] sm:$0xff]  }
   0x5   :  { %v35_v20 = vunpack.c.l.bf16 %v26_v12  ;;  %v39_v21 = vld [vmem:[%s432_s0] sm:$0xff]   ;;  %v249_v24 = vld [vmem:[%s432_s0 + $0x10] sm:$0xff]   ;;  %v57_v29 = vunpack.c.l.bf16 %v247_v23  ;;  %v36_v30 = vunpack.c.l.bf16 %v27_v17  ;;  %v66_v32 = vunpack.c.h.bf16 %v247_v23  ;;  %v29_v35 = vld [vmem:[%s431_s1 + $0x8] sm:$0x1] }
   0x6   :  { %276 = vmatpush3.bf16.msra.mxu0 %v296_v3  ;;  %v44_v22 = vrot.slane %v30_v13, %v348_v6  ;;  %v28_v25 = vld [vmem:[%s431_s1 + $0x7] sm:$0x1]  ;;  %v40_v26 = vunpack.c.l.bf16 %v39_v21  ;;  %v48_v27 = vunpack.c.h.bf16 %v39_v21  ;;  %v52_v28 = vrot.slane %v31_v14, %v348_v6  ;;  %v251_v42 = vld [vmem:[%s432_s0 + $0x18] sm:$0xff]   ;;  %v300_v48 = vld [vmem:[%s430_s3 + $0x28] sm:$0xff]  }
   0x7   :  { %277 = vmatprep.subr.bf16.mxu0 %v303_v1  ;;  %v61_v31 = vrot.slane %v32_v15, %v348_v6  ;;  %v70_v33 = vrot.slane %v33_v18, %v348_v6  ;;  %v299_v34 = vld [vmem:[%s430_s3 + $0x20] sm:$0xff]   ;;  %v75_v38 = vunpack.c.l.bf16 %v249_v24  ;;  %v79_v39 = vrot.slane %v34_v19, %v348_v6  ;;  %v301_v58 = vld [vmem:[%s430_s3 + $0x30] sm:$0xff]   ;;  %v302_v2 = vld [vmem:[%s430_s3 + $0x38] sm:$0xff]  }
   0x8   :  { %v45_v36 = vmul.f32 %v44_v22, %v40_v26  ;;  %v53_v37 = vmul.f32 %v52_v28, %v48_v27  ;;  %v37_v40 = vunpack.c.l.bf16 %v28_v25  ;;  %v84_v45 = vunpack.c.h.bf16 %v249_v24  ;;  %v253_v53 = vld [vmem:[%s432_s0 + $0x20] sm:$0xf] }
   0x9   :  { %v62_v41 = vmul.f32 %v61_v31, %v57_v29  ;;  %v71_v44 = vmul.f32 %v70_v33, %v66_v32  ;;  %v88_v46 = vrot.slane %v35_v20, %v348_v6  ;;  %v38_v47 = vunpack.c.l.bf16 %v29_v35  ;;  %v254_v7 = vld [vmem:[%s433_s2] ss:$0 sm:$0xff] }
   0xa   :  { %278 = vmatpush3.bf16.msra.mxu0 %v297_v5  ;;  %v54_v43 = vadd.f32 %v53_v37, %v45_v36  ;;  %v80_v50 = vmul.f32 %v79_v39, %v75_v38  ;;  %v93_v51 = vunpack.c.l.bf16 %v251_v42  ;;  %v97_v52 = vrot.slane %v36_v30, %v348_v6  ;;  %v255_v11 = vld [vmem:[%s434_s4] ss:$0 sm:$0xff] }
   0xb   :  { %279 = vmatprep.subr.bf16.mxu0 %v303_v1  ;;  %v89_v55 = vmul.f32 %v88_v46, %v84_v45  ;;  %v102_v56 = vunpack.c.h.bf16 %v251_v42  ;;  %v106_v57 = vrot.slane %v37_v40, %v348_v6  ;;  %v111_v61 = vunpack.c.l.bf16 %v253_v53 }
   0xc   :  { %v63_v49 = vadd.f32 %v62_v41, %v54_v43  ;;  %v98_v60 = vmul.f32 %v97_v52, %v93_v51  ;;  %v115_v62 = vrot.slane %v38_v47, %v348_v6 }
   0xd   :  { %v107_v0 = vmul.f32 %v106_v57, %v102_v56 }
   0xe   :  { %280 = vmatpush3.bf16.msra.mxu0 %v298_v16  ;;  %v72_v54 = vadd.f32 %v71_v44, %v63_v49  ;;  %v116_v4 = vmul.f32 %v115_v62, %v111_v61 }
   0xf   :  { %281 = vmatprep.subr.bf16.mxu0 %v303_v1 }
  0x10   :  { %v81_v59 = vadd.f32 %v80_v50, %v72_v54 }
  0x12   :  { %282 = vmatpush3.bf16.msra.mxu0 %v299_v34  ;;  %v90_v63 = vadd.f32 %v89_v55, %v81_v59 }
  0x13   :  { %283 = vmatprep.subr.bf16.mxu0 %v303_v1 }
  0x14   :  { %v99_v3 = vadd.f32 %v98_v60, %v90_v63 }
  0x16   :  { %284 = vmatpush3.bf16.msra.mxu0 %v300_v48  ;;  %v108_v5 = vadd.f32 %v107_v0, %v99_v3 }
  0x17   :  { %285 = vmatprep.subr.bf16.mxu0 %v303_v1 }
  0x18   :  { %v117_v6 = vadd.f32 %v116_v4, %v108_v5 }
  0x1a   :  { %286 = vmatpush3.bf16.msra.mxu0 %v301_v58  ;;  %v125_v8 = vadd.f32 %v254_v7, %v117_v6 }
  0x1b   :  { %287 = vmatprep.subr.bf16.mxu0 %v303_v1 }
  0x1c   :  { %v126_v9 = vmax.f32 %v125_v8, 0.0 }
  0x1e   :  { %288 = vmatpush3.bf16.msra.mxu0 %v302_v2  ;;  %v127_v10 = vpack.c.bf16 %v126_v9, %v126_v9 }
  0x21   :  { %290 = vmatmul.mubr.bf16.vlgmr.msra.gmra.mrb[0].mxu0 %v127_v10 }
  0xf4   :  { %v233_v12 = vpop.f32.mrb[0].mxu0 }
  0xf5   :  { %v234_v13 = vadd.f32 %v255_v11, %v233_v12  ;;  %v291_v14 = vpop.f32.mrb[1].mxu0 }
  0xf6   :  { %v236_v15 = vpop.f32.mrb[2].mxu0 }
  0xf7   :  { %v239_v1 = vmax.f32 %v234_v13, 0.0  ;;  %v292_v16 = vpop.f32.mrb[3].mxu0 }
  0xf9   :  { %v240_v17 = vpack.c.bf16 %v239_v1, %v239_v1 }
  0xfb   :  { %241 = vst [vmem:[%s435_s5] sm:$0xf] %v240_v17 }

// kernel: mobilenet_forward.28
= control target key start
LH: loop header
LB: loop body
LE: loop exit
PB: predicated region body
PF: predicated region fallthrough
CT: control target
= control target key end

     0   :  { %vm21_vm0 = vcmask 1041409   ;;  %vm23_vm1 = vcmask 1043459   ;;  %vm25_vm2 = vcmask 1045509   ;;  %vm27_vm3 = vcmask 1047559   ;;  %s54_s0 = inlined_call_operand.vmem [shape: bf16[2,1,256], index: 0, kind: input, shape index: {}]   ;;  %s55_s1 = inlined_call_operand.vmem [shape: f32[2,256], index: 1, kind: output, shape index: {}]  }
   0x1   :  { %v8_v0 = vld [vmem:[%s54_s0] sm:$0x3]  ;;  %v9_v1 = vld [vmem:[%s54_s0 + $0x2] sm:$0x3] }
   0x2   :  { %v10_v2 = vunpack.c.l.bf16 %v8_v0  ;;  %v11_v3 = vunpack.c.l.bf16 %v9_v1 }
   0x4   :  { %v20_v4 = vrot.slane %v11_v3, 7 }
   0x6   :  { %v22_v5 = vsel %vm21_vm0, %v20_v4, %v10_v2 }
   0x7   :  { %v24_v6 = vsel %vm23_vm1, %v20_v4, %v22_v5 }
   0x8   :  { %v26_v7 = vsel %vm25_vm2, %v20_v4, %v24_v6 }
   0x9   :  { %v28_v8 = vsel %vm27_vm3, %v20_v4, %v26_v7 }
   0xa   :  { %30 = vst [vmem:[%s55_s1] sm:$0xf] %v28_v8 }

// kernel: mobilenet_forward.27
= control target key start
LH: loop header
LB: loop body
LE: loop exit
PB: predicated region body
PF: predicated region fallthrough
CT: control target
= control target key end

     0   :  { %v357_v1 = vmov 0   ;;  %v41_v3 = vlaneseq  ;;  %s517_s3 = inlined_call_operand.vmem [shape: bf16[128,256], index: 3, kind: input, shape index: {}]   ;;  %s518_s1 = inlined_call_operand.vmem [shape: bf16[9,1,128], index: 1, kind: input, shape index: {}]   ;;  %s519_s0 = inlined_call_operand.vmem [shape: bf16[9,2,128], index: 0, kind: input, shape index: {}]   ;;  %s520_s2 = inlined_call_operand.vmem [shape: f32[1,128], index: 2, kind: input, shape index: {}]   ;;  %s521_s4 = inlined_call_operand.vmem [shape: f32[1,256], index: 4, kind: input, shape index: {}]   ;;  %s522_s5 = inlined_call_operand.vmem [shape: bf16[2,256], index: 5, kind: output, shape index: {}]  }
   0x1   :  { %v333_v0 = vld [vmem:[%s517_s3 + $0x4] ss:$8 sps:$4 sm:$0xff]   ;;  %268 = vmatprep.mubr.bf16.mxu0 %v357_v1  ;;  %v335_v2 = vld [vmem:[%s517_s3] ss:$8 sps:$4 sm:$0xff]   ;;  %v336_v4 = vld [vmem:[%s517_s3 + $0x14] ss:$8 sps:$4 sm:$0xff]  }
   0x2   :  { %236 = vmatprep.subr.bf16.mxu0 %v333_v0  ;;  %v338_v5 = vld [vmem:[%s517_s3 + $0x10] ss:$8 sps:$4 sm:$0xff]   ;;  %v339_v6 = vld [vmem:[%s517_s3 + $0x24] ss:$8 sps:$4 sm:$0xff]   ;;  %v404_v7 = vshrl.u32 %v41_v3, 7 }
   0x3   :  { %237 = vmatpush1.bf16.msra.mxu0 %v335_v2  ;;  %v341_v8 = vld [vmem:[%s517_s3 + $0x20] ss:$8 sps:$4 sm:$0xff]   ;;  %v342_v9 = vld [vmem:[%s517_s3 + $0x34] ss:$8 sps:$4 sm:$0xff]   ;;  %v344_v11 = vld [vmem:[%s517_s3 + $0x30] ss:$8 sps:$4 sm:$0xff]  }
   0x4   :  { %238 = vmatprep.subr.bf16.mxu0 %v336_v4  ;;  %v413_v10 = vsub.s32 0, %v404_v7  ;;  %v21_v12 = vld [vmem:[%s518_s1] sm:$0x1]  ;;  %v22_v13 = vld [vmem:[%s518_s1 + $0x1] sm:$0x1] }
   0x5   :  { %v23_v14 = vld [vmem:[%s518_s1 + $0x2] sm:$0x1]  ;;  %v24_v15 = vld [vmem:[%s518_s1 + $0x3] sm:$0x1]  ;;  %v30_v16 = vunpack.c.l.bf16 %v21_v12  ;;  %v345_v17 = vld [vmem:[%s517_s3 + $0x44] ss:$8 sps:$4 sm:$0xff]   ;;  %v31_v20 = vunpack.c.l.bf16 %v22_v13 }
   0x6   :  { %v25_v18 = vld [vmem:[%s518_s1 + $0x4] sm:$0x1]  ;;  %v26_v19 = vld [vmem:[%s518_s1 + $0x5] sm:$0x1]  ;;  %v32_v21 = vunpack.c.l.bf16 %v23_v14  ;;  %v33_v22 = vunpack.c.l.bf16 %v24_v15  ;;  %v27_v23 = vld [vmem:[%s518_s1 + $0x6] sm:$0x1] }
   0x7   :  { %239 = vmatpush1.bf16.msra.mxu0 %v338_v5  ;;  %v34_v24 = vunpack.c.l.bf16 %v25_v18  ;;  %v39_v25 = vld [vmem:[%s519_s0] sm:$0x1]  ;;  %v44_v26 = vrot.slane %v30_v16, %v413_v10  ;;  %v35_v27 = vunpack.c.l.bf16 %v26_v19  ;;  %v304_v29 = vld [vmem:[%s519_s0 + $0x1] sm:$0x1]  ;;  %v52_v30 = vrot.slane %v31_v20, %v413_v10  ;;  %v305_v31 = vld [vmem:[%s519_s0 + $0x2] sm:$0x1] }
   0x8   :  { %240 = vmatprep.subr.bf16.mxu0 %v339_v6  ;;  %v40_v28 = vunpack.c.l.bf16 %v39_v25  ;;  %v306_v32 = vld [vmem:[%s519_s0 + $0x3] sm:$0x1]  ;;  %v28_v34 = vld [vmem:[%s518_s1 + $0x7] sm:$0x1]  ;;  %v48_v35 = vunpack.c.l.bf16 %v304_v29  ;;  %v57_v36 = vunpack.c.l.bf16 %v305_v31  ;;  %v61_v37 = vrot.slane %v32_v21, %v413_v10  ;;  %v307_v39 = vld [vmem:[%s519_s0 + $0x4] sm:$0x1] }
   0x9   :  { %v347_v33 = vld [vmem:[%s517_s3 + $0x40] ss:$8 sps:$4 sm:$0xff]   ;;  %v66_v38 = vunpack.c.l.bf16 %v306_v32  ;;  %v348_v40 = vld [vmem:[%s517_s3 + $0x54] ss:$8 sps:$4 sm:$0xff]   ;;  %v36_v41 = vunpack.c.l.bf16 %v27_v23  ;;  %v70_v43 = vrot.slane %v33_v22, %v413_v10  ;;  %v308_v44 = vld [vmem:[%s519_s0 + $0x5] sm:$0x1]  ;;  %v75_v48 = vunpack.c.l.bf16 %v307_v39 }
   0xa   :  { %v45_v42 = vmul.f32 %v44_v26, %v40_v28  ;;  %v29_v45 = vld [vmem:[%s518_s1 + $0x8] sm:$0x1]  ;;  %v53_v46 = vmul.f32 %v52_v30, %v48_v35  ;;  %v62_v47 = vmul.f32 %v61_v37, %v57_v36  ;;  %v79_v49 = vrot.slane %v34_v24, %v413_v10  ;;  %v309_v51 = vld [vmem:[%s519_s0 + $0x6] sm:$0x1]  ;;  %v350_v52 = vld [vmem:[%s517_s3 + $0x50] ss:$8 sps:$4 sm:$0xff]  }
   0xb   :  { %241 = vmatpush1.bf16.msra.mxu0 %v341_v8  ;;  %v37_v50 = vunpack.c.l.bf16 %v28_v34  ;;  %v71_v54 = vmul.f32 %v70_v43, %v66_v38  ;;  %v84_v55 = vunpack.c.l.bf16 %v308_v44  ;;  %v88_v56 = vrot.slane %v35_v27, %v413_v10  ;;  %v351_v57 = vld [vmem:[%s517_s3 + $0x64] ss:$8 sps:$4 sm:$0xff]   ;;  %v311_v0 = vld [vmem:[%s519_s0 + $0x8] sm:$0x1]  ;;  %v354_v6 = vld [vmem:[%s517_s3 + $0x74] ss:$8 sps:$4 sm:$0xff]  }
   0xc   :  { %242 = vmatprep.subr.bf16.mxu0 %v342_v9  ;;  %v54_v53 = vadd.f32 %v53_v46, %v45_v42  ;;  %v38_v58 = vunpack.c.l.bf16 %v29_v45  ;;  %v310_v59 = vld [vmem:[%s519_s0 + $0x7] sm:$0x1]  ;;  %v80_v61 = vmul.f32 %v79_v49, %v75_v48  ;;  %v93_v62 = vunpack.c.l.bf16 %v309_v51  ;;  %v353_v1 = vld [vmem:[%s517_s3 + $0x60] ss:$8 sps:$4 sm:$0xff]   ;;  %v356_v13 = vld [vmem:[%s517_s3 + $0x70] ss:$8 sps:$4 sm:$0xff]  }
   0xd   :  { %v97_v63 = vrot.slane %v36_v41, %v413_v10  ;;  %v89_v3 = vmul.f32 %v88_v56, %v84_v55  ;;  %v102_v4 = vunpack.c.l.bf16 %v310_v59  ;;  %v106_v5 = vrot.slane %v37_v50, %v413_v10  ;;  %v312_v19 = vld [vmem:[%s520_s2] ss:$0 sm:$0xff] }
   0xe   :  { %v63_v60 = vadd.f32 %v62_v47, %v54_v53  ;;  %v115_v12 = vrot.slane %v38_v58, %v413_v10  ;;  %v144_v24 = vld [vmem:[%s521_s4] sm:$0x3]  ;;  %v152_v25 = vsub.s32 1, %v404_v7  ;;  %v358_v26 = vmov 1966171168  }
   0xf   :  { %243 = vmatpush1.bf16.msra.mxu0 %v344_v11  ;;  %v98_v9 = vmul.f32 %v97_v63, %v93_v62  ;;  %v111_v11 = vunpack.c.l.bf16 %v311_v0  ;;  %v107_v15 = vmul.f32 %v106_v5, %v102_v4  ;;  %v285_v27 = vunpack.c.l.s4 %v358_v26 }
  0x10   :  { %244 = vmatprep.subr.bf16.mxu0 %v345_v17  ;;  %v72_v2 = vadd.f32 %v71_v54, %v63_v60  ;;  %v149_v28 = vrot.slane %v144_v24, %v413_v10  ;;  %v153_v29 = vrot.slane %v144_v24, %v152_v25 }
  0x11   :  { %v116_v17 = vmul.f32 %v115_v12, %v111_v11  ;;  %v286_v31 = vunpack.c.0.s8 %v285_v27 }
  0x12   :  { %v81_v8 = vadd.f32 %v80_v61, %v72_v2 }
  0x13   :  { %245 = vmatpush1.bf16.msra.mxu0 %v347_v33  ;;  %v289_v39 = vsub.s32 %v286_v31, %v404_v7 }
  0x14   :  { %246 = vmatprep.subr.bf16.mxu0 %v348_v40  ;;  %v90_v14 = vadd.f32 %v89_v3, %v81_v8 }
  0x16   :  { %v99_v16 = vadd.f32 %v98_v9, %v90_v14 }
  0x17   :  { %247 = vmatpush1.bf16.msra.mxu0 %v350_v52 }
  0x18   :  { %248 = vmatprep.subr.bf16.mxu0 %v351_v57  ;;  %v108_v18 = vadd.f32 %v107_v15, %v99_v16 }
  0x1a   :  { %v117_v20 = vadd.f32 %v116_v17, %v108_v18 }
  0x1b   :  { %249 = vmatpush1.bf16.msra.mxu0 %v353_v1 }
  0x1c   :  { %250 = vmatprep.subr.bf16.mxu0 %v354_v6  ;;  %v125_v21 = vadd.f32 %v312_v19, %v117_v20 }
  0x1e   :  { %v126_v22 = vmax.f32 %v125_v21, 0.0 }
  0x1f   :  { %251 = vmatpush1.bf16.msra.mxu0 %v356_v13 }
  0x20   :  { %v127_v23 = vpack.c.bf16 %v126_v22, %v126_v22 }
  0x22   :  { %269 = vmatmul.mubr.bf16.vlgmr.msra.gmra.mrb[0].mxu0 %v127_v23 }
  0xf5   :  { %v270_v30 = vpop.f32.mrb[0].mxu0 }
  0xf6   :  { %v271_v32 = vadd.f32 %v270_v30, %v149_v28  ;;  %v272_v33 = vpop.f32.mrb[1].mxu0 }
  0xf7   :  { %v273_v34 = vadd.f32 %v272_v33, %v153_v29  ;;  %v274_v35 = vpop.f32.mrb[2].mxu0 }
  0xf8   :  { %v277_v36 = vmax.f32 %v271_v32, 0.0  ;;  %v275_v37 = vpop.f32.mrb[3].mxu0 }
  0xf9   :  { %v278_v38 = vmax.f32 %v273_v34, 0.0 }
  0xfb   :  { %v329_v40 = vpack.c.bf16 %v278_v38, %v277_v36 }
  0xfd   :  { %v290_v41 = vrot.slane %v329_v40, %v289_v39 }
  0xff   :  { %330 = vst.sshfl [vmem:[%s522_s5] sm:$0x5 pattern:$0x73625140] %v290_v41 }

// kernel: mobilenet_forward.29
= control target key start
LH: loop header
LB: loop body
LE: loop exit
PB: predicated region body
PF: predicated region fallthrough
CT: control target
= control target key end

     0   :  { %s381_s0 = inlined_call_operand.vmem [shape: f32[2,256], index: 0, kind: input, shape index: {}]   ;;  %s382_s1 = inlined_call_operand.vmem [shape: f32[256,16], index: 1, kind: input, shape index: {}]   ;;  %s383_s2 = inlined_call_operand.vmem [shape: f32[1,16], index: 2, kind: input, shape index: {}]   ;;  %s384_s3 = inlined_call_operand.hbm [shape: f32[2,16], index: 3, kind: output, shape index: {}]  }
   0x1   :  { %v32_v0 = vld [vmem:[%s382_s1 + $0x80] sm:$0xff]  ;;  %v33_v1 = vld [vmem:[%s382_s1 + $0x88] sm:$0xff]  ;;  %v34_v5 = vld [vmem:[%s382_s1 + $0x90] sm:$0xff] }
   0x2   :  { %v16_v2 = vld [vmem:[%s382_s1] sm:$0xff]  ;;  %v189_v3 = vpack.c.bf16 %v33_v1, %v32_v0  ;;  %v17_v4 = vld [vmem:[%s382_s1 + $0x8] sm:$0xff]  ;;  %v35_v6 = vld [vmem:[%s382_s1 + $0x98] sm:$0xff] }
   0x3   :  { %v191_v7 = vpack.c.bf16 %v17_v4, %v16_v2  ;;  %v193_v8 = vpack.c.bf16 %v35_v6, %v34_v5  ;;  %v18_v9 = vld [vmem:[%s382_s1 + $0x10] sm:$0xff]  ;;  %v19_v10 = vld [vmem:[%s382_s1 + $0x18] sm:$0xff]  ;;  %v36_v11 = vld [vmem:[%s382_s1 + $0xa0] sm:$0xff] }
   0x4   :  { %190 = vmatprep.subr.bf16.mxu0 %v189_v3  ;;  %v37_v12 = vld [vmem:[%s382_s1 + $0xa8] sm:$0xff]  ;;  %v195_v13 = vpack.c.bf16 %v19_v10, %v18_v9  ;;  %v20_v15 = vld [vmem:[%s382_s1 + $0x20] sm:$0xff]  ;;  %v38_v17 = vld [vmem:[%s382_s1 + $0xb0] sm:$0xff] }
   0x5   :  { %192 = vmatpush3.bf16.msra.mxu0 %v191_v7  ;;  %v197_v14 = vpack.c.bf16 %v37_v12, %v36_v11  ;;  %v21_v16 = vld [vmem:[%s382_s1 + $0x28] sm:$0xff]  ;;  %v39_v18 = vld [vmem:[%s382_s1 + $0xb8] sm:$0xff]  ;;  %v22_v21 = vld [vmem:[%s382_s1 + $0x30] sm:$0xff] }
   0x6   :  { %194 = vmatprep.subr.bf16.mxu0 %v193_v8  ;;  %v199_v19 = vpack.c.bf16 %v21_v16, %v20_v15  ;;  %v201_v20 = vpack.c.bf16 %v39_v18, %v38_v17  ;;  %v23_v22 = vld [vmem:[%s382_s1 + $0x38] sm:$0xff]  ;;  %v40_v23 = vld [vmem:[%s382_s1 + $0xc0] sm:$0xff]  ;;  %v41_v24 = vld [vmem:[%s382_s1 + $0xc8] sm:$0xff] }
   0x7   :  { %v153_v25 = vld.sshfl [vmem:[%s381_s0] sm:$0x33 pattern:$0x76325410] }
   0x8   :  { %v63_v26 = vcombine.high %v153_v25, %v153_v25 }
   0x9   :  { %196 = vmatpush3.bf16.msra.mxu0 %v195_v13 }
   0xa   :  { %198 = vmatprep.subr.bf16.mxu0 %v197_v14 }
   0xb   :  { %8 = vsyncpa [#allocation3], 0  ;;  %v203_v27 = vpack.c.bf16 %v23_v22, %v22_v21  ;;  %v205_v28 = vpack.c.bf16 %v41_v24, %v40_v23  ;;  %v24_v29 = vld [vmem:[%s382_s1 + $0x40] sm:$0xff]  ;;  %v25_v30 = vld [vmem:[%s382_s1 + $0x48] sm:$0xff]  ;;  %130 = vmatprep.mubr.f32.mxu0 %v63_v26  ;;  %s246_s25 = smov [#allocation2]   ;;  %vm136_vm0 = vcmask 123904  }
   0xc   :  { %v42_v31 = vld [vmem:[%s382_s1 + $0xd0] sm:$0xff]  ;;  %v43_v32 = vld [vmem:[%s382_s1 + $0xd8] sm:$0xff]  ;;  %v207_v33 = vpack.c.bf16 %v25_v30, %v24_v29  ;;  %v44_v37 = vld [vmem:[%s382_s1 + $0xe0] sm:$0xff]  ;;  %s144_s26 = sshll.u32 %s246_s25, 4  ;;  %s145_s26 = int_to_ptr.vmem [resolvable:$true] %s144_s26 }
   0xd   :  { %200 = vmatpush3.bf16.msra.mxu0 %v199_v19  ;;  %v209_v34 = vpack.c.bf16 %v43_v32, %v42_v31  ;;  %v26_v35 = vld [vmem:[%s382_s1 + $0x50] sm:$0xff]  ;;  %v27_v36 = vld [vmem:[%s382_s1 + $0x58] sm:$0xff]  ;;  %v45_v38 = vld [vmem:[%s382_s1 + $0xe8] sm:$0xff]  ;;  %s222_s27 = scalar_lea.vmem %s145_s26, 32  ;;  %p227_p1 = scmp.lt.s32.totalorder %s145_s26, %s145_s26 }
   0xe   :  { %202 = vmatprep.subr.bf16.mxu0 %v201_v20  ;;  %v211_v39 = vpack.c.bf16 %v27_v36, %v26_v35  ;;  %v213_v40 = vpack.c.bf16 %v45_v38, %v44_v37  ;;  %v28_v41 = vld [vmem:[%s382_s1 + $0x60] sm:$0xff]  ;;  %v29_v42 = vld [vmem:[%s382_s1 + $0x68] sm:$0xff]  ;;  %v46_v43 = vld [vmem:[%s382_s1 + $0xf0] sm:$0xff]  ;;  %p223_p0 = scmp.ne.s32.totalorder %s145_s26, %s222_s27  ;;  %p228_p2 = scmp.lt.s32.totalorder %s222_s27, %s222_s27 }
   0xf   :  { %v47_v44 = vld [vmem:[%s382_s1 + $0xf8] sm:$0xff]  ;;  %v215_v45 = vpack.c.bf16 %v29_v42, %v28_v41  ;;  %v30_v47 = vld [vmem:[%s382_s1 + $0x70] sm:$0xff]  ;;  %v152_v51 = vld [vmem:[%s383_s2] ss:$0 sm:$0xff] }
  0x10   :  { %v217_v46 = vpack.c.bf16 %v47_v44, %v46_v43  ;;  %v31_v48 = vld [vmem:[%s382_s1 + $0x78] sm:$0xff]  ;;  %p229_p3 = por %p228_p2, %p227_p1 }
  0x11   :  { %204 = vmatpush3.bf16.msra.mxu0 %v203_v27  ;;  %v219_v49 = vpack.c.bf16 %v31_v48, %v30_v47 }
  0x12   :  { %206 = vmatprep.subr.bf16.mxu0 %v205_v28  ;;  %p230_p4 = pnand %p229_p3, %p223_p0 }
  0x15   :  { %208 = vmatpush3.bf16.msra.mxu0 %v207_v33 }
  0x16   :  { %210 = vmatprep.subr.bf16.mxu0 %v209_v34 }
  0x19   :  { %212 = vmatpush3.bf16.msra.mxu0 %v211_v39 }
  0x1a   :  { %214 = vmatprep.subr.bf16.mxu0 %v213_v40 }
  0x1d   :  { %216 = vmatpush3.bf16.msra.mxu0 %v215_v45 }
  0x1e   :  { %218 = vmatprep.subr.bf16.mxu0 %v217_v46 }
  0x21   :  { %220 = vmatpush3.bf16.msra.mxu0 %v219_v49 }
  0x24   :  { %131 = vmatmul.mubr.f32.vlgmr.msra.gmra.mrb[0].mxu0 %v153_v25 }
  0xf7   :  { %v186_v50 = vpop.f32.mrb[0].mxu0 }
  0xf8   :  { %v187_v52 = vpop.f32.mrb[1].mxu0 }
  0xf9   :  { %v188_v53 = vadd.f32 %v187_v52, %v186_v50 }
  0xfb   :  { %v133_v54 = vadd.f32 %v188_v53, %v152_v51 }
  0xfd   :  { %137 = vst.msk [vmem:[#allocation2] sm:$0x3] %vm136_vm0, %v133_v54 }
  0xfe   :  { %233 = shalt.err (!%p230_p4)
}
  0xff   :  { %s234_s0 = scalar_lea.hbm %s384_s3, 32 }
 0x100   :  { %p235_p5 = scmp.ne.s32.totalorder %s384_s3, %s234_s0  ;;  %p238_p6 = scmp.lt.u32.totalorder %s234_s0, %s384_s3 }
 0x102   :  { %p240_p7 = pnand %p238_p6, %p235_p5 }
 0x104   :  { %243 = shalt.err (!%p240_p7)
}
 0x105   :  { %147 = dma.vmem_to_hbm [thread:$0]  %s145_s26, 32, %s384_s3, [#allocation3]  }
 0x106   :  { %244 = dma.done.wait [#allocation3], 32  }
 0x107   :  { %245 = vsyncadd [#allocation3], 4294967264 }
 0x108   :  { %151 = vsyncpa [#allocation3], 1 }

</bundles_post_ra>
